<compile_context>
chip_gen: v6e
topology: v6e:2x2x1
jax: 0.10.0
libtpu: 0.0.40
codegen_flags: <defaults>
</compile_context>

<pallas_src>
import jax
import jax.numpy as jnp
from jax.experimental import pallas as pl
from jax.experimental.pallas import tpu as pltpu

# ---------------- tiny synthetic Whisper configuration ----------------
N_MELS = 16           # mel bins (conv1 in-channels)
T_AUDIO = 16          # audio frames
D_MODEL = 64
N_HEADS = 4
HEAD_DIM = D_MODEL // N_HEADS
D_FFN = 128
N_ENC_LAYERS = 2
N_DEC_LAYERS = 2
VOCAB = 128
MAX_POS = 64
EPS = 1e-5

# "tokenized" decoder_prefix / decoder_candidate (deterministic, synthetic)
PREFIX_IDS = (3, 7, 11)
CANDIDATE_IDS = (5, 9, 2, 13)

T_ENC = (T_AUDIO + 2 * 1 - 3) // 2 + 1        # = 8 (conv2 stride 2)
S_REAL = len(PREFIX_IDS) + len(CANDIDATE_IDS)  # = 7
S_DEC = 8                                      # padded to a sublane multiple

# TODO(synk): pretrained checkpoint + WhisperTokenizer/FeatureExtractor have no
# Pallas equivalent; replaced by deterministic synthetic parameters & token ids.


# ===================== in-kernel math helpers (values) =====================

_ERF_P = 0.3275911
_ERF_A = (0.254829592, -0.284496736, 1.421413741, -1.453152027, 1.061405429)


def _erf(x):
    # Abramowitz & Stegun 7.1.26 (max abs err 1.5e-7): only mul/add/div/exp, so
    # it is guaranteed to lower in Mosaic (exact-GELU without an erf rule).
    s = jnp.where(x >= 0.0, 1.0, -1.0)
    z = jnp.abs(x)
    t = 1.0 / (1.0 + _ERF_P * z)
    poly = _ERF_A[4]
    for a in (_ERF_A[3], _ERF_A[2], _ERF_A[1], _ERF_A[0]):
        poly = poly * t + a
    return s * (1.0 - poly * t * jnp.exp(-z * z))


def _gelu(x):
    # exact (erf-based) GELU, matching torch.nn.functional.gelu default
    return 0.5 * x * (1.0 + _erf(x * 0.7071067811865476))


def _layernorm(x, g, b):
    mu = jnp.mean(x, axis=-1, keepdims=True)
    xc = x - mu
    var = jnp.mean(xc * xc, axis=-1, keepdims=True)
    return xc * jax.lax.rsqrt(var + EPS) * g + b


def _conv1d(x, taps_ref, b_ref, t_out, stride, ksize=3, pad=1):
    # x: (T_in, C_in) value; taps_ref: (K, C_in, D_MODEL) ref; b_ref: (1, D_MODEL)
    # conv-as-matmul: time gather done with iota selection matrices on the MXU
    # (zero padding handled by out-of-range rows having no matching column).
    t_in = x.shape[0]
    r = jax.lax.broadcasted_iota(jnp.int32, (t_out, t_in), 0)
    c = jax.lax.broadcasted_iota(jnp.int32, (t_out, t_in), 1)
    acc = jnp.zeros((t_out, D_MODEL), jnp.float32)
    for k in range(ksize):
        sel = (c == (r * stride + (k - pad))).astype(jnp.float32)
        xk = jnp.dot(sel, x, preferred_element_type=jnp.float32)       # (t_out, C_in)
        acc = acc + jnp.dot(xk, taps_ref[k], preferred_element_type=jnp.float32)
    return acc + b_ref[...]


def _attention(x, kv, a, layer, mask=None):
    # x: (Sq, D) value, kv: (Sk, D) value, a: dict of stacked per-head weight refs
    #   wq/wk/wv: (L*H, D, Dh)  qb/vb: (L*H, 1, Dh)  wo: (L*H, Dh, D)  ob: (L, 1, D)
    # q-scale is already folded into wq/qb; k_proj has no bias (Whisper).
    out = None
    for h in range(N_HEADS):
        i = layer * N_HEADS + h
        q = jnp.dot(x, a["wq"][i], preferred_element_type=jnp.float32) + a["qb"][i]
        k = jnp.dot(kv, a["wk"][i], preferred_element_type=jnp.float32)
        v = jnp.dot(kv, a["wv"][i], preferred_element_type=jnp.float32) + a["vb"][i]
        s = jax.lax.dot_general(q, k, (((1,), (1,)), ((), ())),
                                preferred_element_type=jnp.float32)      # (Sq, Sk)
        if mask is not None:
            s = s + mask
        s = s - jnp.max(s, axis=-1, keepdims=True)
        e = jnp.exp(s)
        p_att = e / jnp.sum(e, axis=-1, keepdims=True)
        o_h = jnp.dot(p_att, v, preferred_element_type=jnp.float32)      # (Sq, Dh)
        proj = jnp.dot(o_h, a["wo"][i], preferred_element_type=jnp.float32)
        out = proj if out is None else out + proj
    return out + a["ob"][layer]


def _ffn(x, f, layer):
    h = jnp.dot(x, f["fc1_w"][layer], preferred_element_type=jnp.float32) + f["fc1_b"][layer]
    h = _gelu(h)
    return jnp.dot(h, f["fc2_w"][layer], preferred_element_type=jnp.float32) + f["fc2_b"][layer]


# ======================== single fused kernel body ========================

def _whisper_body(p, o_ref):
    # ---------------- encoder ----------------
    x = _gelu(_conv1d(p["mel"][...], p["c1_taps"], p["c1_b"], T_AUDIO, 1))
    x = _gelu(_conv1d(x, p["c2_taps"], p["c2_b"], T_ENC, 2))
    x = x + p["enc_pos"][...]
    for l in range(N_ENC_LAYERS):            # pre-LN encoder layers
        h = _layernorm(x, p["e_sa_g"][l], p["e_sa_b"][l])
        x = x + _attention(h, h, p["e_sa"], l)
        h = _layernorm(x, p["e_fl_g"][l], p["e_fl_b"][l])
        x = x + _ffn(h, p["e_ffn"], l)
    enc = _layernorm(x, p["e_ln_g"][...], p["e_ln_b"][...])      # (T_ENC, D) in vregs

    # ---------------- decoder ----------------
    # token embedding via one-hot matmul (one-hot is a compile-time constant)
    x = jnp.dot(p["ids_oh"][...], p["embed"][...], preferred_element_type=jnp.float32)
    x = x + p["dec_pos"][...]
    # causal mask (built once per pass)
    r = jax.lax.broadcasted_iota(jnp.int32, (S_DEC, S_DEC), 0)
    c = jax.lax.broadcasted_iota(jnp.int32, (S_DEC, S_DEC), 1)
    causal = jnp.where(r >= c, 0.0, jnp.finfo(jnp.float32).min).astype(jnp.float32)
    for l in range(N_DEC_LAYERS):            # pre-LN decoder layers
        h = _layernorm(x, p["d_sa_g"][l], p["d_sa_b"][l])
        x = x + _attention(h, h, p["d_sa"], l, mask=causal)
        h = _layernorm(x, p["d_ca_g"][l], p["d_ca_b"][l])
        x = x + _attention(h, enc, p["d_ca"], l)
        h = _layernorm(x, p["d_fl_g"][l], p["d_fl_b"][l])
        x = x + _ffn(h, p["d_ffn"], l)
    x = _layernorm(x, p["d_ln_g"][...], p["d_ln_b"][...])
    # tied proj_out: contract on embed_tokens' feature axis (no transposed copy)
    logits = jax.lax.dot_general(x, p["embed"][...], (((1,), (1,)), ((), ())),
                                 preferred_element_type=jnp.float32)     # (S, VOCAB)
    # fused log-softmax + candidate gather + product (exp of summed log-probs)
    m = jnp.max(logits, axis=-1, keepdims=True)
    lse = jnp.log(jnp.sum(jnp.exp(logits - m), axis=-1, keepdims=True)) + m
    logp = logits - lse
    row_lp = jnp.sum(logp * p["tgt_oh"][...], axis=-1, keepdims=True)    # (S, 1)
    total = jnp.sum(row_lp, axis=0, keepdims=True)                       # (1, 1)
    o_ref[...] = jnp.exp(total)


# =========================== pallas_call plumbing ===========================

def _fused_call(body, arg_tree, out_shape):
    leaves, treedef = jax.tree_util.tree_flatten(arg_tree)

    def kernel(*refs):
        body(jax.tree_util.tree_unflatten(treedef, refs[:-1]), refs[-1])

    return pl.pallas_call(
        kernel,
        out_shape=out_shape,
        in_specs=[pl.BlockSpec(memory_space=pltpu.MemorySpace.VMEM) for _ in leaves],
        out_specs=pl.BlockSpec(memory_space=pltpu.MemorySpace.VMEM),
    )(*leaves)


# ===================== parameter prep (one-time JAX glue) =====================

def _prep_attn(ap):
    scale = HEAD_DIM ** -0.5                       # fold HF q-scaling into weights

    def split_cols(w):                             # (D, D) -> (H, D, HEAD_DIM)
        return jnp.transpose(w.reshape(D_MODEL, N_HEADS, HEAD_DIM), (1, 0, 2))

    return (split_cols(ap["q_w"] * scale),
            (ap["q_b"] * scale).reshape(N_HEADS, 1, HEAD_DIM),
            split_cols(ap["k_w"]),                 # no k bias (Whisper)
            split_cols(ap["v_w"]),
            ap["v_b"].reshape(N_HEADS, 1, HEAD_DIM),
            ap["o_w"].reshape(N_HEADS, HEAD_DIM, D_MODEL),
            ap["o_b"].reshape(1, D_MODEL))


def _stack_attn(attn_params):
    preps = [_prep_attn(a) for a in attn_params]
    cat = lambda i: jnp.concatenate([pr[i] for pr in preps], axis=0)
    return {"wq": cat(0), "qb": cat(1), "wk": cat(2), "wv": cat(3), "vb": cat(4),
            "wo": cat(5), "ob": jnp.stack([pr[6] for pr in preps], axis=0)}


def _stack_ln(layers, gk, bk):
    return (jnp.stack([lp[gk].reshape(1, D_MODEL) for lp in layers]),
            jnp.stack([lp[bk].reshape(1, D_MODEL) for lp in layers]))


def _stack_ffn(layers):
    return {"fc1_w": jnp.stack([lp["fc1_w"] for lp in layers]),
            "fc1_b": jnp.stack([lp["fc1_b"].reshape(1, D_FFN) for lp in layers]),
            "fc2_w": jnp.stack([lp["fc2_w"] for lp in layers]),
            "fc2_b": jnp.stack([lp["fc2_b"].reshape(1, D_MODEL) for lp in layers])}


def _build_args(p, mel_tl, ids_oh, tgt_oh):
    enc_l, dec_l = p["enc_layers"], p["dec_layers"]
    e_sa_g, e_sa_b = _stack_ln(enc_l, "sa_ln_g", "sa_ln_b")
    e_fl_g, e_fl_b = _stack_ln(enc_l, "fl_ln_g", "fl_ln_b")
    d_sa_g, d_sa_b = _stack_ln(dec_l, "sa_ln_g", "sa_ln_b")
    d_ca_g, d_ca_b = _stack_ln(dec_l, "ca_ln_g", "ca_ln_b")
    d_fl_g, d_fl_b = _stack_ln(dec_l, "fl_ln_g", "fl_ln_b")
    return {
        # encoder
        "mel": mel_tl,
        "c1_taps": jnp.transpose(p["conv1_w"], (2, 1, 0)),   # (3, C_in, D)
        "c1_b": p["conv1_b"].reshape(1, D_MODEL),
        "c2_taps": jnp.transpose(p["conv2_w"], (2, 1, 0)),   # (3, D, D)
        "c2_b": p["conv2_b"].reshape(1, D_MODEL),
        "enc_pos": p["enc_pos"][:T_ENC],
        "e_sa_g": e_sa_g, "e_sa_b": e_sa_b,
        "e_sa": _stack_attn([lp["sa"] for lp in enc_l]),
        "e_fl_g": e_fl_g, "e_fl_b": e_fl_b,
        "e_ffn": _stack_ffn(enc_l),
        "e_ln_g": p["enc_ln_g"].reshape(1, D_MODEL),
        "e_ln_b": p["enc_ln_b"].reshape(1, D_MODEL),
        # decoder
        "ids_oh": ids_oh, "tgt_oh": tgt_oh,
        "embed": p["embed_tokens"],
        "dec_pos": p["dec_pos"][:S_DEC],
        "d_sa_g": d_sa_g, "d_sa_b": d_sa_b,
        "d_sa": _stack_attn([lp["sa"] for lp in dec_l]),
        "d_ca_g": d_ca_g, "d_ca_b": d_ca_b,
        "d_ca": _stack_attn([lp["ca"] for lp in dec_l]),
        "d_fl_g": d_fl_g, "d_fl_b": d_fl_b,
        "d_ffn": _stack_ffn(dec_l),
        "d_ln_g": p["dec_ln_g"].reshape(1, D_MODEL),
        "d_ln_b": p["dec_ln_b"].reshape(1, D_MODEL),
    }


# ================================ forward ================================

def whisper_likelihood(params, audio_features):
    """Matches WhisperLikelihoodEstimator.forward.

    audio_features: (1, N_MELS, T_AUDIO) channels-first mel features.
    Returns scalar likelihood = prod_t softmax(logits)[t, candidate[t]].
    """
    mel_tl = jnp.transpose(audio_features[0], (1, 0))            # (T, n_mels) layout glue

    # decoder ids = cat(prefix, candidate), padded with a dummy token at the END
    # (causal masking keeps the real rows bit-identical).
    all_ids = list(PREFIX_IDS + CANDIDATE_IDS) + [0] * (S_DEC - S_REAL)
    ids_oh = jax.nn.one_hot(jnp.array(all_ids, jnp.int32), VOCAB, dtype=jnp.float32)
    # target id per logits row: row (len(prefix)-1+i) predicts candidate[i];
    # all other rows get -1 -> all-zero one-hot row -> contributes log-prob 0.
    tgt_list = [-1] * S_DEC
    for i, cid in enumerate(CANDIDATE_IDS):
        tgt_list[len(PREFIX_IDS) - 1 + i] = cid
    tgt_oh = jax.nn.one_hot(jnp.array(tgt_list, jnp.int32), VOCAB, dtype=jnp.float32)

    lik = _fused_call(_whisper_body, _build_args(params, mel_tl, ids_oh, tgt_oh),
                      jax.ShapeDtypeStruct((1, 1), jnp.float32))
    return lik[0, 0]


# ========================= deterministic params =========================

def _init_params(key):
    keys = iter(jax.random.split(key, 512))

    def w(shape, scale=0.02):
        return scale * jax.random.normal(next(keys), shape, jnp.float32)

    def zeros(shape):
        return jnp.zeros(shape, jnp.float32)

    def ones(shape):
        return jnp.ones(shape, jnp.float32)

    def attn():
        return {"q_w": w((D_MODEL, D_MODEL)), "q_b": zeros((D_MODEL,)),
                "k_w": w((D_MODEL, D_MODEL)),                    # no k bias (Whisper)
                "v_w": w((D_MODEL, D_MODEL)), "v_b": zeros((D_MODEL,)),
                "o_w": w((D_MODEL, D_MODEL)), "o_b": zeros((D_MODEL,))}

    def layer(cross):
        d = {"sa_ln_g": ones((D_MODEL,)), "sa_ln_b": zeros((D_MODEL,)),
             "sa": attn(),
             "fl_ln_g": ones((D_MODEL,)), "fl_ln_b": zeros((D_MODEL,)),
             "fc1_w": w((D_MODEL, D_FFN)), "fc1_b": zeros((D_FFN,)),
             "fc2_w": w((D_FFN, D_MODEL)), "fc2_b": zeros((D_MODEL,))}
        if cross:
            d["ca_ln_g"] = ones((D_MODEL,))
            d["ca_ln_b"] = zeros((D_MODEL,))
            d["ca"] = attn()
        return d

    return {
        "conv1_w": w((D_MODEL, N_MELS, 3)), "conv1_b": zeros((D_MODEL,)),
        "conv2_w": w((D_MODEL, D_MODEL, 3)), "conv2_b": zeros((D_MODEL,)),
        "enc_pos": w((MAX_POS, D_MODEL)),
        "enc_layers": [layer(False) for _ in range(N_ENC_LAYERS)],
        "enc_ln_g": ones((D_MODEL,)), "enc_ln_b": zeros((D_MODEL,)),
        "embed_tokens": w((VOCAB, D_MODEL)),
        "dec_pos": w((MAX_POS, D_MODEL)),
        "dec_layers": [layer(True) for _ in range(N_DEC_LAYERS)],
        "dec_ln_g": ones((D_MODEL,)), "dec_ln_b": zeros((D_MODEL,)),
    }


# ================================ main =================================

if __name__ == "__main__":
    key = jax.random.PRNGKey(0)
    pkey, xkey = jax.random.split(key)
    params = _init_params(pkey)
    audio_features = jax.random.normal(xkey, (1, N_MELS, T_AUDIO), jnp.float32)

    likelihood = jax.jit(whisper_likelihood)(params, audio_features)
    jax.block_until_ready(likelihood)
    assert likelihood.shape == () and jnp.isfinite(likelihood)
    print("KERNEL_OK")
</pallas_src>

<mosaic_0001>
module attributes {stable_mosaic.version = 11 : i64} {
  func.func @kernel(%arg0: memref<1x64xf32, #tpu.memory_space<vmem>>, %arg1: memref<3x16x64xf32, #tpu.memory_space<vmem>>, %arg2: memref<1x64xf32, #tpu.memory_space<vmem>>, %arg3: memref<3x64x64xf32, #tpu.memory_space<vmem>>, %arg4: memref<2x1x64xf32, #tpu.memory_space<vmem>>, %arg5: memref<8x1x16xf32, #tpu.memory_space<vmem>>, %arg6: memref<8x1x16xf32, #tpu.memory_space<vmem>>, %arg7: memref<8x64x16xf32, #tpu.memory_space<vmem>>, %arg8: memref<8x16x64xf32, #tpu.memory_space<vmem>>, %arg9: memref<8x64x16xf32, #tpu.memory_space<vmem>>, %arg10: memref<8x64x16xf32, #tpu.memory_space<vmem>>, %arg11: memref<2x1x64xf32, #tpu.memory_space<vmem>>, %arg12: memref<2x1x64xf32, #tpu.memory_space<vmem>>, %arg13: memref<2x1x128xf32, #tpu.memory_space<vmem>>, %arg14: memref<2x64x128xf32, #tpu.memory_space<vmem>>, %arg15: memref<2x1x64xf32, #tpu.memory_space<vmem>>, %arg16: memref<2x128x64xf32, #tpu.memory_space<vmem>>, %arg17: memref<2x1x64xf32, #tpu.memory_space<vmem>>, %arg18: memref<2x1x64xf32, #tpu.memory_space<vmem>>, %arg19: memref<1x64xf32, #tpu.memory_space<vmem>>, %arg20: memref<1x64xf32, #tpu.memory_space<vmem>>, %arg21: memref<2x1x64xf32, #tpu.memory_space<vmem>>, %arg22: memref<8x1x16xf32, #tpu.memory_space<vmem>>, %arg23: memref<8x1x16xf32, #tpu.memory_space<vmem>>, %arg24: memref<8x64x16xf32, #tpu.memory_space<vmem>>, %arg25: memref<8x16x64xf32, #tpu.memory_space<vmem>>, %arg26: memref<8x64x16xf32, #tpu.memory_space<vmem>>, %arg27: memref<8x64x16xf32, #tpu.memory_space<vmem>>, %arg28: memref<2x1x64xf32, #tpu.memory_space<vmem>>, %arg29: memref<2x1x64xf32, #tpu.memory_space<vmem>>, %arg30: memref<8x64xf32, #tpu.memory_space<vmem>>, %arg31: memref<2x1x128xf32, #tpu.memory_space<vmem>>, %arg32: memref<2x64x128xf32, #tpu.memory_space<vmem>>, %arg33: memref<2x1x64xf32, #tpu.memory_space<vmem>>, %arg34: memref<2x128x64xf32, #tpu.memory_space<vmem>>, %arg35: memref<2x1x64xf32, #tpu.memory_space<vmem>>, %arg36: memref<2x1x64xf32, #tpu.memory_space<vmem>>, %arg37: memref<1x64xf32, #tpu.memory_space<vmem>>, %arg38: memref<1x64xf32, #tpu.memory_space<vmem>>, %arg39: memref<2x1x64xf32, #tpu.memory_space<vmem>>, %arg40: memref<8x1x16xf32, #tpu.memory_space<vmem>>, %arg41: memref<8x1x16xf32, #tpu.memory_space<vmem>>, %arg42: memref<8x64x16xf32, #tpu.memory_space<vmem>>, %arg43: memref<8x16x64xf32, #tpu.memory_space<vmem>>, %arg44: memref<8x64x16xf32, #tpu.memory_space<vmem>>, %arg45: memref<8x64x16xf32, #tpu.memory_space<vmem>>, %arg46: memref<2x1x64xf32, #tpu.memory_space<vmem>>, %arg47: memref<2x1x64xf32, #tpu.memory_space<vmem>>, %arg48: memref<128x64xf32, #tpu.memory_space<vmem>>, %arg49: memref<8x64xf32, #tpu.memory_space<vmem>>, %arg50: memref<8x128xf32, #tpu.memory_space<vmem>>, %arg51: memref<16x16xf32, #tpu.memory_space<vmem>>, %arg52: memref<8x128xf32, #tpu.memory_space<vmem>>, %arg53: memref<1x1xf32, #tpu.memory_space<vmem>>) attributes {dimension_semantics = [], scalar_prefetch = 0 : i64, scratch_operands = 0 : i64, tpu.core_type = #tpu.core_type<tc>} {
    %c0 = arith.constant 0 : index
    %c0_0 = arith.constant 0 : index
    %0 = vector.load %arg51[%c0, %c0_0] : memref<16x16xf32, #tpu.memory_space<vmem>>, vector<16x16xf32>
    %1 = tpu.iota {dimensions = array<i32: 0>} : vector<16x16xi32>
    %2 = tpu.iota {dimensions = array<i32: 1>} : vector<16x16xi32>
    %cst = arith.constant 0.000000e+00 : f32
    %3 = vector.broadcast %cst : f32 to vector<16x64xf32>
    %c1_i32 = arith.constant 1 : i32
    %4 = vector.broadcast %c1_i32 : i32 to vector<16x16xi32>
    %5 = arith.muli %1, %4 : vector<16x16xi32>
    %c-1_i32 = arith.constant -1 : i32
    %6 = vector.broadcast %c-1_i32 : i32 to vector<16x16xi32>
    %7 = arith.addi %5, %6 : vector<16x16xi32>
    %8 = arith.cmpi eq, %2, %7 : vector<16x16xi32>
    %9 = arith.extui %8 : vector<16x16xi1> to vector<16x16xi32>
    %10 = arith.sitofp %9 : vector<16x16xi32> to vector<16x16xf32>
    %cst_1 = arith.constant dense<0.000000e+00> : vector<16x16xf32>
    %11 = tpu.matmul %10, %0, %cst_1 {dimension_numbers = #tpu.dot_dimension_numbers<[1], [0], [0], [1], [0, 0, 1, 1], [], []>} : vector<16x16xf32>, vector<16x16xf32>, vector<16x16xf32> -> vector<16x16xf32>
    %c0_2 = arith.constant 0 : index
    %c0_3 = arith.constant 0 : index
    %c0_4 = arith.constant 0 : index
    %12 = vector.load %arg1[%c0_2, %c0_3, %c0_4] : memref<3x16x64xf32, #tpu.memory_space<vmem>>, vector<1x16x64xf32>
    %13 = vector.shape_cast %12 : vector<1x16x64xf32> to vector<16x64xf32>
    %cst_5 = arith.constant dense<0.000000e+00> : vector<16x64xf32>
    %14 = tpu.matmul %11, %13, %cst_5 {dimension_numbers = #tpu.dot_dimension_numbers<[1], [0], [0], [1], [0, 0, 1, 1], [], []>} : vector<16x16xf32>, vector<16x64xf32>, vector<16x64xf32> -> vector<16x64xf32>
    %15 = arith.addf %3, %14 : vector<16x64xf32>
    %c1_i32_6 = arith.constant 1 : i32
    %16 = vector.broadcast %c1_i32_6 : i32 to vector<16x16xi32>
    %17 = arith.muli %1, %16 : vector<16x16xi32>
    %c0_i32 = arith.constant 0 : i32
    %18 = vector.broadcast %c0_i32 : i32 to vector<16x16xi32>
    %19 = arith.addi %17, %18 : vector<16x16xi32>
    %20 = arith.cmpi eq, %2, %19 : vector<16x16xi32>
    %21 = arith.extui %20 : vector<16x16xi1> to vector<16x16xi32>
    %22 = arith.sitofp %21 : vector<16x16xi32> to vector<16x16xf32>
    %cst_7 = arith.constant dense<0.000000e+00> : vector<16x16xf32>
    %23 = tpu.matmul %22, %0, %cst_7 {dimension_numbers = #tpu.dot_dimension_numbers<[1], [0], [0], [1], [0, 0, 1, 1], [], []>} : vector<16x16xf32>, vector<16x16xf32>, vector<16x16xf32> -> vector<16x16xf32>
    %c1 = arith.constant 1 : index
    %c0_8 = arith.constant 0 : index
    %c0_9 = arith.constant 0 : index
    %24 = vector.load %arg1[%c1, %c0_8, %c0_9] : memref<3x16x64xf32, #tpu.memory_space<vmem>>, vector<1x16x64xf32>
    %25 = vector.shape_cast %24 : vector<1x16x64xf32> to vector<16x64xf32>
    %cst_10 = arith.constant dense<0.000000e+00> : vector<16x64xf32>
    %26 = tpu.matmul %23, %25, %cst_10 {dimension_numbers = #tpu.dot_dimension_numbers<[1], [0], [0], [1], [0, 0, 1, 1], [], []>} : vector<16x16xf32>, vector<16x64xf32>, vector<16x64xf32> -> vector<16x64xf32>
    %27 = arith.addf %15, %26 : vector<16x64xf32>
    %c1_i32_11 = arith.constant 1 : i32
    %28 = vector.broadcast %c1_i32_11 : i32 to vector<16x16xi32>
    %29 = arith.muli %1, %28 : vector<16x16xi32>
    %c1_i32_12 = arith.constant 1 : i32
    %30 = vector.broadcast %c1_i32_12 : i32 to vector<16x16xi32>
    %31 = arith.addi %29, %30 : vector<16x16xi32>
    %32 = arith.cmpi eq, %2, %31 : vector<16x16xi32>
    %33 = arith.extui %32 : vector<16x16xi1> to vector<16x16xi32>
    %34 = arith.sitofp %33 : vector<16x16xi32> to vector<16x16xf32>
    %cst_13 = arith.constant dense<0.000000e+00> : vector<16x16xf32>
    %35 = tpu.matmul %34, %0, %cst_13 {dimension_numbers = #tpu.dot_dimension_numbers<[1], [0], [0], [1], [0, 0, 1, 1], [], []>} : vector<16x16xf32>, vector<16x16xf32>, vector<16x16xf32> -> vector<16x16xf32>
    %c2 = arith.constant 2 : index
    %c0_14 = arith.constant 0 : index
    %c0_15 = arith.constant 0 : index
    %36 = vector.load %arg1[%c2, %c0_14, %c0_15] : memref<3x16x64xf32, #tpu.memory_space<vmem>>, vector<1x16x64xf32>
    %37 = vector.shape_cast %36 : vector<1x16x64xf32> to vector<16x64xf32>
    %cst_16 = arith.constant dense<0.000000e+00> : vector<16x64xf32>
    %38 = tpu.matmul %35, %37, %cst_16 {dimension_numbers = #tpu.dot_dimension_numbers<[1], [0], [0], [1], [0, 0, 1, 1], [], []>} : vector<16x16xf32>, vector<16x64xf32>, vector<16x64xf32> -> vector<16x64xf32>
    %39 = arith.addf %27, %38 : vector<16x64xf32>
    %c0_17 = arith.constant 0 : index
    %c0_18 = arith.constant 0 : index
    %40 = vector.load %arg0[%c0_17, %c0_18] : memref<1x64xf32, #tpu.memory_space<vmem>>, vector<1x64xf32>
    %41 = vector.broadcast %40 : vector<1x64xf32> to vector<16x64xf32>
    %42 = arith.addf %39, %41 : vector<16x64xf32>
    %cst_19 = arith.constant 5.000000e-01 : f32
    %43 = vector.broadcast %cst_19 : f32 to vector<16x64xf32>
    %44 = arith.mulf %43, %42 : vector<16x64xf32>
    %cst_20 = arith.constant 0.707106769 : f32
    %45 = vector.broadcast %cst_20 : f32 to vector<16x64xf32>
    %46 = arith.mulf %42, %45 : vector<16x64xf32>
    %cst_21 = arith.constant 0.000000e+00 : f32
    %47 = vector.broadcast %cst_21 : f32 to vector<16x64xf32>
    %48 = arith.cmpf oge, %46, %47 : vector<16x64xf32>
    %cst_22 = arith.constant 1.000000e+00 : f32
    %cst_23 = arith.constant -1.000000e+00 : f32
    %49 = vector.broadcast %cst_22 : f32 to vector<16x64xf32>
    %50 = vector.broadcast %cst_23 : f32 to vector<16x64xf32>
    %51 = arith.select %48, %49, %50 : vector<16x64xi1>, vector<16x64xf32>
    %52 = math.absf %46 : vector<16x64xf32>
    %cst_24 = arith.constant 0.327591091 : f32
    %53 = vector.broadcast %cst_24 : f32 to vector<16x64xf32>
    %54 = arith.mulf %53, %52 : vector<16x64xf32>
    %cst_25 = arith.constant 1.000000e+00 : f32
    %55 = vector.broadcast %cst_25 : f32 to vector<16x64xf32>
    %56 = arith.addf %55, %54 : vector<16x64xf32>
    %cst_26 = arith.constant 1.000000e+00 : f32
    %57 = vector.broadcast %cst_26 : f32 to vector<16x64xf32>
    %58 = arith.divf %57, %56 : vector<16x64xf32>
    %cst_27 = arith.constant 1.06140542 : f32
    %59 = vector.broadcast %cst_27 : f32 to vector<16x64xf32>
    %60 = arith.mulf %59, %58 : vector<16x64xf32>
    %cst_28 = arith.constant -1.45315206 : f32
    %61 = vector.broadcast %cst_28 : f32 to vector<16x64xf32>
    %62 = arith.addf %60, %61 : vector<16x64xf32>
    %63 = arith.mulf %62, %58 : vector<16x64xf32>
    %cst_29 = arith.constant 1.42141378 : f32
    %64 = vector.broadcast %cst_29 : f32 to vector<16x64xf32>
    %65 = arith.addf %63, %64 : vector<16x64xf32>
    %66 = arith.mulf %65, %58 : vector<16x64xf32>
    %cst_30 = arith.constant -0.284496725 : f32
    %67 = vector.broadcast %cst_30 : f32 to vector<16x64xf32>
    %68 = arith.addf %66, %67 : vector<16x64xf32>
    %69 = arith.mulf %68, %58 : vector<16x64xf32>
    %cst_31 = arith.constant 0.254829586 : f32
    %70 = vector.broadcast %cst_31 : f32 to vector<16x64xf32>
    %71 = arith.addf %69, %70 : vector<16x64xf32>
    %72 = arith.mulf %71, %58 : vector<16x64xf32>
    %cst_32 = arith.constant 0.000000e+00 : f32
    %73 = vector.broadcast %cst_32 : f32 to vector<16x64xf32>
    %74 = arith.subf %73, %52 : vector<16x64xf32>
    %75 = arith.mulf %74, %52 : vector<16x64xf32>
    %76 = math.exp %75 : vector<16x64xf32>
    %77 = arith.mulf %72, %76 : vector<16x64xf32>
    %cst_33 = arith.constant 1.000000e+00 : f32
    %78 = vector.broadcast %cst_33 : f32 to vector<16x64xf32>
    %79 = arith.subf %78, %77 : vector<16x64xf32>
    %80 = arith.mulf %51, %79 : vector<16x64xf32>
    %cst_34 = arith.constant 1.000000e+00 : f32
    %81 = vector.broadcast %cst_34 : f32 to vector<16x64xf32>
    %82 = arith.addf %81, %80 : vector<16x64xf32>
    %83 = arith.mulf %44, %82 : vector<16x64xf32>
    %84 = tpu.iota {dimensions = array<i32: 0>} : vector<8x16xi32>
    %85 = tpu.iota {dimensions = array<i32: 1>} : vector<8x16xi32>
    %cst_35 = arith.constant 0.000000e+00 : f32
    %86 = vector.broadcast %cst_35 : f32 to vector<8x64xf32>
    %c2_i32 = arith.constant 2 : i32
    %87 = vector.broadcast %c2_i32 : i32 to vector<8x16xi32>
    %88 = arith.muli %84, %87 : vector<8x16xi32>
    %c-1_i32_36 = arith.constant -1 : i32
    %89 = vector.broadcast %c-1_i32_36 : i32 to vector<8x16xi32>
    %90 = arith.addi %88, %89 : vector<8x16xi32>
    %91 = arith.cmpi eq, %85, %90 : vector<8x16xi32>
    %92 = arith.extui %91 : vector<8x16xi1> to vector<8x16xi32>
    %93 = arith.sitofp %92 : vector<8x16xi32> to vector<8x16xf32>
    %cst_37 = arith.constant dense<0.000000e+00> : vector<8x64xf32>
    %94 = tpu.matmul %93, %83, %cst_37 {dimension_numbers = #tpu.dot_dimension_numbers<[1], [0], [0], [1], [0, 0, 1, 1], [], []>} : vector<8x16xf32>, vector<16x64xf32>, vector<8x64xf32> -> vector<8x64xf32>
    %c0_38 = arith.constant 0 : index
    %c0_39 = arith.constant 0 : index
    %c0_40 = arith.constant 0 : index
    %95 = vector.load %arg3[%c0_38, %c0_39, %c0_40] : memref<3x64x64xf32, #tpu.memory_space<vmem>>, vector<1x64x64xf32>
    %96 = vector.shape_cast %95 : vector<1x64x64xf32> to vector<64x64xf32>
    %cst_41 = arith.constant dense<0.000000e+00> : vector<8x64xf32>
    %97 = tpu.matmul %94, %96, %cst_41 {dimension_numbers = #tpu.dot_dimension_numbers<[1], [0], [0], [1], [0, 0, 1, 1], [], []>} : vector<8x64xf32>, vector<64x64xf32>, vector<8x64xf32> -> vector<8x64xf32>
    %98 = arith.addf %86, %97 : vector<8x64xf32>
    %c2_i32_42 = arith.constant 2 : i32
    %99 = vector.broadcast %c2_i32_42 : i32 to vector<8x16xi32>
    %100 = arith.muli %84, %99 : vector<8x16xi32>
    %c0_i32_43 = arith.constant 0 : i32
    %101 = vector.broadcast %c0_i32_43 : i32 to vector<8x16xi32>
    %102 = arith.addi %100, %101 : vector<8x16xi32>
    %103 = arith.cmpi eq, %85, %102 : vector<8x16xi32>
    %104 = arith.extui %103 : vector<8x16xi1> to vector<8x16xi32>
    %105 = arith.sitofp %104 : vector<8x16xi32> to vector<8x16xf32>
    %cst_44 = arith.constant dense<0.000000e+00> : vector<8x64xf32>
    %106 = tpu.matmul %105, %83, %cst_44 {dimension_numbers = #tpu.dot_dimension_numbers<[1], [0], [0], [1], [0, 0, 1, 1], [], []>} : vector<8x16xf32>, vector<16x64xf32>, vector<8x64xf32> -> vector<8x64xf32>
    %c1_45 = arith.constant 1 : index
    %c0_46 = arith.constant 0 : index
    %c0_47 = arith.constant 0 : index
    %107 = vector.load %arg3[%c1_45, %c0_46, %c0_47] : memref<3x64x64xf32, #tpu.memory_space<vmem>>, vector<1x64x64xf32>
    %108 = vector.shape_cast %107 : vector<1x64x64xf32> to vector<64x64xf32>
    %cst_48 = arith.constant dense<0.000000e+00> : vector<8x64xf32>
    %109 = tpu.matmul %106, %108, %cst_48 {dimension_numbers = #tpu.dot_dimension_numbers<[1], [0], [0], [1], [0, 0, 1, 1], [], []>} : vector<8x64xf32>, vector<64x64xf32>, vector<8x64xf32> -> vector<8x64xf32>
    %110 = arith.addf %98, %109 : vector<8x64xf32>
    %c2_i32_49 = arith.constant 2 : i32
    %111 = vector.broadcast %c2_i32_49 : i32 to vector<8x16xi32>
    %112 = arith.muli %84, %111 : vector<8x16xi32>
    %c1_i32_50 = arith.constant 1 : i32
    %113 = vector.broadcast %c1_i32_50 : i32 to vector<8x16xi32>
    %114 = arith.addi %112, %113 : vector<8x16xi32>
    %115 = arith.cmpi eq, %85, %114 : vector<8x16xi32>
    %116 = arith.extui %115 : vector<8x16xi1> to vector<8x16xi32>
    %117 = arith.sitofp %116 : vector<8x16xi32> to vector<8x16xf32>
    %cst_51 = arith.constant dense<0.000000e+00> : vector<8x64xf32>
    %118 = tpu.matmul %117, %83, %cst_51 {dimension_numbers = #tpu.dot_dimension_numbers<[1], [0], [0], [1], [0, 0, 1, 1], [], []>} : vector<8x16xf32>, vector<16x64xf32>, vector<8x64xf32> -> vector<8x64xf32>
    %c2_52 = arith.constant 2 : index
    %c0_53 = arith.constant 0 : index
    %c0_54 = arith.constant 0 : index
    %119 = vector.load %arg3[%c2_52, %c0_53, %c0_54] : memref<3x64x64xf32, #tpu.memory_space<vmem>>, vector<1x64x64xf32>
    %120 = vector.shape_cast %119 : vector<1x64x64xf32> to vector<64x64xf32>
    %cst_55 = arith.constant dense<0.000000e+00> : vector<8x64xf32>
    %121 = tpu.matmul %118, %120, %cst_55 {dimension_numbers = #tpu.dot_dimension_numbers<[1], [0], [0], [1], [0, 0, 1, 1], [], []>} : vector<8x64xf32>, vector<64x64xf32>, vector<8x64xf32> -> vector<8x64xf32>
    %122 = arith.addf %110, %121 : vector<8x64xf32>
    %c0_56 = arith.constant 0 : index
    %c0_57 = arith.constant 0 : index
    %123 = vector.load %arg2[%c0_56, %c0_57] : memref<1x64xf32, #tpu.memory_space<vmem>>, vector<1x64xf32>
    %124 = vector.broadcast %123 : vector<1x64xf32> to vector<8x64xf32>
    %125 = arith.addf %122, %124 : vector<8x64xf32>
    %cst_58 = arith.constant 5.000000e-01 : f32
    %126 = vector.broadcast %cst_58 : f32 to vector<8x64xf32>
    %127 = arith.mulf %126, %125 : vector<8x64xf32>
    %cst_59 = arith.constant 0.707106769 : f32
    %128 = vector.broadcast %cst_59 : f32 to vector<8x64xf32>
    %129 = arith.mulf %125, %128 : vector<8x64xf32>
    %cst_60 = arith.constant 0.000000e+00 : f32
    %130 = vector.broadcast %cst_60 : f32 to vector<8x64xf32>
    %131 = arith.cmpf oge, %129, %130 : vector<8x64xf32>
    %cst_61 = arith.constant 1.000000e+00 : f32
    %cst_62 = arith.constant -1.000000e+00 : f32
    %132 = vector.broadcast %cst_61 : f32 to vector<8x64xf32>
    %133 = vector.broadcast %cst_62 : f32 to vector<8x64xf32>
    %134 = arith.select %131, %132, %133 : vector<8x64xi1>, vector<8x64xf32>
    %135 = math.absf %129 : vector<8x64xf32>
    %cst_63 = arith.constant 0.327591091 : f32
    %136 = vector.broadcast %cst_63 : f32 to vector<8x64xf32>
    %137 = arith.mulf %136, %135 : vector<8x64xf32>
    %cst_64 = arith.constant 1.000000e+00 : f32
    %138 = vector.broadcast %cst_64 : f32 to vector<8x64xf32>
    %139 = arith.addf %138, %137 : vector<8x64xf32>
    %cst_65 = arith.constant 1.000000e+00 : f32
    %140 = vector.broadcast %cst_65 : f32 to vector<8x64xf32>
    %141 = arith.divf %140, %139 : vector<8x64xf32>
    %cst_66 = arith.constant 1.06140542 : f32
    %142 = vector.broadcast %cst_66 : f32 to vector<8x64xf32>
    %143 = arith.mulf %142, %141 : vector<8x64xf32>
    %cst_67 = arith.constant -1.45315206 : f32
    %144 = vector.broadcast %cst_67 : f32 to vector<8x64xf32>
    %145 = arith.addf %143, %144 : vector<8x64xf32>
    %146 = arith.mulf %145, %141 : vector<8x64xf32>
    %cst_68 = arith.constant 1.42141378 : f32
    %147 = vector.broadcast %cst_68 : f32 to vector<8x64xf32>
    %148 = arith.addf %146, %147 : vector<8x64xf32>
    %149 = arith.mulf %148, %141 : vector<8x64xf32>
    %cst_69 = arith.constant -0.284496725 : f32
    %150 = vector.broadcast %cst_69 : f32 to vector<8x64xf32>
    %151 = arith.addf %149, %150 : vector<8x64xf32>
    %152 = arith.mulf %151, %141 : vector<8x64xf32>
    %cst_70 = arith.constant 0.254829586 : f32
    %153 = vector.broadcast %cst_70 : f32 to vector<8x64xf32>
    %154 = arith.addf %152, %153 : vector<8x64xf32>
    %155 = arith.mulf %154, %141 : vector<8x64xf32>
    %cst_71 = arith.constant 0.000000e+00 : f32
    %156 = vector.broadcast %cst_71 : f32 to vector<8x64xf32>
    %157 = arith.subf %156, %135 : vector<8x64xf32>
    %158 = arith.mulf %157, %135 : vector<8x64xf32>
    %159 = math.exp %158 : vector<8x64xf32>
    %160 = arith.mulf %155, %159 : vector<8x64xf32>
    %cst_72 = arith.constant 1.000000e+00 : f32
    %161 = vector.broadcast %cst_72 : f32 to vector<8x64xf32>
    %162 = arith.subf %161, %160 : vector<8x64xf32>
    %163 = arith.mulf %134, %162 : vector<8x64xf32>
    %cst_73 = arith.constant 1.000000e+00 : f32
    %164 = vector.broadcast %cst_73 : f32 to vector<8x64xf32>
    %165 = arith.addf %164, %163 : vector<8x64xf32>
    %166 = arith.mulf %127, %165 : vector<8x64xf32>
    %c0_74 = arith.constant 0 : index
    %c0_75 = arith.constant 0 : index
    %167 = vector.load %arg49[%c0_74, %c0_75] : memref<8x64xf32, #tpu.memory_space<vmem>>, vector<8x64xf32>
    %168 = arith.addf %166, %167 : vector<8x64xf32>
    %c0_76 = arith.constant 0 : index
    %c0_77 = arith.constant 0 : index
    %c0_78 = arith.constant 0 : index
    %169 = vector.load %arg47[%c0_76, %c0_77, %c0_78] : memref<2x1x64xf32, #tpu.memory_space<vmem>>, vector<1x1x64xf32>
    %170 = vector.shape_cast %169 : vector<1x1x64xf32> to vector<1x64xf32>
    %c0_79 = arith.constant 0 : index
    %c0_80 = arith.constant 0 : index
    %c0_81 = arith.constant 0 : index
    %171 = vector.load %arg46[%c0_79, %c0_80, %c0_81] : memref<2x1x64xf32, #tpu.memory_space<vmem>>, vector<1x1x64xf32>
    %172 = vector.shape_cast %171 : vector<1x1x64xf32> to vector<1x64xf32>
    %cst_82 = arith.constant dense<0.000000e+00> : vector<8xf32>
    %173 = vector.multi_reduction <add>, %168, %cst_82 [1] : vector<8x64xf32> to vector<8xf32>
    %174 = vector.shape_cast %173 : vector<8xf32> to vector<8x1xf32>
    %cst_83 = arith.constant 6.400000e+01 : f32
    %175 = vector.broadcast %cst_83 : f32 to vector<8x1xf32>
    %176 = arith.divf %174, %175 : vector<8x1xf32>
    %177 = vector.broadcast %176 : vector<8x1xf32> to vector<8x64xf32>
    %178 = arith.subf %168, %177 : vector<8x64xf32>
    %179 = arith.mulf %178, %178 : vector<8x64xf32>
    %cst_84 = arith.constant dense<0.000000e+00> : vector<8xf32>
    %180 = vector.multi_reduction <add>, %179, %cst_84 [1] : vector<8x64xf32> to vector<8xf32>
    %181 = vector.shape_cast %180 : vector<8xf32> to vector<8x1xf32>
    %cst_85 = arith.constant 6.400000e+01 : f32
    %182 = vector.broadcast %cst_85 : f32 to vector<8x1xf32>
    %183 = arith.divf %181, %182 : vector<8x1xf32>
    %cst_86 = arith.constant 9.99999974E-6 : f32
    %184 = vector.broadcast %cst_86 : f32 to vector<8x1xf32>
    %185 = arith.addf %183, %184 : vector<8x1xf32>
    %186 = math.rsqrt %185 : vector<8x1xf32>
    %187 = vector.broadcast %186 : vector<8x1xf32> to vector<8x64xf32>
    %188 = arith.mulf %178, %187 : vector<8x64xf32>
    %189 = vector.broadcast %170 : vector<1x64xf32> to vector<8x64xf32>
    %190 = arith.mulf %188, %189 : vector<8x64xf32>
    %191 = vector.broadcast %172 : vector<1x64xf32> to vector<8x64xf32>
    %192 = arith.addf %190, %191 : vector<8x64xf32>
    %c0_87 = arith.constant 0 : index
    %c0_88 = arith.constant 0 : index
    %c0_89 = arith.constant 0 : index
    %193 = vector.load %arg44[%c0_87, %c0_88, %c0_89] : memref<8x64x16xf32, #tpu.memory_space<vmem>>, vector<1x64x16xf32>
    %194 = vector.shape_cast %193 : vector<1x64x16xf32> to vector<64x16xf32>
    %cst_90 = arith.constant dense<0.000000e+00> : vector<8x16xf32>
    %195 = tpu.matmul %192, %194, %cst_90 {dimension_numbers = #tpu.dot_dimension_numbers<[1], [0], [0], [1], [0, 0, 1, 1], [], []>} : vector<8x64xf32>, vector<64x16xf32>, vector<8x16xf32> -> vector<8x16xf32>
    %c0_91 = arith.constant 0 : index
    %c0_92 = arith.constant 0 : index
    %c0_93 = arith.constant 0 : index
    %196 = vector.load %arg40[%c0_91, %c0_92, %c0_93] : memref<8x1x16xf32, #tpu.memory_space<vmem>>, vector<1x1x16xf32>
    %197 = vector.shape_cast %196 : vector<1x1x16xf32> to vector<1x16xf32>
    %198 = vector.broadcast %197 : vector<1x16xf32> to vector<8x16xf32>
    %199 = arith.addf %195, %198 : vector<8x16xf32>
    %c0_94 = arith.constant 0 : index
    %c0_95 = arith.constant 0 : index
    %c0_96 = arith.constant 0 : index
    %200 = vector.load %arg42[%c0_94, %c0_95, %c0_96] : memref<8x64x16xf32, #tpu.memory_space<vmem>>, vector<1x64x16xf32>
    %201 = vector.shape_cast %200 : vector<1x64x16xf32> to vector<64x16xf32>
    %cst_97 = arith.constant dense<0.000000e+00> : vector<8x16xf32>
    %202 = tpu.matmul %192, %201, %cst_97 {dimension_numbers = #tpu.dot_dimension_numbers<[1], [0], [0], [1], [0, 0, 1, 1], [], []>} : vector<8x64xf32>, vector<64x16xf32>, vector<8x16xf32> -> vector<8x16xf32>
    %c0_98 = arith.constant 0 : index
    %c0_99 = arith.constant 0 : index
    %c0_100 = arith.constant 0 : index
    %203 = vector.load %arg45[%c0_98, %c0_99, %c0_100] : memref<8x64x16xf32, #tpu.memory_space<vmem>>, vector<1x64x16xf32>
    %204 = vector.shape_cast %203 : vector<1x64x16xf32> to vector<64x16xf32>
    %cst_101 = arith.constant dense<0.000000e+00> : vector<8x16xf32>
    %205 = tpu.matmul %192, %204, %cst_101 {dimension_numbers = #tpu.dot_dimension_numbers<[1], [0], [0], [1], [0, 0, 1, 1], [], []>} : vector<8x64xf32>, vector<64x16xf32>, vector<8x16xf32> -> vector<8x16xf32>
    %c0_102 = arith.constant 0 : index
    %c0_103 = arith.constant 0 : index
    %c0_104 = arith.constant 0 : index
    %206 = vector.load %arg41[%c0_102, %c0_103, %c0_104] : memref<8x1x16xf32, #tpu.memory_space<vmem>>, vector<1x1x16xf32>
    %207 = vector.shape_cast %206 : vector<1x1x16xf32> to vector<1x16xf32>
    %208 = vector.broadcast %207 : vector<1x16xf32> to vector<8x16xf32>
    %209 = arith.addf %205, %208 : vector<8x16xf32>
    %cst_105 = arith.constant dense<0.000000e+00> : vector<8x8xf32>
    %210 = tpu.matmul %199, %202, %cst_105 {dimension_numbers = #tpu.dot_dimension_numbers<[1], [1], [0], [0], [0, 0, 1, 0], [], []>} : vector<8x16xf32>, vector<8x16xf32>, vector<8x8xf32> -> vector<8x8xf32>
    %cst_106 = arith.constant dense<0xFF800000> : vector<8xf32>
    %211 = vector.multi_reduction <maximumf>, %210, %cst_106 [1] : vector<8x8xf32> to vector<8xf32>
    %212 = vector.shape_cast %211 : vector<8xf32> to vector<8x1xf32>
    %213 = vector.broadcast %212 : vector<8x1xf32> to vector<8x8xf32>
    %214 = arith.subf %210, %213 : vector<8x8xf32>
    %215 = math.exp %214 : vector<8x8xf32>
    %cst_107 = arith.constant dense<0.000000e+00> : vector<8xf32>
    %216 = vector.multi_reduction <add>, %215, %cst_107 [1] : vector<8x8xf32> to vector<8xf32>
    %217 = vector.shape_cast %216 : vector<8xf32> to vector<8x1xf32>
    %218 = vector.broadcast %217 : vector<8x1xf32> to vector<8x8xf32>
    %219 = arith.divf %215, %218 : vector<8x8xf32>
    %cst_108 = arith.constant dense<0.000000e+00> : vector<8x16xf32>
    %220 = tpu.matmul %219, %209, %cst_108 {dimension_numbers = #tpu.dot_dimension_numbers<[1], [0], [0], [1], [0, 0, 1, 1], [], []>} : vector<8x8xf32>, vector<8x16xf32>, vector<8x16xf32> -> vector<8x16xf32>
    %c0_109 = arith.constant 0 : index
    %c0_110 = arith.constant 0 : index
    %c0_111 = arith.constant 0 : index
    %221 = vector.load %arg43[%c0_109, %c0_110, %c0_111] : memref<8x16x64xf32, #tpu.memory_space<vmem>>, vector<1x16x64xf32>
    %222 = vector.shape_cast %221 : vector<1x16x64xf32> to vector<16x64xf32>
    %cst_112 = arith.constant dense<0.000000e+00> : vector<8x64xf32>
    %223 = tpu.matmul %220, %222, %cst_112 {dimension_numbers = #tpu.dot_dimension_numbers<[1], [0], [0], [1], [0, 0, 1, 1], [], []>} : vector<8x16xf32>, vector<16x64xf32>, vector<8x64xf32> -> vector<8x64xf32>
    %c1_113 = arith.constant 1 : index
    %c0_114 = arith.constant 0 : index
    %c0_115 = arith.constant 0 : index
    %224 = vector.load %arg44[%c1_113, %c0_114, %c0_115] : memref<8x64x16xf32, #tpu.memory_space<vmem>>, vector<1x64x16xf32>
    %225 = vector.shape_cast %224 : vector<1x64x16xf32> to vector<64x16xf32>
    %cst_116 = arith.constant dense<0.000000e+00> : vector<8x16xf32>
    %226 = tpu.matmul %192, %225, %cst_116 {dimension_numbers = #tpu.dot_dimension_numbers<[1], [0], [0], [1], [0, 0, 1, 1], [], []>} : vector<8x64xf32>, vector<64x16xf32>, vector<8x16xf32> -> vector<8x16xf32>
    %c1_117 = arith.constant 1 : index
    %c0_118 = arith.constant 0 : index
    %c0_119 = arith.constant 0 : index
    %227 = vector.load %arg40[%c1_117, %c0_118, %c0_119] : memref<8x1x16xf32, #tpu.memory_space<vmem>>, vector<1x1x16xf32>
    %228 = vector.shape_cast %227 : vector<1x1x16xf32> to vector<1x16xf32>
    %229 = vector.broadcast %228 : vector<1x16xf32> to vector<8x16xf32>
    %230 = arith.addf %226, %229 : vector<8x16xf32>
    %c1_120 = arith.constant 1 : index
    %c0_121 = arith.constant 0 : index
    %c0_122 = arith.constant 0 : index
    %231 = vector.load %arg42[%c1_120, %c0_121, %c0_122] : memref<8x64x16xf32, #tpu.memory_space<vmem>>, vector<1x64x16xf32>
    %232 = vector.shape_cast %231 : vector<1x64x16xf32> to vector<64x16xf32>
    %cst_123 = arith.constant dense<0.000000e+00> : vector<8x16xf32>
    %233 = tpu.matmul %192, %232, %cst_123 {dimension_numbers = #tpu.dot_dimension_numbers<[1], [0], [0], [1], [0, 0, 1, 1], [], []>} : vector<8x64xf32>, vector<64x16xf32>, vector<8x16xf32> -> vector<8x16xf32>
    %c1_124 = arith.constant 1 : index
    %c0_125 = arith.constant 0 : index
    %c0_126 = arith.constant 0 : index
    %234 = vector.load %arg45[%c1_124, %c0_125, %c0_126] : memref<8x64x16xf32, #tpu.memory_space<vmem>>, vector<1x64x16xf32>
    %235 = vector.shape_cast %234 : vector<1x64x16xf32> to vector<64x16xf32>
    %cst_127 = arith.constant dense<0.000000e+00> : vector<8x16xf32>
    %236 = tpu.matmul %192, %235, %cst_127 {dimension_numbers = #tpu.dot_dimension_numbers<[1], [0], [0], [1], [0, 0, 1, 1], [], []>} : vector<8x64xf32>, vector<64x16xf32>, vector<8x16xf32> -> vector<8x16xf32>
    %c1_128 = arith.constant 1 : index
    %c0_129 = arith.constant 0 : index
    %c0_130 = arith.constant 0 : index
    %237 = vector.load %arg41[%c1_128, %c0_129, %c0_130] : memref<8x1x16xf32, #tpu.memory_space<vmem>>, vector<1x1x16xf32>
    %238 = vector.shape_cast %237 : vector<1x1x16xf32> to vector<1x16xf32>
    %239 = vector.broadcast %238 : vector<1x16xf32> to vector<8x16xf32>
    %240 = arith.addf %236, %239 : vector<8x16xf32>
    %cst_131 = arith.constant dense<0.000000e+00> : vector<8x8xf32>
    %241 = tpu.matmul %230, %233, %cst_131 {dimension_numbers = #tpu.dot_dimension_numbers<[1], [1], [0], [0], [0, 0, 1, 0], [], []>} : vector<8x16xf32>, vector<8x16xf32>, vector<8x8xf32> -> vector<8x8xf32>
    %cst_132 = arith.constant dense<0xFF800000> : vector<8xf32>
    %242 = vector.multi_reduction <maximumf>, %241, %cst_132 [1] : vector<8x8xf32> to vector<8xf32>
    %243 = vector.shape_cast %242 : vector<8xf32> to vector<8x1xf32>
    %244 = vector.broadcast %243 : vector<8x1xf32> to vector<8x8xf32>
    %245 = arith.subf %241, %244 : vector<8x8xf32>
    %246 = math.exp %245 : vector<8x8xf32>
    %cst_133 = arith.constant dense<0.000000e+00> : vector<8xf32>
    %247 = vector.multi_reduction <add>, %246, %cst_133 [1] : vector<8x8xf32> to vector<8xf32>
    %248 = vector.shape_cast %247 : vector<8xf32> to vector<8x1xf32>
    %249 = vector.broadcast %248 : vector<8x1xf32> to vector<8x8xf32>
    %250 = arith.divf %246, %249 : vector<8x8xf32>
    %cst_134 = arith.constant dense<0.000000e+00> : vector<8x16xf32>
    %251 = tpu.matmul %250, %240, %cst_134 {dimension_numbers = #tpu.dot_dimension_numbers<[1], [0], [0], [1], [0, 0, 1, 1], [], []>} : vector<8x8xf32>, vector<8x16xf32>, vector<8x16xf32> -> vector<8x16xf32>
    %c1_135 = arith.constant 1 : index
    %c0_136 = arith.constant 0 : index
    %c0_137 = arith.constant 0 : index
    %252 = vector.load %arg43[%c1_135, %c0_136, %c0_137] : memref<8x16x64xf32, #tpu.memory_space<vmem>>, vector<1x16x64xf32>
    %253 = vector.shape_cast %252 : vector<1x16x64xf32> to vector<16x64xf32>
    %cst_138 = arith.constant dense<0.000000e+00> : vector<8x64xf32>
    %254 = tpu.matmul %251, %253, %cst_138 {dimension_numbers = #tpu.dot_dimension_numbers<[1], [0], [0], [1], [0, 0, 1, 1], [], []>} : vector<8x16xf32>, vector<16x64xf32>, vector<8x64xf32> -> vector<8x64xf32>
    %255 = arith.addf %223, %254 : vector<8x64xf32>
    %c2_139 = arith.constant 2 : index
    %c0_140 = arith.constant 0 : index
    %c0_141 = arith.constant 0 : index
    %256 = vector.load %arg44[%c2_139, %c0_140, %c0_141] : memref<8x64x16xf32, #tpu.memory_space<vmem>>, vector<1x64x16xf32>
    %257 = vector.shape_cast %256 : vector<1x64x16xf32> to vector<64x16xf32>
    %cst_142 = arith.constant dense<0.000000e+00> : vector<8x16xf32>
    %258 = tpu.matmul %192, %257, %cst_142 {dimension_numbers = #tpu.dot_dimension_numbers<[1], [0], [0], [1], [0, 0, 1, 1], [], []>} : vector<8x64xf32>, vector<64x16xf32>, vector<8x16xf32> -> vector<8x16xf32>
    %c2_143 = arith.constant 2 : index
    %c0_144 = arith.constant 0 : index
    %c0_145 = arith.constant 0 : index
    %259 = vector.load %arg40[%c2_143, %c0_144, %c0_145] : memref<8x1x16xf32, #tpu.memory_space<vmem>>, vector<1x1x16xf32>
    %260 = vector.shape_cast %259 : vector<1x1x16xf32> to vector<1x16xf32>
    %261 = vector.broadcast %260 : vector<1x16xf32> to vector<8x16xf32>
    %262 = arith.addf %258, %261 : vector<8x16xf32>
    %c2_146 = arith.constant 2 : index
    %c0_147 = arith.constant 0 : index
    %c0_148 = arith.constant 0 : index
    %263 = vector.load %arg42[%c2_146, %c0_147, %c0_148] : memref<8x64x16xf32, #tpu.memory_space<vmem>>, vector<1x64x16xf32>
    %264 = vector.shape_cast %263 : vector<1x64x16xf32> to vector<64x16xf32>
    %cst_149 = arith.constant dense<0.000000e+00> : vector<8x16xf32>
    %265 = tpu.matmul %192, %264, %cst_149 {dimension_numbers = #tpu.dot_dimension_numbers<[1], [0], [0], [1], [0, 0, 1, 1], [], []>} : vector<8x64xf32>, vector<64x16xf32>, vector<8x16xf32> -> vector<8x16xf32>
    %c2_150 = arith.constant 2 : index
    %c0_151 = arith.constant 0 : index
    %c0_152 = arith.constant 0 : index
    %266 = vector.load %arg45[%c2_150, %c0_151, %c0_152] : memref<8x64x16xf32, #tpu.memory_space<vmem>>, vector<1x64x16xf32>
    %267 = vector.shape_cast %266 : vector<1x64x16xf32> to vector<64x16xf32>
    %cst_153 = arith.constant dense<0.000000e+00> : vector<8x16xf32>
    %268 = tpu.matmul %192, %267, %cst_153 {dimension_numbers = #tpu.dot_dimension_numbers<[1], [0], [0], [1], [0, 0, 1, 1], [], []>} : vector<8x64xf32>, vector<64x16xf32>, vector<8x16xf32> -> vector<8x16xf32>
    %c2_154 = arith.constant 2 : index
    %c0_155 = arith.constant 0 : index
    %c0_156 = arith.constant 0 : index
    %269 = vector.load %arg41[%c2_154, %c0_155, %c0_156] : memref<8x1x16xf32, #tpu.memory_space<vmem>>, vector<1x1x16xf32>
    %270 = vector.shape_cast %269 : vector<1x1x16xf32> to vector<1x16xf32>
    %271 = vector.broadcast %270 : vector<1x16xf32> to vector<8x16xf32>
    %272 = arith.addf %268, %271 : vector<8x16xf32>
    %cst_157 = arith.constant dense<0.000000e+00> : vector<8x8xf32>
    %273 = tpu.matmul %262, %265, %cst_157 {dimension_numbers = #tpu.dot_dimension_numbers<[1], [1], [0], [0], [0, 0, 1, 0], [], []>} : vector<8x16xf32>, vector<8x16xf32>, vector<8x8xf32> -> vector<8x8xf32>
    %cst_158 = arith.constant dense<0xFF800000> : vector<8xf32>
    %274 = vector.multi_reduction <maximumf>, %273, %cst_158 [1] : vector<8x8xf32> to vector<8xf32>
    %275 = vector.shape_cast %274 : vector<8xf32> to vector<8x1xf32>
    %276 = vector.broadcast %275 : vector<8x1xf32> to vector<8x8xf32>
    %277 = arith.subf %273, %276 : vector<8x8xf32>
    %278 = math.exp %277 : vector<8x8xf32>
    %cst_159 = arith.constant dense<0.000000e+00> : vector<8xf32>
    %279 = vector.multi_reduction <add>, %278, %cst_159 [1] : vector<8x8xf32> to vector<8xf32>
    %280 = vector.shape_cast %279 : vector<8xf32> to vector<8x1xf32>
    %281 = vector.broadcast %280 : vector<8x1xf32> to vector<8x8xf32>
    %282 = arith.divf %278, %281 : vector<8x8xf32>
    %cst_160 = arith.constant dense<0.000000e+00> : vector<8x16xf32>
    %283 = tpu.matmul %282, %272, %cst_160 {dimension_numbers = #tpu.dot_dimension_numbers<[1], [0], [0], [1], [0, 0, 1, 1], [], []>} : vector<8x8xf32>, vector<8x16xf32>, vector<8x16xf32> -> vector<8x16xf32>
    %c2_161 = arith.constant 2 : index
    %c0_162 = arith.constant 0 : index
    %c0_163 = arith.constant 0 : index
    %284 = vector.load %arg43[%c2_161, %c0_162, %c0_163] : memref<8x16x64xf32, #tpu.memory_space<vmem>>, vector<1x16x64xf32>
    %285 = vector.shape_cast %284 : vector<1x16x64xf32> to vector<16x64xf32>
    %cst_164 = arith.constant dense<0.000000e+00> : vector<8x64xf32>
    %286 = tpu.matmul %283, %285, %cst_164 {dimension_numbers = #tpu.dot_dimension_numbers<[1], [0], [0], [1], [0, 0, 1, 1], [], []>} : vector<8x16xf32>, vector<16x64xf32>, vector<8x64xf32> -> vector<8x64xf32>
    %287 = arith.addf %255, %286 : vector<8x64xf32>
    %c3 = arith.constant 3 : index
    %c0_165 = arith.constant 0 : index
    %c0_166 = arith.constant 0 : index
    %288 = vector.load %arg44[%c3, %c0_165, %c0_166] : memref<8x64x16xf32, #tpu.memory_space<vmem>>, vector<1x64x16xf32>
    %289 = vector.shape_cast %288 : vector<1x64x16xf32> to vector<64x16xf32>
    %cst_167 = arith.constant dense<0.000000e+00> : vector<8x16xf32>
    %290 = tpu.matmul %192, %289, %cst_167 {dimension_numbers = #tpu.dot_dimension_numbers<[1], [0], [0], [1], [0, 0, 1, 1], [], []>} : vector<8x64xf32>, vector<64x16xf32>, vector<8x16xf32> -> vector<8x16xf32>
    %c3_168 = arith.constant 3 : index
    %c0_169 = arith.constant 0 : index
    %c0_170 = arith.constant 0 : index
    %291 = vector.load %arg40[%c3_168, %c0_169, %c0_170] : memref<8x1x16xf32, #tpu.memory_space<vmem>>, vector<1x1x16xf32>
    %292 = vector.shape_cast %291 : vector<1x1x16xf32> to vector<1x16xf32>
    %293 = vector.broadcast %292 : vector<1x16xf32> to vector<8x16xf32>
    %294 = arith.addf %290, %293 : vector<8x16xf32>
    %c3_171 = arith.constant 3 : index
    %c0_172 = arith.constant 0 : index
    %c0_173 = arith.constant 0 : index
    %295 = vector.load %arg42[%c3_171, %c0_172, %c0_173] : memref<8x64x16xf32, #tpu.memory_space<vmem>>, vector<1x64x16xf32>
    %296 = vector.shape_cast %295 : vector<1x64x16xf32> to vector<64x16xf32>
    %cst_174 = arith.constant dense<0.000000e+00> : vector<8x16xf32>
    %297 = tpu.matmul %192, %296, %cst_174 {dimension_numbers = #tpu.dot_dimension_numbers<[1], [0], [0], [1], [0, 0, 1, 1], [], []>} : vector<8x64xf32>, vector<64x16xf32>, vector<8x16xf32> -> vector<8x16xf32>
    %c3_175 = arith.constant 3 : index
    %c0_176 = arith.constant 0 : index
    %c0_177 = arith.constant 0 : index
    %298 = vector.load %arg45[%c3_175, %c0_176, %c0_177] : memref<8x64x16xf32, #tpu.memory_space<vmem>>, vector<1x64x16xf32>
    %299 = vector.shape_cast %298 : vector<1x64x16xf32> to vector<64x16xf32>
    %cst_178 = arith.constant dense<0.000000e+00> : vector<8x16xf32>
    %300 = tpu.matmul %192, %299, %cst_178 {dimension_numbers = #tpu.dot_dimension_numbers<[1], [0], [0], [1], [0, 0, 1, 1], [], []>} : vector<8x64xf32>, vector<64x16xf32>, vector<8x16xf32> -> vector<8x16xf32>
    %c3_179 = arith.constant 3 : index
    %c0_180 = arith.constant 0 : index
    %c0_181 = arith.constant 0 : index
    %301 = vector.load %arg41[%c3_179, %c0_180, %c0_181] : memref<8x1x16xf32, #tpu.memory_space<vmem>>, vector<1x1x16xf32>
    %302 = vector.shape_cast %301 : vector<1x1x16xf32> to vector<1x16xf32>
    %303 = vector.broadcast %302 : vector<1x16xf32> to vector<8x16xf32>
    %304 = arith.addf %300, %303 : vector<8x16xf32>
    %cst_182 = arith.constant dense<0.000000e+00> : vector<8x8xf32>
    %305 = tpu.matmul %294, %297, %cst_182 {dimension_numbers = #tpu.dot_dimension_numbers<[1], [1], [0], [0], [0, 0, 1, 0], [], []>} : vector<8x16xf32>, vector<8x16xf32>, vector<8x8xf32> -> vector<8x8xf32>
    %cst_183 = arith.constant dense<0xFF800000> : vector<8xf32>
    %306 = vector.multi_reduction <maximumf>, %305, %cst_183 [1] : vector<8x8xf32> to vector<8xf32>
    %307 = vector.shape_cast %306 : vector<8xf32> to vector<8x1xf32>
    %308 = vector.broadcast %307 : vector<8x1xf32> to vector<8x8xf32>
    %309 = arith.subf %305, %308 : vector<8x8xf32>
    %310 = math.exp %309 : vector<8x8xf32>
    %cst_184 = arith.constant dense<0.000000e+00> : vector<8xf32>
    %311 = vector.multi_reduction <add>, %310, %cst_184 [1] : vector<8x8xf32> to vector<8xf32>
    %312 = vector.shape_cast %311 : vector<8xf32> to vector<8x1xf32>
    %313 = vector.broadcast %312 : vector<8x1xf32> to vector<8x8xf32>
    %314 = arith.divf %310, %313 : vector<8x8xf32>
    %cst_185 = arith.constant dense<0.000000e+00> : vector<8x16xf32>
    %315 = tpu.matmul %314, %304, %cst_185 {dimension_numbers = #tpu.dot_dimension_numbers<[1], [0], [0], [1], [0, 0, 1, 1], [], []>} : vector<8x8xf32>, vector<8x16xf32>, vector<8x16xf32> -> vector<8x16xf32>
    %c3_186 = arith.constant 3 : index
    %c0_187 = arith.constant 0 : index
    %c0_188 = arith.constant 0 : index
    %316 = vector.load %arg43[%c3_186, %c0_187, %c0_188] : memref<8x16x64xf32, #tpu.memory_space<vmem>>, vector<1x16x64xf32>
    %317 = vector.shape_cast %316 : vector<1x16x64xf32> to vector<16x64xf32>
    %cst_189 = arith.constant dense<0.000000e+00> : vector<8x64xf32>
    %318 = tpu.matmul %315, %317, %cst_189 {dimension_numbers = #tpu.dot_dimension_numbers<[1], [0], [0], [1], [0, 0, 1, 1], [], []>} : vector<8x16xf32>, vector<16x64xf32>, vector<8x64xf32> -> vector<8x64xf32>
    %319 = arith.addf %287, %318 : vector<8x64xf32>
    %c0_190 = arith.constant 0 : index
    %c0_191 = arith.constant 0 : index
    %c0_192 = arith.constant 0 : index
    %320 = vector.load %arg39[%c0_190, %c0_191, %c0_192] : memref<2x1x64xf32, #tpu.memory_space<vmem>>, vector<1x1x64xf32>
    %321 = vector.shape_cast %320 : vector<1x1x64xf32> to vector<1x64xf32>
    %322 = vector.broadcast %321 : vector<1x64xf32> to vector<8x64xf32>
    %323 = arith.addf %319, %322 : vector<8x64xf32>
    %324 = arith.addf %168, %323 : vector<8x64xf32>
    %c0_193 = arith.constant 0 : index
    %c0_194 = arith.constant 0 : index
    %c0_195 = arith.constant 0 : index
    %325 = vector.load %arg36[%c0_193, %c0_194, %c0_195] : memref<2x1x64xf32, #tpu.memory_space<vmem>>, vector<1x1x64xf32>
    %326 = vector.shape_cast %325 : vector<1x1x64xf32> to vector<1x64xf32>
    %c0_196 = arith.constant 0 : index
    %c0_197 = arith.constant 0 : index
    %c0_198 = arith.constant 0 : index
    %327 = vector.load %arg35[%c0_196, %c0_197, %c0_198] : memref<2x1x64xf32, #tpu.memory_space<vmem>>, vector<1x1x64xf32>
    %328 = vector.shape_cast %327 : vector<1x1x64xf32> to vector<1x64xf32>
    %cst_199 = arith.constant dense<0.000000e+00> : vector<8xf32>
    %329 = vector.multi_reduction <add>, %324, %cst_199 [1] : vector<8x64xf32> to vector<8xf32>
    %330 = vector.shape_cast %329 : vector<8xf32> to vector<8x1xf32>
    %cst_200 = arith.constant 6.400000e+01 : f32
    %331 = vector.broadcast %cst_200 : f32 to vector<8x1xf32>
    %332 = arith.divf %330, %331 : vector<8x1xf32>
    %333 = vector.broadcast %332 : vector<8x1xf32> to vector<8x64xf32>
    %334 = arith.subf %324, %333 : vector<8x64xf32>
    %335 = arith.mulf %334, %334 : vector<8x64xf32>
    %cst_201 = arith.constant dense<0.000000e+00> : vector<8xf32>
    %336 = vector.multi_reduction <add>, %335, %cst_201 [1] : vector<8x64xf32> to vector<8xf32>
    %337 = vector.shape_cast %336 : vector<8xf32> to vector<8x1xf32>
    %cst_202 = arith.constant 6.400000e+01 : f32
    %338 = vector.broadcast %cst_202 : f32 to vector<8x1xf32>
    %339 = arith.divf %337, %338 : vector<8x1xf32>
    %cst_203 = arith.constant 9.99999974E-6 : f32
    %340 = vector.broadcast %cst_203 : f32 to vector<8x1xf32>
    %341 = arith.addf %339, %340 : vector<8x1xf32>
    %342 = math.rsqrt %341 : vector<8x1xf32>
    %343 = vector.broadcast %342 : vector<8x1xf32> to vector<8x64xf32>
    %344 = arith.mulf %334, %343 : vector<8x64xf32>
    %345 = vector.broadcast %326 : vector<1x64xf32> to vector<8x64xf32>
    %346 = arith.mulf %344, %345 : vector<8x64xf32>
    %347 = vector.broadcast %328 : vector<1x64xf32> to vector<8x64xf32>
    %348 = arith.addf %346, %347 : vector<8x64xf32>
    %c0_204 = arith.constant 0 : index
    %c0_205 = arith.constant 0 : index
    %c0_206 = arith.constant 0 : index
    %349 = vector.load %arg32[%c0_204, %c0_205, %c0_206] : memref<2x64x128xf32, #tpu.memory_space<vmem>>, vector<1x64x128xf32>
    %350 = vector.shape_cast %349 : vector<1x64x128xf32> to vector<64x128xf32>
    %cst_207 = arith.constant dense<0.000000e+00> : vector<8x128xf32>
    %351 = tpu.matmul %348, %350, %cst_207 {dimension_numbers = #tpu.dot_dimension_numbers<[1], [0], [0], [1], [0, 0, 1, 1], [], []>} : vector<8x64xf32>, vector<64x128xf32>, vector<8x128xf32> -> vector<8x128xf32>
    %c0_208 = arith.constant 0 : index
    %c0_209 = arith.constant 0 : index
    %c0_210 = arith.constant 0 : index
    %352 = vector.load %arg31[%c0_208, %c0_209, %c0_210] : memref<2x1x128xf32, #tpu.memory_space<vmem>>, vector<1x1x128xf32>
    %353 = vector.shape_cast %352 : vector<1x1x128xf32> to vector<1x128xf32>
    %354 = vector.broadcast %353 : vector<1x128xf32> to vector<8x128xf32>
    %355 = arith.addf %351, %354 : vector<8x128xf32>
    %cst_211 = arith.constant 5.000000e-01 : f32
    %356 = vector.broadcast %cst_211 : f32 to vector<8x128xf32>
    %357 = arith.mulf %356, %355 : vector<8x128xf32>
    %cst_212 = arith.constant 0.707106769 : f32
    %358 = vector.broadcast %cst_212 : f32 to vector<8x128xf32>
    %359 = arith.mulf %355, %358 : vector<8x128xf32>
    %cst_213 = arith.constant 0.000000e+00 : f32
    %360 = vector.broadcast %cst_213 : f32 to vector<8x128xf32>
    %361 = arith.cmpf oge, %359, %360 : vector<8x128xf32>
    %cst_214 = arith.constant 1.000000e+00 : f32
    %cst_215 = arith.constant -1.000000e+00 : f32
    %362 = vector.broadcast %cst_214 : f32 to vector<8x128xf32>
    %363 = vector.broadcast %cst_215 : f32 to vector<8x128xf32>
    %364 = arith.select %361, %362, %363 : vector<8x128xi1>, vector<8x128xf32>
    %365 = math.absf %359 : vector<8x128xf32>
    %cst_216 = arith.constant 0.327591091 : f32
    %366 = vector.broadcast %cst_216 : f32 to vector<8x128xf32>
    %367 = arith.mulf %366, %365 : vector<8x128xf32>
    %cst_217 = arith.constant 1.000000e+00 : f32
    %368 = vector.broadcast %cst_217 : f32 to vector<8x128xf32>
    %369 = arith.addf %368, %367 : vector<8x128xf32>
    %cst_218 = arith.constant 1.000000e+00 : f32
    %370 = vector.broadcast %cst_218 : f32 to vector<8x128xf32>
    %371 = arith.divf %370, %369 : vector<8x128xf32>
    %cst_219 = arith.constant 1.06140542 : f32
    %372 = vector.broadcast %cst_219 : f32 to vector<8x128xf32>
    %373 = arith.mulf %372, %371 : vector<8x128xf32>
    %cst_220 = arith.constant -1.45315206 : f32
    %374 = vector.broadcast %cst_220 : f32 to vector<8x128xf32>
    %375 = arith.addf %373, %374 : vector<8x128xf32>
    %376 = arith.mulf %375, %371 : vector<8x128xf32>
    %cst_221 = arith.constant 1.42141378 : f32
    %377 = vector.broadcast %cst_221 : f32 to vector<8x128xf32>
    %378 = arith.addf %376, %377 : vector<8x128xf32>
    %379 = arith.mulf %378, %371 : vector<8x128xf32>
    %cst_222 = arith.constant -0.284496725 : f32
    %380 = vector.broadcast %cst_222 : f32 to vector<8x128xf32>
    %381 = arith.addf %379, %380 : vector<8x128xf32>
    %382 = arith.mulf %381, %371 : vector<8x128xf32>
    %cst_223 = arith.constant 0.254829586 : f32
    %383 = vector.broadcast %cst_223 : f32 to vector<8x128xf32>
    %384 = arith.addf %382, %383 : vector<8x128xf32>
    %385 = arith.mulf %384, %371 : vector<8x128xf32>
    %cst_224 = arith.constant 0.000000e+00 : f32
    %386 = vector.broadcast %cst_224 : f32 to vector<8x128xf32>
    %387 = arith.subf %386, %365 : vector<8x128xf32>
    %388 = arith.mulf %387, %365 : vector<8x128xf32>
    %389 = math.exp %388 : vector<8x128xf32>
    %390 = arith.mulf %385, %389 : vector<8x128xf32>
    %cst_225 = arith.constant 1.000000e+00 : f32
    %391 = vector.broadcast %cst_225 : f32 to vector<8x128xf32>
    %392 = arith.subf %391, %390 : vector<8x128xf32>
    %393 = arith.mulf %364, %392 : vector<8x128xf32>
    %cst_226 = arith.constant 1.000000e+00 : f32
    %394 = vector.broadcast %cst_226 : f32 to vector<8x128xf32>
    %395 = arith.addf %394, %393 : vector<8x128xf32>
    %396 = arith.mulf %357, %395 : vector<8x128xf32>
    %c0_227 = arith.constant 0 : index
    %c0_228 = arith.constant 0 : index
    %c0_229 = arith.constant 0 : index
    %397 = vector.load %arg34[%c0_227, %c0_228, %c0_229] : memref<2x128x64xf32, #tpu.memory_space<vmem>>, vector<1x128x64xf32>
    %398 = vector.shape_cast %397 : vector<1x128x64xf32> to vector<128x64xf32>
    %cst_230 = arith.constant dense<0.000000e+00> : vector<8x64xf32>
    %399 = tpu.matmul %396, %398, %cst_230 {dimension_numbers = #tpu.dot_dimension_numbers<[1], [0], [0], [1], [0, 0, 1, 1], [], []>} : vector<8x128xf32>, vector<128x64xf32>, vector<8x64xf32> -> vector<8x64xf32>
    %c0_231 = arith.constant 0 : index
    %c0_232 = arith.constant 0 : index
    %c0_233 = arith.constant 0 : index
    %400 = vector.load %arg33[%c0_231, %c0_232, %c0_233] : memref<2x1x64xf32, #tpu.memory_space<vmem>>, vector<1x1x64xf32>
    %401 = vector.shape_cast %400 : vector<1x1x64xf32> to vector<1x64xf32>
    %402 = vector.broadcast %401 : vector<1x64xf32> to vector<8x64xf32>
    %403 = arith.addf %399, %402 : vector<8x64xf32>
    %404 = arith.addf %324, %403 : vector<8x64xf32>
    %c1_234 = arith.constant 1 : index
    %c0_235 = arith.constant 0 : index
    %c0_236 = arith.constant 0 : index
    %405 = vector.load %arg47[%c1_234, %c0_235, %c0_236] : memref<2x1x64xf32, #tpu.memory_space<vmem>>, vector<1x1x64xf32>
    %406 = vector.shape_cast %405 : vector<1x1x64xf32> to vector<1x64xf32>
    %c1_237 = arith.constant 1 : index
    %c0_238 = arith.constant 0 : index
    %c0_239 = arith.constant 0 : index
    %407 = vector.load %arg46[%c1_237, %c0_238, %c0_239] : memref<2x1x64xf32, #tpu.memory_space<vmem>>, vector<1x1x64xf32>
    %408 = vector.shape_cast %407 : vector<1x1x64xf32> to vector<1x64xf32>
    %cst_240 = arith.constant dense<0.000000e+00> : vector<8xf32>
    %409 = vector.multi_reduction <add>, %404, %cst_240 [1] : vector<8x64xf32> to vector<8xf32>
    %410 = vector.shape_cast %409 : vector<8xf32> to vector<8x1xf32>
    %cst_241 = arith.constant 6.400000e+01 : f32
    %411 = vector.broadcast %cst_241 : f32 to vector<8x1xf32>
    %412 = arith.divf %410, %411 : vector<8x1xf32>
    %413 = vector.broadcast %412 : vector<8x1xf32> to vector<8x64xf32>
    %414 = arith.subf %404, %413 : vector<8x64xf32>
    %415 = arith.mulf %414, %414 : vector<8x64xf32>
    %cst_242 = arith.constant dense<0.000000e+00> : vector<8xf32>
    %416 = vector.multi_reduction <add>, %415, %cst_242 [1] : vector<8x64xf32> to vector<8xf32>
    %417 = vector.shape_cast %416 : vector<8xf32> to vector<8x1xf32>
    %cst_243 = arith.constant 6.400000e+01 : f32
    %418 = vector.broadcast %cst_243 : f32 to vector<8x1xf32>
    %419 = arith.divf %417, %418 : vector<8x1xf32>
    %cst_244 = arith.constant 9.99999974E-6 : f32
    %420 = vector.broadcast %cst_244 : f32 to vector<8x1xf32>
    %421 = arith.addf %419, %420 : vector<8x1xf32>
    %422 = math.rsqrt %421 : vector<8x1xf32>
    %423 = vector.broadcast %422 : vector<8x1xf32> to vector<8x64xf32>
    %424 = arith.mulf %414, %423 : vector<8x64xf32>
    %425 = vector.broadcast %406 : vector<1x64xf32> to vector<8x64xf32>
    %426 = arith.mulf %424, %425 : vector<8x64xf32>
    %427 = vector.broadcast %408 : vector<1x64xf32> to vector<8x64xf32>
    %428 = arith.addf %426, %427 : vector<8x64xf32>
    %c4 = arith.constant 4 : index
    %c0_245 = arith.constant 0 : index
    %c0_246 = arith.constant 0 : index
    %429 = vector.load %arg44[%c4, %c0_245, %c0_246] : memref<8x64x16xf32, #tpu.memory_space<vmem>>, vector<1x64x16xf32>
    %430 = vector.shape_cast %429 : vector<1x64x16xf32> to vector<64x16xf32>
    %cst_247 = arith.constant dense<0.000000e+00> : vector<8x16xf32>
    %431 = tpu.matmul %428, %430, %cst_247 {dimension_numbers = #tpu.dot_dimension_numbers<[1], [0], [0], [1], [0, 0, 1, 1], [], []>} : vector<8x64xf32>, vector<64x16xf32>, vector<8x16xf32> -> vector<8x16xf32>
    %c4_248 = arith.constant 4 : index
    %c0_249 = arith.constant 0 : index
    %c0_250 = arith.constant 0 : index
    %432 = vector.load %arg40[%c4_248, %c0_249, %c0_250] : memref<8x1x16xf32, #tpu.memory_space<vmem>>, vector<1x1x16xf32>
    %433 = vector.shape_cast %432 : vector<1x1x16xf32> to vector<1x16xf32>
    %434 = vector.broadcast %433 : vector<1x16xf32> to vector<8x16xf32>
    %435 = arith.addf %431, %434 : vector<8x16xf32>
    %c4_251 = arith.constant 4 : index
    %c0_252 = arith.constant 0 : index
    %c0_253 = arith.constant 0 : index
    %436 = vector.load %arg42[%c4_251, %c0_252, %c0_253] : memref<8x64x16xf32, #tpu.memory_space<vmem>>, vector<1x64x16xf32>
    %437 = vector.shape_cast %436 : vector<1x64x16xf32> to vector<64x16xf32>
    %cst_254 = arith.constant dense<0.000000e+00> : vector<8x16xf32>
    %438 = tpu.matmul %428, %437, %cst_254 {dimension_numbers = #tpu.dot_dimension_numbers<[1], [0], [0], [1], [0, 0, 1, 1], [], []>} : vector<8x64xf32>, vector<64x16xf32>, vector<8x16xf32> -> vector<8x16xf32>
    %c4_255 = arith.constant 4 : index
    %c0_256 = arith.constant 0 : index
    %c0_257 = arith.constant 0 : index
    %439 = vector.load %arg45[%c4_255, %c0_256, %c0_257] : memref<8x64x16xf32, #tpu.memory_space<vmem>>, vector<1x64x16xf32>
    %440 = vector.shape_cast %439 : vector<1x64x16xf32> to vector<64x16xf32>
    %cst_258 = arith.constant dense<0.000000e+00> : vector<8x16xf32>
    %441 = tpu.matmul %428, %440, %cst_258 {dimension_numbers = #tpu.dot_dimension_numbers<[1], [0], [0], [1], [0, 0, 1, 1], [], []>} : vector<8x64xf32>, vector<64x16xf32>, vector<8x16xf32> -> vector<8x16xf32>
    %c4_259 = arith.constant 4 : index
    %c0_260 = arith.constant 0 : index
    %c0_261 = arith.constant 0 : index
    %442 = vector.load %arg41[%c4_259, %c0_260, %c0_261] : memref<8x1x16xf32, #tpu.memory_space<vmem>>, vector<1x1x16xf32>
    %443 = vector.shape_cast %442 : vector<1x1x16xf32> to vector<1x16xf32>
    %444 = vector.broadcast %443 : vector<1x16xf32> to vector<8x16xf32>
    %445 = arith.addf %441, %444 : vector<8x16xf32>
    %cst_262 = arith.constant dense<0.000000e+00> : vector<8x8xf32>
    %446 = tpu.matmul %435, %438, %cst_262 {dimension_numbers = #tpu.dot_dimension_numbers<[1], [1], [0], [0], [0, 0, 1, 0], [], []>} : vector<8x16xf32>, vector<8x16xf32>, vector<8x8xf32> -> vector<8x8xf32>
    %cst_263 = arith.constant dense<0xFF800000> : vector<8xf32>
    %447 = vector.multi_reduction <maximumf>, %446, %cst_263 [1] : vector<8x8xf32> to vector<8xf32>
    %448 = vector.shape_cast %447 : vector<8xf32> to vector<8x1xf32>
    %449 = vector.broadcast %448 : vector<8x1xf32> to vector<8x8xf32>
    %450 = arith.subf %446, %449 : vector<8x8xf32>
    %451 = math.exp %450 : vector<8x8xf32>
    %cst_264 = arith.constant dense<0.000000e+00> : vector<8xf32>
    %452 = vector.multi_reduction <add>, %451, %cst_264 [1] : vector<8x8xf32> to vector<8xf32>
    %453 = vector.shape_cast %452 : vector<8xf32> to vector<8x1xf32>
    %454 = vector.broadcast %453 : vector<8x1xf32> to vector<8x8xf32>
    %455 = arith.divf %451, %454 : vector<8x8xf32>
    %cst_265 = arith.constant dense<0.000000e+00> : vector<8x16xf32>
    %456 = tpu.matmul %455, %445, %cst_265 {dimension_numbers = #tpu.dot_dimension_numbers<[1], [0], [0], [1], [0, 0, 1, 1], [], []>} : vector<8x8xf32>, vector<8x16xf32>, vector<8x16xf32> -> vector<8x16xf32>
    %c4_266 = arith.constant 4 : index
    %c0_267 = arith.constant 0 : index
    %c0_268 = arith.constant 0 : index
    %457 = vector.load %arg43[%c4_266, %c0_267, %c0_268] : memref<8x16x64xf32, #tpu.memory_space<vmem>>, vector<1x16x64xf32>
    %458 = vector.shape_cast %457 : vector<1x16x64xf32> to vector<16x64xf32>
    %cst_269 = arith.constant dense<0.000000e+00> : vector<8x64xf32>
    %459 = tpu.matmul %456, %458, %cst_269 {dimension_numbers = #tpu.dot_dimension_numbers<[1], [0], [0], [1], [0, 0, 1, 1], [], []>} : vector<8x16xf32>, vector<16x64xf32>, vector<8x64xf32> -> vector<8x64xf32>
    %c5 = arith.constant 5 : index
    %c0_270 = arith.constant 0 : index
    %c0_271 = arith.constant 0 : index
    %460 = vector.load %arg44[%c5, %c0_270, %c0_271] : memref<8x64x16xf32, #tpu.memory_space<vmem>>, vector<1x64x16xf32>
    %461 = vector.shape_cast %460 : vector<1x64x16xf32> to vector<64x16xf32>
    %cst_272 = arith.constant dense<0.000000e+00> : vector<8x16xf32>
    %462 = tpu.matmul %428, %461, %cst_272 {dimension_numbers = #tpu.dot_dimension_numbers<[1], [0], [0], [1], [0, 0, 1, 1], [], []>} : vector<8x64xf32>, vector<64x16xf32>, vector<8x16xf32> -> vector<8x16xf32>
    %c5_273 = arith.constant 5 : index
    %c0_274 = arith.constant 0 : index
    %c0_275 = arith.constant 0 : index
    %463 = vector.load %arg40[%c5_273, %c0_274, %c0_275] : memref<8x1x16xf32, #tpu.memory_space<vmem>>, vector<1x1x16xf32>
    %464 = vector.shape_cast %463 : vector<1x1x16xf32> to vector<1x16xf32>
    %465 = vector.broadcast %464 : vector<1x16xf32> to vector<8x16xf32>
    %466 = arith.addf %462, %465 : vector<8x16xf32>
    %c5_276 = arith.constant 5 : index
    %c0_277 = arith.constant 0 : index
    %c0_278 = arith.constant 0 : index
    %467 = vector.load %arg42[%c5_276, %c0_277, %c0_278] : memref<8x64x16xf32, #tpu.memory_space<vmem>>, vector<1x64x16xf32>
    %468 = vector.shape_cast %467 : vector<1x64x16xf32> to vector<64x16xf32>
    %cst_279 = arith.constant dense<0.000000e+00> : vector<8x16xf32>
    %469 = tpu.matmul %428, %468, %cst_279 {dimension_numbers = #tpu.dot_dimension_numbers<[1], [0], [0], [1], [0, 0, 1, 1], [], []>} : vector<8x64xf32>, vector<64x16xf32>, vector<8x16xf32> -> vector<8x16xf32>
    %c5_280 = arith.constant 5 : index
    %c0_281 = arith.constant 0 : index
    %c0_282 = arith.constant 0 : index
    %470 = vector.load %arg45[%c5_280, %c0_281, %c0_282] : memref<8x64x16xf32, #tpu.memory_space<vmem>>, vector<1x64x16xf32>
    %471 = vector.shape_cast %470 : vector<1x64x16xf32> to vector<64x16xf32>
    %cst_283 = arith.constant dense<0.000000e+00> : vector<8x16xf32>
    %472 = tpu.matmul %428, %471, %cst_283 {dimension_numbers = #tpu.dot_dimension_numbers<[1], [0], [0], [1], [0, 0, 1, 1], [], []>} : vector<8x64xf32>, vector<64x16xf32>, vector<8x16xf32> -> vector<8x16xf32>
    %c5_284 = arith.constant 5 : index
    %c0_285 = arith.constant 0 : index
    %c0_286 = arith.constant 0 : index
    %473 = vector.load %arg41[%c5_284, %c0_285, %c0_286] : memref<8x1x16xf32, #tpu.memory_space<vmem>>, vector<1x1x16xf32>
    %474 = vector.shape_cast %473 : vector<1x1x16xf32> to vector<1x16xf32>
    %475 = vector.broadcast %474 : vector<1x16xf32> to vector<8x16xf32>
    %476 = arith.addf %472, %475 : vector<8x16xf32>
    %cst_287 = arith.constant dense<0.000000e+00> : vector<8x8xf32>
    %477 = tpu.matmul %466, %469, %cst_287 {dimension_numbers = #tpu.dot_dimension_numbers<[1], [1], [0], [0], [0, 0, 1, 0], [], []>} : vector<8x16xf32>, vector<8x16xf32>, vector<8x8xf32> -> vector<8x8xf32>
    %cst_288 = arith.constant dense<0xFF800000> : vector<8xf32>
    %478 = vector.multi_reduction <maximumf>, %477, %cst_288 [1] : vector<8x8xf32> to vector<8xf32>
    %479 = vector.shape_cast %478 : vector<8xf32> to vector<8x1xf32>
    %480 = vector.broadcast %479 : vector<8x1xf32> to vector<8x8xf32>
    %481 = arith.subf %477, %480 : vector<8x8xf32>
    %482 = math.exp %481 : vector<8x8xf32>
    %cst_289 = arith.constant dense<0.000000e+00> : vector<8xf32>
    %483 = vector.multi_reduction <add>, %482, %cst_289 [1] : vector<8x8xf32> to vector<8xf32>
    %484 = vector.shape_cast %483 : vector<8xf32> to vector<8x1xf32>
    %485 = vector.broadcast %484 : vector<8x1xf32> to vector<8x8xf32>
    %486 = arith.divf %482, %485 : vector<8x8xf32>
    %cst_290 = arith.constant dense<0.000000e+00> : vector<8x16xf32>
    %487 = tpu.matmul %486, %476, %cst_290 {dimension_numbers = #tpu.dot_dimension_numbers<[1], [0], [0], [1], [0, 0, 1, 1], [], []>} : vector<8x8xf32>, vector<8x16xf32>, vector<8x16xf32> -> vector<8x16xf32>
    %c5_291 = arith.constant 5 : index
    %c0_292 = arith.constant 0 : index
    %c0_293 = arith.constant 0 : index
    %488 = vector.load %arg43[%c5_291, %c0_292, %c0_293] : memref<8x16x64xf32, #tpu.memory_space<vmem>>, vector<1x16x64xf32>
    %489 = vector.shape_cast %488 : vector<1x16x64xf32> to vector<16x64xf32>
    %cst_294 = arith.constant dense<0.000000e+00> : vector<8x64xf32>
    %490 = tpu.matmul %487, %489, %cst_294 {dimension_numbers = #tpu.dot_dimension_numbers<[1], [0], [0], [1], [0, 0, 1, 1], [], []>} : vector<8x16xf32>, vector<16x64xf32>, vector<8x64xf32> -> vector<8x64xf32>
    %491 = arith.addf %459, %490 : vector<8x64xf32>
    %c6 = arith.constant 6 : index
    %c0_295 = arith.constant 0 : index
    %c0_296 = arith.constant 0 : index
    %492 = vector.load %arg44[%c6, %c0_295, %c0_296] : memref<8x64x16xf32, #tpu.memory_space<vmem>>, vector<1x64x16xf32>
    %493 = vector.shape_cast %492 : vector<1x64x16xf32> to vector<64x16xf32>
    %cst_297 = arith.constant dense<0.000000e+00> : vector<8x16xf32>
    %494 = tpu.matmul %428, %493, %cst_297 {dimension_numbers = #tpu.dot_dimension_numbers<[1], [0], [0], [1], [0, 0, 1, 1], [], []>} : vector<8x64xf32>, vector<64x16xf32>, vector<8x16xf32> -> vector<8x16xf32>
    %c6_298 = arith.constant 6 : index
    %c0_299 = arith.constant 0 : index
    %c0_300 = arith.constant 0 : index
    %495 = vector.load %arg40[%c6_298, %c0_299, %c0_300] : memref<8x1x16xf32, #tpu.memory_space<vmem>>, vector<1x1x16xf32>
    %496 = vector.shape_cast %495 : vector<1x1x16xf32> to vector<1x16xf32>
    %497 = vector.broadcast %496 : vector<1x16xf32> to vector<8x16xf32>
    %498 = arith.addf %494, %497 : vector<8x16xf32>
    %c6_301 = arith.constant 6 : index
    %c0_302 = arith.constant 0 : index
    %c0_303 = arith.constant 0 : index
    %499 = vector.load %arg42[%c6_301, %c0_302, %c0_303] : memref<8x64x16xf32, #tpu.memory_space<vmem>>, vector<1x64x16xf32>
    %500 = vector.shape_cast %499 : vector<1x64x16xf32> to vector<64x16xf32>
    %cst_304 = arith.constant dense<0.000000e+00> : vector<8x16xf32>
    %501 = tpu.matmul %428, %500, %cst_304 {dimension_numbers = #tpu.dot_dimension_numbers<[1], [0], [0], [1], [0, 0, 1, 1], [], []>} : vector<8x64xf32>, vector<64x16xf32>, vector<8x16xf32> -> vector<8x16xf32>
    %c6_305 = arith.constant 6 : index
    %c0_306 = arith.constant 0 : index
    %c0_307 = arith.constant 0 : index
    %502 = vector.load %arg45[%c6_305, %c0_306, %c0_307] : memref<8x64x16xf32, #tpu.memory_space<vmem>>, vector<1x64x16xf32>
    %503 = vector.shape_cast %502 : vector<1x64x16xf32> to vector<64x16xf32>
    %cst_308 = arith.constant dense<0.000000e+00> : vector<8x16xf32>
    %504 = tpu.matmul %428, %503, %cst_308 {dimension_numbers = #tpu.dot_dimension_numbers<[1], [0], [0], [1], [0, 0, 1, 1], [], []>} : vector<8x64xf32>, vector<64x16xf32>, vector<8x16xf32> -> vector<8x16xf32>
    %c6_309 = arith.constant 6 : index
    %c0_310 = arith.constant 0 : index
    %c0_311 = arith.constant 0 : index
    %505 = vector.load %arg41[%c6_309, %c0_310, %c0_311] : memref<8x1x16xf32, #tpu.memory_space<vmem>>, vector<1x1x16xf32>
    %506 = vector.shape_cast %505 : vector<1x1x16xf32> to vector<1x16xf32>
    %507 = vector.broadcast %506 : vector<1x16xf32> to vector<8x16xf32>
    %508 = arith.addf %504, %507 : vector<8x16xf32>
    %cst_312 = arith.constant dense<0.000000e+00> : vector<8x8xf32>
    %509 = tpu.matmul %498, %501, %cst_312 {dimension_numbers = #tpu.dot_dimension_numbers<[1], [1], [0], [0], [0, 0, 1, 0], [], []>} : vector<8x16xf32>, vector<8x16xf32>, vector<8x8xf32> -> vector<8x8xf32>
    %cst_313 = arith.constant dense<0xFF800000> : vector<8xf32>
    %510 = vector.multi_reduction <maximumf>, %509, %cst_313 [1] : vector<8x8xf32> to vector<8xf32>
    %511 = vector.shape_cast %510 : vector<8xf32> to vector<8x1xf32>
    %512 = vector.broadcast %511 : vector<8x1xf32> to vector<8x8xf32>
    %513 = arith.subf %509, %512 : vector<8x8xf32>
    %514 = math.exp %513 : vector<8x8xf32>
    %cst_314 = arith.constant dense<0.000000e+00> : vector<8xf32>
    %515 = vector.multi_reduction <add>, %514, %cst_314 [1] : vector<8x8xf32> to vector<8xf32>
    %516 = vector.shape_cast %515 : vector<8xf32> to vector<8x1xf32>
    %517 = vector.broadcast %516 : vector<8x1xf32> to vector<8x8xf32>
    %518 = arith.divf %514, %517 : vector<8x8xf32>
    %cst_315 = arith.constant dense<0.000000e+00> : vector<8x16xf32>
    %519 = tpu.matmul %518, %508, %cst_315 {dimension_numbers = #tpu.dot_dimension_numbers<[1], [0], [0], [1], [0, 0, 1, 1], [], []>} : vector<8x8xf32>, vector<8x16xf32>, vector<8x16xf32> -> vector<8x16xf32>
    %c6_316 = arith.constant 6 : index
    %c0_317 = arith.constant 0 : index
    %c0_318 = arith.constant 0 : index
    %520 = vector.load %arg43[%c6_316, %c0_317, %c0_318] : memref<8x16x64xf32, #tpu.memory_space<vmem>>, vector<1x16x64xf32>
    %521 = vector.shape_cast %520 : vector<1x16x64xf32> to vector<16x64xf32>
    %cst_319 = arith.constant dense<0.000000e+00> : vector<8x64xf32>
    %522 = tpu.matmul %519, %521, %cst_319 {dimension_numbers = #tpu.dot_dimension_numbers<[1], [0], [0], [1], [0, 0, 1, 1], [], []>} : vector<8x16xf32>, vector<16x64xf32>, vector<8x64xf32> -> vector<8x64xf32>
    %523 = arith.addf %491, %522 : vector<8x64xf32>
    %c7 = arith.constant 7 : index
    %c0_320 = arith.constant 0 : index
    %c0_321 = arith.constant 0 : index
    %524 = vector.load %arg44[%c7, %c0_320, %c0_321] : memref<8x64x16xf32, #tpu.memory_space<vmem>>, vector<1x64x16xf32>
    %525 = vector.shape_cast %524 : vector<1x64x16xf32> to vector<64x16xf32>
    %cst_322 = arith.constant dense<0.000000e+00> : vector<8x16xf32>
    %526 = tpu.matmul %428, %525, %cst_322 {dimension_numbers = #tpu.dot_dimension_numbers<[1], [0], [0], [1], [0, 0, 1, 1], [], []>} : vector<8x64xf32>, vector<64x16xf32>, vector<8x16xf32> -> vector<8x16xf32>
    %c7_323 = arith.constant 7 : index
    %c0_324 = arith.constant 0 : index
    %c0_325 = arith.constant 0 : index
    %527 = vector.load %arg40[%c7_323, %c0_324, %c0_325] : memref<8x1x16xf32, #tpu.memory_space<vmem>>, vector<1x1x16xf32>
    %528 = vector.shape_cast %527 : vector<1x1x16xf32> to vector<1x16xf32>
    %529 = vector.broadcast %528 : vector<1x16xf32> to vector<8x16xf32>
    %530 = arith.addf %526, %529 : vector<8x16xf32>
    %c7_326 = arith.constant 7 : index
    %c0_327 = arith.constant 0 : index
    %c0_328 = arith.constant 0 : index
    %531 = vector.load %arg42[%c7_326, %c0_327, %c0_328] : memref<8x64x16xf32, #tpu.memory_space<vmem>>, vector<1x64x16xf32>
    %532 = vector.shape_cast %531 : vector<1x64x16xf32> to vector<64x16xf32>
    %cst_329 = arith.constant dense<0.000000e+00> : vector<8x16xf32>
    %533 = tpu.matmul %428, %532, %cst_329 {dimension_numbers = #tpu.dot_dimension_numbers<[1], [0], [0], [1], [0, 0, 1, 1], [], []>} : vector<8x64xf32>, vector<64x16xf32>, vector<8x16xf32> -> vector<8x16xf32>
    %c7_330 = arith.constant 7 : index
    %c0_331 = arith.constant 0 : index
    %c0_332 = arith.constant 0 : index
    %534 = vector.load %arg45[%c7_330, %c0_331, %c0_332] : memref<8x64x16xf32, #tpu.memory_space<vmem>>, vector<1x64x16xf32>
    %535 = vector.shape_cast %534 : vector<1x64x16xf32> to vector<64x16xf32>
    %cst_333 = arith.constant dense<0.000000e+00> : vector<8x16xf32>
    %536 = tpu.matmul %428, %535, %cst_333 {dimension_numbers = #tpu.dot_dimension_numbers<[1], [0], [0], [1], [0, 0, 1, 1], [], []>} : vector<8x64xf32>, vector<64x16xf32>, vector<8x16xf32> -> vector<8x16xf32>
    %c7_334 = arith.constant 7 : index
    %c0_335 = arith.constant 0 : index
    %c0_336 = arith.constant 0 : index
    %537 = vector.load %arg41[%c7_334, %c0_335, %c0_336] : memref<8x1x16xf32, #tpu.memory_space<vmem>>, vector<1x1x16xf32>
    %538 = vector.shape_cast %537 : vector<1x1x16xf32> to vector<1x16xf32>
    %539 = vector.broadcast %538 : vector<1x16xf32> to vector<8x16xf32>
    %540 = arith.addf %536, %539 : vector<8x16xf32>
    %cst_337 = arith.constant dense<0.000000e+00> : vector<8x8xf32>
    %541 = tpu.matmul %530, %533, %cst_337 {dimension_numbers = #tpu.dot_dimension_numbers<[1], [1], [0], [0], [0, 0, 1, 0], [], []>} : vector<8x16xf32>, vector<8x16xf32>, vector<8x8xf32> -> vector<8x8xf32>
    %cst_338 = arith.constant dense<0xFF800000> : vector<8xf32>
    %542 = vector.multi_reduction <maximumf>, %541, %cst_338 [1] : vector<8x8xf32> to vector<8xf32>
    %543 = vector.shape_cast %542 : vector<8xf32> to vector<8x1xf32>
    %544 = vector.broadcast %543 : vector<8x1xf32> to vector<8x8xf32>
    %545 = arith.subf %541, %544 : vector<8x8xf32>
    %546 = math.exp %545 : vector<8x8xf32>
    %cst_339 = arith.constant dense<0.000000e+00> : vector<8xf32>
    %547 = vector.multi_reduction <add>, %546, %cst_339 [1] : vector<8x8xf32> to vector<8xf32>
    %548 = vector.shape_cast %547 : vector<8xf32> to vector<8x1xf32>
    %549 = vector.broadcast %548 : vector<8x1xf32> to vector<8x8xf32>
    %550 = arith.divf %546, %549 : vector<8x8xf32>
    %cst_340 = arith.constant dense<0.000000e+00> : vector<8x16xf32>
    %551 = tpu.matmul %550, %540, %cst_340 {dimension_numbers = #tpu.dot_dimension_numbers<[1], [0], [0], [1], [0, 0, 1, 1], [], []>} : vector<8x8xf32>, vector<8x16xf32>, vector<8x16xf32> -> vector<8x16xf32>
    %c7_341 = arith.constant 7 : index
    %c0_342 = arith.constant 0 : index
    %c0_343 = arith.constant 0 : index
    %552 = vector.load %arg43[%c7_341, %c0_342, %c0_343] : memref<8x16x64xf32, #tpu.memory_space<vmem>>, vector<1x16x64xf32>
    %553 = vector.shape_cast %552 : vector<1x16x64xf32> to vector<16x64xf32>
    %cst_344 = arith.constant dense<0.000000e+00> : vector<8x64xf32>
    %554 = tpu.matmul %551, %553, %cst_344 {dimension_numbers = #tpu.dot_dimension_numbers<[1], [0], [0], [1], [0, 0, 1, 1], [], []>} : vector<8x16xf32>, vector<16x64xf32>, vector<8x64xf32> -> vector<8x64xf32>
    %555 = arith.addf %523, %554 : vector<8x64xf32>
    %c1_345 = arith.constant 1 : index
    %c0_346 = arith.constant 0 : index
    %c0_347 = arith.constant 0 : index
    %556 = vector.load %arg39[%c1_345, %c0_346, %c0_347] : memref<2x1x64xf32, #tpu.memory_space<vmem>>, vector<1x1x64xf32>
    %557 = vector.shape_cast %556 : vector<1x1x64xf32> to vector<1x64xf32>
    %558 = vector.broadcast %557 : vector<1x64xf32> to vector<8x64xf32>
    %559 = arith.addf %555, %558 : vector<8x64xf32>
    %560 = arith.addf %404, %559 : vector<8x64xf32>
    %c1_348 = arith.constant 1 : index
    %c0_349 = arith.constant 0 : index
    %c0_350 = arith.constant 0 : index
    %561 = vector.load %arg36[%c1_348, %c0_349, %c0_350] : memref<2x1x64xf32, #tpu.memory_space<vmem>>, vector<1x1x64xf32>
    %562 = vector.shape_cast %561 : vector<1x1x64xf32> to vector<1x64xf32>
    %c1_351 = arith.constant 1 : index
    %c0_352 = arith.constant 0 : index
    %c0_353 = arith.constant 0 : index
    %563 = vector.load %arg35[%c1_351, %c0_352, %c0_353] : memref<2x1x64xf32, #tpu.memory_space<vmem>>, vector<1x1x64xf32>
    %564 = vector.shape_cast %563 : vector<1x1x64xf32> to vector<1x64xf32>
    %cst_354 = arith.constant dense<0.000000e+00> : vector<8xf32>
    %565 = vector.multi_reduction <add>, %560, %cst_354 [1] : vector<8x64xf32> to vector<8xf32>
    %566 = vector.shape_cast %565 : vector<8xf32> to vector<8x1xf32>
    %cst_355 = arith.constant 6.400000e+01 : f32
    %567 = vector.broadcast %cst_355 : f32 to vector<8x1xf32>
    %568 = arith.divf %566, %567 : vector<8x1xf32>
    %569 = vector.broadcast %568 : vector<8x1xf32> to vector<8x64xf32>
    %570 = arith.subf %560, %569 : vector<8x64xf32>
    %571 = arith.mulf %570, %570 : vector<8x64xf32>
    %cst_356 = arith.constant dense<0.000000e+00> : vector<8xf32>
    %572 = vector.multi_reduction <add>, %571, %cst_356 [1] : vector<8x64xf32> to vector<8xf32>
    %573 = vector.shape_cast %572 : vector<8xf32> to vector<8x1xf32>
    %cst_357 = arith.constant 6.400000e+01 : f32
    %574 = vector.broadcast %cst_357 : f32 to vector<8x1xf32>
    %575 = arith.divf %573, %574 : vector<8x1xf32>
    %cst_358 = arith.constant 9.99999974E-6 : f32
    %576 = vector.broadcast %cst_358 : f32 to vector<8x1xf32>
    %577 = arith.addf %575, %576 : vector<8x1xf32>
    %578 = math.rsqrt %577 : vector<8x1xf32>
    %579 = vector.broadcast %578 : vector<8x1xf32> to vector<8x64xf32>
    %580 = arith.mulf %570, %579 : vector<8x64xf32>
    %581 = vector.broadcast %562 : vector<1x64xf32> to vector<8x64xf32>
    %582 = arith.mulf %580, %581 : vector<8x64xf32>
    %583 = vector.broadcast %564 : vector<1x64xf32> to vector<8x64xf32>
    %584 = arith.addf %582, %583 : vector<8x64xf32>
    %c1_359 = arith.constant 1 : index
    %c0_360 = arith.constant 0 : index
    %c0_361 = arith.constant 0 : index
    %585 = vector.load %arg32[%c1_359, %c0_360, %c0_361] : memref<2x64x128xf32, #tpu.memory_space<vmem>>, vector<1x64x128xf32>
    %586 = vector.shape_cast %585 : vector<1x64x128xf32> to vector<64x128xf32>
    %cst_362 = arith.constant dense<0.000000e+00> : vector<8x128xf32>
    %587 = tpu.matmul %584, %586, %cst_362 {dimension_numbers = #tpu.dot_dimension_numbers<[1], [0], [0], [1], [0, 0, 1, 1], [], []>} : vector<8x64xf32>, vector<64x128xf32>, vector<8x128xf32> -> vector<8x128xf32>
    %c1_363 = arith.constant 1 : index
    %c0_364 = arith.constant 0 : index
    %c0_365 = arith.constant 0 : index
    %588 = vector.load %arg31[%c1_363, %c0_364, %c0_365] : memref<2x1x128xf32, #tpu.memory_space<vmem>>, vector<1x1x128xf32>
    %589 = vector.shape_cast %588 : vector<1x1x128xf32> to vector<1x128xf32>
    %590 = vector.broadcast %589 : vector<1x128xf32> to vector<8x128xf32>
    %591 = arith.addf %587, %590 : vector<8x128xf32>
    %cst_366 = arith.constant 5.000000e-01 : f32
    %592 = vector.broadcast %cst_366 : f32 to vector<8x128xf32>
    %593 = arith.mulf %592, %591 : vector<8x128xf32>
    %cst_367 = arith.constant 0.707106769 : f32
    %594 = vector.broadcast %cst_367 : f32 to vector<8x128xf32>
    %595 = arith.mulf %591, %594 : vector<8x128xf32>
    %cst_368 = arith.constant 0.000000e+00 : f32
    %596 = vector.broadcast %cst_368 : f32 to vector<8x128xf32>
    %597 = arith.cmpf oge, %595, %596 : vector<8x128xf32>
    %cst_369 = arith.constant 1.000000e+00 : f32
    %cst_370 = arith.constant -1.000000e+00 : f32
    %598 = vector.broadcast %cst_369 : f32 to vector<8x128xf32>
    %599 = vector.broadcast %cst_370 : f32 to vector<8x128xf32>
    %600 = arith.select %597, %598, %599 : vector<8x128xi1>, vector<8x128xf32>
    %601 = math.absf %595 : vector<8x128xf32>
    %cst_371 = arith.constant 0.327591091 : f32
    %602 = vector.broadcast %cst_371 : f32 to vector<8x128xf32>
    %603 = arith.mulf %602, %601 : vector<8x128xf32>
    %cst_372 = arith.constant 1.000000e+00 : f32
    %604 = vector.broadcast %cst_372 : f32 to vector<8x128xf32>
    %605 = arith.addf %604, %603 : vector<8x128xf32>
    %cst_373 = arith.constant 1.000000e+00 : f32
    %606 = vector.broadcast %cst_373 : f32 to vector<8x128xf32>
    %607 = arith.divf %606, %605 : vector<8x128xf32>
    %cst_374 = arith.constant 1.06140542 : f32
    %608 = vector.broadcast %cst_374 : f32 to vector<8x128xf32>
    %609 = arith.mulf %608, %607 : vector<8x128xf32>
    %cst_375 = arith.constant -1.45315206 : f32
    %610 = vector.broadcast %cst_375 : f32 to vector<8x128xf32>
    %611 = arith.addf %609, %610 : vector<8x128xf32>
    %612 = arith.mulf %611, %607 : vector<8x128xf32>
    %cst_376 = arith.constant 1.42141378 : f32
    %613 = vector.broadcast %cst_376 : f32 to vector<8x128xf32>
    %614 = arith.addf %612, %613 : vector<8x128xf32>
    %615 = arith.mulf %614, %607 : vector<8x128xf32>
    %cst_377 = arith.constant -0.284496725 : f32
    %616 = vector.broadcast %cst_377 : f32 to vector<8x128xf32>
    %617 = arith.addf %615, %616 : vector<8x128xf32>
    %618 = arith.mulf %617, %607 : vector<8x128xf32>
    %cst_378 = arith.constant 0.254829586 : f32
    %619 = vector.broadcast %cst_378 : f32 to vector<8x128xf32>
    %620 = arith.addf %618, %619 : vector<8x128xf32>
    %621 = arith.mulf %620, %607 : vector<8x128xf32>
    %cst_379 = arith.constant 0.000000e+00 : f32
    %622 = vector.broadcast %cst_379 : f32 to vector<8x128xf32>
    %623 = arith.subf %622, %601 : vector<8x128xf32>
    %624 = arith.mulf %623, %601 : vector<8x128xf32>
    %625 = math.exp %624 : vector<8x128xf32>
    %626 = arith.mulf %621, %625 : vector<8x128xf32>
    %cst_380 = arith.constant 1.000000e+00 : f32
    %627 = vector.broadcast %cst_380 : f32 to vector<8x128xf32>
    %628 = arith.subf %627, %626 : vector<8x128xf32>
    %629 = arith.mulf %600, %628 : vector<8x128xf32>
    %cst_381 = arith.constant 1.000000e+00 : f32
    %630 = vector.broadcast %cst_381 : f32 to vector<8x128xf32>
    %631 = arith.addf %630, %629 : vector<8x128xf32>
    %632 = arith.mulf %593, %631 : vector<8x128xf32>
    %c1_382 = arith.constant 1 : index
    %c0_383 = arith.constant 0 : index
    %c0_384 = arith.constant 0 : index
    %633 = vector.load %arg34[%c1_382, %c0_383, %c0_384] : memref<2x128x64xf32, #tpu.memory_space<vmem>>, vector<1x128x64xf32>
    %634 = vector.shape_cast %633 : vector<1x128x64xf32> to vector<128x64xf32>
    %cst_385 = arith.constant dense<0.000000e+00> : vector<8x64xf32>
    %635 = tpu.matmul %632, %634, %cst_385 {dimension_numbers = #tpu.dot_dimension_numbers<[1], [0], [0], [1], [0, 0, 1, 1], [], []>} : vector<8x128xf32>, vector<128x64xf32>, vector<8x64xf32> -> vector<8x64xf32>
    %c1_386 = arith.constant 1 : index
    %c0_387 = arith.constant 0 : index
    %c0_388 = arith.constant 0 : index
    %636 = vector.load %arg33[%c1_386, %c0_387, %c0_388] : memref<2x1x64xf32, #tpu.memory_space<vmem>>, vector<1x1x64xf32>
    %637 = vector.shape_cast %636 : vector<1x1x64xf32> to vector<1x64xf32>
    %638 = vector.broadcast %637 : vector<1x64xf32> to vector<8x64xf32>
    %639 = arith.addf %635, %638 : vector<8x64xf32>
    %640 = arith.addf %560, %639 : vector<8x64xf32>
    %c0_389 = arith.constant 0 : index
    %c0_390 = arith.constant 0 : index
    %641 = vector.load %arg38[%c0_389, %c0_390] : memref<1x64xf32, #tpu.memory_space<vmem>>, vector<1x64xf32>
    %c0_391 = arith.constant 0 : index
    %c0_392 = arith.constant 0 : index
    %642 = vector.load %arg37[%c0_391, %c0_392] : memref<1x64xf32, #tpu.memory_space<vmem>>, vector<1x64xf32>
    %cst_393 = arith.constant dense<0.000000e+00> : vector<8xf32>
    %643 = vector.multi_reduction <add>, %640, %cst_393 [1] : vector<8x64xf32> to vector<8xf32>
    %644 = vector.shape_cast %643 : vector<8xf32> to vector<8x1xf32>
    %cst_394 = arith.constant 6.400000e+01 : f32
    %645 = vector.broadcast %cst_394 : f32 to vector<8x1xf32>
    %646 = arith.divf %644, %645 : vector<8x1xf32>
    %647 = vector.broadcast %646 : vector<8x1xf32> to vector<8x64xf32>
    %648 = arith.subf %640, %647 : vector<8x64xf32>
    %649 = arith.mulf %648, %648 : vector<8x64xf32>
    %cst_395 = arith.constant dense<0.000000e+00> : vector<8xf32>
    %650 = vector.multi_reduction <add>, %649, %cst_395 [1] : vector<8x64xf32> to vector<8xf32>
    %651 = vector.shape_cast %650 : vector<8xf32> to vector<8x1xf32>
    %cst_396 = arith.constant 6.400000e+01 : f32
    %652 = vector.broadcast %cst_396 : f32 to vector<8x1xf32>
    %653 = arith.divf %651, %652 : vector<8x1xf32>
    %cst_397 = arith.constant 9.99999974E-6 : f32
    %654 = vector.broadcast %cst_397 : f32 to vector<8x1xf32>
    %655 = arith.addf %653, %654 : vector<8x1xf32>
    %656 = math.rsqrt %655 : vector<8x1xf32>
    %657 = vector.broadcast %656 : vector<8x1xf32> to vector<8x64xf32>
    %658 = arith.mulf %648, %657 : vector<8x64xf32>
    %659 = vector.broadcast %641 : vector<1x64xf32> to vector<8x64xf32>
    %660 = arith.mulf %658, %659 : vector<8x64xf32>
    %661 = vector.broadcast %642 : vector<1x64xf32> to vector<8x64xf32>
    %662 = arith.addf %660, %661 : vector<8x64xf32>
    %c0_398 = arith.constant 0 : index
    %c0_399 = arith.constant 0 : index
    %663 = vector.load %arg50[%c0_398, %c0_399] : memref<8x128xf32, #tpu.memory_space<vmem>>, vector<8x128xf32>
    %c0_400 = arith.constant 0 : index
    %c0_401 = arith.constant 0 : index
    %664 = vector.load %arg48[%c0_400, %c0_401] : memref<128x64xf32, #tpu.memory_space<vmem>>, vector<128x64xf32>
    %cst_402 = arith.constant dense<0.000000e+00> : vector<8x64xf32>
    %665 = tpu.matmul %663, %664, %cst_402 {dimension_numbers = #tpu.dot_dimension_numbers<[1], [0], [0], [1], [0, 0, 1, 1], [], []>} : vector<8x128xf32>, vector<128x64xf32>, vector<8x64xf32> -> vector<8x64xf32>
    %c0_403 = arith.constant 0 : index
    %c0_404 = arith.constant 0 : index
    %666 = vector.load %arg30[%c0_403, %c0_404] : memref<8x64xf32, #tpu.memory_space<vmem>>, vector<8x64xf32>
    %667 = arith.addf %665, %666 : vector<8x64xf32>
    %668 = tpu.iota {dimensions = array<i32: 0>} : vector<8x8xi32>
    %669 = tpu.iota {dimensions = array<i32: 1>} : vector<8x8xi32>
    %670 = arith.cmpi sge, %668, %669 : vector<8x8xi32>
    %cst_405 = arith.constant 0.000000e+00 : f32
    %cst_406 = arith.constant -3.40282347E+38 : f32
    %671 = vector.broadcast %cst_405 : f32 to vector<8x8xf32>
    %672 = vector.broadcast %cst_406 : f32 to vector<8x8xf32>
    %673 = arith.select %670, %671, %672 : vector<8x8xi1>, vector<8x8xf32>
    %c0_407 = arith.constant 0 : index
    %c0_408 = arith.constant 0 : index
    %c0_409 = arith.constant 0 : index
    %674 = vector.load %arg29[%c0_407, %c0_408, %c0_409] : memref<2x1x64xf32, #tpu.memory_space<vmem>>, vector<1x1x64xf32>
    %675 = vector.shape_cast %674 : vector<1x1x64xf32> to vector<1x64xf32>
    %c0_410 = arith.constant 0 : index
    %c0_411 = arith.constant 0 : index
    %c0_412 = arith.constant 0 : index
    %676 = vector.load %arg28[%c0_410, %c0_411, %c0_412] : memref<2x1x64xf32, #tpu.memory_space<vmem>>, vector<1x1x64xf32>
    %677 = vector.shape_cast %676 : vector<1x1x64xf32> to vector<1x64xf32>
    %cst_413 = arith.constant dense<0.000000e+00> : vector<8xf32>
    %678 = vector.multi_reduction <add>, %667, %cst_413 [1] : vector<8x64xf32> to vector<8xf32>
    %679 = vector.shape_cast %678 : vector<8xf32> to vector<8x1xf32>
    %cst_414 = arith.constant 6.400000e+01 : f32
    %680 = vector.broadcast %cst_414 : f32 to vector<8x1xf32>
    %681 = arith.divf %679, %680 : vector<8x1xf32>
    %682 = vector.broadcast %681 : vector<8x1xf32> to vector<8x64xf32>
    %683 = arith.subf %667, %682 : vector<8x64xf32>
    %684 = arith.mulf %683, %683 : vector<8x64xf32>
    %cst_415 = arith.constant dense<0.000000e+00> : vector<8xf32>
    %685 = vector.multi_reduction <add>, %684, %cst_415 [1] : vector<8x64xf32> to vector<8xf32>
    %686 = vector.shape_cast %685 : vector<8xf32> to vector<8x1xf32>
    %cst_416 = arith.constant 6.400000e+01 : f32
    %687 = vector.broadcast %cst_416 : f32 to vector<8x1xf32>
    %688 = arith.divf %686, %687 : vector<8x1xf32>
    %cst_417 = arith.constant 9.99999974E-6 : f32
    %689 = vector.broadcast %cst_417 : f32 to vector<8x1xf32>
    %690 = arith.addf %688, %689 : vector<8x1xf32>
    %691 = math.rsqrt %690 : vector<8x1xf32>
    %692 = vector.broadcast %691 : vector<8x1xf32> to vector<8x64xf32>
    %693 = arith.mulf %683, %692 : vector<8x64xf32>
    %694 = vector.broadcast %675 : vector<1x64xf32> to vector<8x64xf32>
    %695 = arith.mulf %693, %694 : vector<8x64xf32>
    %696 = vector.broadcast %677 : vector<1x64xf32> to vector<8x64xf32>
    %697 = arith.addf %695, %696 : vector<8x64xf32>
    %c0_418 = arith.constant 0 : index
    %c0_419 = arith.constant 0 : index
    %c0_420 = arith.constant 0 : index
    %698 = vector.load %arg26[%c0_418, %c0_419, %c0_420] : memref<8x64x16xf32, #tpu.memory_space<vmem>>, vector<1x64x16xf32>
    %699 = vector.shape_cast %698 : vector<1x64x16xf32> to vector<64x16xf32>
    %cst_421 = arith.constant dense<0.000000e+00> : vector<8x16xf32>
    %700 = tpu.matmul %697, %699, %cst_421 {dimension_numbers = #tpu.dot_dimension_numbers<[1], [0], [0], [1], [0, 0, 1, 1], [], []>} : vector<8x64xf32>, vector<64x16xf32>, vector<8x16xf32> -> vector<8x16xf32>
    %c0_422 = arith.constant 0 : index
    %c0_423 = arith.constant 0 : index
    %c0_424 = arith.constant 0 : index
    %701 = vector.load %arg22[%c0_422, %c0_423, %c0_424] : memref<8x1x16xf32, #tpu.memory_space<vmem>>, vector<1x1x16xf32>
    %702 = vector.shape_cast %701 : vector<1x1x16xf32> to vector<1x16xf32>
    %703 = vector.broadcast %702 : vector<1x16xf32> to vector<8x16xf32>
    %704 = arith.addf %700, %703 : vector<8x16xf32>
    %c0_425 = arith.constant 0 : index
    %c0_426 = arith.constant 0 : index
    %c0_427 = arith.constant 0 : index
    %705 = vector.load %arg24[%c0_425, %c0_426, %c0_427] : memref<8x64x16xf32, #tpu.memory_space<vmem>>, vector<1x64x16xf32>
    %706 = vector.shape_cast %705 : vector<1x64x16xf32> to vector<64x16xf32>
    %cst_428 = arith.constant dense<0.000000e+00> : vector<8x16xf32>
    %707 = tpu.matmul %697, %706, %cst_428 {dimension_numbers = #tpu.dot_dimension_numbers<[1], [0], [0], [1], [0, 0, 1, 1], [], []>} : vector<8x64xf32>, vector<64x16xf32>, vector<8x16xf32> -> vector<8x16xf32>
    %c0_429 = arith.constant 0 : index
    %c0_430 = arith.constant 0 : index
    %c0_431 = arith.constant 0 : index
    %708 = vector.load %arg27[%c0_429, %c0_430, %c0_431] : memref<8x64x16xf32, #tpu.memory_space<vmem>>, vector<1x64x16xf32>
    %709 = vector.shape_cast %708 : vector<1x64x16xf32> to vector<64x16xf32>
    %cst_432 = arith.constant dense<0.000000e+00> : vector<8x16xf32>
    %710 = tpu.matmul %697, %709, %cst_432 {dimension_numbers = #tpu.dot_dimension_numbers<[1], [0], [0], [1], [0, 0, 1, 1], [], []>} : vector<8x64xf32>, vector<64x16xf32>, vector<8x16xf32> -> vector<8x16xf32>
    %c0_433 = arith.constant 0 : index
    %c0_434 = arith.constant 0 : index
    %c0_435 = arith.constant 0 : index
    %711 = vector.load %arg23[%c0_433, %c0_434, %c0_435] : memref<8x1x16xf32, #tpu.memory_space<vmem>>, vector<1x1x16xf32>
    %712 = vector.shape_cast %711 : vector<1x1x16xf32> to vector<1x16xf32>
    %713 = vector.broadcast %712 : vector<1x16xf32> to vector<8x16xf32>
    %714 = arith.addf %710, %713 : vector<8x16xf32>
    %cst_436 = arith.constant dense<0.000000e+00> : vector<8x8xf32>
    %715 = tpu.matmul %704, %707, %cst_436 {dimension_numbers = #tpu.dot_dimension_numbers<[1], [1], [0], [0], [0, 0, 1, 0], [], []>} : vector<8x16xf32>, vector<8x16xf32>, vector<8x8xf32> -> vector<8x8xf32>
    %716 = arith.addf %715, %673 : vector<8x8xf32>
    %cst_437 = arith.constant dense<0xFF800000> : vector<8xf32>
    %717 = vector.multi_reduction <maximumf>, %716, %cst_437 [1] : vector<8x8xf32> to vector<8xf32>
    %718 = vector.shape_cast %717 : vector<8xf32> to vector<8x1xf32>
    %719 = vector.broadcast %718 : vector<8x1xf32> to vector<8x8xf32>
    %720 = arith.subf %716, %719 : vector<8x8xf32>
    %721 = math.exp %720 : vector<8x8xf32>
    %cst_438 = arith.constant dense<0.000000e+00> : vector<8xf32>
    %722 = vector.multi_reduction <add>, %721, %cst_438 [1] : vector<8x8xf32> to vector<8xf32>
    %723 = vector.shape_cast %722 : vector<8xf32> to vector<8x1xf32>
    %724 = vector.broadcast %723 : vector<8x1xf32> to vector<8x8xf32>
    %725 = arith.divf %721, %724 : vector<8x8xf32>
    %cst_439 = arith.constant dense<0.000000e+00> : vector<8x16xf32>
    %726 = tpu.matmul %725, %714, %cst_439 {dimension_numbers = #tpu.dot_dimension_numbers<[1], [0], [0], [1], [0, 0, 1, 1], [], []>} : vector<8x8xf32>, vector<8x16xf32>, vector<8x16xf32> -> vector<8x16xf32>
    %c0_440 = arith.constant 0 : index
    %c0_441 = arith.constant 0 : index
    %c0_442 = arith.constant 0 : index
    %727 = vector.load %arg25[%c0_440, %c0_441, %c0_442] : memref<8x16x64xf32, #tpu.memory_space<vmem>>, vector<1x16x64xf32>
    %728 = vector.shape_cast %727 : vector<1x16x64xf32> to vector<16x64xf32>
    %cst_443 = arith.constant dense<0.000000e+00> : vector<8x64xf32>
    %729 = tpu.matmul %726, %728, %cst_443 {dimension_numbers = #tpu.dot_dimension_numbers<[1], [0], [0], [1], [0, 0, 1, 1], [], []>} : vector<8x16xf32>, vector<16x64xf32>, vector<8x64xf32> -> vector<8x64xf32>
    %c1_444 = arith.constant 1 : index
    %c0_445 = arith.constant 0 : index
    %c0_446 = arith.constant 0 : index
    %730 = vector.load %arg26[%c1_444, %c0_445, %c0_446] : memref<8x64x16xf32, #tpu.memory_space<vmem>>, vector<1x64x16xf32>
    %731 = vector.shape_cast %730 : vector<1x64x16xf32> to vector<64x16xf32>
    %cst_447 = arith.constant dense<0.000000e+00> : vector<8x16xf32>
    %732 = tpu.matmul %697, %731, %cst_447 {dimension_numbers = #tpu.dot_dimension_numbers<[1], [0], [0], [1], [0, 0, 1, 1], [], []>} : vector<8x64xf32>, vector<64x16xf32>, vector<8x16xf32> -> vector<8x16xf32>
    %c1_448 = arith.constant 1 : index
    %c0_449 = arith.constant 0 : index
    %c0_450 = arith.constant 0 : index
    %733 = vector.load %arg22[%c1_448, %c0_449, %c0_450] : memref<8x1x16xf32, #tpu.memory_space<vmem>>, vector<1x1x16xf32>
    %734 = vector.shape_cast %733 : vector<1x1x16xf32> to vector<1x16xf32>
    %735 = vector.broadcast %734 : vector<1x16xf32> to vector<8x16xf32>
    %736 = arith.addf %732, %735 : vector<8x16xf32>
    %c1_451 = arith.constant 1 : index
    %c0_452 = arith.constant 0 : index
    %c0_453 = arith.constant 0 : index
    %737 = vector.load %arg24[%c1_451, %c0_452, %c0_453] : memref<8x64x16xf32, #tpu.memory_space<vmem>>, vector<1x64x16xf32>
    %738 = vector.shape_cast %737 : vector<1x64x16xf32> to vector<64x16xf32>
    %cst_454 = arith.constant dense<0.000000e+00> : vector<8x16xf32>
    %739 = tpu.matmul %697, %738, %cst_454 {dimension_numbers = #tpu.dot_dimension_numbers<[1], [0], [0], [1], [0, 0, 1, 1], [], []>} : vector<8x64xf32>, vector<64x16xf32>, vector<8x16xf32> -> vector<8x16xf32>
    %c1_455 = arith.constant 1 : index
    %c0_456 = arith.constant 0 : index
    %c0_457 = arith.constant 0 : index
    %740 = vector.load %arg27[%c1_455, %c0_456, %c0_457] : memref<8x64x16xf32, #tpu.memory_space<vmem>>, vector<1x64x16xf32>
    %741 = vector.shape_cast %740 : vector<1x64x16xf32> to vector<64x16xf32>
    %cst_458 = arith.constant dense<0.000000e+00> : vector<8x16xf32>
    %742 = tpu.matmul %697, %741, %cst_458 {dimension_numbers = #tpu.dot_dimension_numbers<[1], [0], [0], [1], [0, 0, 1, 1], [], []>} : vector<8x64xf32>, vector<64x16xf32>, vector<8x16xf32> -> vector<8x16xf32>
    %c1_459 = arith.constant 1 : index
    %c0_460 = arith.constant 0 : index
    %c0_461 = arith.constant 0 : index
    %743 = vector.load %arg23[%c1_459, %c0_460, %c0_461] : memref<8x1x16xf32, #tpu.memory_space<vmem>>, vector<1x1x16xf32>
    %744 = vector.shape_cast %743 : vector<1x1x16xf32> to vector<1x16xf32>
    %745 = vector.broadcast %744 : vector<1x16xf32> to vector<8x16xf32>
    %746 = arith.addf %742, %745 : vector<8x16xf32>
    %cst_462 = arith.constant dense<0.000000e+00> : vector<8x8xf32>
    %747 = tpu.matmul %736, %739, %cst_462 {dimension_numbers = #tpu.dot_dimension_numbers<[1], [1], [0], [0], [0, 0, 1, 0], [], []>} : vector<8x16xf32>, vector<8x16xf32>, vector<8x8xf32> -> vector<8x8xf32>
    %748 = arith.addf %747, %673 : vector<8x8xf32>
    %cst_463 = arith.constant dense<0xFF800000> : vector<8xf32>
    %749 = vector.multi_reduction <maximumf>, %748, %cst_463 [1] : vector<8x8xf32> to vector<8xf32>
    %750 = vector.shape_cast %749 : vector<8xf32> to vector<8x1xf32>
    %751 = vector.broadcast %750 : vector<8x1xf32> to vector<8x8xf32>
    %752 = arith.subf %748, %751 : vector<8x8xf32>
    %753 = math.exp %752 : vector<8x8xf32>
    %cst_464 = arith.constant dense<0.000000e+00> : vector<8xf32>
    %754 = vector.multi_reduction <add>, %753, %cst_464 [1] : vector<8x8xf32> to vector<8xf32>
    %755 = vector.shape_cast %754 : vector<8xf32> to vector<8x1xf32>
    %756 = vector.broadcast %755 : vector<8x1xf32> to vector<8x8xf32>
    %757 = arith.divf %753, %756 : vector<8x8xf32>
    %cst_465 = arith.constant dense<0.000000e+00> : vector<8x16xf32>
    %758 = tpu.matmul %757, %746, %cst_465 {dimension_numbers = #tpu.dot_dimension_numbers<[1], [0], [0], [1], [0, 0, 1, 1], [], []>} : vector<8x8xf32>, vector<8x16xf32>, vector<8x16xf32> -> vector<8x16xf32>
    %c1_466 = arith.constant 1 : index
    %c0_467 = arith.constant 0 : index
    %c0_468 = arith.constant 0 : index
    %759 = vector.load %arg25[%c1_466, %c0_467, %c0_468] : memref<8x16x64xf32, #tpu.memory_space<vmem>>, vector<1x16x64xf32>
    %760 = vector.shape_cast %759 : vector<1x16x64xf32> to vector<16x64xf32>
    %cst_469 = arith.constant dense<0.000000e+00> : vector<8x64xf32>
    %761 = tpu.matmul %758, %760, %cst_469 {dimension_numbers = #tpu.dot_dimension_numbers<[1], [0], [0], [1], [0, 0, 1, 1], [], []>} : vector<8x16xf32>, vector<16x64xf32>, vector<8x64xf32> -> vector<8x64xf32>
    %762 = arith.addf %729, %761 : vector<8x64xf32>
    %c2_470 = arith.constant 2 : index
    %c0_471 = arith.constant 0 : index
    %c0_472 = arith.constant 0 : index
    %763 = vector.load %arg26[%c2_470, %c0_471, %c0_472] : memref<8x64x16xf32, #tpu.memory_space<vmem>>, vector<1x64x16xf32>
    %764 = vector.shape_cast %763 : vector<1x64x16xf32> to vector<64x16xf32>
    %cst_473 = arith.constant dense<0.000000e+00> : vector<8x16xf32>
    %765 = tpu.matmul %697, %764, %cst_473 {dimension_numbers = #tpu.dot_dimension_numbers<[1], [0], [0], [1], [0, 0, 1, 1], [], []>} : vector<8x64xf32>, vector<64x16xf32>, vector<8x16xf32> -> vector<8x16xf32>
    %c2_474 = arith.constant 2 : index
    %c0_475 = arith.constant 0 : index
    %c0_476 = arith.constant 0 : index
    %766 = vector.load %arg22[%c2_474, %c0_475, %c0_476] : memref<8x1x16xf32, #tpu.memory_space<vmem>>, vector<1x1x16xf32>
    %767 = vector.shape_cast %766 : vector<1x1x16xf32> to vector<1x16xf32>
    %768 = vector.broadcast %767 : vector<1x16xf32> to vector<8x16xf32>
    %769 = arith.addf %765, %768 : vector<8x16xf32>
    %c2_477 = arith.constant 2 : index
    %c0_478 = arith.constant 0 : index
    %c0_479 = arith.constant 0 : index
    %770 = vector.load %arg24[%c2_477, %c0_478, %c0_479] : memref<8x64x16xf32, #tpu.memory_space<vmem>>, vector<1x64x16xf32>
    %771 = vector.shape_cast %770 : vector<1x64x16xf32> to vector<64x16xf32>
    %cst_480 = arith.constant dense<0.000000e+00> : vector<8x16xf32>
    %772 = tpu.matmul %697, %771, %cst_480 {dimension_numbers = #tpu.dot_dimension_numbers<[1], [0], [0], [1], [0, 0, 1, 1], [], []>} : vector<8x64xf32>, vector<64x16xf32>, vector<8x16xf32> -> vector<8x16xf32>
    %c2_481 = arith.constant 2 : index
    %c0_482 = arith.constant 0 : index
    %c0_483 = arith.constant 0 : index
    %773 = vector.load %arg27[%c2_481, %c0_482, %c0_483] : memref<8x64x16xf32, #tpu.memory_space<vmem>>, vector<1x64x16xf32>
    %774 = vector.shape_cast %773 : vector<1x64x16xf32> to vector<64x16xf32>
    %cst_484 = arith.constant dense<0.000000e+00> : vector<8x16xf32>
    %775 = tpu.matmul %697, %774, %cst_484 {dimension_numbers = #tpu.dot_dimension_numbers<[1], [0], [0], [1], [0, 0, 1, 1], [], []>} : vector<8x64xf32>, vector<64x16xf32>, vector<8x16xf32> -> vector<8x16xf32>
    %c2_485 = arith.constant 2 : index
    %c0_486 = arith.constant 0 : index
    %c0_487 = arith.constant 0 : index
    %776 = vector.load %arg23[%c2_485, %c0_486, %c0_487] : memref<8x1x16xf32, #tpu.memory_space<vmem>>, vector<1x1x16xf32>
    %777 = vector.shape_cast %776 : vector<1x1x16xf32> to vector<1x16xf32>
    %778 = vector.broadcast %777 : vector<1x16xf32> to vector<8x16xf32>
    %779 = arith.addf %775, %778 : vector<8x16xf32>
    %cst_488 = arith.constant dense<0.000000e+00> : vector<8x8xf32>
    %780 = tpu.matmul %769, %772, %cst_488 {dimension_numbers = #tpu.dot_dimension_numbers<[1], [1], [0], [0], [0, 0, 1, 0], [], []>} : vector<8x16xf32>, vector<8x16xf32>, vector<8x8xf32> -> vector<8x8xf32>
    %781 = arith.addf %780, %673 : vector<8x8xf32>
    %cst_489 = arith.constant dense<0xFF800000> : vector<8xf32>
    %782 = vector.multi_reduction <maximumf>, %781, %cst_489 [1] : vector<8x8xf32> to vector<8xf32>
    %783 = vector.shape_cast %782 : vector<8xf32> to vector<8x1xf32>
    %784 = vector.broadcast %783 : vector<8x1xf32> to vector<8x8xf32>
    %785 = arith.subf %781, %784 : vector<8x8xf32>
    %786 = math.exp %785 : vector<8x8xf32>
    %cst_490 = arith.constant dense<0.000000e+00> : vector<8xf32>
    %787 = vector.multi_reduction <add>, %786, %cst_490 [1] : vector<8x8xf32> to vector<8xf32>
    %788 = vector.shape_cast %787 : vector<8xf32> to vector<8x1xf32>
    %789 = vector.broadcast %788 : vector<8x1xf32> to vector<8x8xf32>
    %790 = arith.divf %786, %789 : vector<8x8xf32>
    %cst_491 = arith.constant dense<0.000000e+00> : vector<8x16xf32>
    %791 = tpu.matmul %790, %779, %cst_491 {dimension_numbers = #tpu.dot_dimension_numbers<[1], [0], [0], [1], [0, 0, 1, 1], [], []>} : vector<8x8xf32>, vector<8x16xf32>, vector<8x16xf32> -> vector<8x16xf32>
    %c2_492 = arith.constant 2 : index
    %c0_493 = arith.constant 0 : index
    %c0_494 = arith.constant 0 : index
    %792 = vector.load %arg25[%c2_492, %c0_493, %c0_494] : memref<8x16x64xf32, #tpu.memory_space<vmem>>, vector<1x16x64xf32>
    %793 = vector.shape_cast %792 : vector<1x16x64xf32> to vector<16x64xf32>
    %cst_495 = arith.constant dense<0.000000e+00> : vector<8x64xf32>
    %794 = tpu.matmul %791, %793, %cst_495 {dimension_numbers = #tpu.dot_dimension_numbers<[1], [0], [0], [1], [0, 0, 1, 1], [], []>} : vector<8x16xf32>, vector<16x64xf32>, vector<8x64xf32> -> vector<8x64xf32>
    %795 = arith.addf %762, %794 : vector<8x64xf32>
    %c3_496 = arith.constant 3 : index
    %c0_497 = arith.constant 0 : index
    %c0_498 = arith.constant 0 : index
    %796 = vector.load %arg26[%c3_496, %c0_497, %c0_498] : memref<8x64x16xf32, #tpu.memory_space<vmem>>, vector<1x64x16xf32>
    %797 = vector.shape_cast %796 : vector<1x64x16xf32> to vector<64x16xf32>
    %cst_499 = arith.constant dense<0.000000e+00> : vector<8x16xf32>
    %798 = tpu.matmul %697, %797, %cst_499 {dimension_numbers = #tpu.dot_dimension_numbers<[1], [0], [0], [1], [0, 0, 1, 1], [], []>} : vector<8x64xf32>, vector<64x16xf32>, vector<8x16xf32> -> vector<8x16xf32>
    %c3_500 = arith.constant 3 : index
    %c0_501 = arith.constant 0 : index
    %c0_502 = arith.constant 0 : index
    %799 = vector.load %arg22[%c3_500, %c0_501, %c0_502] : memref<8x1x16xf32, #tpu.memory_space<vmem>>, vector<1x1x16xf32>
    %800 = vector.shape_cast %799 : vector<1x1x16xf32> to vector<1x16xf32>
    %801 = vector.broadcast %800 : vector<1x16xf32> to vector<8x16xf32>
    %802 = arith.addf %798, %801 : vector<8x16xf32>
    %c3_503 = arith.constant 3 : index
    %c0_504 = arith.constant 0 : index
    %c0_505 = arith.constant 0 : index
    %803 = vector.load %arg24[%c3_503, %c0_504, %c0_505] : memref<8x64x16xf32, #tpu.memory_space<vmem>>, vector<1x64x16xf32>
    %804 = vector.shape_cast %803 : vector<1x64x16xf32> to vector<64x16xf32>
    %cst_506 = arith.constant dense<0.000000e+00> : vector<8x16xf32>
    %805 = tpu.matmul %697, %804, %cst_506 {dimension_numbers = #tpu.dot_dimension_numbers<[1], [0], [0], [1], [0, 0, 1, 1], [], []>} : vector<8x64xf32>, vector<64x16xf32>, vector<8x16xf32> -> vector<8x16xf32>
    %c3_507 = arith.constant 3 : index
    %c0_508 = arith.constant 0 : index
    %c0_509 = arith.constant 0 : index
    %806 = vector.load %arg27[%c3_507, %c0_508, %c0_509] : memref<8x64x16xf32, #tpu.memory_space<vmem>>, vector<1x64x16xf32>
    %807 = vector.shape_cast %806 : vector<1x64x16xf32> to vector<64x16xf32>
    %cst_510 = arith.constant dense<0.000000e+00> : vector<8x16xf32>
    %808 = tpu.matmul %697, %807, %cst_510 {dimension_numbers = #tpu.dot_dimension_numbers<[1], [0], [0], [1], [0, 0, 1, 1], [], []>} : vector<8x64xf32>, vector<64x16xf32>, vector<8x16xf32> -> vector<8x16xf32>
    %c3_511 = arith.constant 3 : index
    %c0_512 = arith.constant 0 : index
    %c0_513 = arith.constant 0 : index
    %809 = vector.load %arg23[%c3_511, %c0_512, %c0_513] : memref<8x1x16xf32, #tpu.memory_space<vmem>>, vector<1x1x16xf32>
    %810 = vector.shape_cast %809 : vector<1x1x16xf32> to vector<1x16xf32>
    %811 = vector.broadcast %810 : vector<1x16xf32> to vector<8x16xf32>
    %812 = arith.addf %808, %811 : vector<8x16xf32>
    %cst_514 = arith.constant dense<0.000000e+00> : vector<8x8xf32>
    %813 = tpu.matmul %802, %805, %cst_514 {dimension_numbers = #tpu.dot_dimension_numbers<[1], [1], [0], [0], [0, 0, 1, 0], [], []>} : vector<8x16xf32>, vector<8x16xf32>, vector<8x8xf32> -> vector<8x8xf32>
    %814 = arith.addf %813, %673 : vector<8x8xf32>
    %cst_515 = arith.constant dense<0xFF800000> : vector<8xf32>
    %815 = vector.multi_reduction <maximumf>, %814, %cst_515 [1] : vector<8x8xf32> to vector<8xf32>
    %816 = vector.shape_cast %815 : vector<8xf32> to vector<8x1xf32>
    %817 = vector.broadcast %816 : vector<8x1xf32> to vector<8x8xf32>
    %818 = arith.subf %814, %817 : vector<8x8xf32>
    %819 = math.exp %818 : vector<8x8xf32>
    %cst_516 = arith.constant dense<0.000000e+00> : vector<8xf32>
    %820 = vector.multi_reduction <add>, %819, %cst_516 [1] : vector<8x8xf32> to vector<8xf32>
    %821 = vector.shape_cast %820 : vector<8xf32> to vector<8x1xf32>
    %822 = vector.broadcast %821 : vector<8x1xf32> to vector<8x8xf32>
    %823 = arith.divf %819, %822 : vector<8x8xf32>
    %cst_517 = arith.constant dense<0.000000e+00> : vector<8x16xf32>
    %824 = tpu.matmul %823, %812, %cst_517 {dimension_numbers = #tpu.dot_dimension_numbers<[1], [0], [0], [1], [0, 0, 1, 1], [], []>} : vector<8x8xf32>, vector<8x16xf32>, vector<8x16xf32> -> vector<8x16xf32>
    %c3_518 = arith.constant 3 : index
    %c0_519 = arith.constant 0 : index
    %c0_520 = arith.constant 0 : index
    %825 = vector.load %arg25[%c3_518, %c0_519, %c0_520] : memref<8x16x64xf32, #tpu.memory_space<vmem>>, vector<1x16x64xf32>
    %826 = vector.shape_cast %825 : vector<1x16x64xf32> to vector<16x64xf32>
    %cst_521 = arith.constant dense<0.000000e+00> : vector<8x64xf32>
    %827 = tpu.matmul %824, %826, %cst_521 {dimension_numbers = #tpu.dot_dimension_numbers<[1], [0], [0], [1], [0, 0, 1, 1], [], []>} : vector<8x16xf32>, vector<16x64xf32>, vector<8x64xf32> -> vector<8x64xf32>
    %828 = arith.addf %795, %827 : vector<8x64xf32>
    %c0_522 = arith.constant 0 : index
    %c0_523 = arith.constant 0 : index
    %c0_524 = arith.constant 0 : index
    %829 = vector.load %arg21[%c0_522, %c0_523, %c0_524] : memref<2x1x64xf32, #tpu.memory_space<vmem>>, vector<1x1x64xf32>
    %830 = vector.shape_cast %829 : vector<1x1x64xf32> to vector<1x64xf32>
    %831 = vector.broadcast %830 : vector<1x64xf32> to vector<8x64xf32>
    %832 = arith.addf %828, %831 : vector<8x64xf32>
    %833 = arith.addf %667, %832 : vector<8x64xf32>
    %c0_525 = arith.constant 0 : index
    %c0_526 = arith.constant 0 : index
    %c0_527 = arith.constant 0 : index
    %834 = vector.load %arg12[%c0_525, %c0_526, %c0_527] : memref<2x1x64xf32, #tpu.memory_space<vmem>>, vector<1x1x64xf32>
    %835 = vector.shape_cast %834 : vector<1x1x64xf32> to vector<1x64xf32>
    %c0_528 = arith.constant 0 : index
    %c0_529 = arith.constant 0 : index
    %c0_530 = arith.constant 0 : index
    %836 = vector.load %arg11[%c0_528, %c0_529, %c0_530] : memref<2x1x64xf32, #tpu.memory_space<vmem>>, vector<1x1x64xf32>
    %837 = vector.shape_cast %836 : vector<1x1x64xf32> to vector<1x64xf32>
    %cst_531 = arith.constant dense<0.000000e+00> : vector<8xf32>
    %838 = vector.multi_reduction <add>, %833, %cst_531 [1] : vector<8x64xf32> to vector<8xf32>
    %839 = vector.shape_cast %838 : vector<8xf32> to vector<8x1xf32>
    %cst_532 = arith.constant 6.400000e+01 : f32
    %840 = vector.broadcast %cst_532 : f32 to vector<8x1xf32>
    %841 = arith.divf %839, %840 : vector<8x1xf32>
    %842 = vector.broadcast %841 : vector<8x1xf32> to vector<8x64xf32>
    %843 = arith.subf %833, %842 : vector<8x64xf32>
    %844 = arith.mulf %843, %843 : vector<8x64xf32>
    %cst_533 = arith.constant dense<0.000000e+00> : vector<8xf32>
    %845 = vector.multi_reduction <add>, %844, %cst_533 [1] : vector<8x64xf32> to vector<8xf32>
    %846 = vector.shape_cast %845 : vector<8xf32> to vector<8x1xf32>
    %cst_534 = arith.constant 6.400000e+01 : f32
    %847 = vector.broadcast %cst_534 : f32 to vector<8x1xf32>
    %848 = arith.divf %846, %847 : vector<8x1xf32>
    %cst_535 = arith.constant 9.99999974E-6 : f32
    %849 = vector.broadcast %cst_535 : f32 to vector<8x1xf32>
    %850 = arith.addf %848, %849 : vector<8x1xf32>
    %851 = math.rsqrt %850 : vector<8x1xf32>
    %852 = vector.broadcast %851 : vector<8x1xf32> to vector<8x64xf32>
    %853 = arith.mulf %843, %852 : vector<8x64xf32>
    %854 = vector.broadcast %835 : vector<1x64xf32> to vector<8x64xf32>
    %855 = arith.mulf %853, %854 : vector<8x64xf32>
    %856 = vector.broadcast %837 : vector<1x64xf32> to vector<8x64xf32>
    %857 = arith.addf %855, %856 : vector<8x64xf32>
    %c0_536 = arith.constant 0 : index
    %c0_537 = arith.constant 0 : index
    %c0_538 = arith.constant 0 : index
    %858 = vector.load %arg9[%c0_536, %c0_537, %c0_538] : memref<8x64x16xf32, #tpu.memory_space<vmem>>, vector<1x64x16xf32>
    %859 = vector.shape_cast %858 : vector<1x64x16xf32> to vector<64x16xf32>
    %cst_539 = arith.constant dense<0.000000e+00> : vector<8x16xf32>
    %860 = tpu.matmul %857, %859, %cst_539 {dimension_numbers = #tpu.dot_dimension_numbers<[1], [0], [0], [1], [0, 0, 1, 1], [], []>} : vector<8x64xf32>, vector<64x16xf32>, vector<8x16xf32> -> vector<8x16xf32>
    %c0_540 = arith.constant 0 : index
    %c0_541 = arith.constant 0 : index
    %c0_542 = arith.constant 0 : index
    %861 = vector.load %arg5[%c0_540, %c0_541, %c0_542] : memref<8x1x16xf32, #tpu.memory_space<vmem>>, vector<1x1x16xf32>
    %862 = vector.shape_cast %861 : vector<1x1x16xf32> to vector<1x16xf32>
    %863 = vector.broadcast %862 : vector<1x16xf32> to vector<8x16xf32>
    %864 = arith.addf %860, %863 : vector<8x16xf32>
    %c0_543 = arith.constant 0 : index
    %c0_544 = arith.constant 0 : index
    %c0_545 = arith.constant 0 : index
    %865 = vector.load %arg7[%c0_543, %c0_544, %c0_545] : memref<8x64x16xf32, #tpu.memory_space<vmem>>, vector<1x64x16xf32>
    %866 = vector.shape_cast %865 : vector<1x64x16xf32> to vector<64x16xf32>
    %cst_546 = arith.constant dense<0.000000e+00> : vector<8x16xf32>
    %867 = tpu.matmul %662, %866, %cst_546 {dimension_numbers = #tpu.dot_dimension_numbers<[1], [0], [0], [1], [0, 0, 1, 1], [], []>} : vector<8x64xf32>, vector<64x16xf32>, vector<8x16xf32> -> vector<8x16xf32>
    %c0_547 = arith.constant 0 : index
    %c0_548 = arith.constant 0 : index
    %c0_549 = arith.constant 0 : index
    %868 = vector.load %arg10[%c0_547, %c0_548, %c0_549] : memref<8x64x16xf32, #tpu.memory_space<vmem>>, vector<1x64x16xf32>
    %869 = vector.shape_cast %868 : vector<1x64x16xf32> to vector<64x16xf32>
    %cst_550 = arith.constant dense<0.000000e+00> : vector<8x16xf32>
    %870 = tpu.matmul %662, %869, %cst_550 {dimension_numbers = #tpu.dot_dimension_numbers<[1], [0], [0], [1], [0, 0, 1, 1], [], []>} : vector<8x64xf32>, vector<64x16xf32>, vector<8x16xf32> -> vector<8x16xf32>
    %c0_551 = arith.constant 0 : index
    %c0_552 = arith.constant 0 : index
    %c0_553 = arith.constant 0 : index
    %871 = vector.load %arg6[%c0_551, %c0_552, %c0_553] : memref<8x1x16xf32, #tpu.memory_space<vmem>>, vector<1x1x16xf32>
    %872 = vector.shape_cast %871 : vector<1x1x16xf32> to vector<1x16xf32>
    %873 = vector.broadcast %872 : vector<1x16xf32> to vector<8x16xf32>
    %874 = arith.addf %870, %873 : vector<8x16xf32>
    %cst_554 = arith.constant dense<0.000000e+00> : vector<8x8xf32>
    %875 = tpu.matmul %864, %867, %cst_554 {dimension_numbers = #tpu.dot_dimension_numbers<[1], [1], [0], [0], [0, 0, 1, 0], [], []>} : vector<8x16xf32>, vector<8x16xf32>, vector<8x8xf32> -> vector<8x8xf32>
    %cst_555 = arith.constant dense<0xFF800000> : vector<8xf32>
    %876 = vector.multi_reduction <maximumf>, %875, %cst_555 [1] : vector<8x8xf32> to vector<8xf32>
    %877 = vector.shape_cast %876 : vector<8xf32> to vector<8x1xf32>
    %878 = vector.broadcast %877 : vector<8x1xf32> to vector<8x8xf32>
    %879 = arith.subf %875, %878 : vector<8x8xf32>
    %880 = math.exp %879 : vector<8x8xf32>
    %cst_556 = arith.constant dense<0.000000e+00> : vector<8xf32>
    %881 = vector.multi_reduction <add>, %880, %cst_556 [1] : vector<8x8xf32> to vector<8xf32>
    %882 = vector.shape_cast %881 : vector<8xf32> to vector<8x1xf32>
    %883 = vector.broadcast %882 : vector<8x1xf32> to vector<8x8xf32>
    %884 = arith.divf %880, %883 : vector<8x8xf32>
    %cst_557 = arith.constant dense<0.000000e+00> : vector<8x16xf32>
    %885 = tpu.matmul %884, %874, %cst_557 {dimension_numbers = #tpu.dot_dimension_numbers<[1], [0], [0], [1], [0, 0, 1, 1], [], []>} : vector<8x8xf32>, vector<8x16xf32>, vector<8x16xf32> -> vector<8x16xf32>
    %c0_558 = arith.constant 0 : index
    %c0_559 = arith.constant 0 : index
    %c0_560 = arith.constant 0 : index
    %886 = vector.load %arg8[%c0_558, %c0_559, %c0_560] : memref<8x16x64xf32, #tpu.memory_space<vmem>>, vector<1x16x64xf32>
    %887 = vector.shape_cast %886 : vector<1x16x64xf32> to vector<16x64xf32>
    %cst_561 = arith.constant dense<0.000000e+00> : vector<8x64xf32>
    %888 = tpu.matmul %885, %887, %cst_561 {dimension_numbers = #tpu.dot_dimension_numbers<[1], [0], [0], [1], [0, 0, 1, 1], [], []>} : vector<8x16xf32>, vector<16x64xf32>, vector<8x64xf32> -> vector<8x64xf32>
    %c1_562 = arith.constant 1 : index
    %c0_563 = arith.constant 0 : index
    %c0_564 = arith.constant 0 : index
    %889 = vector.load %arg9[%c1_562, %c0_563, %c0_564] : memref<8x64x16xf32, #tpu.memory_space<vmem>>, vector<1x64x16xf32>
    %890 = vector.shape_cast %889 : vector<1x64x16xf32> to vector<64x16xf32>
    %cst_565 = arith.constant dense<0.000000e+00> : vector<8x16xf32>
    %891 = tpu.matmul %857, %890, %cst_565 {dimension_numbers = #tpu.dot_dimension_numbers<[1], [0], [0], [1], [0, 0, 1, 1], [], []>} : vector<8x64xf32>, vector<64x16xf32>, vector<8x16xf32> -> vector<8x16xf32>
    %c1_566 = arith.constant 1 : index
    %c0_567 = arith.constant 0 : index
    %c0_568 = arith.constant 0 : index
    %892 = vector.load %arg5[%c1_566, %c0_567, %c0_568] : memref<8x1x16xf32, #tpu.memory_space<vmem>>, vector<1x1x16xf32>
    %893 = vector.shape_cast %892 : vector<1x1x16xf32> to vector<1x16xf32>
    %894 = vector.broadcast %893 : vector<1x16xf32> to vector<8x16xf32>
    %895 = arith.addf %891, %894 : vector<8x16xf32>
    %c1_569 = arith.constant 1 : index
    %c0_570 = arith.constant 0 : index
    %c0_571 = arith.constant 0 : index
    %896 = vector.load %arg7[%c1_569, %c0_570, %c0_571] : memref<8x64x16xf32, #tpu.memory_space<vmem>>, vector<1x64x16xf32>
    %897 = vector.shape_cast %896 : vector<1x64x16xf32> to vector<64x16xf32>
    %cst_572 = arith.constant dense<0.000000e+00> : vector<8x16xf32>
    %898 = tpu.matmul %662, %897, %cst_572 {dimension_numbers = #tpu.dot_dimension_numbers<[1], [0], [0], [1], [0, 0, 1, 1], [], []>} : vector<8x64xf32>, vector<64x16xf32>, vector<8x16xf32> -> vector<8x16xf32>
    %c1_573 = arith.constant 1 : index
    %c0_574 = arith.constant 0 : index
    %c0_575 = arith.constant 0 : index
    %899 = vector.load %arg10[%c1_573, %c0_574, %c0_575] : memref<8x64x16xf32, #tpu.memory_space<vmem>>, vector<1x64x16xf32>
    %900 = vector.shape_cast %899 : vector<1x64x16xf32> to vector<64x16xf32>
    %cst_576 = arith.constant dense<0.000000e+00> : vector<8x16xf32>
    %901 = tpu.matmul %662, %900, %cst_576 {dimension_numbers = #tpu.dot_dimension_numbers<[1], [0], [0], [1], [0, 0, 1, 1], [], []>} : vector<8x64xf32>, vector<64x16xf32>, vector<8x16xf32> -> vector<8x16xf32>
    %c1_577 = arith.constant 1 : index
    %c0_578 = arith.constant 0 : index
    %c0_579 = arith.constant 0 : index
    %902 = vector.load %arg6[%c1_577, %c0_578, %c0_579] : memref<8x1x16xf32, #tpu.memory_space<vmem>>, vector<1x1x16xf32>
    %903 = vector.shape_cast %902 : vector<1x1x16xf32> to vector<1x16xf32>
    %904 = vector.broadcast %903 : vector<1x16xf32> to vector<8x16xf32>
    %905 = arith.addf %901, %904 : vector<8x16xf32>
    %cst_580 = arith.constant dense<0.000000e+00> : vector<8x8xf32>
    %906 = tpu.matmul %895, %898, %cst_580 {dimension_numbers = #tpu.dot_dimension_numbers<[1], [1], [0], [0], [0, 0, 1, 0], [], []>} : vector<8x16xf32>, vector<8x16xf32>, vector<8x8xf32> -> vector<8x8xf32>
    %cst_581 = arith.constant dense<0xFF800000> : vector<8xf32>
    %907 = vector.multi_reduction <maximumf>, %906, %cst_581 [1] : vector<8x8xf32> to vector<8xf32>
    %908 = vector.shape_cast %907 : vector<8xf32> to vector<8x1xf32>
    %909 = vector.broadcast %908 : vector<8x1xf32> to vector<8x8xf32>
    %910 = arith.subf %906, %909 : vector<8x8xf32>
    %911 = math.exp %910 : vector<8x8xf32>
    %cst_582 = arith.constant dense<0.000000e+00> : vector<8xf32>
    %912 = vector.multi_reduction <add>, %911, %cst_582 [1] : vector<8x8xf32> to vector<8xf32>
    %913 = vector.shape_cast %912 : vector<8xf32> to vector<8x1xf32>
    %914 = vector.broadcast %913 : vector<8x1xf32> to vector<8x8xf32>
    %915 = arith.divf %911, %914 : vector<8x8xf32>
    %cst_583 = arith.constant dense<0.000000e+00> : vector<8x16xf32>
    %916 = tpu.matmul %915, %905, %cst_583 {dimension_numbers = #tpu.dot_dimension_numbers<[1], [0], [0], [1], [0, 0, 1, 1], [], []>} : vector<8x8xf32>, vector<8x16xf32>, vector<8x16xf32> -> vector<8x16xf32>
    %c1_584 = arith.constant 1 : index
    %c0_585 = arith.constant 0 : index
    %c0_586 = arith.constant 0 : index
    %917 = vector.load %arg8[%c1_584, %c0_585, %c0_586] : memref<8x16x64xf32, #tpu.memory_space<vmem>>, vector<1x16x64xf32>
    %918 = vector.shape_cast %917 : vector<1x16x64xf32> to vector<16x64xf32>
    %cst_587 = arith.constant dense<0.000000e+00> : vector<8x64xf32>
    %919 = tpu.matmul %916, %918, %cst_587 {dimension_numbers = #tpu.dot_dimension_numbers<[1], [0], [0], [1], [0, 0, 1, 1], [], []>} : vector<8x16xf32>, vector<16x64xf32>, vector<8x64xf32> -> vector<8x64xf32>
    %920 = arith.addf %888, %919 : vector<8x64xf32>
    %c2_588 = arith.constant 2 : index
    %c0_589 = arith.constant 0 : index
    %c0_590 = arith.constant 0 : index
    %921 = vector.load %arg9[%c2_588, %c0_589, %c0_590] : memref<8x64x16xf32, #tpu.memory_space<vmem>>, vector<1x64x16xf32>
    %922 = vector.shape_cast %921 : vector<1x64x16xf32> to vector<64x16xf32>
    %cst_591 = arith.constant dense<0.000000e+00> : vector<8x16xf32>
    %923 = tpu.matmul %857, %922, %cst_591 {dimension_numbers = #tpu.dot_dimension_numbers<[1], [0], [0], [1], [0, 0, 1, 1], [], []>} : vector<8x64xf32>, vector<64x16xf32>, vector<8x16xf32> -> vector<8x16xf32>
    %c2_592 = arith.constant 2 : index
    %c0_593 = arith.constant 0 : index
    %c0_594 = arith.constant 0 : index
    %924 = vector.load %arg5[%c2_592, %c0_593, %c0_594] : memref<8x1x16xf32, #tpu.memory_space<vmem>>, vector<1x1x16xf32>
    %925 = vector.shape_cast %924 : vector<1x1x16xf32> to vector<1x16xf32>
    %926 = vector.broadcast %925 : vector<1x16xf32> to vector<8x16xf32>
    %927 = arith.addf %923, %926 : vector<8x16xf32>
    %c2_595 = arith.constant 2 : index
    %c0_596 = arith.constant 0 : index
    %c0_597 = arith.constant 0 : index
    %928 = vector.load %arg7[%c2_595, %c0_596, %c0_597] : memref<8x64x16xf32, #tpu.memory_space<vmem>>, vector<1x64x16xf32>
    %929 = vector.shape_cast %928 : vector<1x64x16xf32> to vector<64x16xf32>
    %cst_598 = arith.constant dense<0.000000e+00> : vector<8x16xf32>
    %930 = tpu.matmul %662, %929, %cst_598 {dimension_numbers = #tpu.dot_dimension_numbers<[1], [0], [0], [1], [0, 0, 1, 1], [], []>} : vector<8x64xf32>, vector<64x16xf32>, vector<8x16xf32> -> vector<8x16xf32>
    %c2_599 = arith.constant 2 : index
    %c0_600 = arith.constant 0 : index
    %c0_601 = arith.constant 0 : index
    %931 = vector.load %arg10[%c2_599, %c0_600, %c0_601] : memref<8x64x16xf32, #tpu.memory_space<vmem>>, vector<1x64x16xf32>
    %932 = vector.shape_cast %931 : vector<1x64x16xf32> to vector<64x16xf32>
    %cst_602 = arith.constant dense<0.000000e+00> : vector<8x16xf32>
    %933 = tpu.matmul %662, %932, %cst_602 {dimension_numbers = #tpu.dot_dimension_numbers<[1], [0], [0], [1], [0, 0, 1, 1], [], []>} : vector<8x64xf32>, vector<64x16xf32>, vector<8x16xf32> -> vector<8x16xf32>
    %c2_603 = arith.constant 2 : index
    %c0_604 = arith.constant 0 : index
    %c0_605 = arith.constant 0 : index
    %934 = vector.load %arg6[%c2_603, %c0_604, %c0_605] : memref<8x1x16xf32, #tpu.memory_space<vmem>>, vector<1x1x16xf32>
    %935 = vector.shape_cast %934 : vector<1x1x16xf32> to vector<1x16xf32>
    %936 = vector.broadcast %935 : vector<1x16xf32> to vector<8x16xf32>
    %937 = arith.addf %933, %936 : vector<8x16xf32>
    %cst_606 = arith.constant dense<0.000000e+00> : vector<8x8xf32>
    %938 = tpu.matmul %927, %930, %cst_606 {dimension_numbers = #tpu.dot_dimension_numbers<[1], [1], [0], [0], [0, 0, 1, 0], [], []>} : vector<8x16xf32>, vector<8x16xf32>, vector<8x8xf32> -> vector<8x8xf32>
    %cst_607 = arith.constant dense<0xFF800000> : vector<8xf32>
    %939 = vector.multi_reduction <maximumf>, %938, %cst_607 [1] : vector<8x8xf32> to vector<8xf32>
    %940 = vector.shape_cast %939 : vector<8xf32> to vector<8x1xf32>
    %941 = vector.broadcast %940 : vector<8x1xf32> to vector<8x8xf32>
    %942 = arith.subf %938, %941 : vector<8x8xf32>
    %943 = math.exp %942 : vector<8x8xf32>
    %cst_608 = arith.constant dense<0.000000e+00> : vector<8xf32>
    %944 = vector.multi_reduction <add>, %943, %cst_608 [1] : vector<8x8xf32> to vector<8xf32>
    %945 = vector.shape_cast %944 : vector<8xf32> to vector<8x1xf32>
    %946 = vector.broadcast %945 : vector<8x1xf32> to vector<8x8xf32>
    %947 = arith.divf %943, %946 : vector<8x8xf32>
    %cst_609 = arith.constant dense<0.000000e+00> : vector<8x16xf32>
    %948 = tpu.matmul %947, %937, %cst_609 {dimension_numbers = #tpu.dot_dimension_numbers<[1], [0], [0], [1], [0, 0, 1, 1], [], []>} : vector<8x8xf32>, vector<8x16xf32>, vector<8x16xf32> -> vector<8x16xf32>
    %c2_610 = arith.constant 2 : index
    %c0_611 = arith.constant 0 : index
    %c0_612 = arith.constant 0 : index
    %949 = vector.load %arg8[%c2_610, %c0_611, %c0_612] : memref<8x16x64xf32, #tpu.memory_space<vmem>>, vector<1x16x64xf32>
    %950 = vector.shape_cast %949 : vector<1x16x64xf32> to vector<16x64xf32>
    %cst_613 = arith.constant dense<0.000000e+00> : vector<8x64xf32>
    %951 = tpu.matmul %948, %950, %cst_613 {dimension_numbers = #tpu.dot_dimension_numbers<[1], [0], [0], [1], [0, 0, 1, 1], [], []>} : vector<8x16xf32>, vector<16x64xf32>, vector<8x64xf32> -> vector<8x64xf32>
    %952 = arith.addf %920, %951 : vector<8x64xf32>
    %c3_614 = arith.constant 3 : index
    %c0_615 = arith.constant 0 : index
    %c0_616 = arith.constant 0 : index
    %953 = vector.load %arg9[%c3_614, %c0_615, %c0_616] : memref<8x64x16xf32, #tpu.memory_space<vmem>>, vector<1x64x16xf32>
    %954 = vector.shape_cast %953 : vector<1x64x16xf32> to vector<64x16xf32>
    %cst_617 = arith.constant dense<0.000000e+00> : vector<8x16xf32>
    %955 = tpu.matmul %857, %954, %cst_617 {dimension_numbers = #tpu.dot_dimension_numbers<[1], [0], [0], [1], [0, 0, 1, 1], [], []>} : vector<8x64xf32>, vector<64x16xf32>, vector<8x16xf32> -> vector<8x16xf32>
    %c3_618 = arith.constant 3 : index
    %c0_619 = arith.constant 0 : index
    %c0_620 = arith.constant 0 : index
    %956 = vector.load %arg5[%c3_618, %c0_619, %c0_620] : memref<8x1x16xf32, #tpu.memory_space<vmem>>, vector<1x1x16xf32>
    %957 = vector.shape_cast %956 : vector<1x1x16xf32> to vector<1x16xf32>
    %958 = vector.broadcast %957 : vector<1x16xf32> to vector<8x16xf32>
    %959 = arith.addf %955, %958 : vector<8x16xf32>
    %c3_621 = arith.constant 3 : index
    %c0_622 = arith.constant 0 : index
    %c0_623 = arith.constant 0 : index
    %960 = vector.load %arg7[%c3_621, %c0_622, %c0_623] : memref<8x64x16xf32, #tpu.memory_space<vmem>>, vector<1x64x16xf32>
    %961 = vector.shape_cast %960 : vector<1x64x16xf32> to vector<64x16xf32>
    %cst_624 = arith.constant dense<0.000000e+00> : vector<8x16xf32>
    %962 = tpu.matmul %662, %961, %cst_624 {dimension_numbers = #tpu.dot_dimension_numbers<[1], [0], [0], [1], [0, 0, 1, 1], [], []>} : vector<8x64xf32>, vector<64x16xf32>, vector<8x16xf32> -> vector<8x16xf32>
    %c3_625 = arith.constant 3 : index
    %c0_626 = arith.constant 0 : index
    %c0_627 = arith.constant 0 : index
    %963 = vector.load %arg10[%c3_625, %c0_626, %c0_627] : memref<8x64x16xf32, #tpu.memory_space<vmem>>, vector<1x64x16xf32>
    %964 = vector.shape_cast %963 : vector<1x64x16xf32> to vector<64x16xf32>
    %cst_628 = arith.constant dense<0.000000e+00> : vector<8x16xf32>
    %965 = tpu.matmul %662, %964, %cst_628 {dimension_numbers = #tpu.dot_dimension_numbers<[1], [0], [0], [1], [0, 0, 1, 1], [], []>} : vector<8x64xf32>, vector<64x16xf32>, vector<8x16xf32> -> vector<8x16xf32>
    %c3_629 = arith.constant 3 : index
    %c0_630 = arith.constant 0 : index
    %c0_631 = arith.constant 0 : index
    %966 = vector.load %arg6[%c3_629, %c0_630, %c0_631] : memref<8x1x16xf32, #tpu.memory_space<vmem>>, vector<1x1x16xf32>
    %967 = vector.shape_cast %966 : vector<1x1x16xf32> to vector<1x16xf32>
    %968 = vector.broadcast %967 : vector<1x16xf32> to vector<8x16xf32>
    %969 = arith.addf %965, %968 : vector<8x16xf32>
    %cst_632 = arith.constant dense<0.000000e+00> : vector<8x8xf32>
    %970 = tpu.matmul %959, %962, %cst_632 {dimension_numbers = #tpu.dot_dimension_numbers<[1], [1], [0], [0], [0, 0, 1, 0], [], []>} : vector<8x16xf32>, vector<8x16xf32>, vector<8x8xf32> -> vector<8x8xf32>
    %cst_633 = arith.constant dense<0xFF800000> : vector<8xf32>
    %971 = vector.multi_reduction <maximumf>, %970, %cst_633 [1] : vector<8x8xf32> to vector<8xf32>
    %972 = vector.shape_cast %971 : vector<8xf32> to vector<8x1xf32>
    %973 = vector.broadcast %972 : vector<8x1xf32> to vector<8x8xf32>
    %974 = arith.subf %970, %973 : vector<8x8xf32>
    %975 = math.exp %974 : vector<8x8xf32>
    %cst_634 = arith.constant dense<0.000000e+00> : vector<8xf32>
    %976 = vector.multi_reduction <add>, %975, %cst_634 [1] : vector<8x8xf32> to vector<8xf32>
    %977 = vector.shape_cast %976 : vector<8xf32> to vector<8x1xf32>
    %978 = vector.broadcast %977 : vector<8x1xf32> to vector<8x8xf32>
    %979 = arith.divf %975, %978 : vector<8x8xf32>
    %cst_635 = arith.constant dense<0.000000e+00> : vector<8x16xf32>
    %980 = tpu.matmul %979, %969, %cst_635 {dimension_numbers = #tpu.dot_dimension_numbers<[1], [0], [0], [1], [0, 0, 1, 1], [], []>} : vector<8x8xf32>, vector<8x16xf32>, vector<8x16xf32> -> vector<8x16xf32>
    %c3_636 = arith.constant 3 : index
    %c0_637 = arith.constant 0 : index
    %c0_638 = arith.constant 0 : index
    %981 = vector.load %arg8[%c3_636, %c0_637, %c0_638] : memref<8x16x64xf32, #tpu.memory_space<vmem>>, vector<1x16x64xf32>
    %982 = vector.shape_cast %981 : vector<1x16x64xf32> to vector<16x64xf32>
    %cst_639 = arith.constant dense<0.000000e+00> : vector<8x64xf32>
    %983 = tpu.matmul %980, %982, %cst_639 {dimension_numbers = #tpu.dot_dimension_numbers<[1], [0], [0], [1], [0, 0, 1, 1], [], []>} : vector<8x16xf32>, vector<16x64xf32>, vector<8x64xf32> -> vector<8x64xf32>
    %984 = arith.addf %952, %983 : vector<8x64xf32>
    %c0_640 = arith.constant 0 : index
    %c0_641 = arith.constant 0 : index
    %c0_642 = arith.constant 0 : index
    %985 = vector.load %arg4[%c0_640, %c0_641, %c0_642] : memref<2x1x64xf32, #tpu.memory_space<vmem>>, vector<1x1x64xf32>
    %986 = vector.shape_cast %985 : vector<1x1x64xf32> to vector<1x64xf32>
    %987 = vector.broadcast %986 : vector<1x64xf32> to vector<8x64xf32>
    %988 = arith.addf %984, %987 : vector<8x64xf32>
    %989 = arith.addf %833, %988 : vector<8x64xf32>
    %c0_643 = arith.constant 0 : index
    %c0_644 = arith.constant 0 : index
    %c0_645 = arith.constant 0 : index
    %990 = vector.load %arg18[%c0_643, %c0_644, %c0_645] : memref<2x1x64xf32, #tpu.memory_space<vmem>>, vector<1x1x64xf32>
    %991 = vector.shape_cast %990 : vector<1x1x64xf32> to vector<1x64xf32>
    %c0_646 = arith.constant 0 : index
    %c0_647 = arith.constant 0 : index
    %c0_648 = arith.constant 0 : index
    %992 = vector.load %arg17[%c0_646, %c0_647, %c0_648] : memref<2x1x64xf32, #tpu.memory_space<vmem>>, vector<1x1x64xf32>
    %993 = vector.shape_cast %992 : vector<1x1x64xf32> to vector<1x64xf32>
    %cst_649 = arith.constant dense<0.000000e+00> : vector<8xf32>
    %994 = vector.multi_reduction <add>, %989, %cst_649 [1] : vector<8x64xf32> to vector<8xf32>
    %995 = vector.shape_cast %994 : vector<8xf32> to vector<8x1xf32>
    %cst_650 = arith.constant 6.400000e+01 : f32
    %996 = vector.broadcast %cst_650 : f32 to vector<8x1xf32>
    %997 = arith.divf %995, %996 : vector<8x1xf32>
    %998 = vector.broadcast %997 : vector<8x1xf32> to vector<8x64xf32>
    %999 = arith.subf %989, %998 : vector<8x64xf32>
    %1000 = arith.mulf %999, %999 : vector<8x64xf32>
    %cst_651 = arith.constant dense<0.000000e+00> : vector<8xf32>
    %1001 = vector.multi_reduction <add>, %1000, %cst_651 [1] : vector<8x64xf32> to vector<8xf32>
    %1002 = vector.shape_cast %1001 : vector<8xf32> to vector<8x1xf32>
    %cst_652 = arith.constant 6.400000e+01 : f32
    %1003 = vector.broadcast %cst_652 : f32 to vector<8x1xf32>
    %1004 = arith.divf %1002, %1003 : vector<8x1xf32>
    %cst_653 = arith.constant 9.99999974E-6 : f32
    %1005 = vector.broadcast %cst_653 : f32 to vector<8x1xf32>
    %1006 = arith.addf %1004, %1005 : vector<8x1xf32>
    %1007 = math.rsqrt %1006 : vector<8x1xf32>
    %1008 = vector.broadcast %1007 : vector<8x1xf32> to vector<8x64xf32>
    %1009 = arith.mulf %999, %1008 : vector<8x64xf32>
    %1010 = vector.broadcast %991 : vector<1x64xf32> to vector<8x64xf32>
    %1011 = arith.mulf %1009, %1010 : vector<8x64xf32>
    %1012 = vector.broadcast %993 : vector<1x64xf32> to vector<8x64xf32>
    %1013 = arith.addf %1011, %1012 : vector<8x64xf32>
    %c0_654 = arith.constant 0 : index
    %c0_655 = arith.constant 0 : index
    %c0_656 = arith.constant 0 : index
    %1014 = vector.load %arg14[%c0_654, %c0_655, %c0_656] : memref<2x64x128xf32, #tpu.memory_space<vmem>>, vector<1x64x128xf32>
    %1015 = vector.shape_cast %1014 : vector<1x64x128xf32> to vector<64x128xf32>
    %cst_657 = arith.constant dense<0.000000e+00> : vector<8x128xf32>
    %1016 = tpu.matmul %1013, %1015, %cst_657 {dimension_numbers = #tpu.dot_dimension_numbers<[1], [0], [0], [1], [0, 0, 1, 1], [], []>} : vector<8x64xf32>, vector<64x128xf32>, vector<8x128xf32> -> vector<8x128xf32>
    %c0_658 = arith.constant 0 : index
    %c0_659 = arith.constant 0 : index
    %c0_660 = arith.constant 0 : index
    %1017 = vector.load %arg13[%c0_658, %c0_659, %c0_660] : memref<2x1x128xf32, #tpu.memory_space<vmem>>, vector<1x1x128xf32>
    %1018 = vector.shape_cast %1017 : vector<1x1x128xf32> to vector<1x128xf32>
    %1019 = vector.broadcast %1018 : vector<1x128xf32> to vector<8x128xf32>
    %1020 = arith.addf %1016, %1019 : vector<8x128xf32>
    %cst_661 = arith.constant 5.000000e-01 : f32
    %1021 = vector.broadcast %cst_661 : f32 to vector<8x128xf32>
    %1022 = arith.mulf %1021, %1020 : vector<8x128xf32>
    %cst_662 = arith.constant 0.707106769 : f32
    %1023 = vector.broadcast %cst_662 : f32 to vector<8x128xf32>
    %1024 = arith.mulf %1020, %1023 : vector<8x128xf32>
    %cst_663 = arith.constant 0.000000e+00 : f32
    %1025 = vector.broadcast %cst_663 : f32 to vector<8x128xf32>
    %1026 = arith.cmpf oge, %1024, %1025 : vector<8x128xf32>
    %cst_664 = arith.constant 1.000000e+00 : f32
    %cst_665 = arith.constant -1.000000e+00 : f32
    %1027 = vector.broadcast %cst_664 : f32 to vector<8x128xf32>
    %1028 = vector.broadcast %cst_665 : f32 to vector<8x128xf32>
    %1029 = arith.select %1026, %1027, %1028 : vector<8x128xi1>, vector<8x128xf32>
    %1030 = math.absf %1024 : vector<8x128xf32>
    %cst_666 = arith.constant 0.327591091 : f32
    %1031 = vector.broadcast %cst_666 : f32 to vector<8x128xf32>
    %1032 = arith.mulf %1031, %1030 : vector<8x128xf32>
    %cst_667 = arith.constant 1.000000e+00 : f32
    %1033 = vector.broadcast %cst_667 : f32 to vector<8x128xf32>
    %1034 = arith.addf %1033, %1032 : vector<8x128xf32>
    %cst_668 = arith.constant 1.000000e+00 : f32
    %1035 = vector.broadcast %cst_668 : f32 to vector<8x128xf32>
    %1036 = arith.divf %1035, %1034 : vector<8x128xf32>
    %cst_669 = arith.constant 1.06140542 : f32
    %1037 = vector.broadcast %cst_669 : f32 to vector<8x128xf32>
    %1038 = arith.mulf %1037, %1036 : vector<8x128xf32>
    %cst_670 = arith.constant -1.45315206 : f32
    %1039 = vector.broadcast %cst_670 : f32 to vector<8x128xf32>
    %1040 = arith.addf %1038, %1039 : vector<8x128xf32>
    %1041 = arith.mulf %1040, %1036 : vector<8x128xf32>
    %cst_671 = arith.constant 1.42141378 : f32
    %1042 = vector.broadcast %cst_671 : f32 to vector<8x128xf32>
    %1043 = arith.addf %1041, %1042 : vector<8x128xf32>
    %1044 = arith.mulf %1043, %1036 : vector<8x128xf32>
    %cst_672 = arith.constant -0.284496725 : f32
    %1045 = vector.broadcast %cst_672 : f32 to vector<8x128xf32>
    %1046 = arith.addf %1044, %1045 : vector<8x128xf32>
    %1047 = arith.mulf %1046, %1036 : vector<8x128xf32>
    %cst_673 = arith.constant 0.254829586 : f32
    %1048 = vector.broadcast %cst_673 : f32 to vector<8x128xf32>
    %1049 = arith.addf %1047, %1048 : vector<8x128xf32>
    %1050 = arith.mulf %1049, %1036 : vector<8x128xf32>
    %cst_674 = arith.constant 0.000000e+00 : f32
    %1051 = vector.broadcast %cst_674 : f32 to vector<8x128xf32>
    %1052 = arith.subf %1051, %1030 : vector<8x128xf32>
    %1053 = arith.mulf %1052, %1030 : vector<8x128xf32>
    %1054 = math.exp %1053 : vector<8x128xf32>
    %1055 = arith.mulf %1050, %1054 : vector<8x128xf32>
    %cst_675 = arith.constant 1.000000e+00 : f32
    %1056 = vector.broadcast %cst_675 : f32 to vector<8x128xf32>
    %1057 = arith.subf %1056, %1055 : vector<8x128xf32>
    %1058 = arith.mulf %1029, %1057 : vector<8x128xf32>
    %cst_676 = arith.constant 1.000000e+00 : f32
    %1059 = vector.broadcast %cst_676 : f32 to vector<8x128xf32>
    %1060 = arith.addf %1059, %1058 : vector<8x128xf32>
    %1061 = arith.mulf %1022, %1060 : vector<8x128xf32>
    %c0_677 = arith.constant 0 : index
    %c0_678 = arith.constant 0 : index
    %c0_679 = arith.constant 0 : index
    %1062 = vector.load %arg16[%c0_677, %c0_678, %c0_679] : memref<2x128x64xf32, #tpu.memory_space<vmem>>, vector<1x128x64xf32>
    %1063 = vector.shape_cast %1062 : vector<1x128x64xf32> to vector<128x64xf32>
    %cst_680 = arith.constant dense<0.000000e+00> : vector<8x64xf32>
    %1064 = tpu.matmul %1061, %1063, %cst_680 {dimension_numbers = #tpu.dot_dimension_numbers<[1], [0], [0], [1], [0, 0, 1, 1], [], []>} : vector<8x128xf32>, vector<128x64xf32>, vector<8x64xf32> -> vector<8x64xf32>
    %c0_681 = arith.constant 0 : index
    %c0_682 = arith.constant 0 : index
    %c0_683 = arith.constant 0 : index
    %1065 = vector.load %arg15[%c0_681, %c0_682, %c0_683] : memref<2x1x64xf32, #tpu.memory_space<vmem>>, vector<1x1x64xf32>
    %1066 = vector.shape_cast %1065 : vector<1x1x64xf32> to vector<1x64xf32>
    %1067 = vector.broadcast %1066 : vector<1x64xf32> to vector<8x64xf32>
    %1068 = arith.addf %1064, %1067 : vector<8x64xf32>
    %1069 = arith.addf %989, %1068 : vector<8x64xf32>
    %c1_684 = arith.constant 1 : index
    %c0_685 = arith.constant 0 : index
    %c0_686 = arith.constant 0 : index
    %1070 = vector.load %arg29[%c1_684, %c0_685, %c0_686] : memref<2x1x64xf32, #tpu.memory_space<vmem>>, vector<1x1x64xf32>
    %1071 = vector.shape_cast %1070 : vector<1x1x64xf32> to vector<1x64xf32>
    %c1_687 = arith.constant 1 : index
    %c0_688 = arith.constant 0 : index
    %c0_689 = arith.constant 0 : index
    %1072 = vector.load %arg28[%c1_687, %c0_688, %c0_689] : memref<2x1x64xf32, #tpu.memory_space<vmem>>, vector<1x1x64xf32>
    %1073 = vector.shape_cast %1072 : vector<1x1x64xf32> to vector<1x64xf32>
    %cst_690 = arith.constant dense<0.000000e+00> : vector<8xf32>
    %1074 = vector.multi_reduction <add>, %1069, %cst_690 [1] : vector<8x64xf32> to vector<8xf32>
    %1075 = vector.shape_cast %1074 : vector<8xf32> to vector<8x1xf32>
    %cst_691 = arith.constant 6.400000e+01 : f32
    %1076 = vector.broadcast %cst_691 : f32 to vector<8x1xf32>
    %1077 = arith.divf %1075, %1076 : vector<8x1xf32>
    %1078 = vector.broadcast %1077 : vector<8x1xf32> to vector<8x64xf32>
    %1079 = arith.subf %1069, %1078 : vector<8x64xf32>
    %1080 = arith.mulf %1079, %1079 : vector<8x64xf32>
    %cst_692 = arith.constant dense<0.000000e+00> : vector<8xf32>
    %1081 = vector.multi_reduction <add>, %1080, %cst_692 [1] : vector<8x64xf32> to vector<8xf32>
    %1082 = vector.shape_cast %1081 : vector<8xf32> to vector<8x1xf32>
    %cst_693 = arith.constant 6.400000e+01 : f32
    %1083 = vector.broadcast %cst_693 : f32 to vector<8x1xf32>
    %1084 = arith.divf %1082, %1083 : vector<8x1xf32>
    %cst_694 = arith.constant 9.99999974E-6 : f32
    %1085 = vector.broadcast %cst_694 : f32 to vector<8x1xf32>
    %1086 = arith.addf %1084, %1085 : vector<8x1xf32>
    %1087 = math.rsqrt %1086 : vector<8x1xf32>
    %1088 = vector.broadcast %1087 : vector<8x1xf32> to vector<8x64xf32>
    %1089 = arith.mulf %1079, %1088 : vector<8x64xf32>
    %1090 = vector.broadcast %1071 : vector<1x64xf32> to vector<8x64xf32>
    %1091 = arith.mulf %1089, %1090 : vector<8x64xf32>
    %1092 = vector.broadcast %1073 : vector<1x64xf32> to vector<8x64xf32>
    %1093 = arith.addf %1091, %1092 : vector<8x64xf32>
    %c4_695 = arith.constant 4 : index
    %c0_696 = arith.constant 0 : index
    %c0_697 = arith.constant 0 : index
    %1094 = vector.load %arg26[%c4_695, %c0_696, %c0_697] : memref<8x64x16xf32, #tpu.memory_space<vmem>>, vector<1x64x16xf32>
    %1095 = vector.shape_cast %1094 : vector<1x64x16xf32> to vector<64x16xf32>
    %cst_698 = arith.constant dense<0.000000e+00> : vector<8x16xf32>
    %1096 = tpu.matmul %1093, %1095, %cst_698 {dimension_numbers = #tpu.dot_dimension_numbers<[1], [0], [0], [1], [0, 0, 1, 1], [], []>} : vector<8x64xf32>, vector<64x16xf32>, vector<8x16xf32> -> vector<8x16xf32>
    %c4_699 = arith.constant 4 : index
    %c0_700 = arith.constant 0 : index
    %c0_701 = arith.constant 0 : index
    %1097 = vector.load %arg22[%c4_699, %c0_700, %c0_701] : memref<8x1x16xf32, #tpu.memory_space<vmem>>, vector<1x1x16xf32>
    %1098 = vector.shape_cast %1097 : vector<1x1x16xf32> to vector<1x16xf32>
    %1099 = vector.broadcast %1098 : vector<1x16xf32> to vector<8x16xf32>
    %1100 = arith.addf %1096, %1099 : vector<8x16xf32>
    %c4_702 = arith.constant 4 : index
    %c0_703 = arith.constant 0 : index
    %c0_704 = arith.constant 0 : index
    %1101 = vector.load %arg24[%c4_702, %c0_703, %c0_704] : memref<8x64x16xf32, #tpu.memory_space<vmem>>, vector<1x64x16xf32>
    %1102 = vector.shape_cast %1101 : vector<1x64x16xf32> to vector<64x16xf32>
    %cst_705 = arith.constant dense<0.000000e+00> : vector<8x16xf32>
    %1103 = tpu.matmul %1093, %1102, %cst_705 {dimension_numbers = #tpu.dot_dimension_numbers<[1], [0], [0], [1], [0, 0, 1, 1], [], []>} : vector<8x64xf32>, vector<64x16xf32>, vector<8x16xf32> -> vector<8x16xf32>
    %c4_706 = arith.constant 4 : index
    %c0_707 = arith.constant 0 : index
    %c0_708 = arith.constant 0 : index
    %1104 = vector.load %arg27[%c4_706, %c0_707, %c0_708] : memref<8x64x16xf32, #tpu.memory_space<vmem>>, vector<1x64x16xf32>
    %1105 = vector.shape_cast %1104 : vector<1x64x16xf32> to vector<64x16xf32>
    %cst_709 = arith.constant dense<0.000000e+00> : vector<8x16xf32>
    %1106 = tpu.matmul %1093, %1105, %cst_709 {dimension_numbers = #tpu.dot_dimension_numbers<[1], [0], [0], [1], [0, 0, 1, 1], [], []>} : vector<8x64xf32>, vector<64x16xf32>, vector<8x16xf32> -> vector<8x16xf32>
    %c4_710 = arith.constant 4 : index
    %c0_711 = arith.constant 0 : index
    %c0_712 = arith.constant 0 : index
    %1107 = vector.load %arg23[%c4_710, %c0_711, %c0_712] : memref<8x1x16xf32, #tpu.memory_space<vmem>>, vector<1x1x16xf32>
    %1108 = vector.shape_cast %1107 : vector<1x1x16xf32> to vector<1x16xf32>
    %1109 = vector.broadcast %1108 : vector<1x16xf32> to vector<8x16xf32>
    %1110 = arith.addf %1106, %1109 : vector<8x16xf32>
    %cst_713 = arith.constant dense<0.000000e+00> : vector<8x8xf32>
    %1111 = tpu.matmul %1100, %1103, %cst_713 {dimension_numbers = #tpu.dot_dimension_numbers<[1], [1], [0], [0], [0, 0, 1, 0], [], []>} : vector<8x16xf32>, vector<8x16xf32>, vector<8x8xf32> -> vector<8x8xf32>
    %1112 = arith.addf %1111, %673 : vector<8x8xf32>
    %cst_714 = arith.constant dense<0xFF800000> : vector<8xf32>
    %1113 = vector.multi_reduction <maximumf>, %1112, %cst_714 [1] : vector<8x8xf32> to vector<8xf32>
    %1114 = vector.shape_cast %1113 : vector<8xf32> to vector<8x1xf32>
    %1115 = vector.broadcast %1114 : vector<8x1xf32> to vector<8x8xf32>
    %1116 = arith.subf %1112, %1115 : vector<8x8xf32>
    %1117 = math.exp %1116 : vector<8x8xf32>
    %cst_715 = arith.constant dense<0.000000e+00> : vector<8xf32>
    %1118 = vector.multi_reduction <add>, %1117, %cst_715 [1] : vector<8x8xf32> to vector<8xf32>
    %1119 = vector.shape_cast %1118 : vector<8xf32> to vector<8x1xf32>
    %1120 = vector.broadcast %1119 : vector<8x1xf32> to vector<8x8xf32>
    %1121 = arith.divf %1117, %1120 : vector<8x8xf32>
    %cst_716 = arith.constant dense<0.000000e+00> : vector<8x16xf32>
    %1122 = tpu.matmul %1121, %1110, %cst_716 {dimension_numbers = #tpu.dot_dimension_numbers<[1], [0], [0], [1], [0, 0, 1, 1], [], []>} : vector<8x8xf32>, vector<8x16xf32>, vector<8x16xf32> -> vector<8x16xf32>
    %c4_717 = arith.constant 4 : index
    %c0_718 = arith.constant 0 : index
    %c0_719 = arith.constant 0 : index
    %1123 = vector.load %arg25[%c4_717, %c0_718, %c0_719] : memref<8x16x64xf32, #tpu.memory_space<vmem>>, vector<1x16x64xf32>
    %1124 = vector.shape_cast %1123 : vector<1x16x64xf32> to vector<16x64xf32>
    %cst_720 = arith.constant dense<0.000000e+00> : vector<8x64xf32>
    %1125 = tpu.matmul %1122, %1124, %cst_720 {dimension_numbers = #tpu.dot_dimension_numbers<[1], [0], [0], [1], [0, 0, 1, 1], [], []>} : vector<8x16xf32>, vector<16x64xf32>, vector<8x64xf32> -> vector<8x64xf32>
    %c5_721 = arith.constant 5 : index
    %c0_722 = arith.constant 0 : index
    %c0_723 = arith.constant 0 : index
    %1126 = vector.load %arg26[%c5_721, %c0_722, %c0_723] : memref<8x64x16xf32, #tpu.memory_space<vmem>>, vector<1x64x16xf32>
    %1127 = vector.shape_cast %1126 : vector<1x64x16xf32> to vector<64x16xf32>
    %cst_724 = arith.constant dense<0.000000e+00> : vector<8x16xf32>
    %1128 = tpu.matmul %1093, %1127, %cst_724 {dimension_numbers = #tpu.dot_dimension_numbers<[1], [0], [0], [1], [0, 0, 1, 1], [], []>} : vector<8x64xf32>, vector<64x16xf32>, vector<8x16xf32> -> vector<8x16xf32>
    %c5_725 = arith.constant 5 : index
    %c0_726 = arith.constant 0 : index
    %c0_727 = arith.constant 0 : index
    %1129 = vector.load %arg22[%c5_725, %c0_726, %c0_727] : memref<8x1x16xf32, #tpu.memory_space<vmem>>, vector<1x1x16xf32>
    %1130 = vector.shape_cast %1129 : vector<1x1x16xf32> to vector<1x16xf32>
    %1131 = vector.broadcast %1130 : vector<1x16xf32> to vector<8x16xf32>
    %1132 = arith.addf %1128, %1131 : vector<8x16xf32>
    %c5_728 = arith.constant 5 : index
    %c0_729 = arith.constant 0 : index
    %c0_730 = arith.constant 0 : index
    %1133 = vector.load %arg24[%c5_728, %c0_729, %c0_730] : memref<8x64x16xf32, #tpu.memory_space<vmem>>, vector<1x64x16xf32>
    %1134 = vector.shape_cast %1133 : vector<1x64x16xf32> to vector<64x16xf32>
    %cst_731 = arith.constant dense<0.000000e+00> : vector<8x16xf32>
    %1135 = tpu.matmul %1093, %1134, %cst_731 {dimension_numbers = #tpu.dot_dimension_numbers<[1], [0], [0], [1], [0, 0, 1, 1], [], []>} : vector<8x64xf32>, vector<64x16xf32>, vector<8x16xf32> -> vector<8x16xf32>
    %c5_732 = arith.constant 5 : index
    %c0_733 = arith.constant 0 : index
    %c0_734 = arith.constant 0 : index
    %1136 = vector.load %arg27[%c5_732, %c0_733, %c0_734] : memref<8x64x16xf32, #tpu.memory_space<vmem>>, vector<1x64x16xf32>
    %1137 = vector.shape_cast %1136 : vector<1x64x16xf32> to vector<64x16xf32>
    %cst_735 = arith.constant dense<0.000000e+00> : vector<8x16xf32>
    %1138 = tpu.matmul %1093, %1137, %cst_735 {dimension_numbers = #tpu.dot_dimension_numbers<[1], [0], [0], [1], [0, 0, 1, 1], [], []>} : vector<8x64xf32>, vector<64x16xf32>, vector<8x16xf32> -> vector<8x16xf32>
    %c5_736 = arith.constant 5 : index
    %c0_737 = arith.constant 0 : index
    %c0_738 = arith.constant 0 : index
    %1139 = vector.load %arg23[%c5_736, %c0_737, %c0_738] : memref<8x1x16xf32, #tpu.memory_space<vmem>>, vector<1x1x16xf32>
    %1140 = vector.shape_cast %1139 : vector<1x1x16xf32> to vector<1x16xf32>
    %1141 = vector.broadcast %1140 : vector<1x16xf32> to vector<8x16xf32>
    %1142 = arith.addf %1138, %1141 : vector<8x16xf32>
    %cst_739 = arith.constant dense<0.000000e+00> : vector<8x8xf32>
    %1143 = tpu.matmul %1132, %1135, %cst_739 {dimension_numbers = #tpu.dot_dimension_numbers<[1], [1], [0], [0], [0, 0, 1, 0], [], []>} : vector<8x16xf32>, vector<8x16xf32>, vector<8x8xf32> -> vector<8x8xf32>
    %1144 = arith.addf %1143, %673 : vector<8x8xf32>
    %cst_740 = arith.constant dense<0xFF800000> : vector<8xf32>
    %1145 = vector.multi_reduction <maximumf>, %1144, %cst_740 [1] : vector<8x8xf32> to vector<8xf32>
    %1146 = vector.shape_cast %1145 : vector<8xf32> to vector<8x1xf32>
    %1147 = vector.broadcast %1146 : vector<8x1xf32> to vector<8x8xf32>
    %1148 = arith.subf %1144, %1147 : vector<8x8xf32>
    %1149 = math.exp %1148 : vector<8x8xf32>
    %cst_741 = arith.constant dense<0.000000e+00> : vector<8xf32>
    %1150 = vector.multi_reduction <add>, %1149, %cst_741 [1] : vector<8x8xf32> to vector<8xf32>
    %1151 = vector.shape_cast %1150 : vector<8xf32> to vector<8x1xf32>
    %1152 = vector.broadcast %1151 : vector<8x1xf32> to vector<8x8xf32>
    %1153 = arith.divf %1149, %1152 : vector<8x8xf32>
    %cst_742 = arith.constant dense<0.000000e+00> : vector<8x16xf32>
    %1154 = tpu.matmul %1153, %1142, %cst_742 {dimension_numbers = #tpu.dot_dimension_numbers<[1], [0], [0], [1], [0, 0, 1, 1], [], []>} : vector<8x8xf32>, vector<8x16xf32>, vector<8x16xf32> -> vector<8x16xf32>
    %c5_743 = arith.constant 5 : index
    %c0_744 = arith.constant 0 : index
    %c0_745 = arith.constant 0 : index
    %1155 = vector.load %arg25[%c5_743, %c0_744, %c0_745] : memref<8x16x64xf32, #tpu.memory_space<vmem>>, vector<1x16x64xf32>
    %1156 = vector.shape_cast %1155 : vector<1x16x64xf32> to vector<16x64xf32>
    %cst_746 = arith.constant dense<0.000000e+00> : vector<8x64xf32>
    %1157 = tpu.matmul %1154, %1156, %cst_746 {dimension_numbers = #tpu.dot_dimension_numbers<[1], [0], [0], [1], [0, 0, 1, 1], [], []>} : vector<8x16xf32>, vector<16x64xf32>, vector<8x64xf32> -> vector<8x64xf32>
    %1158 = arith.addf %1125, %1157 : vector<8x64xf32>
    %c6_747 = arith.constant 6 : index
    %c0_748 = arith.constant 0 : index
    %c0_749 = arith.constant 0 : index
    %1159 = vector.load %arg26[%c6_747, %c0_748, %c0_749] : memref<8x64x16xf32, #tpu.memory_space<vmem>>, vector<1x64x16xf32>
    %1160 = vector.shape_cast %1159 : vector<1x64x16xf32> to vector<64x16xf32>
    %cst_750 = arith.constant dense<0.000000e+00> : vector<8x16xf32>
    %1161 = tpu.matmul %1093, %1160, %cst_750 {dimension_numbers = #tpu.dot_dimension_numbers<[1], [0], [0], [1], [0, 0, 1, 1], [], []>} : vector<8x64xf32>, vector<64x16xf32>, vector<8x16xf32> -> vector<8x16xf32>
    %c6_751 = arith.constant 6 : index
    %c0_752 = arith.constant 0 : index
    %c0_753 = arith.constant 0 : index
    %1162 = vector.load %arg22[%c6_751, %c0_752, %c0_753] : memref<8x1x16xf32, #tpu.memory_space<vmem>>, vector<1x1x16xf32>
    %1163 = vector.shape_cast %1162 : vector<1x1x16xf32> to vector<1x16xf32>
    %1164 = vector.broadcast %1163 : vector<1x16xf32> to vector<8x16xf32>
    %1165 = arith.addf %1161, %1164 : vector<8x16xf32>
    %c6_754 = arith.constant 6 : index
    %c0_755 = arith.constant 0 : index
    %c0_756 = arith.constant 0 : index
    %1166 = vector.load %arg24[%c6_754, %c0_755, %c0_756] : memref<8x64x16xf32, #tpu.memory_space<vmem>>, vector<1x64x16xf32>
    %1167 = vector.shape_cast %1166 : vector<1x64x16xf32> to vector<64x16xf32>
    %cst_757 = arith.constant dense<0.000000e+00> : vector<8x16xf32>
    %1168 = tpu.matmul %1093, %1167, %cst_757 {dimension_numbers = #tpu.dot_dimension_numbers<[1], [0], [0], [1], [0, 0, 1, 1], [], []>} : vector<8x64xf32>, vector<64x16xf32>, vector<8x16xf32> -> vector<8x16xf32>
    %c6_758 = arith.constant 6 : index
    %c0_759 = arith.constant 0 : index
    %c0_760 = arith.constant 0 : index
    %1169 = vector.load %arg27[%c6_758, %c0_759, %c0_760] : memref<8x64x16xf32, #tpu.memory_space<vmem>>, vector<1x64x16xf32>
    %1170 = vector.shape_cast %1169 : vector<1x64x16xf32> to vector<64x16xf32>
    %cst_761 = arith.constant dense<0.000000e+00> : vector<8x16xf32>
    %1171 = tpu.matmul %1093, %1170, %cst_761 {dimension_numbers = #tpu.dot_dimension_numbers<[1], [0], [0], [1], [0, 0, 1, 1], [], []>} : vector<8x64xf32>, vector<64x16xf32>, vector<8x16xf32> -> vector<8x16xf32>
    %c6_762 = arith.constant 6 : index
    %c0_763 = arith.constant 0 : index
    %c0_764 = arith.constant 0 : index
    %1172 = vector.load %arg23[%c6_762, %c0_763, %c0_764] : memref<8x1x16xf32, #tpu.memory_space<vmem>>, vector<1x1x16xf32>
    %1173 = vector.shape_cast %1172 : vector<1x1x16xf32> to vector<1x16xf32>
    %1174 = vector.broadcast %1173 : vector<1x16xf32> to vector<8x16xf32>
    %1175 = arith.addf %1171, %1174 : vector<8x16xf32>
    %cst_765 = arith.constant dense<0.000000e+00> : vector<8x8xf32>
    %1176 = tpu.matmul %1165, %1168, %cst_765 {dimension_numbers = #tpu.dot_dimension_numbers<[1], [1], [0], [0], [0, 0, 1, 0], [], []>} : vector<8x16xf32>, vector<8x16xf32>, vector<8x8xf32> -> vector<8x8xf32>
    %1177 = arith.addf %1176, %673 : vector<8x8xf32>
    %cst_766 = arith.constant dense<0xFF800000> : vector<8xf32>
    %1178 = vector.multi_reduction <maximumf>, %1177, %cst_766 [1] : vector<8x8xf32> to vector<8xf32>
    %1179 = vector.shape_cast %1178 : vector<8xf32> to vector<8x1xf32>
    %1180 = vector.broadcast %1179 : vector<8x1xf32> to vector<8x8xf32>
    %1181 = arith.subf %1177, %1180 : vector<8x8xf32>
    %1182 = math.exp %1181 : vector<8x8xf32>
    %cst_767 = arith.constant dense<0.000000e+00> : vector<8xf32>
    %1183 = vector.multi_reduction <add>, %1182, %cst_767 [1] : vector<8x8xf32> to vector<8xf32>
    %1184 = vector.shape_cast %1183 : vector<8xf32> to vector<8x1xf32>
    %1185 = vector.broadcast %1184 : vector<8x1xf32> to vector<8x8xf32>
    %1186 = arith.divf %1182, %1185 : vector<8x8xf32>
    %cst_768 = arith.constant dense<0.000000e+00> : vector<8x16xf32>
    %1187 = tpu.matmul %1186, %1175, %cst_768 {dimension_numbers = #tpu.dot_dimension_numbers<[1], [0], [0], [1], [0, 0, 1, 1], [], []>} : vector<8x8xf32>, vector<8x16xf32>, vector<8x16xf32> -> vector<8x16xf32>
    %c6_769 = arith.constant 6 : index
    %c0_770 = arith.constant 0 : index
    %c0_771 = arith.constant 0 : index
    %1188 = vector.load %arg25[%c6_769, %c0_770, %c0_771] : memref<8x16x64xf32, #tpu.memory_space<vmem>>, vector<1x16x64xf32>
    %1189 = vector.shape_cast %1188 : vector<1x16x64xf32> to vector<16x64xf32>
    %cst_772 = arith.constant dense<0.000000e+00> : vector<8x64xf32>
    %1190 = tpu.matmul %1187, %1189, %cst_772 {dimension_numbers = #tpu.dot_dimension_numbers<[1], [0], [0], [1], [0, 0, 1, 1], [], []>} : vector<8x16xf32>, vector<16x64xf32>, vector<8x64xf32> -> vector<8x64xf32>
    %1191 = arith.addf %1158, %1190 : vector<8x64xf32>
    %c7_773 = arith.constant 7 : index
    %c0_774 = arith.constant 0 : index
    %c0_775 = arith.constant 0 : index
    %1192 = vector.load %arg26[%c7_773, %c0_774, %c0_775] : memref<8x64x16xf32, #tpu.memory_space<vmem>>, vector<1x64x16xf32>
    %1193 = vector.shape_cast %1192 : vector<1x64x16xf32> to vector<64x16xf32>
    %cst_776 = arith.constant dense<0.000000e+00> : vector<8x16xf32>
    %1194 = tpu.matmul %1093, %1193, %cst_776 {dimension_numbers = #tpu.dot_dimension_numbers<[1], [0], [0], [1], [0, 0, 1, 1], [], []>} : vector<8x64xf32>, vector<64x16xf32>, vector<8x16xf32> -> vector<8x16xf32>
    %c7_777 = arith.constant 7 : index
    %c0_778 = arith.constant 0 : index
    %c0_779 = arith.constant 0 : index
    %1195 = vector.load %arg22[%c7_777, %c0_778, %c0_779] : memref<8x1x16xf32, #tpu.memory_space<vmem>>, vector<1x1x16xf32>
    %1196 = vector.shape_cast %1195 : vector<1x1x16xf32> to vector<1x16xf32>
    %1197 = vector.broadcast %1196 : vector<1x16xf32> to vector<8x16xf32>
    %1198 = arith.addf %1194, %1197 : vector<8x16xf32>
    %c7_780 = arith.constant 7 : index
    %c0_781 = arith.constant 0 : index
    %c0_782 = arith.constant 0 : index
    %1199 = vector.load %arg24[%c7_780, %c0_781, %c0_782] : memref<8x64x16xf32, #tpu.memory_space<vmem>>, vector<1x64x16xf32>
    %1200 = vector.shape_cast %1199 : vector<1x64x16xf32> to vector<64x16xf32>
    %cst_783 = arith.constant dense<0.000000e+00> : vector<8x16xf32>
    %1201 = tpu.matmul %1093, %1200, %cst_783 {dimension_numbers = #tpu.dot_dimension_numbers<[1], [0], [0], [1], [0, 0, 1, 1], [], []>} : vector<8x64xf32>, vector<64x16xf32>, vector<8x16xf32> -> vector<8x16xf32>
    %c7_784 = arith.constant 7 : index
    %c0_785 = arith.constant 0 : index
    %c0_786 = arith.constant 0 : index
    %1202 = vector.load %arg27[%c7_784, %c0_785, %c0_786] : memref<8x64x16xf32, #tpu.memory_space<vmem>>, vector<1x64x16xf32>
    %1203 = vector.shape_cast %1202 : vector<1x64x16xf32> to vector<64x16xf32>
    %cst_787 = arith.constant dense<0.000000e+00> : vector<8x16xf32>
    %1204 = tpu.matmul %1093, %1203, %cst_787 {dimension_numbers = #tpu.dot_dimension_numbers<[1], [0], [0], [1], [0, 0, 1, 1], [], []>} : vector<8x64xf32>, vector<64x16xf32>, vector<8x16xf32> -> vector<8x16xf32>
    %c7_788 = arith.constant 7 : index
    %c0_789 = arith.constant 0 : index
    %c0_790 = arith.constant 0 : index
    %1205 = vector.load %arg23[%c7_788, %c0_789, %c0_790] : memref<8x1x16xf32, #tpu.memory_space<vmem>>, vector<1x1x16xf32>
    %1206 = vector.shape_cast %1205 : vector<1x1x16xf32> to vector<1x16xf32>
    %1207 = vector.broadcast %1206 : vector<1x16xf32> to vector<8x16xf32>
    %1208 = arith.addf %1204, %1207 : vector<8x16xf32>
    %cst_791 = arith.constant dense<0.000000e+00> : vector<8x8xf32>
    %1209 = tpu.matmul %1198, %1201, %cst_791 {dimension_numbers = #tpu.dot_dimension_numbers<[1], [1], [0], [0], [0, 0, 1, 0], [], []>} : vector<8x16xf32>, vector<8x16xf32>, vector<8x8xf32> -> vector<8x8xf32>
    %1210 = arith.addf %1209, %673 : vector<8x8xf32>
    %cst_792 = arith.constant dense<0xFF800000> : vector<8xf32>
    %1211 = vector.multi_reduction <maximumf>, %1210, %cst_792 [1] : vector<8x8xf32> to vector<8xf32>
    %1212 = vector.shape_cast %1211 : vector<8xf32> to vector<8x1xf32>
    %1213 = vector.broadcast %1212 : vector<8x1xf32> to vector<8x8xf32>
    %1214 = arith.subf %1210, %1213 : vector<8x8xf32>
    %1215 = math.exp %1214 : vector<8x8xf32>
    %cst_793 = arith.constant dense<0.000000e+00> : vector<8xf32>
    %1216 = vector.multi_reduction <add>, %1215, %cst_793 [1] : vector<8x8xf32> to vector<8xf32>
    %1217 = vector.shape_cast %1216 : vector<8xf32> to vector<8x1xf32>
    %1218 = vector.broadcast %1217 : vector<8x1xf32> to vector<8x8xf32>
    %1219 = arith.divf %1215, %1218 : vector<8x8xf32>
    %cst_794 = arith.constant dense<0.000000e+00> : vector<8x16xf32>
    %1220 = tpu.matmul %1219, %1208, %cst_794 {dimension_numbers = #tpu.dot_dimension_numbers<[1], [0], [0], [1], [0, 0, 1, 1], [], []>} : vector<8x8xf32>, vector<8x16xf32>, vector<8x16xf32> -> vector<8x16xf32>
    %c7_795 = arith.constant 7 : index
    %c0_796 = arith.constant 0 : index
    %c0_797 = arith.constant 0 : index
    %1221 = vector.load %arg25[%c7_795, %c0_796, %c0_797] : memref<8x16x64xf32, #tpu.memory_space<vmem>>, vector<1x16x64xf32>
    %1222 = vector.shape_cast %1221 : vector<1x16x64xf32> to vector<16x64xf32>
    %cst_798 = arith.constant dense<0.000000e+00> : vector<8x64xf32>
    %1223 = tpu.matmul %1220, %1222, %cst_798 {dimension_numbers = #tpu.dot_dimension_numbers<[1], [0], [0], [1], [0, 0, 1, 1], [], []>} : vector<8x16xf32>, vector<16x64xf32>, vector<8x64xf32> -> vector<8x64xf32>
    %1224 = arith.addf %1191, %1223 : vector<8x64xf32>
    %c1_799 = arith.constant 1 : index
    %c0_800 = arith.constant 0 : index
    %c0_801 = arith.constant 0 : index
    %1225 = vector.load %arg21[%c1_799, %c0_800, %c0_801] : memref<2x1x64xf32, #tpu.memory_space<vmem>>, vector<1x1x64xf32>
    %1226 = vector.shape_cast %1225 : vector<1x1x64xf32> to vector<1x64xf32>
    %1227 = vector.broadcast %1226 : vector<1x64xf32> to vector<8x64xf32>
    %1228 = arith.addf %1224, %1227 : vector<8x64xf32>
    %1229 = arith.addf %1069, %1228 : vector<8x64xf32>
    %c1_802 = arith.constant 1 : index
    %c0_803 = arith.constant 0 : index
    %c0_804 = arith.constant 0 : index
    %1230 = vector.load %arg12[%c1_802, %c0_803, %c0_804] : memref<2x1x64xf32, #tpu.memory_space<vmem>>, vector<1x1x64xf32>
    %1231 = vector.shape_cast %1230 : vector<1x1x64xf32> to vector<1x64xf32>
    %c1_805 = arith.constant 1 : index
    %c0_806 = arith.constant 0 : index
    %c0_807 = arith.constant 0 : index
    %1232 = vector.load %arg11[%c1_805, %c0_806, %c0_807] : memref<2x1x64xf32, #tpu.memory_space<vmem>>, vector<1x1x64xf32>
    %1233 = vector.shape_cast %1232 : vector<1x1x64xf32> to vector<1x64xf32>
    %cst_808 = arith.constant dense<0.000000e+00> : vector<8xf32>
    %1234 = vector.multi_reduction <add>, %1229, %cst_808 [1] : vector<8x64xf32> to vector<8xf32>
    %1235 = vector.shape_cast %1234 : vector<8xf32> to vector<8x1xf32>
    %cst_809 = arith.constant 6.400000e+01 : f32
    %1236 = vector.broadcast %cst_809 : f32 to vector<8x1xf32>
    %1237 = arith.divf %1235, %1236 : vector<8x1xf32>
    %1238 = vector.broadcast %1237 : vector<8x1xf32> to vector<8x64xf32>
    %1239 = arith.subf %1229, %1238 : vector<8x64xf32>
    %1240 = arith.mulf %1239, %1239 : vector<8x64xf32>
    %cst_810 = arith.constant dense<0.000000e+00> : vector<8xf32>
    %1241 = vector.multi_reduction <add>, %1240, %cst_810 [1] : vector<8x64xf32> to vector<8xf32>
    %1242 = vector.shape_cast %1241 : vector<8xf32> to vector<8x1xf32>
    %cst_811 = arith.constant 6.400000e+01 : f32
    %1243 = vector.broadcast %cst_811 : f32 to vector<8x1xf32>
    %1244 = arith.divf %1242, %1243 : vector<8x1xf32>
    %cst_812 = arith.constant 9.99999974E-6 : f32
    %1245 = vector.broadcast %cst_812 : f32 to vector<8x1xf32>
    %1246 = arith.addf %1244, %1245 : vector<8x1xf32>
    %1247 = math.rsqrt %1246 : vector<8x1xf32>
    %1248 = vector.broadcast %1247 : vector<8x1xf32> to vector<8x64xf32>
    %1249 = arith.mulf %1239, %1248 : vector<8x64xf32>
    %1250 = vector.broadcast %1231 : vector<1x64xf32> to vector<8x64xf32>
    %1251 = arith.mulf %1249, %1250 : vector<8x64xf32>
    %1252 = vector.broadcast %1233 : vector<1x64xf32> to vector<8x64xf32>
    %1253 = arith.addf %1251, %1252 : vector<8x64xf32>
    %c4_813 = arith.constant 4 : index
    %c0_814 = arith.constant 0 : index
    %c0_815 = arith.constant 0 : index
    %1254 = vector.load %arg9[%c4_813, %c0_814, %c0_815] : memref<8x64x16xf32, #tpu.memory_space<vmem>>, vector<1x64x16xf32>
    %1255 = vector.shape_cast %1254 : vector<1x64x16xf32> to vector<64x16xf32>
    %cst_816 = arith.constant dense<0.000000e+00> : vector<8x16xf32>
    %1256 = tpu.matmul %1253, %1255, %cst_816 {dimension_numbers = #tpu.dot_dimension_numbers<[1], [0], [0], [1], [0, 0, 1, 1], [], []>} : vector<8x64xf32>, vector<64x16xf32>, vector<8x16xf32> -> vector<8x16xf32>
    %c4_817 = arith.constant 4 : index
    %c0_818 = arith.constant 0 : index
    %c0_819 = arith.constant 0 : index
    %1257 = vector.load %arg5[%c4_817, %c0_818, %c0_819] : memref<8x1x16xf32, #tpu.memory_space<vmem>>, vector<1x1x16xf32>
    %1258 = vector.shape_cast %1257 : vector<1x1x16xf32> to vector<1x16xf32>
    %1259 = vector.broadcast %1258 : vector<1x16xf32> to vector<8x16xf32>
    %1260 = arith.addf %1256, %1259 : vector<8x16xf32>
    %c4_820 = arith.constant 4 : index
    %c0_821 = arith.constant 0 : index
    %c0_822 = arith.constant 0 : index
    %1261 = vector.load %arg7[%c4_820, %c0_821, %c0_822] : memref<8x64x16xf32, #tpu.memory_space<vmem>>, vector<1x64x16xf32>
    %1262 = vector.shape_cast %1261 : vector<1x64x16xf32> to vector<64x16xf32>
    %cst_823 = arith.constant dense<0.000000e+00> : vector<8x16xf32>
    %1263 = tpu.matmul %662, %1262, %cst_823 {dimension_numbers = #tpu.dot_dimension_numbers<[1], [0], [0], [1], [0, 0, 1, 1], [], []>} : vector<8x64xf32>, vector<64x16xf32>, vector<8x16xf32> -> vector<8x16xf32>
    %c4_824 = arith.constant 4 : index
    %c0_825 = arith.constant 0 : index
    %c0_826 = arith.constant 0 : index
    %1264 = vector.load %arg10[%c4_824, %c0_825, %c0_826] : memref<8x64x16xf32, #tpu.memory_space<vmem>>, vector<1x64x16xf32>
    %1265 = vector.shape_cast %1264 : vector<1x64x16xf32> to vector<64x16xf32>
    %cst_827 = arith.constant dense<0.000000e+00> : vector<8x16xf32>
    %1266 = tpu.matmul %662, %1265, %cst_827 {dimension_numbers = #tpu.dot_dimension_numbers<[1], [0], [0], [1], [0, 0, 1, 1], [], []>} : vector<8x64xf32>, vector<64x16xf32>, vector<8x16xf32> -> vector<8x16xf32>
    %c4_828 = arith.constant 4 : index
    %c0_829 = arith.constant 0 : index
    %c0_830 = arith.constant 0 : index
    %1267 = vector.load %arg6[%c4_828, %c0_829, %c0_830] : memref<8x1x16xf32, #tpu.memory_space<vmem>>, vector<1x1x16xf32>
    %1268 = vector.shape_cast %1267 : vector<1x1x16xf32> to vector<1x16xf32>
    %1269 = vector.broadcast %1268 : vector<1x16xf32> to vector<8x16xf32>
    %1270 = arith.addf %1266, %1269 : vector<8x16xf32>
    %cst_831 = arith.constant dense<0.000000e+00> : vector<8x8xf32>
    %1271 = tpu.matmul %1260, %1263, %cst_831 {dimension_numbers = #tpu.dot_dimension_numbers<[1], [1], [0], [0], [0, 0, 1, 0], [], []>} : vector<8x16xf32>, vector<8x16xf32>, vector<8x8xf32> -> vector<8x8xf32>
    %cst_832 = arith.constant dense<0xFF800000> : vector<8xf32>
    %1272 = vector.multi_reduction <maximumf>, %1271, %cst_832 [1] : vector<8x8xf32> to vector<8xf32>
    %1273 = vector.shape_cast %1272 : vector<8xf32> to vector<8x1xf32>
    %1274 = vector.broadcast %1273 : vector<8x1xf32> to vector<8x8xf32>
    %1275 = arith.subf %1271, %1274 : vector<8x8xf32>
    %1276 = math.exp %1275 : vector<8x8xf32>
    %cst_833 = arith.constant dense<0.000000e+00> : vector<8xf32>
    %1277 = vector.multi_reduction <add>, %1276, %cst_833 [1] : vector<8x8xf32> to vector<8xf32>
    %1278 = vector.shape_cast %1277 : vector<8xf32> to vector<8x1xf32>
    %1279 = vector.broadcast %1278 : vector<8x1xf32> to vector<8x8xf32>
    %1280 = arith.divf %1276, %1279 : vector<8x8xf32>
    %cst_834 = arith.constant dense<0.000000e+00> : vector<8x16xf32>
    %1281 = tpu.matmul %1280, %1270, %cst_834 {dimension_numbers = #tpu.dot_dimension_numbers<[1], [0], [0], [1], [0, 0, 1, 1], [], []>} : vector<8x8xf32>, vector<8x16xf32>, vector<8x16xf32> -> vector<8x16xf32>
    %c4_835 = arith.constant 4 : index
    %c0_836 = arith.constant 0 : index
    %c0_837 = arith.constant 0 : index
    %1282 = vector.load %arg8[%c4_835, %c0_836, %c0_837] : memref<8x16x64xf32, #tpu.memory_space<vmem>>, vector<1x16x64xf32>
    %1283 = vector.shape_cast %1282 : vector<1x16x64xf32> to vector<16x64xf32>
    %cst_838 = arith.constant dense<0.000000e+00> : vector<8x64xf32>
    %1284 = tpu.matmul %1281, %1283, %cst_838 {dimension_numbers = #tpu.dot_dimension_numbers<[1], [0], [0], [1], [0, 0, 1, 1], [], []>} : vector<8x16xf32>, vector<16x64xf32>, vector<8x64xf32> -> vector<8x64xf32>
    %c5_839 = arith.constant 5 : index
    %c0_840 = arith.constant 0 : index
    %c0_841 = arith.constant 0 : index
    %1285 = vector.load %arg9[%c5_839, %c0_840, %c0_841] : memref<8x64x16xf32, #tpu.memory_space<vmem>>, vector<1x64x16xf32>
    %1286 = vector.shape_cast %1285 : vector<1x64x16xf32> to vector<64x16xf32>
    %cst_842 = arith.constant dense<0.000000e+00> : vector<8x16xf32>
    %1287 = tpu.matmul %1253, %1286, %cst_842 {dimension_numbers = #tpu.dot_dimension_numbers<[1], [0], [0], [1], [0, 0, 1, 1], [], []>} : vector<8x64xf32>, vector<64x16xf32>, vector<8x16xf32> -> vector<8x16xf32>
    %c5_843 = arith.constant 5 : index
    %c0_844 = arith.constant 0 : index
    %c0_845 = arith.constant 0 : index
    %1288 = vector.load %arg5[%c5_843, %c0_844, %c0_845] : memref<8x1x16xf32, #tpu.memory_space<vmem>>, vector<1x1x16xf32>
    %1289 = vector.shape_cast %1288 : vector<1x1x16xf32> to vector<1x16xf32>
    %1290 = vector.broadcast %1289 : vector<1x16xf32> to vector<8x16xf32>
    %1291 = arith.addf %1287, %1290 : vector<8x16xf32>
    %c5_846 = arith.constant 5 : index
    %c0_847 = arith.constant 0 : index
    %c0_848 = arith.constant 0 : index
    %1292 = vector.load %arg7[%c5_846, %c0_847, %c0_848] : memref<8x64x16xf32, #tpu.memory_space<vmem>>, vector<1x64x16xf32>
    %1293 = vector.shape_cast %1292 : vector<1x64x16xf32> to vector<64x16xf32>
    %cst_849 = arith.constant dense<0.000000e+00> : vector<8x16xf32>
    %1294 = tpu.matmul %662, %1293, %cst_849 {dimension_numbers = #tpu.dot_dimension_numbers<[1], [0], [0], [1], [0, 0, 1, 1], [], []>} : vector<8x64xf32>, vector<64x16xf32>, vector<8x16xf32> -> vector<8x16xf32>
    %c5_850 = arith.constant 5 : index
    %c0_851 = arith.constant 0 : index
    %c0_852 = arith.constant 0 : index
    %1295 = vector.load %arg10[%c5_850, %c0_851, %c0_852] : memref<8x64x16xf32, #tpu.memory_space<vmem>>, vector<1x64x16xf32>
    %1296 = vector.shape_cast %1295 : vector<1x64x16xf32> to vector<64x16xf32>
    %cst_853 = arith.constant dense<0.000000e+00> : vector<8x16xf32>
    %1297 = tpu.matmul %662, %1296, %cst_853 {dimension_numbers = #tpu.dot_dimension_numbers<[1], [0], [0], [1], [0, 0, 1, 1], [], []>} : vector<8x64xf32>, vector<64x16xf32>, vector<8x16xf32> -> vector<8x16xf32>
    %c5_854 = arith.constant 5 : index
    %c0_855 = arith.constant 0 : index
    %c0_856 = arith.constant 0 : index
    %1298 = vector.load %arg6[%c5_854, %c0_855, %c0_856] : memref<8x1x16xf32, #tpu.memory_space<vmem>>, vector<1x1x16xf32>
    %1299 = vector.shape_cast %1298 : vector<1x1x16xf32> to vector<1x16xf32>
    %1300 = vector.broadcast %1299 : vector<1x16xf32> to vector<8x16xf32>
    %1301 = arith.addf %1297, %1300 : vector<8x16xf32>
    %cst_857 = arith.constant dense<0.000000e+00> : vector<8x8xf32>
    %1302 = tpu.matmul %1291, %1294, %cst_857 {dimension_numbers = #tpu.dot_dimension_numbers<[1], [1], [0], [0], [0, 0, 1, 0], [], []>} : vector<8x16xf32>, vector<8x16xf32>, vector<8x8xf32> -> vector<8x8xf32>
    %cst_858 = arith.constant dense<0xFF800000> : vector<8xf32>
    %1303 = vector.multi_reduction <maximumf>, %1302, %cst_858 [1] : vector<8x8xf32> to vector<8xf32>
    %1304 = vector.shape_cast %1303 : vector<8xf32> to vector<8x1xf32>
    %1305 = vector.broadcast %1304 : vector<8x1xf32> to vector<8x8xf32>
    %1306 = arith.subf %1302, %1305 : vector<8x8xf32>
    %1307 = math.exp %1306 : vector<8x8xf32>
    %cst_859 = arith.constant dense<0.000000e+00> : vector<8xf32>
    %1308 = vector.multi_reduction <add>, %1307, %cst_859 [1] : vector<8x8xf32> to vector<8xf32>
    %1309 = vector.shape_cast %1308 : vector<8xf32> to vector<8x1xf32>
    %1310 = vector.broadcast %1309 : vector<8x1xf32> to vector<8x8xf32>
    %1311 = arith.divf %1307, %1310 : vector<8x8xf32>
    %cst_860 = arith.constant dense<0.000000e+00> : vector<8x16xf32>
    %1312 = tpu.matmul %1311, %1301, %cst_860 {dimension_numbers = #tpu.dot_dimension_numbers<[1], [0], [0], [1], [0, 0, 1, 1], [], []>} : vector<8x8xf32>, vector<8x16xf32>, vector<8x16xf32> -> vector<8x16xf32>
    %c5_861 = arith.constant 5 : index
    %c0_862 = arith.constant 0 : index
    %c0_863 = arith.constant 0 : index
    %1313 = vector.load %arg8[%c5_861, %c0_862, %c0_863] : memref<8x16x64xf32, #tpu.memory_space<vmem>>, vector<1x16x64xf32>
    %1314 = vector.shape_cast %1313 : vector<1x16x64xf32> to vector<16x64xf32>
    %cst_864 = arith.constant dense<0.000000e+00> : vector<8x64xf32>
    %1315 = tpu.matmul %1312, %1314, %cst_864 {dimension_numbers = #tpu.dot_dimension_numbers<[1], [0], [0], [1], [0, 0, 1, 1], [], []>} : vector<8x16xf32>, vector<16x64xf32>, vector<8x64xf32> -> vector<8x64xf32>
    %1316 = arith.addf %1284, %1315 : vector<8x64xf32>
    %c6_865 = arith.constant 6 : index
    %c0_866 = arith.constant 0 : index
    %c0_867 = arith.constant 0 : index
    %1317 = vector.load %arg9[%c6_865, %c0_866, %c0_867] : memref<8x64x16xf32, #tpu.memory_space<vmem>>, vector<1x64x16xf32>
    %1318 = vector.shape_cast %1317 : vector<1x64x16xf32> to vector<64x16xf32>
    %cst_868 = arith.constant dense<0.000000e+00> : vector<8x16xf32>
    %1319 = tpu.matmul %1253, %1318, %cst_868 {dimension_numbers = #tpu.dot_dimension_numbers<[1], [0], [0], [1], [0, 0, 1, 1], [], []>} : vector<8x64xf32>, vector<64x16xf32>, vector<8x16xf32> -> vector<8x16xf32>
    %c6_869 = arith.constant 6 : index
    %c0_870 = arith.constant 0 : index
    %c0_871 = arith.constant 0 : index
    %1320 = vector.load %arg5[%c6_869, %c0_870, %c0_871] : memref<8x1x16xf32, #tpu.memory_space<vmem>>, vector<1x1x16xf32>
    %1321 = vector.shape_cast %1320 : vector<1x1x16xf32> to vector<1x16xf32>
    %1322 = vector.broadcast %1321 : vector<1x16xf32> to vector<8x16xf32>
    %1323 = arith.addf %1319, %1322 : vector<8x16xf32>
    %c6_872 = arith.constant 6 : index
    %c0_873 = arith.constant 0 : index
    %c0_874 = arith.constant 0 : index
    %1324 = vector.load %arg7[%c6_872, %c0_873, %c0_874] : memref<8x64x16xf32, #tpu.memory_space<vmem>>, vector<1x64x16xf32>
    %1325 = vector.shape_cast %1324 : vector<1x64x16xf32> to vector<64x16xf32>
    %cst_875 = arith.constant dense<0.000000e+00> : vector<8x16xf32>
    %1326 = tpu.matmul %662, %1325, %cst_875 {dimension_numbers = #tpu.dot_dimension_numbers<[1], [0], [0], [1], [0, 0, 1, 1], [], []>} : vector<8x64xf32>, vector<64x16xf32>, vector<8x16xf32> -> vector<8x16xf32>
    %c6_876 = arith.constant 6 : index
    %c0_877 = arith.constant 0 : index
    %c0_878 = arith.constant 0 : index
    %1327 = vector.load %arg10[%c6_876, %c0_877, %c0_878] : memref<8x64x16xf32, #tpu.memory_space<vmem>>, vector<1x64x16xf32>
    %1328 = vector.shape_cast %1327 : vector<1x64x16xf32> to vector<64x16xf32>
    %cst_879 = arith.constant dense<0.000000e+00> : vector<8x16xf32>
    %1329 = tpu.matmul %662, %1328, %cst_879 {dimension_numbers = #tpu.dot_dimension_numbers<[1], [0], [0], [1], [0, 0, 1, 1], [], []>} : vector<8x64xf32>, vector<64x16xf32>, vector<8x16xf32> -> vector<8x16xf32>
    %c6_880 = arith.constant 6 : index
    %c0_881 = arith.constant 0 : index
    %c0_882 = arith.constant 0 : index
    %1330 = vector.load %arg6[%c6_880, %c0_881, %c0_882] : memref<8x1x16xf32, #tpu.memory_space<vmem>>, vector<1x1x16xf32>
    %1331 = vector.shape_cast %1330 : vector<1x1x16xf32> to vector<1x16xf32>
    %1332 = vector.broadcast %1331 : vector<1x16xf32> to vector<8x16xf32>
    %1333 = arith.addf %1329, %1332 : vector<8x16xf32>
    %cst_883 = arith.constant dense<0.000000e+00> : vector<8x8xf32>
    %1334 = tpu.matmul %1323, %1326, %cst_883 {dimension_numbers = #tpu.dot_dimension_numbers<[1], [1], [0], [0], [0, 0, 1, 0], [], []>} : vector<8x16xf32>, vector<8x16xf32>, vector<8x8xf32> -> vector<8x8xf32>
    %cst_884 = arith.constant dense<0xFF800000> : vector<8xf32>
    %1335 = vector.multi_reduction <maximumf>, %1334, %cst_884 [1] : vector<8x8xf32> to vector<8xf32>
    %1336 = vector.shape_cast %1335 : vector<8xf32> to vector<8x1xf32>
    %1337 = vector.broadcast %1336 : vector<8x1xf32> to vector<8x8xf32>
    %1338 = arith.subf %1334, %1337 : vector<8x8xf32>
    %1339 = math.exp %1338 : vector<8x8xf32>
    %cst_885 = arith.constant dense<0.000000e+00> : vector<8xf32>
    %1340 = vector.multi_reduction <add>, %1339, %cst_885 [1] : vector<8x8xf32> to vector<8xf32>
    %1341 = vector.shape_cast %1340 : vector<8xf32> to vector<8x1xf32>
    %1342 = vector.broadcast %1341 : vector<8x1xf32> to vector<8x8xf32>
    %1343 = arith.divf %1339, %1342 : vector<8x8xf32>
    %cst_886 = arith.constant dense<0.000000e+00> : vector<8x16xf32>
    %1344 = tpu.matmul %1343, %1333, %cst_886 {dimension_numbers = #tpu.dot_dimension_numbers<[1], [0], [0], [1], [0, 0, 1, 1], [], []>} : vector<8x8xf32>, vector<8x16xf32>, vector<8x16xf32> -> vector<8x16xf32>
    %c6_887 = arith.constant 6 : index
    %c0_888 = arith.constant 0 : index
    %c0_889 = arith.constant 0 : index
    %1345 = vector.load %arg8[%c6_887, %c0_888, %c0_889] : memref<8x16x64xf32, #tpu.memory_space<vmem>>, vector<1x16x64xf32>
    %1346 = vector.shape_cast %1345 : vector<1x16x64xf32> to vector<16x64xf32>
    %cst_890 = arith.constant dense<0.000000e+00> : vector<8x64xf32>
    %1347 = tpu.matmul %1344, %1346, %cst_890 {dimension_numbers = #tpu.dot_dimension_numbers<[1], [0], [0], [1], [0, 0, 1, 1], [], []>} : vector<8x16xf32>, vector<16x64xf32>, vector<8x64xf32> -> vector<8x64xf32>
    %1348 = arith.addf %1316, %1347 : vector<8x64xf32>
    %c7_891 = arith.constant 7 : index
    %c0_892 = arith.constant 0 : index
    %c0_893 = arith.constant 0 : index
    %1349 = vector.load %arg9[%c7_891, %c0_892, %c0_893] : memref<8x64x16xf32, #tpu.memory_space<vmem>>, vector<1x64x16xf32>
    %1350 = vector.shape_cast %1349 : vector<1x64x16xf32> to vector<64x16xf32>
    %cst_894 = arith.constant dense<0.000000e+00> : vector<8x16xf32>
    %1351 = tpu.matmul %1253, %1350, %cst_894 {dimension_numbers = #tpu.dot_dimension_numbers<[1], [0], [0], [1], [0, 0, 1, 1], [], []>} : vector<8x64xf32>, vector<64x16xf32>, vector<8x16xf32> -> vector<8x16xf32>
    %c7_895 = arith.constant 7 : index
    %c0_896 = arith.constant 0 : index
    %c0_897 = arith.constant 0 : index
    %1352 = vector.load %arg5[%c7_895, %c0_896, %c0_897] : memref<8x1x16xf32, #tpu.memory_space<vmem>>, vector<1x1x16xf32>
    %1353 = vector.shape_cast %1352 : vector<1x1x16xf32> to vector<1x16xf32>
    %1354 = vector.broadcast %1353 : vector<1x16xf32> to vector<8x16xf32>
    %1355 = arith.addf %1351, %1354 : vector<8x16xf32>
    %c7_898 = arith.constant 7 : index
    %c0_899 = arith.constant 0 : index
    %c0_900 = arith.constant 0 : index
    %1356 = vector.load %arg7[%c7_898, %c0_899, %c0_900] : memref<8x64x16xf32, #tpu.memory_space<vmem>>, vector<1x64x16xf32>
    %1357 = vector.shape_cast %1356 : vector<1x64x16xf32> to vector<64x16xf32>
    %cst_901 = arith.constant dense<0.000000e+00> : vector<8x16xf32>
    %1358 = tpu.matmul %662, %1357, %cst_901 {dimension_numbers = #tpu.dot_dimension_numbers<[1], [0], [0], [1], [0, 0, 1, 1], [], []>} : vector<8x64xf32>, vector<64x16xf32>, vector<8x16xf32> -> vector<8x16xf32>
    %c7_902 = arith.constant 7 : index
    %c0_903 = arith.constant 0 : index
    %c0_904 = arith.constant 0 : index
    %1359 = vector.load %arg10[%c7_902, %c0_903, %c0_904] : memref<8x64x16xf32, #tpu.memory_space<vmem>>, vector<1x64x16xf32>
    %1360 = vector.shape_cast %1359 : vector<1x64x16xf32> to vector<64x16xf32>
    %cst_905 = arith.constant dense<0.000000e+00> : vector<8x16xf32>
    %1361 = tpu.matmul %662, %1360, %cst_905 {dimension_numbers = #tpu.dot_dimension_numbers<[1], [0], [0], [1], [0, 0, 1, 1], [], []>} : vector<8x64xf32>, vector<64x16xf32>, vector<8x16xf32> -> vector<8x16xf32>
    %c7_906 = arith.constant 7 : index
    %c0_907 = arith.constant 0 : index
    %c0_908 = arith.constant 0 : index
    %1362 = vector.load %arg6[%c7_906, %c0_907, %c0_908] : memref<8x1x16xf32, #tpu.memory_space<vmem>>, vector<1x1x16xf32>
    %1363 = vector.shape_cast %1362 : vector<1x1x16xf32> to vector<1x16xf32>
    %1364 = vector.broadcast %1363 : vector<1x16xf32> to vector<8x16xf32>
    %1365 = arith.addf %1361, %1364 : vector<8x16xf32>
    %cst_909 = arith.constant dense<0.000000e+00> : vector<8x8xf32>
    %1366 = tpu.matmul %1355, %1358, %cst_909 {dimension_numbers = #tpu.dot_dimension_numbers<[1], [1], [0], [0], [0, 0, 1, 0], [], []>} : vector<8x16xf32>, vector<8x16xf32>, vector<8x8xf32> -> vector<8x8xf32>
    %cst_910 = arith.constant dense<0xFF800000> : vector<8xf32>
    %1367 = vector.multi_reduction <maximumf>, %1366, %cst_910 [1] : vector<8x8xf32> to vector<8xf32>
    %1368 = vector.shape_cast %1367 : vector<8xf32> to vector<8x1xf32>
    %1369 = vector.broadcast %1368 : vector<8x1xf32> to vector<8x8xf32>
    %1370 = arith.subf %1366, %1369 : vector<8x8xf32>
    %1371 = math.exp %1370 : vector<8x8xf32>
    %cst_911 = arith.constant dense<0.000000e+00> : vector<8xf32>
    %1372 = vector.multi_reduction <add>, %1371, %cst_911 [1] : vector<8x8xf32> to vector<8xf32>
    %1373 = vector.shape_cast %1372 : vector<8xf32> to vector<8x1xf32>
    %1374 = vector.broadcast %1373 : vector<8x1xf32> to vector<8x8xf32>
    %1375 = arith.divf %1371, %1374 : vector<8x8xf32>
    %cst_912 = arith.constant dense<0.000000e+00> : vector<8x16xf32>
    %1376 = tpu.matmul %1375, %1365, %cst_912 {dimension_numbers = #tpu.dot_dimension_numbers<[1], [0], [0], [1], [0, 0, 1, 1], [], []>} : vector<8x8xf32>, vector<8x16xf32>, vector<8x16xf32> -> vector<8x16xf32>
    %c7_913 = arith.constant 7 : index
    %c0_914 = arith.constant 0 : index
    %c0_915 = arith.constant 0 : index
    %1377 = vector.load %arg8[%c7_913, %c0_914, %c0_915] : memref<8x16x64xf32, #tpu.memory_space<vmem>>, vector<1x16x64xf32>
    %1378 = vector.shape_cast %1377 : vector<1x16x64xf32> to vector<16x64xf32>
    %cst_916 = arith.constant dense<0.000000e+00> : vector<8x64xf32>
    %1379 = tpu.matmul %1376, %1378, %cst_916 {dimension_numbers = #tpu.dot_dimension_numbers<[1], [0], [0], [1], [0, 0, 1, 1], [], []>} : vector<8x16xf32>, vector<16x64xf32>, vector<8x64xf32> -> vector<8x64xf32>
    %1380 = arith.addf %1348, %1379 : vector<8x64xf32>
    %c1_917 = arith.constant 1 : index
    %c0_918 = arith.constant 0 : index
    %c0_919 = arith.constant 0 : index
    %1381 = vector.load %arg4[%c1_917, %c0_918, %c0_919] : memref<2x1x64xf32, #tpu.memory_space<vmem>>, vector<1x1x64xf32>
    %1382 = vector.shape_cast %1381 : vector<1x1x64xf32> to vector<1x64xf32>
    %1383 = vector.broadcast %1382 : vector<1x64xf32> to vector<8x64xf32>
    %1384 = arith.addf %1380, %1383 : vector<8x64xf32>
    %1385 = arith.addf %1229, %1384 : vector<8x64xf32>
    %c1_920 = arith.constant 1 : index
    %c0_921 = arith.constant 0 : index
    %c0_922 = arith.constant 0 : index
    %1386 = vector.load %arg18[%c1_920, %c0_921, %c0_922] : memref<2x1x64xf32, #tpu.memory_space<vmem>>, vector<1x1x64xf32>
    %1387 = vector.shape_cast %1386 : vector<1x1x64xf32> to vector<1x64xf32>
    %c1_923 = arith.constant 1 : index
    %c0_924 = arith.constant 0 : index
    %c0_925 = arith.constant 0 : index
    %1388 = vector.load %arg17[%c1_923, %c0_924, %c0_925] : memref<2x1x64xf32, #tpu.memory_space<vmem>>, vector<1x1x64xf32>
    %1389 = vector.shape_cast %1388 : vector<1x1x64xf32> to vector<1x64xf32>
    %cst_926 = arith.constant dense<0.000000e+00> : vector<8xf32>
    %1390 = vector.multi_reduction <add>, %1385, %cst_926 [1] : vector<8x64xf32> to vector<8xf32>
    %1391 = vector.shape_cast %1390 : vector<8xf32> to vector<8x1xf32>
    %cst_927 = arith.constant 6.400000e+01 : f32
    %1392 = vector.broadcast %cst_927 : f32 to vector<8x1xf32>
    %1393 = arith.divf %1391, %1392 : vector<8x1xf32>
    %1394 = vector.broadcast %1393 : vector<8x1xf32> to vector<8x64xf32>
    %1395 = arith.subf %1385, %1394 : vector<8x64xf32>
    %1396 = arith.mulf %1395, %1395 : vector<8x64xf32>
    %cst_928 = arith.constant dense<0.000000e+00> : vector<8xf32>
    %1397 = vector.multi_reduction <add>, %1396, %cst_928 [1] : vector<8x64xf32> to vector<8xf32>
    %1398 = vector.shape_cast %1397 : vector<8xf32> to vector<8x1xf32>
    %cst_929 = arith.constant 6.400000e+01 : f32
    %1399 = vector.broadcast %cst_929 : f32 to vector<8x1xf32>
    %1400 = arith.divf %1398, %1399 : vector<8x1xf32>
    %cst_930 = arith.constant 9.99999974E-6 : f32
    %1401 = vector.broadcast %cst_930 : f32 to vector<8x1xf32>
    %1402 = arith.addf %1400, %1401 : vector<8x1xf32>
    %1403 = math.rsqrt %1402 : vector<8x1xf32>
    %1404 = vector.broadcast %1403 : vector<8x1xf32> to vector<8x64xf32>
    %1405 = arith.mulf %1395, %1404 : vector<8x64xf32>
    %1406 = vector.broadcast %1387 : vector<1x64xf32> to vector<8x64xf32>
    %1407 = arith.mulf %1405, %1406 : vector<8x64xf32>
    %1408 = vector.broadcast %1389 : vector<1x64xf32> to vector<8x64xf32>
    %1409 = arith.addf %1407, %1408 : vector<8x64xf32>
    %c1_931 = arith.constant 1 : index
    %c0_932 = arith.constant 0 : index
    %c0_933 = arith.constant 0 : index
    %1410 = vector.load %arg14[%c1_931, %c0_932, %c0_933] : memref<2x64x128xf32, #tpu.memory_space<vmem>>, vector<1x64x128xf32>
    %1411 = vector.shape_cast %1410 : vector<1x64x128xf32> to vector<64x128xf32>
    %cst_934 = arith.constant dense<0.000000e+00> : vector<8x128xf32>
    %1412 = tpu.matmul %1409, %1411, %cst_934 {dimension_numbers = #tpu.dot_dimension_numbers<[1], [0], [0], [1], [0, 0, 1, 1], [], []>} : vector<8x64xf32>, vector<64x128xf32>, vector<8x128xf32> -> vector<8x128xf32>
    %c1_935 = arith.constant 1 : index
    %c0_936 = arith.constant 0 : index
    %c0_937 = arith.constant 0 : index
    %1413 = vector.load %arg13[%c1_935, %c0_936, %c0_937] : memref<2x1x128xf32, #tpu.memory_space<vmem>>, vector<1x1x128xf32>
    %1414 = vector.shape_cast %1413 : vector<1x1x128xf32> to vector<1x128xf32>
    %1415 = vector.broadcast %1414 : vector<1x128xf32> to vector<8x128xf32>
    %1416 = arith.addf %1412, %1415 : vector<8x128xf32>
    %cst_938 = arith.constant 5.000000e-01 : f32
    %1417 = vector.broadcast %cst_938 : f32 to vector<8x128xf32>
    %1418 = arith.mulf %1417, %1416 : vector<8x128xf32>
    %cst_939 = arith.constant 0.707106769 : f32
    %1419 = vector.broadcast %cst_939 : f32 to vector<8x128xf32>
    %1420 = arith.mulf %1416, %1419 : vector<8x128xf32>
    %cst_940 = arith.constant 0.000000e+00 : f32
    %1421 = vector.broadcast %cst_940 : f32 to vector<8x128xf32>
    %1422 = arith.cmpf oge, %1420, %1421 : vector<8x128xf32>
    %cst_941 = arith.constant 1.000000e+00 : f32
    %cst_942 = arith.constant -1.000000e+00 : f32
    %1423 = vector.broadcast %cst_941 : f32 to vector<8x128xf32>
    %1424 = vector.broadcast %cst_942 : f32 to vector<8x128xf32>
    %1425 = arith.select %1422, %1423, %1424 : vector<8x128xi1>, vector<8x128xf32>
    %1426 = math.absf %1420 : vector<8x128xf32>
    %cst_943 = arith.constant 0.327591091 : f32
    %1427 = vector.broadcast %cst_943 : f32 to vector<8x128xf32>
    %1428 = arith.mulf %1427, %1426 : vector<8x128xf32>
    %cst_944 = arith.constant 1.000000e+00 : f32
    %1429 = vector.broadcast %cst_944 : f32 to vector<8x128xf32>
    %1430 = arith.addf %1429, %1428 : vector<8x128xf32>
    %cst_945 = arith.constant 1.000000e+00 : f32
    %1431 = vector.broadcast %cst_945 : f32 to vector<8x128xf32>
    %1432 = arith.divf %1431, %1430 : vector<8x128xf32>
    %cst_946 = arith.constant 1.06140542 : f32
    %1433 = vector.broadcast %cst_946 : f32 to vector<8x128xf32>
    %1434 = arith.mulf %1433, %1432 : vector<8x128xf32>
    %cst_947 = arith.constant -1.45315206 : f32
    %1435 = vector.broadcast %cst_947 : f32 to vector<8x128xf32>
    %1436 = arith.addf %1434, %1435 : vector<8x128xf32>
    %1437 = arith.mulf %1436, %1432 : vector<8x128xf32>
    %cst_948 = arith.constant 1.42141378 : f32
    %1438 = vector.broadcast %cst_948 : f32 to vector<8x128xf32>
    %1439 = arith.addf %1437, %1438 : vector<8x128xf32>
    %1440 = arith.mulf %1439, %1432 : vector<8x128xf32>
    %cst_949 = arith.constant -0.284496725 : f32
    %1441 = vector.broadcast %cst_949 : f32 to vector<8x128xf32>
    %1442 = arith.addf %1440, %1441 : vector<8x128xf32>
    %1443 = arith.mulf %1442, %1432 : vector<8x128xf32>
    %cst_950 = arith.constant 0.254829586 : f32
    %1444 = vector.broadcast %cst_950 : f32 to vector<8x128xf32>
    %1445 = arith.addf %1443, %1444 : vector<8x128xf32>
    %1446 = arith.mulf %1445, %1432 : vector<8x128xf32>
    %cst_951 = arith.constant 0.000000e+00 : f32
    %1447 = vector.broadcast %cst_951 : f32 to vector<8x128xf32>
    %1448 = arith.subf %1447, %1426 : vector<8x128xf32>
    %1449 = arith.mulf %1448, %1426 : vector<8x128xf32>
    %1450 = math.exp %1449 : vector<8x128xf32>
    %1451 = arith.mulf %1446, %1450 : vector<8x128xf32>
    %cst_952 = arith.constant 1.000000e+00 : f32
    %1452 = vector.broadcast %cst_952 : f32 to vector<8x128xf32>
    %1453 = arith.subf %1452, %1451 : vector<8x128xf32>
    %1454 = arith.mulf %1425, %1453 : vector<8x128xf32>
    %cst_953 = arith.constant 1.000000e+00 : f32
    %1455 = vector.broadcast %cst_953 : f32 to vector<8x128xf32>
    %1456 = arith.addf %1455, %1454 : vector<8x128xf32>
    %1457 = arith.mulf %1418, %1456 : vector<8x128xf32>
    %c1_954 = arith.constant 1 : index
    %c0_955 = arith.constant 0 : index
    %c0_956 = arith.constant 0 : index
    %1458 = vector.load %arg16[%c1_954, %c0_955, %c0_956] : memref<2x128x64xf32, #tpu.memory_space<vmem>>, vector<1x128x64xf32>
    %1459 = vector.shape_cast %1458 : vector<1x128x64xf32> to vector<128x64xf32>
    %cst_957 = arith.constant dense<0.000000e+00> : vector<8x64xf32>
    %1460 = tpu.matmul %1457, %1459, %cst_957 {dimension_numbers = #tpu.dot_dimension_numbers<[1], [0], [0], [1], [0, 0, 1, 1], [], []>} : vector<8x128xf32>, vector<128x64xf32>, vector<8x64xf32> -> vector<8x64xf32>
    %c1_958 = arith.constant 1 : index
    %c0_959 = arith.constant 0 : index
    %c0_960 = arith.constant 0 : index
    %1461 = vector.load %arg15[%c1_958, %c0_959, %c0_960] : memref<2x1x64xf32, #tpu.memory_space<vmem>>, vector<1x1x64xf32>
    %1462 = vector.shape_cast %1461 : vector<1x1x64xf32> to vector<1x64xf32>
    %1463 = vector.broadcast %1462 : vector<1x64xf32> to vector<8x64xf32>
    %1464 = arith.addf %1460, %1463 : vector<8x64xf32>
    %1465 = arith.addf %1385, %1464 : vector<8x64xf32>
    %c0_961 = arith.constant 0 : index
    %c0_962 = arith.constant 0 : index
    %1466 = vector.load %arg20[%c0_961, %c0_962] : memref<1x64xf32, #tpu.memory_space<vmem>>, vector<1x64xf32>
    %c0_963 = arith.constant 0 : index
    %c0_964 = arith.constant 0 : index
    %1467 = vector.load %arg19[%c0_963, %c0_964] : memref<1x64xf32, #tpu.memory_space<vmem>>, vector<1x64xf32>
    %cst_965 = arith.constant dense<0.000000e+00> : vector<8xf32>
    %1468 = vector.multi_reduction <add>, %1465, %cst_965 [1] : vector<8x64xf32> to vector<8xf32>
    %1469 = vector.shape_cast %1468 : vector<8xf32> to vector<8x1xf32>
    %cst_966 = arith.constant 6.400000e+01 : f32
    %1470 = vector.broadcast %cst_966 : f32 to vector<8x1xf32>
    %1471 = arith.divf %1469, %1470 : vector<8x1xf32>
    %1472 = vector.broadcast %1471 : vector<8x1xf32> to vector<8x64xf32>
    %1473 = arith.subf %1465, %1472 : vector<8x64xf32>
    %1474 = arith.mulf %1473, %1473 : vector<8x64xf32>
    %cst_967 = arith.constant dense<0.000000e+00> : vector<8xf32>
    %1475 = vector.multi_reduction <add>, %1474, %cst_967 [1] : vector<8x64xf32> to vector<8xf32>
    %1476 = vector.shape_cast %1475 : vector<8xf32> to vector<8x1xf32>
    %cst_968 = arith.constant 6.400000e+01 : f32
    %1477 = vector.broadcast %cst_968 : f32 to vector<8x1xf32>
    %1478 = arith.divf %1476, %1477 : vector<8x1xf32>
    %cst_969 = arith.constant 9.99999974E-6 : f32
    %1479 = vector.broadcast %cst_969 : f32 to vector<8x1xf32>
    %1480 = arith.addf %1478, %1479 : vector<8x1xf32>
    %1481 = math.rsqrt %1480 : vector<8x1xf32>
    %1482 = vector.broadcast %1481 : vector<8x1xf32> to vector<8x64xf32>
    %1483 = arith.mulf %1473, %1482 : vector<8x64xf32>
    %1484 = vector.broadcast %1466 : vector<1x64xf32> to vector<8x64xf32>
    %1485 = arith.mulf %1483, %1484 : vector<8x64xf32>
    %1486 = vector.broadcast %1467 : vector<1x64xf32> to vector<8x64xf32>
    %1487 = arith.addf %1485, %1486 : vector<8x64xf32>
    %c0_970 = arith.constant 0 : index
    %c0_971 = arith.constant 0 : index
    %1488 = vector.load %arg48[%c0_970, %c0_971] : memref<128x64xf32, #tpu.memory_space<vmem>>, vector<128x64xf32>
    %cst_972 = arith.constant dense<0.000000e+00> : vector<8x128xf32>
    %1489 = tpu.matmul %1487, %1488, %cst_972 {dimension_numbers = #tpu.dot_dimension_numbers<[1], [1], [0], [0], [0, 0, 1, 0], [], []>} : vector<8x64xf32>, vector<128x64xf32>, vector<8x128xf32> -> vector<8x128xf32>
    %cst_973 = arith.constant dense<0xFF800000> : vector<8xf32>
    %1490 = vector.multi_reduction <maximumf>, %1489, %cst_973 [1] : vector<8x128xf32> to vector<8xf32>
    %1491 = vector.shape_cast %1490 : vector<8xf32> to vector<8x1xf32>
    %1492 = vector.broadcast %1491 : vector<8x1xf32> to vector<8x128xf32>
    %1493 = arith.subf %1489, %1492 : vector<8x128xf32>
    %1494 = math.exp %1493 : vector<8x128xf32>
    %cst_974 = arith.constant dense<0.000000e+00> : vector<8xf32>
    %1495 = vector.multi_reduction <add>, %1494, %cst_974 [1] : vector<8x128xf32> to vector<8xf32>
    %1496 = vector.shape_cast %1495 : vector<8xf32> to vector<8x1xf32>
    %1497 = math.log %1496 : vector<8x1xf32>
    %1498 = arith.addf %1497, %1491 : vector<8x1xf32>
    %1499 = vector.broadcast %1498 : vector<8x1xf32> to vector<8x128xf32>
    %1500 = arith.subf %1489, %1499 : vector<8x128xf32>
    %c0_975 = arith.constant 0 : index
    %c0_976 = arith.constant 0 : index
    %1501 = vector.load %arg52[%c0_975, %c0_976] : memref<8x128xf32, #tpu.memory_space<vmem>>, vector<8x128xf32>
    %1502 = arith.mulf %1500, %1501 : vector<8x128xf32>
    %cst_977 = arith.constant dense<0.000000e+00> : vector<8xf32>
    %1503 = vector.multi_reduction <add>, %1502, %cst_977 [1] : vector<8x128xf32> to vector<8xf32>
    %1504 = vector.shape_cast %1503 : vector<8xf32> to vector<8x1xf32>
    %cst_978 = arith.constant dense<0.000000e+00> : vector<1xf32>
    %1505 = vector.multi_reduction <add>, %1504, %cst_978 [0] : vector<8x1xf32> to vector<1xf32>
    %1506 = vector.shape_cast %1505 : vector<1xf32> to vector<1x1xf32>
    %1507 = math.exp %1506 : vector<1x1xf32>
    %c0_979 = arith.constant 0 : index
    %c0_980 = arith.constant 0 : index
    %1508 = vector.load %arg53[%c0_979, %c0_980] : memref<1x1xf32, #tpu.memory_space<vmem>>, vector<1x1xf32>
    tpu.vector_store %arg53[%c0_979, %c0_980], %1507 {strides = array<i32>} : memref<1x1xf32, #tpu.memory_space<vmem>>, vector<1x1xf32>,
    return
  }
}

</mosaic_0001>

<bundles_post_ra>
// kernel: whisper_likelihood.1
= control target key start
LH: loop header
LB: loop body
LE: loop exit
PB: predicated region body
PF: predicated region fallthrough
CT: control target
= control target key end

     0   :  { %s19061_s6 = smov 1   ;;  %s19062_s10 = smov 2   ;;  %s21947_s0 = inlined_call_operand.smem [shape: u32[54], index: -1, kind: input, shape index: {}] }
   0x1   :  { %s19127_s5 = sld [smem:[%s21947_s0]]   ;;  %s19063_s14 = smov 3  }
   0x2   :  { %s19132_s9 = sld [smem:[%s21947_s0 + %s19061_s6]]   ;;  %s19064_s18 = smov 4  }
   0x3   :  { %s19137_s13 = sld [smem:[%s21947_s0 + %s19062_s10]]   ;;  %s19065_s22 = smov 5  }
   0x4   :  { %s19142_s17 = sld [smem:[%s21947_s0 + %s19063_s14]]   ;;  %s19066_s26 = smov 6  }
   0x5   :  { %s19147_s21 = sld [smem:[%s21947_s0 + %s19064_s18]]   ;;  %s19067_s30 = smov 7  }
   0x6   :  { %s19152_s25 = sld [smem:[%s21947_s0 + %s19065_s22]]   ;;  %s19068_s4 = smov 8  }
   0x7   :  { %s19157_s29 = sld [smem:[%s21947_s0 + %s19066_s26]]   ;;  %s19069_s10 = smov 9  }
   0x8   :  { %s19162_s3 = sld [smem:[%s21947_s0 + %s19067_s30]]   ;;  %s19070_s15 = smov 10  }
   0x9   :  { %s19167_s8 = sld [smem:[%s21947_s0 + %s19068_s4]]   ;;  %s19071_s20 = smov 11  }
   0xa   :  { %s19172_s14 = sld [smem:[%s21947_s0 + %s19069_s10]]   ;;  %s19072_s26 = smov 12  }
   0xb   :  { %21979 = sst [smem:[#allocation5_spill]] %s19147_s21  ;;  %s19073_s1 = smov 13  }
   0xc   :  { %21980 = sst [smem:[#allocation6_spill]] %s19152_s25  ;;  %s19074_s7 = smov 14  }
   0xd   :  { %21981 = sst [smem:[#allocation7_spill]] %s19157_s29  ;;  %s19076_s22 = smov 16  }
   0xe   :  { %21982 = sst [smem:[#allocation8_spill]] %s19162_s3  ;;  %s19077_s28 = smov 17  }
   0xf   :  { %21983 = sst [smem:[#allocation9_spill]] %s19167_s8  ;;  %s19112_s23 = smov 52  }
  0x10   :  { %21984 = sst [smem:[#allocation10_spill]] %s19172_s14 }
  0x11   :  { %s19177_s19 = sld [smem:[%s21947_s0 + %s19070_s15]]   ;;  %s19075_s15 = smov 15  }
  0x12   :  { %s19182_s24 = sld [smem:[%s21947_s0 + %s19071_s20]]  }
  0x13   :  { %s19187_s30 = sld [smem:[%s21947_s0 + %s19072_s26]]  }
  0x14   :  { %s19192_s6 = sld [smem:[%s21947_s0 + %s19073_s1]]   ;;  %s19113_s1 = smov 53  }
  0x15   :  { %s19197_s12 = sld [smem:[%s21947_s0 + %s19074_s7]]   ;;  %s19078_s7 = smov 18  }
  0x16   :  { %s19202_s20 = sld [smem:[%s21947_s0 + %s19075_s15]]   ;;  %s19079_s15 = smov 19  }
  0x17   :  { %21985 = sst [smem:[#allocation11_spill]] %s19177_s19 }
  0x18   :  { %21986 = sst [smem:[#allocation12_spill]] %s19182_s24 }
  0x19   :  { %21987 = sst [smem:[#allocation13_spill]] %s19187_s30 }
  0x1a   :  { %21988 = sst [smem:[#allocation14_spill]] %s19192_s6 }
  0x1b   :  { %21989 = sst [smem:[#allocation15_spill]] %s19197_s12 }
  0x1c   :  { %21990 = sst [smem:[#allocation16_spill]] %s19202_s20 }
  0x1d   :  { %s19207_s27 = sld [smem:[%s21947_s0 + %s19076_s22]]   ;;  %s19080_s22 = smov 20  }
  0x1e   :  { %s19212_s4 = sld [smem:[%s21947_s0 + %s19077_s28]]   ;;  %s19081_s28 = smov 21  }
  0x1f   :  { %s19217_s6 = sld [smem:[%s21947_s0 + %s19078_s7]]   ;;  %s19082_s7 = smov 22  }
  0x20   :  { %s19222_s20 = sld [smem:[%s21947_s0 + %s19079_s15]]   ;;  %s19083_s15 = smov 23  }
  0x23   :  { %21991 = sst [smem:[#allocation17_spill]] %s19207_s27 }
  0x24   :  { %21992 = sst [smem:[#allocation18_spill]] %s19212_s4 }
  0x25   :  { %21993 = sst [smem:[#allocation19_spill]] %s19217_s6 }
  0x26   :  { %21994 = sst [smem:[#allocation20_spill]] %s19222_s20 }
  0x27   :  { %s19227_s27 = sld [smem:[%s21947_s0 + %s19080_s22]]   ;;  %s19084_s22 = smov 24  }
  0x28   :  { %s19232_s4 = sld [smem:[%s21947_s0 + %s19081_s28]]   ;;  %s19085_s28 = smov 25  }
  0x29   :  { %s19237_s6 = sld [smem:[%s21947_s0 + %s19082_s7]]   ;;  %s19086_s7 = smov 26  }
  0x2a   :  { %s19242_s20 = sld [smem:[%s21947_s0 + %s19083_s15]]   ;;  %s19087_s15 = smov 27  }
  0x2b   :  { %s19252_s12 = sld [smem:[%s21947_s0 + %s19085_s28]]   ;;  %s19089_s28 = smov 29  }
  0x2c   :  { %s19257_s21 = sld [smem:[%s21947_s0 + %s19086_s7]]   ;;  %s19090_s7 = smov 30  }
  0x2d   :  { %21995 = sst [smem:[#allocation21_spill]] %s19227_s27 }
  0x2e   :  { %21996 = sst [smem:[#allocation22_spill]] %s19232_s4 }
  0x2f   :  { %21997 = sst [smem:[#allocation23_spill]] %s19237_s6 }
  0x30   :  { %21998 = sst [smem:[#allocation24_spill]] %s19242_s20 }
  0x31   :  { %s19247_s27 = sld [smem:[%s21947_s0 + %s19084_s22]]   ;;  %s19088_s22 = smov 28  }
  0x32   :  { %22000 = sst [smem:[#allocation26_spill]] %s19252_s12 }
  0x33   :  { %22001 = sst [smem:[#allocation27_spill]] %s19257_s21 }
  0x34   :  { %s19262_s8 = sld [smem:[%s21947_s0 + %s19087_s15]]   ;;  %s19091_s15 = smov 31  }
  0x35   :  { %s19267_s29 = sld [smem:[%s21947_s0 + %s19088_s22]]   ;;  %s19092_s22 = smov 32  }
  0x36   :  { %s19272_s25 = sld [smem:[%s21947_s0 + %s19089_s28]]   ;;  %s19093_s28 = smov 33  }
  0x37   :  { %21999 = sst [smem:[#allocation25_spill]] %s19247_s27 }
  0x38   :  { %s19277_s19 = sld [smem:[%s21947_s0 + %s19090_s7]]   ;;  %s19094_s7 = smov 34  }
  0x39   :  { %s19282_s24 = sld [smem:[%s21947_s0 + %s19091_s15]]   ;;  %s19095_s15 = smov 35  }
  0x3a   :  { %22002 = sst [smem:[#allocation28_spill]] %s19262_s8 }
  0x3b   :  { %22003 = sst [smem:[#allocation29_spill]] %s19267_s29 }
  0x3c   :  { %22004 = sst [smem:[#allocation30_spill]] %s19272_s25 }
  0x3d   :  { %s19287_s30 = sld [smem:[%s21947_s0 + %s19092_s22]]   ;;  %s19096_s22 = smov 36  }
  0x3e   :  { %22005 = sst [smem:[#allocation31_spill]] %s19277_s19 }
  0x3f   :  { %22006 = sst [smem:[#allocation32_spill]] %s19282_s24 }
  0x40   :  { %s19292_s14 = sld [smem:[%s21947_s0 + %s19093_s28]]   ;;  %s19097_s28 = smov 37  }
  0x41   :  { %s19297_s4 = sld [smem:[%s21947_s0 + %s19094_s7]]   ;;  %s19098_s7 = smov 38  }
  0x42   :  { %s19302_s3 = sld [smem:[%s21947_s0 + %s19095_s15]]   ;;  %s19099_s15 = smov 39  }
  0x43   :  { %22007 = sst [smem:[#allocation33_spill]] %s19287_s30 }
  0x44   :  { %s19307_s12 = sld [smem:[%s21947_s0 + %s19096_s22]]   ;;  %s19100_s22 = smov 40  }
  0x45   :  { %s19312_s20 = sld [smem:[%s21947_s0 + %s19097_s28]]   ;;  %s19101_s28 = smov 41  }
  0x46   :  { %22008 = sst [smem:[#allocation34_spill]] %s19292_s14 }
  0x47   :  { %22009 = sst [smem:[#allocation35_spill]] %s19297_s4 }
  0x48   :  { %22010 = sst [smem:[#allocation36_spill]] %s19302_s3 }
  0x49   :  { %s19317_s6 = sld [smem:[%s21947_s0 + %s19098_s7]]   ;;  %s19102_s7 = smov 42  }
  0x4a   :  { %22011 = sst [smem:[#allocation37_spill]] %s19307_s12 }
  0x4b   :  { %22012 = sst [smem:[#allocation38_spill]] %s19312_s20 }
  0x4c   :  { %s19322_s8 = sld [smem:[%s21947_s0 + %s19099_s15]]   ;;  %s19103_s15 = smov 43  }
  0x4d   :  { %s19327_s29 = sld [smem:[%s21947_s0 + %s19100_s22]]   ;;  %s19104_s22 = smov 44  }
  0x4e   :  { %s19332_s20 = sld [smem:[%s21947_s0 + %s19101_s28]]   ;;  %s19105_s28 = smov 45  }
  0x4f   :  { %22013 = sst [smem:[#allocation39_spill]] %s19317_s6 }
  0x50   :  { %s19337_s6 = sld [smem:[%s21947_s0 + %s19102_s7]]   ;;  %s19106_s7 = smov 46  }
  0x51   :  { %s19342_s25 = sld [smem:[%s21947_s0 + %s19103_s15]]   ;;  %s19107_s15 = smov 47  }
  0x52   :  { %s19347_s27 = sld [smem:[%s21947_s0 + %s19104_s22]]   ;;  %s19108_s22 = smov 48  }
  0x53   :  { %s19352_s21 = sld [smem:[%s21947_s0 + %s19105_s28]]   ;;  %s19109_s28 = smov 49  }
  0x54   :  { %s19357_s19 = sld [smem:[%s21947_s0 + %s19106_s7]]   ;;  %s19110_s7 = smov 50  }
  0x55   :  { %s19362_s14 = sld [smem:[%s21947_s0 + %s19107_s15]]   ;;  %s19111_s15 = smov 51  }
  0x56   :  { %s19367_s24 = sld [smem:[%s21947_s0 + %s19108_s22]]  }
  0x57   :  { %s19372_s4 = sld [smem:[%s21947_s0 + %s19109_s28]]  }
  0x58   :  { %s19377_s3 = sld [smem:[%s21947_s0 + %s19110_s7]]  }
  0x59   :  { %s14635_s12 = sld [smem:[%s21947_s0 + %s19111_s15]]  }
  0x5a   :  { %s19390_s30 = sld [smem:[%s21947_s0 + %s19113_s1]]  }
  0x5c   :  { %22014 = sst [smem:[#allocation40_spill]] %s19367_s24 }
  0x5d   :  { %s19385_s24 = sld [smem:[%s21947_s0 + %s19112_s23]]  }
  0x5e   :  { %v221_v2 = vlaneseq }
  0x5f   :  { %v220_v0 = vld [vmem:[%s14635_s12 + $0x8] sm:$0xff]  ;;  %v219_v1 = vld [vmem:[%s14635_s12] sm:$0xff] }
  0x60   :  { %112 = vsyncpa [#allocation3], 0  ;;  %16629 = vmatprep.subr.mxu0 %v220_v0  ;;  %v19392_v3 = vshrl.u32 %v221_v2, 7  ;;  %v19394_v4 = vand.u32 127, %v221_v2  ;;  %vm234_vm0 = vcmask 130048   ;;  %v19114_v8 = vmov 0.0  }
  0x61   :  { %16630 = vmatpush3.msra.mxu0 %v220_v0  ;;  %v317_v13 = vld [vmem:[%s19132_s9 + $0x8] sm:$0xff]  ;;  %v316_v14 = vld [vmem:[%s19132_s9] sm:$0xff]  ;;  %v14647_v15 = vld [vmem:[%s19132_s9 + $0x18] sm:$0xff]  ;;  %vm19115_vm7 = vmmov 0   ;;  %vm979_vm12 = vcmask 523264   ;;  %vm1680_vm15 = vcmask 64512  }
  0x62   :  { %16631 = vmatprep.subr.mxu0 %v219_v1  ;;  %v226_v5 = vadd.s32 4294967295, %v19392_v3  ;;  %v223_v6 = vadd.s32 8, %v19392_v3  ;;  %vm318_vm1 = vcmp.eq.s32.totalorder %v19394_v4, %v19392_v3  ;;  %16650 = vmatprep.subr.mxu1 %v317_v13  ;;  %v14646_v16 = vld [vmem:[%s19132_s9 + $0x10] sm:$0xff]  ;;  %v570_v17 = vadd.s32 1, %v19392_v3  ;;  %v14657_v25 = vld [vmem:[%s19132_s9 + $0x28] sm:$0xff]  ;;  %v14656_v26 = vld [vmem:[%s19132_s9 + $0x20] sm:$0xff] }
  0x63   :  { %16632 = vmatpush3.msra.mxu0 %v219_v1  ;;  %v14642_v10 = vsel %vm318_vm1, 1.0, %v19114_v8  ;;  %16651 = vmatpush3.msra.mxu1 %v317_v13  ;;  %v14660_v35 = vld [vmem:[%s19127_s5] ss:$0 sm:$0xff]  ;;  %s22015_s0 = sld [smem:[#allocation33_spill]] }
  0x64   :  { %16636 = vmatprep.subr.mxu0 %v220_v0  ;;  %vm228_vm2 = vcmp.eq.s32.totalorder %v19394_v4, %v226_v5  ;;  %v227_v7 = vadd.s32 4294967295, %v223_v6  ;;  %vm319_vm4 = vcmp.eq.s32.totalorder %v19394_v4, %v223_v6  ;;  %16652 = vmatprep.subr.mxu1 %v316_v14  ;;  %v571_v20 = vadd.s32 1, %v223_v6  ;;  %s22016_s5 = sld [smem:[#allocation37_spill]] }
  0x65   :  { %v14638_v9 = vsel %vm228_vm2, 1.0, %v19114_v8  ;;  %v14643_v12 = vsel %vm319_vm4, 1.0, %v19114_v8  ;;  %16653 = vmatpush3.msra.mxu1 %v316_v14  ;;  %vm572_vm5 = vcmp.eq.s32.totalorder %v19394_v4, %v570_v17  ;;  %s22017_s9 = sld [smem:[#allocation36_spill]] }
  0x66   :  { %16633 = vmatprep.mubr.msk.f32.mxu0 %vm234_vm0, %v14638_v9  ;;  %vm229_vm3 = vcmp.eq.s32.totalorder %v19394_v4, %v227_v7  ;;  %v14652_v23 = vsel %vm572_vm5, 1.0, %v19114_v8  ;;  %vm573_vm6 = vcmp.eq.s32.totalorder %v19394_v4, %v571_v20  ;;  %16664 = vmatprep.subr.mxu1 %v14657_v25  ;;  %v19116_v20 = vmov -1.0   ;;  %s22020_s12 = sld [smem:[#allocation34_spill]] }
  0x67   :  { %v14639_v11 = vsel %vm229_vm3, 1.0, %v19114_v8  ;;  %v14653_v24 = vsel %vm573_vm6, 1.0, %v19114_v8  ;;  %vm5919_vm3 = vcmp.ge.s32.totalorder %v19392_v3, %v19394_v4  ;;  %s22032_s7 = sld [smem:[#allocation39_spill]]  ;;  %vm14569_vm5 = vcmask 0  }
  0x68   :  { %16634 = vmatmul.mubr.msk.f32.vlgmr.msra.gmra.mxu0 %vm234_vm0, %v14639_v11  ;;  %s22033_s10 = sld [smem:[#allocation38_spill]] }
  0x69   :  { %16637 = vmatpush3.msra.mxu0 %v220_v0  ;;  %16640 = vmatprep.mubr.msk.f32.mxu0 %vm234_vm0, %v14642_v10  ;;  %s22034_s11 = sld [smem:[#allocation22_spill]] }
  0x6a   :  { %16638 = vmatprep.subr.mxu0 %v219_v1  ;;  %s22035_s15 = sld [smem:[#allocation10_spill]] }
  0x6b   :  { %16639 = vmatpush3.msra.mxu0 %v219_v1  ;;  %s22036_s16 = sld [smem:[#allocation13_spill]] }
  0x6c   :  { %16641 = vmatmul.mubr.msk.f32.vlgmr.msra.gmra.mxu0 %vm234_vm0, %v14643_v12  ;;  %16643 = vmatprep.subr.mxu0 %v14647_v15  ;;  %s22037_s18 = sld [smem:[#allocation12_spill]] }
  0x6d   :  { %16644 = vmatpush3.msra.mxu0 %v14647_v15  ;;  %s22038_s23 = sld [smem:[#allocation11_spill]] }
  0x6e   :  { %16645 = vmatprep.subr.mxu0 %v14646_v16  ;;  %s22039_s22 = sld [smem:[#allocation6_spill]] }
  0x6f   :  { %16646 = vmatpush3.msra.mxu0 %v14646_v16  ;;  %s22040_s26 = sld [smem:[#allocation7_spill]] }
  0x70   :  { %16657 = vmatprep.subr.mxu0 %v220_v0  ;;  %s22041_s1 = sld [smem:[#allocation9_spill]] }
  0x71   :  { %s22042_s28 = sld [smem:[#allocation5_spill]] }
  0x72   :  { %s22043_s2 = sld [smem:[#allocation15_spill]] }
 0x128   :  { %v16635_v18 = vpop.f32.mrf.mxu0 }
 0x12a   :  { %v307_v19 = vpop.f32.mrf.mxu0 }
 0x12b   :  { %16654 = vmatprep.mubr.msk.f32.mxu1 %vm234_vm0, %v307_v19  ;;  %v19438_v19 = vmul.u32 2, %v19392_v3 }
 0x12c   :  { %v16642_v21 = vpop.f32.mrf.mxu0  ;;  %16655 = vmatmul.mubr.msk.f32.vlgmr.msra.gmra.mxu1 %vm234_vm0, %v16635_v18 }
 0x12d   :  { %16665 = vmatpush3.msra.mxu1 %v14657_v25  ;;  %vm894_vm10 = vcmp.eq.s32.totalorder %v19394_v4, %v19438_v19 }
 0x12e   :  { %v396_v22 = vpop.f32.mrf.mxu0  ;;  %16666 = vmatprep.subr.mxu1 %v14656_v26 }
 0x12f   :  { %16647 = vmatprep.mubr.msk.f32.mxu0 %vm234_vm0, %v396_v22  ;;  %16667 = vmatpush3.msra.mxu1 %v14656_v26 }
 0x130   :  { %16648 = vmatmul.mubr.msk.f32.vlgmr.msra.gmra.mxu0 %vm234_vm0, %v16642_v21  ;;  %16678 = vmatprep.subr.mxu1 %v19114_v8 }
 0x131   :  { %16658 = vmatpush3.msra.mxu0 %v220_v0  ;;  %16661 = vmatprep.mubr.msk.f32.mxu0 %vm234_vm0, %v14652_v23 }
 0x132   :  { %16659 = vmatprep.subr.mxu0 %v219_v1 }
 0x133   :  { %16660 = vmatpush3.msra.mxu0 %v219_v1 }
 0x134   :  { %16662 = vmatmul.mubr.msk.f32.vlgmr.msra.gmra.mxu0 %vm234_vm0, %v14653_v24  ;;  %16671 = vmatprep.subr.mxu0 %v19114_v8  ;;  %v809_v24 = vadd.s32 4294967295, %v19438_v19 }
 0x135   :  { %16675 = vmatprep.mubr.msk.f32.mxu0 %vm19115_vm7, %v19114_v8 }
 0x136   :  { %vm810_vm11 = vcmp.eq.s32.totalorder %v19394_v4, %v809_v24 }
 0x1ec   :  { %v16656_v31 = vpop.f32.mrf.mxu1 }
 0x1ee   :  { %v561_v32 = vpop.f32.mrf.mxu1 }
 0x1f0   :  { %v16649_v27 = vpop.f32.mrf.mxu0 }
 0x1f1   :  { %v567_v33 = vadd.f32 %v16656_v31, %v16649_v27 }
 0x1f2   :  { %v480_v28 = vpop.f32.mrf.mxu0 }
 0x1f3   :  { %v562_v36 = vadd.f32 %v561_v32, %v480_v28 }
 0x1f4   :  { %v16663_v29 = vpop.f32.mrf.mxu0 }
 0x1f6   :  { %v650_v30 = vpop.f32.mrf.mxu0 }
 0x1f7   :  { %16668 = vmatprep.mubr.msk.f32.mxu1 %vm234_vm0, %v650_v30 }
 0x1f8   :  { %16669 = vmatmul.mubr.msk.f32.vlgmr.msra.gmra.mxu1 %vm234_vm0, %v16663_v29 }
 0x1f9   :  { %16682 = vmatprep.mubr.msk.f32.mxu1 %vm19115_vm7, %v19114_v8 }
 0x2b8   :  { %v16670_v34 = vpop.f32.mrf.mxu1 }
 0x2b9   :  { %v744_v37 = vadd.f32 %v16670_v34, %v567_v33  ;;  %v14663_v34 = vsel %vm894_vm10, 1.0, %v19114_v8 }
 0x2ba   :  { %v734_v38 = vpop.f32.mrf.mxu1 }
 0x2bb   :  { %v753_v39 = vadd.f32 %v14660_v35, %v744_v37  ;;  %v743_v40 = vadd.f32 %v734_v38, %v562_v36  ;;  %v14672_v36 = vld [vmem:[%s19142_s17 + $0x78] sm:$0xff]  ;;  %v14671_v37 = vld [vmem:[%s19142_s17 + $0x70] sm:$0xff]  ;;  %v14670_v38 = vld [vmem:[%s19142_s17 + $0x68] sm:$0xff] }
 0x2bd   :  { %v757_v41 = vmul.f32 0.70710677, %v753_v39  ;;  %v752_v42 = vadd.f32 %v14660_v35, %v743_v40  ;;  %v755_v26 = vmul.f32 0.5, %v753_v39  ;;  %v14661_v35 = vsel %vm810_vm11, 1.0, %v19114_v8  ;;  %v14669_v39 = vld [vmem:[%s19142_s17 + $0x60] sm:$0xff]  ;;  %v14668_v40 = vld [vmem:[%s19142_s17 + $0x58] sm:$0xff] }
 0x2bf   :  { %v763_v43 = vand.u32 2147483647, %v757_v41  ;;  %v756_v44 = vmul.f32 0.70710677, %v752_v42  ;;  %vm759_vm8 = vcmp.ge.f32.partialorder %v757_v41, 0.0  ;;  %v754_v31 = vmul.f32 0.5, %v752_v42 }
 0x2c0   :  { %v761_v21 = vsel %vm759_vm8, 1.0, %v19116_v20  ;;  %v14667_v41 = vld [vmem:[%s19142_s17 + $0x50] sm:$0xff]  ;;  %v14666_v42 = vld [vmem:[%s19142_s17 + $0x48] sm:$0xff] }
 0x2c1   :  { %v765_v45 = vmul.f32 0.3275911, %v763_v43  ;;  %v762_v46 = vand.u32 2147483647, %v756_v44  ;;  %v791_v50 = vsub.f32 0.0, %v763_v43  ;;  %vm758_vm9 = vcmp.ge.f32.partialorder %v756_v44, 0.0 }
 0x2c2   :  { %v760_v28 = vsel %vm758_vm9, 1.0, %v19116_v20  ;;  %v893_v44 = vld [vmem:[%s19142_s17 + $0x38] sm:$0xff] }
 0x2c3   :  { %v767_v47 = vadd.f32 1.0, %v765_v45  ;;  %v764_v48 = vmul.f32 0.3275911, %v762_v46  ;;  %v790_v51 = vsub.f32 0.0, %v762_v46  ;;  %v793_v52 = vmul.f32 %v791_v50, %v763_v43  ;;  %v14665_v43 = vld [vmem:[%s19142_s17 + $0x40] sm:$0xff]  ;;  %v891_v50 = vld [vmem:[%s19142_s17 + $0x28] sm:$0xff] }
 0x2c5   :  { %18869 = vrcp.f32 %v767_v47  ;;  %v766_v49 = vadd.f32 1.0, %v764_v48  ;;  %v792_v54 = vmul.f32 %v790_v51, %v762_v46  ;;  %v796_v56 = vmul.f32 1.442695, %v793_v52  ;;  %v892_v47 = vld [vmem:[%s19142_s17 + $0x30] sm:$0xff]  ;;  %v890_v51 = vld [vmem:[%s19142_s17 + $0x20] sm:$0xff]  ;;  %v889_v52 = vld [vmem:[%s19142_s17 + $0x18] sm:$0xff] }
 0x2c7   :  { %18871 = vrcp.f32 %v766_v49  ;;  %v794_v60 = vmul.f32 1.442695, %v792_v54  ;;  %v887_v54 = vld [vmem:[%s19142_s17 + $0x8] sm:$0xff] }
 0x2c8   :  { %18873 = vpow2.f32 %v796_v56  ;;  %v886_v56 = vld [vmem:[%s19142_s17] sm:$0xff] }
 0x2c9   :  { %18875 = vpow2.f32 %v794_v60  ;;  %v14682_v60 = vld [vmem:[%s19142_s17 + $0xa8] sm:$0xff] }
 0x2d2   :  { %v18870_v53 = vpop.eup %18869 }
 0x2d3   :  { %v773_v55 = vmul.f32 1.0614054, %v18870_v53 }
 0x2d4   :  { %v18872_v57 = vpop.eup %18871 }
 0x2d5   :  { %v775_v58 = vadd.f32 -1.4531521, %v773_v55  ;;  %v772_v59 = vmul.f32 1.0614054, %v18872_v57  ;;  %v18874_v13 = vpop.eup %18873  ;;  %v1126_v55 = vadd.s32 1, %v19438_v19 }
 0x2d6   :  { %v18876_v17 = vpop.eup %18875 }
 0x2d7   :  { %v777_v61 = vmul.f32 %v18870_v53, %v775_v58  ;;  %v774_v62 = vadd.f32 -1.4531521, %v772_v59  ;;  %vm1127_vm13 = vcmp.eq.s32.totalorder %v19394_v4, %v1126_v55  ;;  %v14684_v58 = vld [vmem:[%s19142_s17 + $0xb8] sm:$0xff]  ;;  %v14683_v59 = vld [vmem:[%s19142_s17 + $0xb0] sm:$0xff]  ;;  %v1358_v55 = vld [vmem:[%s19347_s27 + $0x28] sm:$0xff] }
 0x2d9   :  { %v779_v63 = vadd.f32 1.4214138, %v777_v61  ;;  %v776_v0 = vmul.f32 %v18872_v57, %v774_v62  ;;  %v14681_v61 = vld [vmem:[%s19142_s17 + $0xa0] sm:$0xff]  ;;  %v14680_v62 = vld [vmem:[%s19142_s17 + $0x98] sm:$0xff] }
 0x2db   :  { %v781_v1 = vmul.f32 %v18870_v53, %v779_v63  ;;  %v778_v2 = vadd.f32 1.4214138, %v776_v0  ;;  %v14679_v63 = vld [vmem:[%s19142_s17 + $0x90] sm:$0xff]  ;;  %v14678_v0 = vld [vmem:[%s19142_s17 + $0x88] sm:$0xff] }
 0x2dd   :  { %v783_v5 = vadd.f32 -0.28449672, %v781_v1  ;;  %v780_v6 = vmul.f32 %v18872_v57, %v778_v2  ;;  %v14677_v1 = vld [vmem:[%s19142_s17 + $0x80] sm:$0xff] }
 0x2df   :  { %v785_v7 = vmul.f32 %v18870_v53, %v783_v5  ;;  %v782_v9 = vadd.f32 -0.28449672, %v780_v6 }
 0x2e1   :  { %v787_v10 = vadd.f32 0.2548296, %v785_v7  ;;  %v784_v11 = vmul.f32 %v18872_v57, %v782_v9 }
 0x2e3   :  { %v789_v12 = vmul.f32 %v18870_v53, %v787_v10  ;;  %v786_v14 = vadd.f32 0.2548296, %v784_v11  ;;  %v888_v53 = vld [vmem:[%s19142_s17 + $0x10] sm:$0xff]  ;;  %s22019_s17 = sld [smem:[#allocation32_spill]] }
 0x2e5   :  { %v799_v15 = vmul.f32 %v18874_v13, %v789_v12  ;;  %v788_v16 = vmul.f32 %v18872_v57, %v786_v14  ;;  %v14675_v57 = vsel %vm1127_vm13, 1.0, %v19114_v8  ;;  %v14686_v13 = vld [vmem:[%s19137_s13] ss:$0 sm:$0xff]  ;;  %s22018_s13 = sld [smem:[#allocation35_spill]] }
 0x2e7   :  { %v801_v18 = vsub.f32 1.0, %v799_v15  ;;  %v798_v22 = vmul.f32 %v18876_v17, %v788_v16 }
 0x2e9   :  { %v803_v23 = vmul.f32 %v801_v18, %v761_v21  ;;  %v800_v25 = vsub.f32 1.0, %v798_v22 }
 0x2eb   :  { %v805_v27 = vadd.f32 1.0, %v803_v23  ;;  %v802_v29 = vmul.f32 %v800_v25, %v760_v28 }
 0x2ed   :  { %v19443_v30 = vmul.f32 %v805_v27, %v755_v26  ;;  %v804_v32 = vadd.f32 1.0, %v802_v29 }
 0x2ef   :  { %16672 = vmatpush3.msra.mxu0 %v19443_v30  ;;  %16679 = vmatpush3.msra.mxu1 %v19443_v30  ;;  %v19452_v33 = vmul.f32 %v804_v32, %v754_v31 }
 0x2f0   :  { %16673 = vmatprep.subr.mxu0 %v19114_v8  ;;  %16680 = vmatprep.subr.mxu1 %v19114_v8 }
 0x2f1   :  { %16674 = vmatpush3.msra.mxu0 %v19452_v33  ;;  %16681 = vmatpush3.msra.mxu1 %v19452_v33 }
 0x2f2   :  { %16683 = vmatmul.mubr.msk.f32.vlgmr.msra.gmra.mxu1 %vm234_vm0, %v14663_v34  ;;  %16676 = vmatmul.mubr.msk.f32.vlgmr.msra.gmra.mxu0 %vm234_vm0, %v14661_v35 }
 0x2f3   :  { %16685 = vmatprep.subr.mxu0 %v19114_v8  ;;  %16701 = vmatprep.mubr.msk.f32.mxu0 %vm19115_vm7, %v19114_v8 }
 0x2f4   :  { %16686 = vmatpush3.msra.mxu0 %v14672_v36  ;;  %16730 = vmatprep.subr.mxu1 %v19114_v8 }
 0x2f5   :  { %16687 = vmatprep.subr.mxu0 %v19114_v8  ;;  %16746 = vmatprep.mubr.msk.f32.mxu1 %vm19115_vm7, %v19114_v8 }
 0x2f6   :  { %16688 = vmatpush3.msra.mxu0 %v14671_v37  ;;  %16731 = vmatpush3.msra.mxu1 %v14684_v58  ;;  %v1445_v58 = vld [vmem:[%s19337_s6 + $0x20] sm:$0xff] }
 0x2f7   :  { %16689 = vmatprep.subr.mxu0 %v19114_v8  ;;  %16732 = vmatprep.subr.mxu1 %v19114_v8 }
 0x2f8   :  { %16690 = vmatpush3.msra.mxu0 %v14670_v38  ;;  %16733 = vmatpush3.msra.mxu1 %v14683_v59  ;;  %v1356_v59 = vld [vmem:[%s19347_s27 + $0x18] sm:$0xff] }
 0x2f9   :  { %16691 = vmatprep.subr.mxu0 %v19114_v8  ;;  %16734 = vmatprep.subr.mxu1 %v19114_v8 }
 0x2fa   :  { %16692 = vmatpush3.msra.mxu0 %v14669_v39  ;;  %16735 = vmatpush3.msra.mxu1 %v14682_v60  ;;  %v1444_v60 = vld [vmem:[%s19337_s6 + $0x18] sm:$0xff] }
 0x2fb   :  { %16693 = vmatprep.subr.mxu0 %v19114_v8  ;;  %16736 = vmatprep.subr.mxu1 %v19114_v8 }
 0x2fc   :  { %16694 = vmatpush3.msra.mxu0 %v14668_v40  ;;  %16737 = vmatpush3.msra.mxu1 %v14681_v61  ;;  %v1355_v61 = vld [vmem:[%s19347_s27 + $0x10] sm:$0xff] }
 0x2fd   :  { %16695 = vmatprep.subr.mxu0 %v19114_v8  ;;  %16738 = vmatprep.subr.mxu1 %v19114_v8 }
 0x2fe   :  { %16696 = vmatpush3.msra.mxu0 %v14667_v41  ;;  %16739 = vmatpush3.msra.mxu1 %v14680_v62  ;;  %v1443_v62 = vld [vmem:[%s19337_s6 + $0x10] sm:$0xff] }
 0x2ff   :  { %16697 = vmatprep.subr.mxu0 %v19114_v8  ;;  %16740 = vmatprep.subr.mxu1 %v19114_v8 }
 0x300   :  { %16698 = vmatpush3.msra.mxu0 %v14666_v42  ;;  %16741 = vmatpush3.msra.mxu1 %v14679_v63  ;;  %v1321_v42 = vld [vmem:[%s19372_s4] sm:$0xff]  ;;  %v1354_v63 = vld [vmem:[%s19347_s27 + $0x8] sm:$0xff]  ;;  %s22031_s4 = sld [smem:[#allocation8_spill]] }
 0x301   :  { %16699 = vmatprep.subr.mxu0 %v19114_v8  ;;  %16742 = vmatprep.subr.mxu1 %v19114_v8 }
 0x302   :  { %16700 = vmatpush3.msra.mxu0 %v14665_v43  ;;  %16743 = vmatpush3.msra.mxu1 %v14678_v0  ;;  %v1442_v0 = vld [vmem:[%s19337_s6 + $0x8] sm:$0xff] }
 0x303   :  { %16704 = vmatprep.subr.mxu0 %v19114_v8  ;;  %16744 = vmatprep.subr.mxu1 %v19114_v8 }
 0x304   :  { %16745 = vmatpush3.msra.mxu1 %v14677_v1  ;;  %v1353_v1 = vld [vmem:[%s19347_s27] sm:$0xff] }
 0x305   :  { %16768 = vmatprep.subr.mxu1 %v19114_v8 }
 0x3b2   :  { %v966_v45 = vpop.f32.mrf.mxu1  ;;  %v882_v46 = vpop.f32.mrf.mxu0 }
 0x3b3   :  { %16702 = vmatmul.mubr.msk.f32.vlgmr.msra.gmra.mxu0 %vm979_vm12, %v966_v45 }
 0x3b4   :  { %16705 = vmatpush3.msra.mxu0 %v893_v44  ;;  %v16684_v48 = vpop.f32.mrf.mxu1  ;;  %v16677_v49 = vpop.f32.mrf.mxu0  ;;  %16720 = vmatprep.mubr.msk.f32.mxu0 %vm19115_vm7, %v19114_v8 }
 0x3b5   :  { %16706 = vmatprep.subr.mxu0 %v19114_v8 }
 0x3b6   :  { %16707 = vmatpush3.msra.mxu0 %v892_v47 }
 0x3b7   :  { %16708 = vmatprep.subr.mxu0 %v19114_v8 }
 0x3b8   :  { %16709 = vmatpush3.msra.mxu0 %v891_v50 }
 0x3b9   :  { %16710 = vmatprep.subr.mxu0 %v19114_v8 }
 0x3ba   :  { %16711 = vmatpush3.msra.mxu0 %v890_v51  ;;  %v1360_v51 = vld [vmem:[%s19347_s27 + $0x38] sm:$0xff] }
 0x3bb   :  { %16712 = vmatprep.subr.mxu0 %v19114_v8 }
 0x3bc   :  { %16713 = vmatpush3.msra.mxu0 %v889_v52  ;;  %v1448_v52 = vld [vmem:[%s19337_s6 + $0x38] sm:$0xff] }
 0x3bd   :  { %16714 = vmatprep.subr.mxu0 %v19114_v8 }
 0x3be   :  { %16715 = vmatpush3.msra.mxu0 %v888_v53  ;;  %v1359_v53 = vld [vmem:[%s19347_s27 + $0x30] sm:$0xff] }
 0x3bf   :  { %16716 = vmatprep.subr.mxu0 %v19114_v8 }
 0x3c0   :  { %16717 = vmatpush3.msra.mxu0 %v887_v54  ;;  %v1447_v54 = vld [vmem:[%s19337_s6 + $0x30] sm:$0xff] }
 0x3c1   :  { %16718 = vmatprep.subr.mxu0 %v19114_v8 }
 0x3c2   :  { %16719 = vmatpush3.msra.mxu0 %v886_v56  ;;  %v1446_v56 = vld [vmem:[%s19337_s6 + $0x28] sm:$0xff] }
 0x3c3   :  { %16721 = vmatmul.mubr.msk.f32.vlgmr.msra.gmra.mxu0 %vm979_vm12, %v882_v46  ;;  %16723 = vmatprep.subr.mxu0 %v19114_v8 }
 0x3c4   :  { %16724 = vmatpush3.msra.mxu0 %v19443_v30  ;;  %16727 = vmatprep.mubr.msk.f32.mxu0 %vm19115_vm7, %v19114_v8 }
 0x3c5   :  { %16725 = vmatprep.subr.mxu0 %v19114_v8 }
 0x3c6   :  { %16726 = vmatpush3.msra.mxu0 %v19452_v33 }
 0x3c7   :  { %16728 = vmatmul.mubr.msk.f32.vlgmr.msra.gmra.mxu0 %vm234_vm0, %v14675_v57  ;;  %16749 = vmatprep.subr.mxu0 %v19114_v8  ;;  %v1357_v57 = vld [vmem:[%s19347_s27 + $0x20] sm:$0xff] }
 0x3c8   :  { %16765 = vmatprep.mubr.msk.f32.mxu0 %vm19115_vm7, %v19114_v8  ;;  %16750 = vmatpush3.msra.mxu0 %v1360_v51  ;;  %v14742_v51 = vld [vmem:[%s19347_s27 + $0xb8] sm:$0xff] }
 0x3c9   :  { %16751 = vmatprep.subr.mxu0 %v19114_v8 }
 0x3ca   :  { %16752 = vmatpush3.msra.mxu0 %v1359_v53  ;;  %v14740_v53 = vld [vmem:[%s19347_s27 + $0xa8] sm:$0xff] }
 0x3cb   :  { %16753 = vmatprep.subr.mxu0 %v19114_v8 }
 0x3cc   :  { %16754 = vmatpush3.msra.mxu0 %v1358_v55  ;;  %v14738_v55 = vld [vmem:[%s19347_s27 + $0x98] sm:$0xff] }
 0x3cd   :  { %16755 = vmatprep.subr.mxu0 %v19114_v8 }
 0x3ce   :  { %16756 = vmatpush3.msra.mxu0 %v1357_v57  ;;  %v14736_v57 = vld [vmem:[%s19347_s27 + $0x88] sm:$0xff] }
 0x3cf   :  { %16757 = vmatprep.subr.mxu0 %v19114_v8 }
 0x3d0   :  { %16758 = vmatpush3.msra.mxu0 %v1356_v59  ;;  %v14762_v59 = vld [vmem:[%s19352_s21 + $0xb8] sm:$0xff] }
 0x3d1   :  { %16759 = vmatprep.subr.mxu0 %v19114_v8 }
 0x3d2   :  { %16760 = vmatpush3.msra.mxu0 %v1355_v61  ;;  %v14760_v61 = vld [vmem:[%s19352_s21 + $0xa8] sm:$0xff] }
 0x3d3   :  { %16761 = vmatprep.subr.mxu0 %v19114_v8 }
 0x3d4   :  { %16762 = vmatpush3.msra.mxu0 %v1354_v63  ;;  %v14758_v63 = vld [vmem:[%s19352_s21 + $0x98] sm:$0xff] }
 0x3d5   :  { %16763 = vmatprep.subr.mxu0 %v19114_v8 }
 0x3d6   :  { %16764 = vmatpush3.msra.mxu0 %v1353_v1  ;;  %v14756_v1 = vld [vmem:[%s19352_s21 + $0x88] sm:$0xff] }
 0x3d7   :  { %16787 = vmatprep.subr.mxu0 %v19114_v8 }
 0x473   :  { %v1049_v2 = vpop.f32.mrf.mxu0 }
 0x475   :  { %v16703_v5 = vpop.f32.mrf.mxu0 }
 0x483   :  { %v1122_v6 = vpop.f32.mrf.mxu0 }
 0x484   :  { %v1123_v7 = vadd.f32 %v1122_v6, %v1049_v2  ;;  %v1441_v2 = vld [vmem:[%s19337_s6] sm:$0xff] }
 0x485   :  { %v16722_v9 = vpop.f32.mrf.mxu0 }
 0x487   :  { %v1199_v10 = vpop.f32.mrf.mxu0 }
 0x488   :  { %16747 = vmatmul.mubr.msk.f32.vlgmr.msra.gmra.mxu1 %vm979_vm12, %v1199_v10  ;;  %v14687_v10 = vld [vmem:[%s19362_s14] ss:$0 sm:$0xff] }
 0x489   :  { %v16729_v11 = vpop.f32.mrf.mxu0  ;;  %16784 = vmatprep.mubr.msk.f32.mxu1 %vm19115_vm7, %v19114_v8  ;;  %16769 = vmatpush3.msra.mxu1 %v1448_v52  ;;  %v14741_v52 = vld [vmem:[%s19347_s27 + $0xb0] sm:$0xff] }
 0x48a   :  { %16770 = vmatprep.subr.mxu1 %v19114_v8 }
 0x48b   :  { %16771 = vmatpush3.msra.mxu1 %v1447_v54  ;;  %v14739_v54 = vld [vmem:[%s19347_s27 + $0xa0] sm:$0xff] }
 0x48c   :  { %16772 = vmatprep.subr.mxu1 %v19114_v8 }
 0x48d   :  { %16773 = vmatpush3.msra.mxu1 %v1446_v56  ;;  %v14737_v56 = vld [vmem:[%s19347_s27 + $0x90] sm:$0xff] }
 0x48e   :  { %16774 = vmatprep.subr.mxu1 %v19114_v8 }
 0x48f   :  { %16775 = vmatpush3.msra.mxu1 %v1445_v58  ;;  %v14735_v58 = vld [vmem:[%s19347_s27 + $0x80] sm:$0xff] }
 0x490   :  { %16776 = vmatprep.subr.mxu1 %v19114_v8 }
 0x491   :  { %16777 = vmatpush3.msra.mxu1 %v1444_v60  ;;  %v14761_v60 = vld [vmem:[%s19352_s21 + $0xb0] sm:$0xff] }
 0x492   :  { %16778 = vmatprep.subr.mxu1 %v19114_v8 }
 0x493   :  { %16779 = vmatpush3.msra.mxu1 %v1443_v62  ;;  %v14759_v62 = vld [vmem:[%s19352_s21 + $0xa0] sm:$0xff] }
 0x494   :  { %16780 = vmatprep.subr.mxu1 %v19114_v8 }
 0x495   :  { %16781 = vmatpush3.msra.mxu1 %v1442_v0  ;;  %v14757_v0 = vld [vmem:[%s19352_s21 + $0x90] sm:$0xff] }
 0x496   :  { %16782 = vmatprep.subr.mxu1 %v19114_v8 }
 0x497   :  { %16783 = vmatpush3.msra.mxu1 %v1441_v2  ;;  %v14755_v2 = vld [vmem:[%s19352_s21 + $0x80] sm:$0xff] }
 0x498   :  { %16806 = vmatprep.subr.mxu1 %v19114_v8 }
 0x548   :  { %v1281_v12 = vpop.f32.mrf.mxu1 }
 0x549   :  { %v1285_v14 = vadd.f32 %v1281_v12, %v1123_v7  ;;  %v14688_v12 = vld [vmem:[%s19357_s19] ss:$0 sm:$0xff] }
 0x54a   :  { %v16748_v15 = vpop.f32.mrf.mxu1 }
 0x54b   :  { %v1293_v16 = vadd.f32 %v14686_v13, %v1285_v14  ;;  %v1526_v15 = vld [vmem:[%s19352_s21 + $0x38] sm:$0xff] }
 0x54d   :  { %v1295_v17 = vmul.f32 0.70710677, %v1293_v16  ;;  %v1294_v40 = vmul.f32 0.5, %v1293_v16  ;;  %v1525_v16 = vld [vmem:[%s19352_s21 + $0x30] sm:$0xff] }
 0x54f   :  { %v1298_v18 = vand.u32 2147483647, %v1295_v17  ;;  %vm1296_vm14 = vcmp.ge.f32.partialorder %v1295_v17, 0.0  ;;  %v1524_v17 = vld [vmem:[%s19352_s21 + $0x28] sm:$0xff] }
 0x550   :  { %v1297_v38 = vsel %vm1296_vm14, 1.0, %v19116_v20 }
 0x551   :  { %v1299_v19 = vmul.f32 0.3275911, %v1298_v18  ;;  %v1312_v22 = vsub.f32 0.0, %v1298_v18 }
 0x553   :  { %v1300_v21 = vadd.f32 1.0, %v1299_v19  ;;  %v1313_v23 = vmul.f32 %v1312_v22, %v1298_v18  ;;  %v1523_v18 = vld [vmem:[%s19352_s21 + $0x20] sm:$0xff]  ;;  %v1522_v19 = vld [vmem:[%s19352_s21 + $0x18] sm:$0xff]  ;;  %v1520_v22 = vld [vmem:[%s19352_s21 + $0x8] sm:$0xff] }
 0x555   :  { %18877 = vrcp.f32 %v1300_v21  ;;  %v1314_v26 = vmul.f32 1.442695, %v1313_v23  ;;  %v1521_v21 = vld [vmem:[%s19352_s21 + $0x10] sm:$0xff]  ;;  %v1519_v23 = vld [vmem:[%s19352_s21] sm:$0xff] }
 0x557   :  { %18879 = vpow2.f32 %v1314_v26 }
 0x562   :  { %v18878_v24 = vpop.eup %18877 }
 0x563   :  { %v1303_v25 = vmul.f32 1.0614054, %v18878_v24 }
 0x564   :  { %v18880_v35 = vpop.eup %18879 }
 0x565   :  { %v1304_v27 = vadd.f32 -1.4531521, %v1303_v25 }
 0x567   :  { %v1305_v28 = vmul.f32 %v18878_v24, %v1304_v27 }
 0x569   :  { %v1306_v29 = vadd.f32 1.4214138, %v1305_v28 }
 0x56b   :  { %v1307_v30 = vmul.f32 %v18878_v24, %v1306_v29 }
 0x56d   :  { %v1308_v31 = vadd.f32 -0.28449672, %v1307_v30  ;;  %v14704_v30 = vld [vmem:[%s19347_s27 + $0x78] sm:$0xff] }
 0x56f   :  { %v1309_v32 = vmul.f32 %v18878_v24, %v1308_v31  ;;  %v14703_v31 = vld [vmem:[%s19347_s27 + $0x70] sm:$0xff] }
 0x571   :  { %v1310_v33 = vadd.f32 0.2548296, %v1309_v32  ;;  %v14702_v32 = vld [vmem:[%s19347_s27 + $0x68] sm:$0xff] }
 0x573   :  { %v1311_v34 = vmul.f32 %v18878_v24, %v1310_v33  ;;  %v14689_v24 = vld [vmem:[%s19327_s29] ss:$0 sm:$0xff] }
 0x574   :  { %v14701_v33 = vld [vmem:[%s19347_s27 + $0x60] sm:$0xff] }
 0x575   :  { %v1316_v36 = vmul.f32 %v18880_v35, %v1311_v34  ;;  %v14700_v34 = vld [vmem:[%s19347_s27 + $0x58] sm:$0xff]  ;;  %v14699_v35 = vld [vmem:[%s19347_s27 + $0x50] sm:$0xff] }
 0x577   :  { %v1317_v37 = vsub.f32 1.0, %v1316_v36  ;;  %v14692_v36 = vld [vmem:[%s19332_s20] ss:$0 sm:$0xff] }
 0x579   :  { %v1318_v39 = vmul.f32 %v1317_v37, %v1297_v38  ;;  %v14698_v37 = vld [vmem:[%s19347_s27 + $0x48] sm:$0xff] }
 0x57b   :  { %v1319_v41 = vadd.f32 1.0, %v1318_v39  ;;  %v14697_v39 = vld [vmem:[%s19347_s27 + $0x40] sm:$0xff] }
 0x57d   :  { %v1320_v43 = vmul.f32 %v1319_v41, %v1294_v40 }
 0x57f   :  { %v19536_v44 = vadd.f32 %v1321_v42, %v1320_v43  ;;  %v14724_v42 = vld [vmem:[%s19352_s21 + $0x78] sm:$0xff]  ;;  %v14723_v43 = vld [vmem:[%s19352_s21 + $0x70] sm:$0xff] }
 0x581   :  { %v1325_v45 = vsel %vm979_vm12, %v19536_v44, 0.0 }
 0x582   :  { %1326 = vadd.xlane.f32.xlu0 %v1325_v45  ;;  %v14722_v45 = vld [vmem:[%s19352_s21 + $0x68] sm:$0xff] }
 0x60b   :  { %v1327_v46 = vpop.xlane.xlu0 %1326 }
 0x60c   :  { %v1329_v47 = vmul.f32 0.015625, %v1327_v46  ;;  %v14721_v46 = vld [vmem:[%s19352_s21 + $0x60] sm:$0xff] }
 0x60e   :  { %v1330_v48 = vsub.f32 %v19536_v44, %v1329_v47  ;;  %v14720_v47 = vld [vmem:[%s19352_s21 + $0x58] sm:$0xff] }
 0x610   :  { %v1331_v49 = vmul.f32 %v1330_v48, %v1330_v48 }
 0x612   :  { %v1332_v50 = vsel %vm979_vm12, %v1331_v49, 0.0  ;;  %v14718_v49 = vld [vmem:[%s19352_s21 + $0x48] sm:$0xff] }
 0x613   :  { %1333 = vadd.xlane.f32.xlu0 %v1332_v50  ;;  %v14717_v50 = vld [vmem:[%s19352_s21 + $0x40] sm:$0xff] }
 0x69c   :  { %v1334_v5 = vpop.xlane.xlu0 %1333 }
 0x69d   :  { %v1335_v6 = vmul.f32 0.015625, %v1334_v5  ;;  %v14790_v5 = vld [vmem:[%s19337_s6 + $0xf8] sm:$0xff] }
 0x69f   :  { %v1336_v7 = vadd.f32 1e-05, %v1335_v6  ;;  %v14789_v6 = vld [vmem:[%s19337_s6 + $0xf0] sm:$0xff] }
 0x6a1   :  { %18881 = vrsqrt.f32 %v1336_v7  ;;  %v14788_v7 = vld [vmem:[%s19337_s6 + $0xe8] sm:$0xff] }
 0x6ae   :  { %v18882_v9 = vpop.eup %18881 }
 0x6af   :  { %v1338_v11 = vmul.f32 %v18882_v9, %v1330_v48  ;;  %v14719_v48 = vld [vmem:[%s19352_s21 + $0x50] sm:$0xff]  ;;  %v14787_v9 = vld [vmem:[%s19337_s6 + $0xe0] sm:$0xff] }
 0x6b1   :  { %v1345_v13 = vmul.f32 %v14687_v10, %v1338_v11  ;;  %v14786_v10 = vld [vmem:[%s19337_s6 + $0xd8] sm:$0xff]  ;;  %v14785_v11 = vld [vmem:[%s19337_s6 + $0xd0] sm:$0xff] }
 0x6b3   :  { %v19576_v14 = vadd.f32 %v14688_v12, %v1345_v13  ;;  %v14784_v12 = vld [vmem:[%s19337_s6 + $0xc8] sm:$0xff]  ;;  %v14783_v13 = vld [vmem:[%s19337_s6 + $0xc0] sm:$0xff] }
 0x6b5   :  { %16766 = vmatmul.mubr.msk.f32.vlgmr.msra.gmra.mxu0 %vm979_vm12, %v19576_v14  ;;  %16785 = vmatmul.mubr.msk.f32.vlgmr.msra.gmra.mxu1 %vm979_vm12, %v19576_v14 }
 0x6b6   :  { %16788 = vmatpush3.msra.mxu0 %v1526_v15  ;;  %16803 = vmatprep.mubr.msk.f32.mxu0 %vm19115_vm7, %v19114_v8 }
 0x6b7   :  { %16789 = vmatprep.subr.mxu0 %v19114_v8  ;;  %16808 = vmatprep.mubr.msk.f32.mxu1 %vm19115_vm7, %v19114_v8 }
 0x6b8   :  { %16790 = vmatpush3.msra.mxu0 %v1525_v16 }
 0x6b9   :  { %16791 = vmatprep.subr.mxu0 %v19114_v8 }
 0x6ba   :  { %16792 = vmatpush3.msra.mxu0 %v1524_v17 }
 0x6bb   :  { %16793 = vmatprep.subr.mxu0 %v19114_v8 }
 0x6bc   :  { %16794 = vmatpush3.msra.mxu0 %v1523_v18 }
 0x6bd   :  { %16795 = vmatprep.subr.mxu0 %v19114_v8 }
 0x6be   :  { %16796 = vmatpush3.msra.mxu0 %v1522_v19 }
 0x6bf   :  { %16797 = vmatprep.subr.mxu0 %v19114_v8 }
 0x6c0   :  { %16798 = vmatpush3.msra.mxu0 %v1521_v21 }
 0x6c1   :  { %16799 = vmatprep.subr.mxu0 %v19114_v8 }
 0x6c2   :  { %16800 = vmatpush3.msra.mxu0 %v1520_v22 }
 0x6c3   :  { %16801 = vmatprep.subr.mxu0 %v19114_v8 }
 0x6c4   :  { %16802 = vmatpush3.msra.mxu0 %v1519_v23 }
 0x6c5   :  { %16804 = vmatmul.mubr.msk.f32.vlgmr.msra.gmra.mxu0 %vm979_vm12, %v19576_v14  ;;  %16811 = vmatprep.subr.mxu0 %v19114_v8 }
 0x6c6   :  { %16813 = vmatprep.mubr.msk.f32.mxu0 %vm19115_vm7, %v19114_v8 }
 0x775   :  { %v1437_v25 = vpop.f32.mrf.mxu0  ;;  %v1515_v26 = vpop.f32.mrf.mxu1 }
 0x776   :  { %v1438_v27 = vadd.f32 %v14689_v24, %v1437_v25  ;;  %16807 = vmatpush3.xpose.msk.msra.mxu1 %vm234_vm0, %v1515_v26 }
 0x777   :  { %v16767_v28 = vpop.f32.mrf.mxu0  ;;  %v16786_v29 = vpop.f32.mrf.mxu1  ;;  %16816 = vmatprep.subr.mxu1 %v19114_v8 }
 0x779   :  { %16809 = vmatmul.mubr.msk.f32.vlgmr.msra.gmra.mxu1 %vm234_vm0, %v1438_v27 }
 0x77a   :  { %16817 = vmatpush3.msra.mxu1 %v14704_v30  ;;  %16832 = vmatprep.mubr.msk.f32.mxu1 %vm19115_vm7, %v19114_v8 }
 0x77b   :  { %16818 = vmatprep.subr.mxu1 %v19114_v8 }
 0x77c   :  { %16819 = vmatpush3.msra.mxu1 %v14703_v31 }
 0x77d   :  { %16820 = vmatprep.subr.mxu1 %v19114_v8 }
 0x77e   :  { %16821 = vmatpush3.msra.mxu1 %v14702_v32 }
 0x77f   :  { %16822 = vmatprep.subr.mxu1 %v19114_v8 }
 0x780   :  { %16823 = vmatpush3.msra.mxu1 %v14701_v33 }
 0x781   :  { %16824 = vmatprep.subr.mxu1 %v19114_v8 }
 0x782   :  { %16825 = vmatpush3.msra.mxu1 %v14700_v34 }
 0x783   :  { %16826 = vmatprep.subr.mxu1 %v19114_v8 }
 0x784   :  { %16827 = vmatpush3.msra.mxu1 %v14699_v35 }
 0x785   :  { %v1600_v38 = vpop.f32.mrf.mxu0  ;;  %16828 = vmatprep.subr.mxu1 %v19114_v8 }
 0x786   :  { %v1601_v40 = vadd.f32 %v14692_v36, %v1600_v38  ;;  %16829 = vmatpush3.msra.mxu1 %v14698_v37  ;;  %v14715_v37 = vld [vmem:[%s19337_s6 + $0x78] sm:$0xff]  ;;  %v14714_v38 = vld [vmem:[%s19337_s6 + $0x70] sm:$0xff] }
 0x787   :  { %v16805_v41 = vpop.f32.mrf.mxu0  ;;  %16830 = vmatprep.subr.mxu1 %v19114_v8 }
 0x788   :  { %16812 = vmatpush3.msra.mxu0 %v1601_v40  ;;  %16831 = vmatpush3.msra.mxu1 %v14697_v39  ;;  %v14713_v39 = vld [vmem:[%s19337_s6 + $0x68] sm:$0xff]  ;;  %v14712_v40 = vld [vmem:[%s19337_s6 + $0x60] sm:$0xff]  ;;  %v14711_v41 = vld [vmem:[%s19337_s6 + $0x58] sm:$0xff] }
 0x789   :  { %16833 = vmatmul.mubr.msk.f32.vlgmr.msra.gmra.mxu1 %vm979_vm12, %v19576_v14  ;;  %16854 = vmatprep.subr.mxu1 %v19114_v8 }
 0x78a   :  { %16855 = vmatpush3.msra.mxu1 %v14724_v42  ;;  %16870 = vmatprep.mubr.msk.f32.mxu1 %vm19115_vm7, %v19114_v8  ;;  %v14710_v42 = vld [vmem:[%s19337_s6 + $0x50] sm:$0xff] }
 0x78b   :  { %16856 = vmatprep.subr.mxu1 %v19114_v8  ;;  %16835 = vmatprep.subr.mxu0 %v19114_v8 }
 0x78c   :  { %16857 = vmatpush3.msra.mxu1 %v14723_v43  ;;  %v14709_v43 = vld [vmem:[%s19337_s6 + $0x48] sm:$0xff] }
 0x78d   :  { %16858 = vmatprep.subr.mxu1 %v19114_v8 }
 0x78e   :  { %16859 = vmatpush3.msra.mxu1 %v14722_v45  ;;  %v14708_v45 = vld [vmem:[%s19337_s6 + $0x40] sm:$0xff] }
 0x78f   :  { %16860 = vmatprep.subr.mxu1 %v19114_v8 }
 0x790   :  { %16861 = vmatpush3.msra.mxu1 %v14721_v46 }
 0x791   :  { %16862 = vmatprep.subr.mxu1 %v19114_v8 }
 0x792   :  { %16863 = vmatpush3.msra.mxu1 %v14720_v47 }
 0x793   :  { %16864 = vmatprep.subr.mxu1 %v19114_v8 }
 0x794   :  { %16865 = vmatpush3.msra.mxu1 %v14719_v48  ;;  %v14706_v48 = vld [vmem:[%s19327_s29 + $0x1] ss:$0 sm:$0xff] }
 0x795   :  { %16866 = vmatprep.subr.mxu1 %v19114_v8 }
 0x796   :  { %16867 = vmatpush3.msra.mxu1 %v14718_v49  ;;  %v14726_v49 = vld [vmem:[%s19332_s20 + $0x1] ss:$0 sm:$0xff] }
 0x797   :  { %16868 = vmatprep.subr.mxu1 %v19114_v8 }
 0x798   :  { %16869 = vmatpush3.msra.mxu1 %v14717_v50 }
 0x799   :  { %16871 = vmatmul.mubr.msk.f32.vlgmr.msra.gmra.mxu1 %vm979_vm12, %v19576_v14  ;;  %16897 = vmatprep.subr.mxu1 %v19114_v8 }
 0x79a   :  { %16898 = vmatpush3.msra.mxu1 %v14742_v51  ;;  %16913 = vmatprep.mubr.msk.f32.mxu1 %vm19115_vm7, %v19114_v8 }
 0x79b   :  { %16899 = vmatprep.subr.mxu1 %v19114_v8 }
 0x79c   :  { %16900 = vmatpush3.msra.mxu1 %v14741_v52 }
 0x79d   :  { %16901 = vmatprep.subr.mxu1 %v19114_v8 }
 0x79e   :  { %16902 = vmatpush3.msra.mxu1 %v14740_v53 }
 0x79f   :  { %16903 = vmatprep.subr.mxu1 %v19114_v8 }
 0x7a0   :  { %16904 = vmatpush3.msra.mxu1 %v14739_v54 }
 0x7a1   :  { %16905 = vmatprep.subr.mxu1 %v19114_v8 }
 0x7a2   :  { %16906 = vmatpush3.msra.mxu1 %v14738_v55 }
 0x7a3   :  { %16907 = vmatprep.subr.mxu1 %v19114_v8 }
 0x7a4   :  { %16908 = vmatpush3.msra.mxu1 %v14737_v56 }
 0x7a5   :  { %16909 = vmatprep.subr.mxu1 %v19114_v8 }
 0x7a6   :  { %16910 = vmatpush3.msra.mxu1 %v14736_v57 }
 0x7a7   :  { %16911 = vmatprep.subr.mxu1 %v19114_v8 }
 0x7a8   :  { %16912 = vmatpush3.msra.mxu1 %v14735_v58 }
 0x7a9   :  { %16914 = vmatmul.mubr.msk.f32.vlgmr.msra.gmra.mxu1 %vm979_vm12, %v19576_v14  ;;  %16935 = vmatprep.subr.mxu1 %v19114_v8 }
 0x7aa   :  { %16936 = vmatpush3.msra.mxu1 %v14762_v59  ;;  %16951 = vmatprep.mubr.msk.f32.mxu1 %vm19115_vm7, %v19114_v8 }
 0x7ab   :  { %16937 = vmatprep.subr.mxu1 %v19114_v8 }
 0x7ac   :  { %16938 = vmatpush3.msra.mxu1 %v14761_v60 }
 0x7ad   :  { %16939 = vmatprep.subr.mxu1 %v19114_v8 }
 0x7ae   :  { %16940 = vmatpush3.msra.mxu1 %v14760_v61 }
 0x7af   :  { %16941 = vmatprep.subr.mxu1 %v19114_v8 }
 0x7b0   :  { %16942 = vmatpush3.msra.mxu1 %v14759_v62 }
 0x7b1   :  { %16943 = vmatprep.subr.mxu1 %v19114_v8 }
 0x7b2   :  { %16944 = vmatpush3.msra.mxu1 %v14758_v63 }
 0x7b3   :  { %16945 = vmatprep.subr.mxu1 %v19114_v8 }
 0x7b4   :  { %16946 = vmatpush3.msra.mxu1 %v14757_v0 }
 0x7b5   :  { %16947 = vmatprep.subr.mxu1 %v19114_v8 }
 0x7b6   :  { %16948 = vmatpush3.msra.mxu1 %v14756_v1  ;;  %v14732_v1 = vld [vmem:[%s19342_s25 + $0x18] sm:$0xff] }
 0x7b7   :  { %16949 = vmatprep.subr.mxu1 %v19114_v8 }
 0x7b8   :  { %16950 = vmatpush3.msra.mxu1 %v14755_v2  ;;  %v14731_v2 = vld [vmem:[%s19342_s25 + $0x10] sm:$0xff] }
 0x7b9   :  { %16952 = vmatmul.mubr.msk.f32.vlgmr.msra.gmra.mxu1 %vm979_vm12, %v19576_v14  ;;  %16990 = vmatprep.subr.mxu1 %v19114_v8 }
 0x7ba   :  { %16991 = vmatpush3.msra.mxu1 %v14790_v5  ;;  %17006 = vmatprep.mubr.msk.f32.mxu1 %vm19115_vm7, %v19114_v8  ;;  %v1766_v5 = vld [vmem:[%s19342_s25 + $0x8] sm:$0xff] }
 0x7bb   :  { %16992 = vmatprep.subr.mxu1 %v19114_v8 }
 0x7bc   :  { %16993 = vmatpush3.msra.mxu1 %v14789_v6 }
 0x7bd   :  { %16994 = vmatprep.subr.mxu1 %v19114_v8 }
 0x7be   :  { %16995 = vmatpush3.msra.mxu1 %v14788_v7  ;;  %v1765_v7 = vld [vmem:[%s19342_s25] sm:$0xff] }
 0x7bf   :  { %16996 = vmatprep.subr.mxu1 %v19114_v8 }
 0x7c0   :  { %16997 = vmatpush3.msra.mxu1 %v14787_v9 }
 0x7c1   :  { %16998 = vmatprep.subr.mxu1 %v19114_v8 }
 0x7c2   :  { %16999 = vmatpush3.msra.mxu1 %v14786_v10  ;;  %v14753_v10 = vld [vmem:[%s19337_s6 + $0xb8] sm:$0xff] }
 0x7c3   :  { %17000 = vmatprep.subr.mxu1 %v19114_v8 }
 0x7c4   :  { %17001 = vmatpush3.msra.mxu1 %v14785_v11  ;;  %v14752_v11 = vld [vmem:[%s19337_s6 + $0xb0] sm:$0xff] }
 0x7c5   :  { %17002 = vmatprep.subr.mxu1 %v19114_v8 }
 0x7c6   :  { %17003 = vmatpush3.msra.mxu1 %v14784_v12  ;;  %v14751_v12 = vld [vmem:[%s19337_s6 + $0xa8] sm:$0xff] }
 0x7c7   :  { %17004 = vmatprep.subr.mxu1 %v19114_v8 }
 0x7c8   :  { %17005 = vmatpush3.msra.mxu1 %v14783_v13  ;;  %v14750_v13 = vld [vmem:[%s19337_s6 + $0xa0] sm:$0xff] }
 0x7c9   :  { %17007 = vmatmul.mubr.msk.f32.vlgmr.msra.gmra.mxu1 %vm979_vm12, %v19576_v14  ;;  %17028 = vmatprep.subr.mxu1 %v19114_v8 }
 0x7ca   :  { %17030 = vmatprep.mubr.msk.f32.mxu1 %vm19115_vm7, %v19114_v8 }
 0x839   :  { %v1676_v15 = vpop.f32.mrf.mxu1 }
 0x83a   :  { %v1681_v16 = vsel %vm1680_vm15, %v1676_v15, -inf }
 0x83b   :  { %1682 = vmax.xlane.f32.xlu1 %v1681_v16  ;;  %v16810_v17 = vpop.f32.mrf.mxu1  ;;  %v14748_v16 = vld [vmem:[%s19337_s6 + $0x90] sm:$0xff] }
 0x83c   :  { %v14747_v17 = vld [vmem:[%s19337_s6 + $0x88] sm:$0xff] }
 0x849   :  { %v1850_v18 = vpop.f32.mrf.mxu1 }
 0x84a   :  { %v1851_v51 = vadd.f32 %v14706_v48, %v1850_v18  ;;  %v14746_v18 = vld [vmem:[%s19337_s6 + $0x80] sm:$0xff] }
 0x84b   :  { %v16834_v19 = vpop.f32.mrf.mxu1 }
 0x859   :  { %v2016_v21 = vpop.f32.mrf.mxu1 }
 0x85a   :  { %v2017_v53 = vadd.f32 %v14726_v49, %v2016_v21  ;;  %v14777_v49 = vld [vmem:[%s19347_s27 + $0xe8] sm:$0xff] }
 0x85b   :  { %v16872_v22 = vpop.f32.mrf.mxu1 }
 0x869   :  { %v19715_v23 = vpop.f32.mrf.mxu1 }
 0x86b   :  { %v16915_v24 = vpop.f32.mrf.mxu1 }
 0x879   :  { %v19717_v25 = vpop.f32.mrf.mxu1 }
 0x87b   :  { %v16953_v26 = vpop.f32.mrf.mxu1 }
 0x889   :  { %v2981_v27 = vpop.f32.mrf.mxu1 }
 0x88a   :  { %17029 = vmatpush3.xpose.msk.msra.mxu1 %vm234_vm0, %v2981_v27  ;;  %v14744_v27 = vld [vmem:[%s19327_s29 + $0x2] ss:$0 sm:$0xff] }
 0x88b   :  { %v17008_v28 = vpop.f32.mrf.mxu1  ;;  %17033 = vmatprep.subr.mxu1 %v19114_v8 }
 0x88c   :  { %v14764_v28 = vld [vmem:[%s19332_s20 + $0x2] ss:$0 sm:$0xff] }
 0x8c4   :  { %v1683_v29 = vpop.xlane.xlu1 %1682 }
 0x8c5   :  { %v1684_v30 = vsub.f32 %v1676_v15, %v1683_v29  ;;  %v14749_v15 = vld [vmem:[%s19337_s6 + $0x98] sm:$0xff] }
 0x8c7   :  { %v1685_v31 = vmul.f32 1.442695, %v1684_v30  ;;  %v2413_v30 = vadd.f32 %v14744_v27, %v19715_v23  ;;  %v14807_v27 = vld [vmem:[%s19342_s25 + $0x38] sm:$0xff] }
 0x8c9   :  { %18883 = vpow2.f32 %v1685_v31 }
 0x8d6   :  { %v18884_v32 = vpop.eup %18883 }
 0x8d7   :  { %v1687_v33 = vsel %vm1680_vm15, %v18884_v32, 0.0 }
 0x8d8   :  { %1688 = vadd.xlane.f32.xlu1 %v1687_v33 }
 0x961   :  { %v1689_v34 = vpop.xlane.xlu1 %1688 }
 0x962   :  { %18885 = vrcp.f32 %v1689_v34 }
 0x96f   :  { %v18886_v35 = vpop.eup %18885 }
 0x970   :  { %v1691_v36 = vmul.f32 %v18886_v35, %v18884_v32  ;;  %v2579_v32 = vadd.f32 %v14764_v28, %v19717_v25  ;;  %v14806_v28 = vld [vmem:[%s19342_s25 + $0x30] sm:$0xff] }
 0x972   :  { %16814 = vmatmul.mubr.msk.f32.vlgmr.msra.gmra.mxu0 %vm1680_vm15, %v1691_v36 }
 0x973   :  { %16836 = vmatpush3.msra.mxu0 %v14715_v37  ;;  %16851 = vmatprep.mubr.msk.f32.mxu0 %vm19115_vm7, %v19114_v8 }
 0x974   :  { %16837 = vmatprep.subr.mxu0 %v19114_v8 }
 0x975   :  { %16838 = vmatpush3.msra.mxu0 %v14714_v38 }
 0x976   :  { %16839 = vmatprep.subr.mxu0 %v19114_v8 }
 0x977   :  { %16840 = vmatpush3.msra.mxu0 %v14713_v39 }
 0x978   :  { %16841 = vmatprep.subr.mxu0 %v19114_v8 }
 0x979   :  { %16842 = vmatpush3.msra.mxu0 %v14712_v40 }
 0x97a   :  { %16843 = vmatprep.subr.mxu0 %v19114_v8 }
 0x97b   :  { %16844 = vmatpush3.msra.mxu0 %v14711_v41 }
 0x97c   :  { %16845 = vmatprep.subr.mxu0 %v19114_v8 }
 0x97d   :  { %16846 = vmatpush3.msra.mxu0 %v14710_v42  ;;  %v14770_v42 = vld [vmem:[%s19342_s25 + $0x28] sm:$0xff] }
 0x97e   :  { %16847 = vmatprep.subr.mxu0 %v19114_v8 }
 0x97f   :  { %16848 = vmatpush3.msra.mxu0 %v14709_v43  ;;  %v14769_v43 = vld [vmem:[%s19342_s25 + $0x20] sm:$0xff] }
 0x980   :  { %16849 = vmatprep.subr.mxu0 %v19114_v8 }
 0x981   :  { %16850 = vmatpush3.msra.mxu0 %v14708_v45  ;;  %v14779_v45 = vld [vmem:[%s19347_s27 + $0xf8] sm:$0xff] }
 0x982   :  { %16852 = vmatmul.mubr.msk.f32.vlgmr.msra.gmra.mxu0 %vm979_vm12, %v19576_v14  ;;  %16873 = vmatprep.subr.mxu0 %v19114_v8 }
 0x983   :  { %16875 = vmatprep.mubr.msk.f32.mxu0 %vm19115_vm7, %v19114_v8 }
 0xa32   :  { %v1761_v46 = vpop.f32.mrf.mxu0 }
 0xa34   :  { %v16815_v47 = vpop.f32.mrf.mxu0 }
 0xa35   :  { %v14778_v47 = vld [vmem:[%s19347_s27 + $0xf0] sm:$0xff] }
 0xa42   :  { %v1929_v50 = vpop.f32.mrf.mxu0 }
 0xa43   :  { %16874 = vmatpush3.xpose.msk.msra.mxu0 %vm234_vm0, %v1929_v50  ;;  %v14776_v50 = vld [vmem:[%s19347_s27 + $0xe0] sm:$0xff] }
 0xa44   :  { %v16853_v52 = vpop.f32.mrf.mxu0  ;;  %16878 = vmatprep.subr.mxu0 %v19114_v8 }
 0xa45   :  { %v14774_v52 = vld [vmem:[%s19347_s27 + $0xd0] sm:$0xff] }
 0xa46   :  { %16876 = vmatmul.mubr.msk.f32.vlgmr.msra.gmra.mxu0 %vm234_vm0, %v1851_v51  ;;  %v14775_v51 = vld [vmem:[%s19347_s27 + $0xd8] sm:$0xff] }
 0xa47   :  { %16879 = vmatpush3.msra.mxu0 %v2017_v53  ;;  %16880 = vmatprep.mubr.msk.f32.mxu0 %vm19115_vm7, %v19114_v8  ;;  %v14773_v53 = vld [vmem:[%s19347_s27 + $0xc8] sm:$0xff] }
 0xa48   :  { %16883 = vmatprep.subr.mxu0 %v19114_v8 }
 0xb06   :  { %v2092_v54 = vpop.f32.mrf.mxu0 }
 0xb07   :  { %v2096_v55 = vsel %vm1680_vm15, %v2092_v54, -inf }
 0xb08   :  { %2097 = vmax.xlane.f32.xlu0 %v2096_v55  ;;  %v16877_v56 = vpop.f32.mrf.mxu0  ;;  %v14799_v55 = vld [vmem:[%s19352_s21 + $0xf8] sm:$0xff] }
 0xb09   :  { %v14798_v56 = vld [vmem:[%s19352_s21 + $0xf0] sm:$0xff] }
 0xb91   :  { %v2098_v57 = vpop.xlane.xlu0 %2097 }
 0xb92   :  { %v2099_v58 = vsub.f32 %v2092_v54, %v2098_v57  ;;  %v14772_v54 = vld [vmem:[%s19347_s27 + $0xc0] sm:$0xff]  ;;  %v14797_v57 = vld [vmem:[%s19352_s21 + $0xe8] sm:$0xff] }
 0xb94   :  { %v2100_v59 = vmul.f32 1.442695, %v2099_v58  ;;  %v14796_v58 = vld [vmem:[%s19352_s21 + $0xe0] sm:$0xff] }
 0xb96   :  { %18887 = vpow2.f32 %v2100_v59  ;;  %v14795_v59 = vld [vmem:[%s19352_s21 + $0xd8] sm:$0xff] }
 0xba3   :  { %v18888_v60 = vpop.eup %18887 }
 0xba4   :  { %v2102_v61 = vsel %vm1680_vm15, %v18888_v60, 0.0 }
 0xba5   :  { %2103 = vadd.xlane.f32.xlu1 %v2102_v61  ;;  %v14793_v61 = vld [vmem:[%s19352_s21 + $0xc8] sm:$0xff] }
 0xc2e   :  { %v2104_v62 = vpop.xlane.xlu1 %2103 }
 0xc2f   :  { %18889 = vrcp.f32 %v2104_v62  ;;  %v14792_v62 = vld [vmem:[%s19352_s21 + $0xc0] sm:$0xff] }
 0xc3c   :  { %v18890_v63 = vpop.eup %18889 }
 0xc3d   :  { %v2106_v0 = vmul.f32 %v18890_v63, %v18888_v60  ;;  %v14794_v60 = vld [vmem:[%s19352_s21 + $0xd0] sm:$0xff] }
 0xc3f   :  { %16881 = vmatmul.mubr.msk.f32.vlgmr.msra.gmra.mxu0 %vm1680_vm15, %v2106_v0 }
 0xc40   :  { %16884 = vmatpush3.msra.mxu0 %v14732_v1  ;;  %16887 = vmatprep.mubr.msk.f32.mxu0 %vm19115_vm7, %v19114_v8 }
 0xc41   :  { %16885 = vmatprep.subr.mxu0 %v19114_v8 }
 0xc42   :  { %16886 = vmatpush3.msra.mxu0 %v14731_v2  ;;  %v14781_v2 = vld [vmem:[%s19327_s29 + $0x3] ss:$0 sm:$0xff] }
 0xc43   :  { %16890 = vmatprep.subr.mxu0 %v19114_v8 }
 0xcff   :  { %v2176_v6 = vpop.f32.mrf.mxu0 }
 0xd00   :  { %16888 = vmatmul.mubr.msk.f32.vlgmr.msra.gmra.mxu0 %vm234_vm0, %v2176_v6 }
 0xd01   :  { %16891 = vmatpush3.msra.mxu0 %v1766_v5  ;;  %v16882_v9 = vpop.f32.mrf.mxu0  ;;  %16894 = vmatprep.mubr.msk.f32.mxu0 %vm19115_vm7, %v19114_v8 }
 0xd02   :  { %16892 = vmatprep.subr.mxu0 %v19114_v8  ;;  %v14801_v9 = vld [vmem:[%s19332_s20 + $0x3] ss:$0 sm:$0xff] }
 0xd03   :  { %16893 = vmatpush3.msra.mxu0 %v1765_v7 }
 0xd04   :  { %16916 = vmatprep.subr.mxu0 %v19114_v8  ;;  %16895 = vmatmul.mubr.msk.f32.vlgmr.msra.gmra.mxu0 %vm234_vm0, %v1761_v46 }
 0xd05   :  { %16917 = vmatpush3.msra.mxu0 %v14753_v10  ;;  %16932 = vmatprep.mubr.msk.f32.mxu0 %vm19115_vm7, %v19114_v8 }
 0xd06   :  { %16918 = vmatprep.subr.mxu0 %v19114_v8 }
 0xd07   :  { %16919 = vmatpush3.msra.mxu0 %v14752_v11 }
 0xd08   :  { %16920 = vmatprep.subr.mxu0 %v19114_v8 }
 0xd09   :  { %16921 = vmatpush3.msra.mxu0 %v14751_v12 }
 0xd0a   :  { %16922 = vmatprep.subr.mxu0 %v19114_v8 }
 0xd0b   :  { %16923 = vmatpush3.msra.mxu0 %v14750_v13 }
 0xd0c   :  { %16924 = vmatprep.subr.mxu0 %v19114_v8 }
 0xd0d   :  { %16925 = vmatpush3.msra.mxu0 %v14749_v15 }
 0xd0e   :  { %16926 = vmatprep.subr.mxu0 %v19114_v8 }
 0xd0f   :  { %16927 = vmatpush3.msra.mxu0 %v14748_v16 }
 0xd10   :  { %16928 = vmatprep.subr.mxu0 %v19114_v8 }
 0xd11   :  { %16929 = vmatpush3.msra.mxu0 %v14747_v17 }
 0xd12   :  { %16930 = vmatprep.subr.mxu0 %v19114_v8 }
 0xd13   :  { %16931 = vmatpush3.msra.mxu0 %v14746_v18 }
 0xd14   :  { %16933 = vmatmul.mubr.msk.f32.vlgmr.msra.gmra.mxu0 %vm979_vm12, %v19576_v14  ;;  %16954 = vmatprep.subr.mxu0 %v19114_v8 }
 0xd15   :  { %16956 = vmatprep.mubr.msk.f32.mxu0 %vm19115_vm7, %v19114_v8 }
 0xdc0   :  { %v2252_v19 = vpop.f32.mrf.mxu0 }
 0xdc2   :  { %v16889_v21 = vpop.f32.mrf.mxu0 }
 0xdc4   :  { %v2325_v22 = vpop.f32.mrf.mxu0 }
 0xdc5   :  { %v19792_v24 = vadd.f32 %v2325_v22, %v2252_v19 }
 0xdc6   :  { %v16896_v26 = vpop.f32.mrf.mxu0 }
 0xdd4   :  { %v2491_v29 = vpop.f32.mrf.mxu0 }
 0xdd5   :  { %16955 = vmatpush3.xpose.msk.msra.mxu0 %vm234_vm0, %v2491_v29 }
 0xdd6   :  { %v16934_v31 = vpop.f32.mrf.mxu0  ;;  %16959 = vmatprep.subr.mxu0 %v19114_v8 }
 0xdd8   :  { %16957 = vmatmul.mubr.msk.f32.vlgmr.msra.gmra.mxu0 %vm234_vm0, %v2413_v30 }
 0xdd9   :  { %16960 = vmatpush3.msra.mxu0 %v2579_v32  ;;  %16961 = vmatprep.mubr.msk.f32.mxu0 %vm19115_vm7, %v19114_v8  ;;  %v14809_v32 = vld [vmem:[%s19322_s8] ss:$0 sm:$0xff] }
 0xdda   :  { %16964 = vmatprep.subr.mxu0 %v19114_v8 }
 0xe98   :  { %v2654_v33 = vpop.f32.mrf.mxu0 }
 0xe99   :  { %v2658_v34 = vsel %vm1680_vm15, %v2654_v33, -inf }
 0xe9a   :  { %2659 = vmax.xlane.f32.xlu0 %v2658_v34  ;;  %v16958_v23 = vpop.f32.mrf.mxu0 }
 0xf23   :  { %v2660_v35 = vpop.xlane.xlu0 %2659 }
 0xf24   :  { %v2661_v36 = vsub.f32 %v2654_v33, %v2660_v35 }
 0xf26   :  { %v2662_v37 = vmul.f32 1.442695, %v2661_v36 }
 0xf28   :  { %18891 = vpow2.f32 %v2662_v37 }
 0xf35   :  { %v18892_v25 = vpop.eup %18891 }
 0xf36   :  { %v2664_v38 = vsel %vm1680_vm15, %v18892_v25, 0.0 }
 0xf37   :  { %2665 = vadd.xlane.f32.xlu1 %v2664_v38 }
 0xfc0   :  { %v2666_v39 = vpop.xlane.xlu1 %2665 }
 0xfc1   :  { %18893 = vrcp.f32 %v2666_v39 }
 0xfce   :  { %v18894_v40 = vpop.eup %18893 }
 0xfcf   :  { %v2668_v41 = vmul.f32 %v18894_v40, %v18892_v25 }
 0xfd1   :  { %16962 = vmatmul.mubr.msk.f32.vlgmr.msra.gmra.mxu0 %vm1680_vm15, %v2668_v41  ;;  %v3354_v41 = vld [vmem:[%s22015_s0 + $0x38] sm:$0xff] }
 0xfd2   :  { %16965 = vmatpush3.msra.mxu0 %v14770_v42  ;;  %16968 = vmatprep.mubr.msk.f32.mxu0 %vm19115_vm7, %v19114_v8  ;;  %v3352_v42 = vld [vmem:[%s22015_s0 + $0x28] sm:$0xff] }
 0xfd3   :  { %16966 = vmatprep.subr.mxu0 %v19114_v8 }
 0xfd4   :  { %16967 = vmatpush3.msra.mxu0 %v14769_v43  ;;  %v3351_v43 = vld [vmem:[%s22015_s0 + $0x20] sm:$0xff] }
 0xfd5   :  { %16971 = vmatprep.subr.mxu0 %v19114_v8 }
0x1091   :  { %v2738_v46 = vpop.f32.mrf.mxu0 }
0x1092   :  { %16969 = vmatmul.mubr.msk.f32.vlgmr.msra.gmra.mxu0 %vm234_vm0, %v2738_v46  ;;  %v3349_v46 = vld [vmem:[%s22015_s0 + $0x10] sm:$0xff] }
0x1093   :  { %16972 = vmatpush3.msra.mxu0 %v14779_v45  ;;  %v16963_v48 = vpop.f32.mrf.mxu0  ;;  %16987 = vmatprep.mubr.msk.f32.mxu0 %vm19115_vm7, %v19114_v8  ;;  %v3350_v45 = vld [vmem:[%s22015_s0 + $0x18] sm:$0xff] }
0x1094   :  { %16973 = vmatprep.subr.mxu0 %v19114_v8  ;;  %v3347_v48 = vld [vmem:[%s22015_s0] sm:$0xff] }
0x1095   :  { %16974 = vmatpush3.msra.mxu0 %v14778_v47  ;;  %v3348_v47 = vld [vmem:[%s22015_s0 + $0x8] sm:$0xff] }
0x1096   :  { %16975 = vmatprep.subr.mxu0 %v19114_v8 }
0x1097   :  { %16976 = vmatpush3.msra.mxu0 %v14777_v49 }
0x1098   :  { %16977 = vmatprep.subr.mxu0 %v19114_v8 }
0x1099   :  { %16978 = vmatpush3.msra.mxu0 %v14776_v50 }
0x109a   :  { %16979 = vmatprep.subr.mxu0 %v19114_v8 }
0x109b   :  { %16980 = vmatpush3.msra.mxu0 %v14775_v51 }
0x109c   :  { %16981 = vmatprep.subr.mxu0 %v19114_v8 }
0x109d   :  { %16982 = vmatpush3.msra.mxu0 %v14774_v52 }
0x109e   :  { %16983 = vmatprep.subr.mxu0 %v19114_v8 }
0x109f   :  { %16984 = vmatpush3.msra.mxu0 %v14773_v53  ;;  %v14810_v53 = vld [vmem:[%s22016_s5] ss:$0 sm:$0xff] }
0x10a0   :  { %16985 = vmatprep.subr.mxu0 %v19114_v8 }
0x10a1   :  { %16986 = vmatpush3.msra.mxu0 %v14772_v54 }
0x10a2   :  { %16988 = vmatmul.mubr.msk.f32.vlgmr.msra.gmra.mxu0 %vm979_vm12, %v19576_v14  ;;  %17009 = vmatprep.subr.mxu0 %v19114_v8 }
0x10a3   :  { %17010 = vmatpush3.msra.mxu0 %v14799_v55  ;;  %17025 = vmatprep.mubr.msk.f32.mxu0 %vm19115_vm7, %v19114_v8  ;;  %v14811_v55 = vld [vmem:[%s22017_s9] ss:$0 sm:$0xff] }
0x10a4   :  { %17011 = vmatprep.subr.mxu0 %v19114_v8 }
0x10a5   :  { %17012 = vmatpush3.msra.mxu0 %v14798_v56 }
0x10a6   :  { %17013 = vmatprep.subr.mxu0 %v19114_v8 }
0x10a7   :  { %17014 = vmatpush3.msra.mxu0 %v14797_v57 }
0x10a8   :  { %17015 = vmatprep.subr.mxu0 %v19114_v8 }
0x10a9   :  { %17016 = vmatpush3.msra.mxu0 %v14796_v58  ;;  %v3477_v58 = vld [vmem:[%s22018_s13 + $0x78] sm:$0xff] }
0x10aa   :  { %17017 = vmatprep.subr.mxu0 %v19114_v8 }
0x10ab   :  { %17018 = vmatpush3.msra.mxu0 %v14795_v59  ;;  %v3476_v59 = vld [vmem:[%s22018_s13 + $0x70] sm:$0xff] }
0x10ac   :  { %17019 = vmatprep.subr.mxu0 %v19114_v8 }
0x10ad   :  { %17020 = vmatpush3.msra.mxu0 %v14794_v60  ;;  %v3475_v60 = vld [vmem:[%s22018_s13 + $0x68] sm:$0xff] }
0x10ae   :  { %17021 = vmatprep.subr.mxu0 %v19114_v8 }
0x10af   :  { %17022 = vmatpush3.msra.mxu0 %v14793_v61  ;;  %v3474_v61 = vld [vmem:[%s22018_s13 + $0x60] sm:$0xff] }
0x10b0   :  { %17023 = vmatprep.subr.mxu0 %v19114_v8 }
0x10b1   :  { %17024 = vmatpush3.msra.mxu0 %v14792_v62  ;;  %v3473_v62 = vld [vmem:[%s22018_s13 + $0x58] sm:$0xff] }
0x10b2   :  { %17026 = vmatmul.mubr.msk.f32.vlgmr.msra.gmra.mxu0 %vm979_vm12, %v19576_v14  ;;  %17064 = vmatprep.subr.mxu0 %v19114_v8 }
0x10b3   :  { %17096 = vmatprep.mubr.msk.f32.mxu0 %vm19115_vm7, %v19114_v8  ;;  %17065 = vmatpush3.msra.mxu0 %v3477_v58  ;;  %v14824_v58 = vld [vmem:[%s19347_s27 + $0x128] sm:$0xff] }
0x10b4   :  { %17066 = vmatprep.subr.mxu0 %v19114_v8 }
0x10b5   :  { %17067 = vmatpush3.msra.mxu0 %v3476_v59  ;;  %v14844_v59 = vld [vmem:[%s19352_s21 + $0x128] sm:$0xff] }
0x10b6   :  { %17068 = vmatprep.subr.mxu0 %v19114_v8 }
0x10b7   :  { %17069 = vmatpush3.msra.mxu0 %v3475_v60  ;;  %v14823_v60 = vld [vmem:[%s19347_s27 + $0x120] sm:$0xff] }
0x10b8   :  { %17070 = vmatprep.subr.mxu0 %v19114_v8 }
0x10b9   :  { %17071 = vmatpush3.msra.mxu0 %v3474_v61  ;;  %v14843_v61 = vld [vmem:[%s19352_s21 + $0x120] sm:$0xff] }
0x10ba   :  { %17072 = vmatprep.subr.mxu0 %v19114_v8 }
0x10bb   :  { %17073 = vmatpush3.msra.mxu0 %v3473_v62  ;;  %v14822_v62 = vld [vmem:[%s19347_s27 + $0x118] sm:$0xff] }
0x10bc   :  { %17074 = vmatprep.subr.mxu0 %v19114_v8 }
0x1152   :  { %v2814_v63 = vpop.f32.mrf.mxu0 }
0x1153   :  { %v2818_v0 = vadd.f32 %v2814_v63, %v19792_v24  ;;  %v3472_v63 = vld [vmem:[%s22018_s13 + $0x50] sm:$0xff] }
0x1154   :  { %v16970_v1 = vpop.f32.mrf.mxu0  ;;  %17075 = vmatpush3.msra.mxu0 %v3472_v63  ;;  %v14842_v63 = vld [vmem:[%s19352_s21 + $0x118] sm:$0xff] }
0x1155   :  { %17076 = vmatprep.subr.mxu0 %v19114_v8  ;;  %v3470_v1 = vld [vmem:[%s22018_s13 + $0x40] sm:$0xff] }
0x1162   :  { %v2902_v5 = vpop.f32.mrf.mxu0 }
0x1163   :  { %v2903_v6 = vadd.f32 %v14781_v2, %v2902_v5  ;;  %v3469_v2 = vld [vmem:[%s22018_s13 + $0x38] sm:$0xff]  ;;  %v3468_v5 = vld [vmem:[%s22018_s13 + $0x30] sm:$0xff] }
0x1164   :  { %v16989_v7 = vpop.f32.mrf.mxu0 }
0x1165   :  { %17031 = vmatmul.mubr.msk.f32.vlgmr.msra.gmra.mxu1 %vm234_vm0, %v2903_v6  ;;  %v3467_v6 = vld [vmem:[%s22018_s13 + $0x28] sm:$0xff]  ;;  %v3466_v7 = vld [vmem:[%s22018_s13 + $0x20] sm:$0xff] }
0x1166   :  { %17035 = vmatprep.mubr.msk.f32.mxu1 %vm19115_vm7, %v19114_v8 }
0x1172   :  { %v3068_v14 = vpop.f32.mrf.mxu0 }
0x1173   :  { %v3069_v10 = vadd.f32 %v14801_v9, %v3068_v14  ;;  %v3465_v9 = vld [vmem:[%s22018_s13 + $0x18] sm:$0xff]  ;;  %v3464_v14 = vld [vmem:[%s22018_s13 + $0x10] sm:$0xff] }
0x1174   :  { %v17027_v11 = vpop.f32.mrf.mxu0 }
0x1175   :  { %17034 = vmatpush3.msra.mxu1 %v3069_v10  ;;  %v3463_v10 = vld [vmem:[%s22018_s13 + $0x8] sm:$0xff]  ;;  %v3462_v11 = vld [vmem:[%s22018_s13] sm:$0xff] }
0x1176   :  { %17038 = vmatprep.subr.mxu1 %v19114_v8 }
0x1225   :  { %v3144_v12 = vpop.f32.mrf.mxu1 }
0x1226   :  { %v3148_v13 = vsel %vm1680_vm15, %v3144_v12, -inf }
0x1227   :  { %3149 = vmax.xlane.f32.xlu0 %v3148_v13  ;;  %v17032_v15 = vpop.f32.mrf.mxu1 }
0x12b0   :  { %v3150_v16 = vpop.xlane.xlu0 %3149 }
0x12b1   :  { %v3151_v17 = vsub.f32 %v3144_v12, %v3150_v16  ;;  %v14812_v12 = vld [vmem:[%s22019_s17] ss:$0 sm:$0xff] }
0x12b3   :  { %v3152_v18 = vmul.f32 1.442695, %v3151_v17 }
0x12b5   :  { %18895 = vpow2.f32 %v3152_v18 }
0x12c2   :  { %v18896_v19 = vpop.eup %18895 }
0x12c3   :  { %v3154_v21 = vsel %vm1680_vm15, %v18896_v19, 0.0 }
0x12c4   :  { %3155 = vadd.xlane.f32.xlu1 %v3154_v21 }
0x134d   :  { %v3156_v22 = vpop.xlane.xlu1 %3155 }
0x134e   :  { %18897 = vrcp.f32 %v3156_v22 }
0x135b   :  { %v18898_v24 = vpop.eup %18897 }
0x135c   :  { %v3158_v26 = vmul.f32 %v18898_v24, %v18896_v19 }
0x135e   :  { %17036 = vmatmul.mubr.msk.f32.vlgmr.msra.gmra.mxu1 %vm1680_vm15, %v3158_v26 }
0x135f   :  { %17039 = vmatpush3.msra.mxu1 %v14807_v27  ;;  %17042 = vmatprep.mubr.msk.f32.mxu1 %vm19115_vm7, %v19114_v8 }
0x1360   :  { %17040 = vmatprep.subr.mxu1 %v19114_v8 }
0x1361   :  { %17041 = vmatpush3.msra.mxu1 %v14806_v28 }
0x1362   :  { %17045 = vmatprep.subr.mxu1 %v19114_v8 }
0x141e   :  { %v3228_v29 = vpop.f32.mrf.mxu1 }
0x141f   :  { %17043 = vmatmul.mubr.msk.f32.vlgmr.msra.gmra.mxu1 %vm234_vm0, %v3228_v29 }
0x1420   :  { %v17037_v30 = vpop.f32.mrf.mxu1  ;;  %17061 = vmatprep.mubr.msk.f32.mxu1 %vm19115_vm7, %v19114_v8  ;;  %17046 = vmatpush3.msra.mxu1 %v3354_v41 }
0x1421   :  { %17047 = vmatprep.subr.mxu1 %v19114_v8 }
0x14df   :  { %v3304_v31 = vpop.f32.mrf.mxu1 }
0x14e0   :  { %v3308_v33 = vadd.f32 %v3304_v31, %v2818_v0  ;;  %v3471_v0 = vld [vmem:[%s22018_s13 + $0x48] sm:$0xff] }
0x14e1   :  { %v17044_v34 = vpop.f32.mrf.mxu1  ;;  %17077 = vmatpush3.msra.mxu0 %v3471_v0  ;;  %v14821_v0 = vld [vmem:[%s19347_s27 + $0x110] sm:$0xff] }
0x14e2   :  { %v3316_v23 = vadd.f32 %v14809_v32, %v3308_v33  ;;  %17078 = vmatprep.subr.mxu0 %v19114_v8 }
0x14e3   :  { %17079 = vmatpush3.msra.mxu0 %v3470_v1  ;;  %v14841_v1 = vld [vmem:[%s19352_s21 + $0x110] sm:$0xff] }
0x14e4   :  { %v19877_v35 = vadd.f32 %v3316_v23, %v19536_v44  ;;  %v3353_v44 = vld [vmem:[%s22015_s0 + $0x30] sm:$0xff]  ;;  %17080 = vmatprep.subr.mxu0 %v19114_v8 }
0x14e5   :  { %17048 = vmatpush3.msra.mxu1 %v3353_v44  ;;  %17081 = vmatpush3.msra.mxu0 %v3469_v2  ;;  %v14820_v2 = vld [vmem:[%s19347_s27 + $0x108] sm:$0xff] }
0x14e6   :  { %v3320_v36 = vsel %vm979_vm12, %v19877_v35, 0.0  ;;  %17049 = vmatprep.subr.mxu1 %v19114_v8  ;;  %17082 = vmatprep.subr.mxu0 %v19114_v8 }
0x14e7   :  { %3321 = vadd.xlane.f32.xlu0 %v3320_v36  ;;  %17050 = vmatpush3.msra.mxu1 %v3352_v42 }
0x14e8   :  { %17051 = vmatprep.subr.mxu1 %v19114_v8  ;;  %17083 = vmatpush3.msra.mxu0 %v3468_v5  ;;  %v14840_v5 = vld [vmem:[%s19352_s21 + $0x108] sm:$0xff] }
0x14e9   :  { %17052 = vmatpush3.msra.mxu1 %v3351_v43  ;;  %17084 = vmatprep.subr.mxu0 %v19114_v8  ;;  %v14814_v43 = vld [vmem:[%s22020_s12] ss:$0 sm:$0xff] }
0x14ea   :  { %17053 = vmatprep.subr.mxu1 %v19114_v8  ;;  %17085 = vmatpush3.msra.mxu0 %v3467_v6  ;;  %v14819_v6 = vld [vmem:[%s19347_s27 + $0x100] sm:$0xff] }
0x14eb   :  { %17054 = vmatpush3.msra.mxu1 %v3350_v45  ;;  %17086 = vmatprep.subr.mxu0 %v19114_v8 }
0x14ec   :  { %17055 = vmatprep.subr.mxu1 %v19114_v8  ;;  %17087 = vmatpush3.msra.mxu0 %v3466_v7  ;;  %v14839_v7 = vld [vmem:[%s19352_s21 + $0x100] sm:$0xff] }
0x14ed   :  { %17056 = vmatpush3.msra.mxu1 %v3349_v46  ;;  %17088 = vmatprep.subr.mxu0 %v19114_v8 }
0x14ee   :  { %17057 = vmatprep.subr.mxu1 %v19114_v8  ;;  %17089 = vmatpush3.msra.mxu0 %v3465_v9 }
0x14ef   :  { %17058 = vmatpush3.msra.mxu1 %v3348_v47  ;;  %17090 = vmatprep.subr.mxu0 %v19114_v8 }
0x14f0   :  { %17059 = vmatprep.subr.mxu1 %v19114_v8  ;;  %17091 = vmatpush3.msra.mxu0 %v3464_v14 }
0x14f1   :  { %17060 = vmatpush3.msra.mxu1 %v3347_v48  ;;  %17092 = vmatprep.subr.mxu0 %v19114_v8 }
0x14f2   :  { %17099 = vmatprep.subr.mxu1 %v19114_v8  ;;  %17093 = vmatpush3.msra.mxu0 %v3463_v10 }
0x14f3   :  { %17094 = vmatprep.subr.mxu0 %v19114_v8 }
0x14f4   :  { %17095 = vmatpush3.msra.mxu0 %v3462_v11 }
0x14f5   :  { %17137 = vmatprep.subr.mxu0 %v19114_v8 }
0x1570   :  { %v3322_v37 = vpop.xlane.xlu0 %3321 }
0x1571   :  { %v3323_v25 = vmul.f32 0.015625, %v3322_v37 }
0x1573   :  { %v3324_v38 = vsub.f32 %v19877_v35, %v3323_v25 }
0x1575   :  { %v3325_v39 = vmul.f32 %v3324_v38, %v3324_v38 }
0x1577   :  { %v3326_v40 = vsel %vm979_vm12, %v3325_v39, 0.0 }
0x1578   :  { %3327 = vadd.xlane.f32.xlu1 %v3326_v40 }
0x1601   :  { %v3328_v49 = vpop.xlane.xlu1 %3327 }
0x1602   :  { %v3329_v50 = vmul.f32 0.015625, %v3328_v49 }
0x1604   :  { %v3330_v51 = vadd.f32 1e-05, %v3329_v50 }
0x1606   :  { %18899 = vrsqrt.f32 %v3330_v51 }
0x1613   :  { %v18900_v52 = vpop.eup %18899 }
0x1614   :  { %v3332_v54 = vmul.f32 %v18900_v52, %v3324_v38 }
0x1616   :  { %v3339_v56 = vmul.f32 %v14810_v53, %v3332_v54 }
0x1618   :  { %v3346_v57 = vadd.f32 %v14811_v55, %v3339_v56  ;;  %v14826_v55 = vld [vmem:[%s19347_s27 + $0x138] sm:$0xff]  ;;  %v14825_v56 = vld [vmem:[%s19347_s27 + $0x130] sm:$0xff] }
0x161a   :  { %17062 = vmatmul.mubr.msk.f32.vlgmr.msra.gmra.mxu1 %vm979_vm12, %v3346_v57  ;;  %v14845_v57 = vld [vmem:[%s19352_s21 + $0x130] sm:$0xff] }
0x161b   :  { %17115 = vmatprep.mubr.msk.f32.mxu1 %vm19115_vm7, %v19114_v8  ;;  %17100 = vmatpush3.msra.mxu1 %v14826_v55  ;;  %v14900_v55 = vld [vmem:[%s19347_s27 + $0x1b8] sm:$0xff] }
0x161c   :  { %17101 = vmatprep.subr.mxu1 %v19114_v8 }
0x161d   :  { %17102 = vmatpush3.msra.mxu1 %v14825_v56  ;;  %v14898_v56 = vld [vmem:[%s19347_s27 + $0x1a8] sm:$0xff] }
0x161e   :  { %17103 = vmatprep.subr.mxu1 %v19114_v8 }
0x161f   :  { %17104 = vmatpush3.msra.mxu1 %v14824_v58  ;;  %v14896_v58 = vld [vmem:[%s19347_s27 + $0x198] sm:$0xff] }
0x1620   :  { %17105 = vmatprep.subr.mxu1 %v19114_v8 }
0x1621   :  { %17106 = vmatpush3.msra.mxu1 %v14823_v60  ;;  %v14894_v60 = vld [vmem:[%s19347_s27 + $0x188] sm:$0xff] }
0x1622   :  { %17107 = vmatprep.subr.mxu1 %v19114_v8 }
0x1623   :  { %17108 = vmatpush3.msra.mxu1 %v14822_v62  ;;  %v14920_v62 = vld [vmem:[%s19352_s21 + $0x1b8] sm:$0xff] }
0x1624   :  { %17109 = vmatprep.subr.mxu1 %v19114_v8 }
0x1625   :  { %17110 = vmatpush3.msra.mxu1 %v14821_v0  ;;  %v14918_v0 = vld [vmem:[%s19352_s21 + $0x1a8] sm:$0xff] }
0x1626   :  { %17111 = vmatprep.subr.mxu1 %v19114_v8 }
0x1627   :  { %17112 = vmatpush3.msra.mxu1 %v14820_v2  ;;  %v14916_v2 = vld [vmem:[%s19352_s21 + $0x198] sm:$0xff] }
0x1628   :  { %17113 = vmatprep.subr.mxu1 %v19114_v8 }
0x1629   :  { %17114 = vmatpush3.msra.mxu1 %v14819_v6  ;;  %v14914_v6 = vld [vmem:[%s19352_s21 + $0x188] sm:$0xff] }
0x162a   :  { %17118 = vmatprep.subr.mxu1 %v19114_v8 }
0x16da   :  { %v3431_v13 = vpop.f32.mrf.mxu1 }
0x16db   :  { %v3432_v15 = vadd.f32 %v14812_v12, %v3431_v13  ;;  %v14817_v12 = vld [vmem:[%s19362_s14 + $0x1] ss:$0 sm:$0xff]  ;;  %s22026_s14 = sld [smem:[#allocation29_spill]] }
0x16dc   :  { %v17063_v16 = vpop.f32.mrf.mxu1 }
0x16dd   :  { %v3436_v17 = vmul.f32 0.70710677, %v3432_v15  ;;  %v3435_v41 = vmul.f32 0.5, %v3432_v15  ;;  %v14818_v15 = vld [vmem:[%s19357_s19 + $0x1] ss:$0 sm:$0xff]  ;;  %s22027_s19 = sld [smem:[#allocation28_spill]] }
0x16df   :  { %v3439_v18 = vand.u32 2147483647, %v3436_v17  ;;  %vm3437_vm1 = vcmp.ge.f32.partialorder %v3436_v17, 0.0 }
0x16e0   :  { %v3438_v39 = vsel %vm3437_vm1, 1.0, %v19116_v20 }
0x16e1   :  { %v3440_v19 = vmul.f32 0.3275911, %v3439_v18  ;;  %v3453_v22 = vsub.f32 0.0, %v3439_v18 }
0x16e3   :  { %v3441_v21 = vadd.f32 1.0, %v3440_v19  ;;  %v3454_v24 = vmul.f32 %v3453_v22, %v3439_v18  ;;  %v14837_v18 = vld [vmem:[%s19337_s6 + $0x138] sm:$0xff]  ;;  %v14836_v19 = vld [vmem:[%s19337_s6 + $0x130] sm:$0xff]  ;;  %v14834_v22 = vld [vmem:[%s19337_s6 + $0x120] sm:$0xff] }
0x16e5   :  { %18901 = vrcp.f32 %v3441_v21  ;;  %v3455_v28 = vmul.f32 1.442695, %v3454_v24  ;;  %v14835_v21 = vld [vmem:[%s19337_s6 + $0x128] sm:$0xff]  ;;  %v14833_v24 = vld [vmem:[%s19337_s6 + $0x118] sm:$0xff] }
0x16e7   :  { %18903 = vpow2.f32 %v3455_v28  ;;  %v14830_v28 = vld [vmem:[%s19337_s6 + $0x100] sm:$0xff] }
0x16f2   :  { %v18902_v26 = vpop.eup %18901 }
0x16f3   :  { %v3444_v27 = vmul.f32 1.0614054, %v18902_v26 }
0x16f4   :  { %v18904_v37 = vpop.eup %18903 }
0x16f5   :  { %v3445_v29 = vadd.f32 -1.4531521, %v3444_v27  ;;  %v14831_v27 = vld [vmem:[%s19337_s6 + $0x108] sm:$0xff] }
0x16f7   :  { %v3446_v30 = vmul.f32 %v18902_v26, %v3445_v29  ;;  %v14848_v29 = vld [vmem:[%s19332_s20 + $0x4] ss:$0 sm:$0xff] }
0x16f9   :  { %v3447_v31 = vadd.f32 1.4214138, %v3446_v30 }
0x16fb   :  { %v3448_v32 = vmul.f32 %v18902_v26, %v3447_v31 }
0x16fd   :  { %v3449_v33 = vadd.f32 -0.28449672, %v3448_v32 }
0x16ff   :  { %v3450_v34 = vmul.f32 %v18902_v26, %v3449_v33 }
0x1701   :  { %v3451_v23 = vadd.f32 0.2548296, %v3450_v34 }
0x1703   :  { %v3452_v36 = vmul.f32 %v18902_v26, %v3451_v23  ;;  %v14832_v26 = vld [vmem:[%s19337_s6 + $0x110] sm:$0xff]  ;;  %v14828_v23 = vld [vmem:[%s19327_s29 + $0x4] ss:$0 sm:$0xff] }
0x1705   :  { %v3457_v25 = vmul.f32 %v18904_v37, %v3452_v36 }
0x1707   :  { %v3458_v38 = vsub.f32 1.0, %v3457_v25 }
0x1709   :  { %v3459_v40 = vmul.f32 %v3458_v38, %v3438_v39  ;;  %v14862_v38 = vld [vmem:[%s19347_s27 + $0x178] sm:$0xff]  ;;  %v14861_v39 = vld [vmem:[%s19347_s27 + $0x170] sm:$0xff] }
0x170b   :  { %v3460_v44 = vadd.f32 1.0, %v3459_v40  ;;  %v14860_v40 = vld [vmem:[%s19347_s27 + $0x168] sm:$0xff] }
0x170d   :  { %v3461_v42 = vmul.f32 %v3460_v44, %v3435_v41  ;;  %v14859_v41 = vld [vmem:[%s19347_s27 + $0x160] sm:$0xff]  ;;  %v14858_v44 = vld [vmem:[%s19347_s27 + $0x158] sm:$0xff] }
0x170f   :  { %17097 = vmatmul.mubr.f32.vlgmr.msra.gmra.mxu0 %v3461_v42  ;;  %v14857_v42 = vld [vmem:[%s19347_s27 + $0x150] sm:$0xff] }
0x1710   :  { %17153 = vmatprep.mubr.msk.f32.mxu0 %vm19115_vm7, %v19114_v8 }
0x17cf   :  { %v3551_v45 = vpop.f32.mrf.mxu0 }
0x17d0   :  { %v3552_v46 = vadd.f32 %v14814_v43, %v3551_v45  ;;  %v14856_v43 = vld [vmem:[%s19347_s27 + $0x148] sm:$0xff]  ;;  %v14855_v45 = vld [vmem:[%s19347_s27 + $0x140] sm:$0xff] }
0x17d1   :  { %v17098_v47 = vpop.f32.mrf.mxu0 }
0x17d2   :  { %v19942_v48 = vadd.f32 %v3552_v46, %v19877_v35  ;;  %v14846_v35 = vld [vmem:[%s19352_s21 + $0x138] sm:$0xff]  ;;  %v14881_v47 = vld [vmem:[%s19352_s21 + $0x170] sm:$0xff] }
0x17d3   :  { %17138 = vmatpush3.msra.mxu0 %v14846_v35  ;;  %v14882_v46 = vld [vmem:[%s19352_s21 + $0x178] sm:$0xff]  ;;  %v14899_v35 = vld [vmem:[%s19347_s27 + $0x1b0] sm:$0xff] }
0x17d4   :  { %v3560_v49 = vsel %vm979_vm12, %v19942_v48, 0.0  ;;  %17139 = vmatprep.subr.mxu0 %v19114_v8 }
0x17d5   :  { %3561 = vadd.xlane.f32.xlu0 %v3560_v49  ;;  %17140 = vmatpush3.msra.mxu0 %v14845_v57  ;;  %v14880_v49 = vld [vmem:[%s19352_s21 + $0x168] sm:$0xff]  ;;  %v14897_v57 = vld [vmem:[%s19347_s27 + $0x1a0] sm:$0xff] }
0x17d6   :  { %17141 = vmatprep.subr.mxu0 %v19114_v8 }
0x17d7   :  { %17142 = vmatpush3.msra.mxu0 %v14844_v59  ;;  %v14895_v59 = vld [vmem:[%s19347_s27 + $0x190] sm:$0xff] }
0x17d8   :  { %17143 = vmatprep.subr.mxu0 %v19114_v8 }
0x17d9   :  { %17144 = vmatpush3.msra.mxu0 %v14843_v61  ;;  %v14893_v61 = vld [vmem:[%s19347_s27 + $0x180] sm:$0xff] }
0x17da   :  { %17145 = vmatprep.subr.mxu0 %v19114_v8 }
0x17db   :  { %17146 = vmatpush3.msra.mxu0 %v14842_v63  ;;  %v14919_v63 = vld [vmem:[%s19352_s21 + $0x1b0] sm:$0xff] }
0x17dc   :  { %17147 = vmatprep.subr.mxu0 %v19114_v8 }
0x17dd   :  { %17148 = vmatpush3.msra.mxu0 %v14841_v1  ;;  %v14917_v1 = vld [vmem:[%s19352_s21 + $0x1a0] sm:$0xff] }
0x17de   :  { %17149 = vmatprep.subr.mxu0 %v19114_v8 }
0x17df   :  { %17150 = vmatpush3.msra.mxu0 %v14840_v5  ;;  %v14915_v5 = vld [vmem:[%s19352_s21 + $0x190] sm:$0xff] }
0x17e0   :  { %17151 = vmatprep.subr.mxu0 %v19114_v8 }
0x17e1   :  { %17152 = vmatpush3.msra.mxu0 %v14839_v7  ;;  %v14913_v7 = vld [vmem:[%s19352_s21 + $0x180] sm:$0xff] }
0x17e2   :  { %17161 = vmatprep.subr.mxu0 %v19114_v8 }
0x185e   :  { %v3562_v50 = vpop.xlane.xlu0 %3561 }
0x185f   :  { %v3563_v51 = vmul.f32 0.015625, %v3562_v50  ;;  %v14879_v50 = vld [vmem:[%s19352_s21 + $0x160] sm:$0xff] }
0x1861   :  { %v3564_v52 = vsub.f32 %v19942_v48, %v3563_v51  ;;  %v14878_v51 = vld [vmem:[%s19352_s21 + $0x158] sm:$0xff] }
0x1863   :  { %v3565_v53 = vmul.f32 %v3564_v52, %v3564_v52 }
0x1865   :  { %v3566_v54 = vsel %vm979_vm12, %v3565_v53, 0.0  ;;  %v14876_v53 = vld [vmem:[%s19352_s21 + $0x148] sm:$0xff] }
0x1866   :  { %3567 = vadd.xlane.f32.xlu1 %v3566_v54  ;;  %v14875_v54 = vld [vmem:[%s19352_s21 + $0x140] sm:$0xff] }
0x18ef   :  { %v3568_v9 = vpop.xlane.xlu1 %3567 }
0x18f0   :  { %v3569_v14 = vmul.f32 0.015625, %v3568_v9  ;;  %v14948_v9 = vld [vmem:[%s19337_s6 + $0x1f8] sm:$0xff] }
0x18f2   :  { %v3570_v10 = vadd.f32 1e-05, %v3569_v14  ;;  %v14947_v14 = vld [vmem:[%s19337_s6 + $0x1f0] sm:$0xff] }
0x18f4   :  { %18905 = vrsqrt.f32 %v3570_v10  ;;  %v14946_v10 = vld [vmem:[%s19337_s6 + $0x1e8] sm:$0xff] }
0x1901   :  { %v18906_v11 = vpop.eup %18905 }
0x1902   :  { %v3572_v13 = vmul.f32 %v18906_v11, %v3564_v52  ;;  %v14877_v52 = vld [vmem:[%s19352_s21 + $0x150] sm:$0xff]  ;;  %v14945_v11 = vld [vmem:[%s19337_s6 + $0x1e0] sm:$0xff] }
0x1904   :  { %v3579_v16 = vmul.f32 %v14817_v12, %v3572_v13  ;;  %v14944_v12 = vld [vmem:[%s19337_s6 + $0x1d8] sm:$0xff]  ;;  %v14943_v13 = vld [vmem:[%s19337_s6 + $0x1d0] sm:$0xff] }
0x1906   :  { %v19982_v17 = vadd.f32 %v14818_v15, %v3579_v16  ;;  %v14942_v15 = vld [vmem:[%s19337_s6 + $0x1c8] sm:$0xff]  ;;  %v14941_v16 = vld [vmem:[%s19337_s6 + $0x1c0] sm:$0xff] }
0x1908   :  { %17116 = vmatmul.mubr.msk.f32.vlgmr.msra.gmra.mxu1 %vm979_vm12, %v19982_v17  ;;  %17154 = vmatmul.mubr.msk.f32.vlgmr.msra.gmra.mxu0 %vm979_vm12, %v19982_v17 }
0x1909   :  { %17119 = vmatpush3.msra.mxu1 %v14837_v18  ;;  %17134 = vmatprep.mubr.msk.f32.mxu1 %vm19115_vm7, %v19114_v8 }
0x190a   :  { %17120 = vmatprep.subr.mxu1 %v19114_v8  ;;  %17163 = vmatprep.mubr.msk.f32.mxu0 %vm19115_vm7, %v19114_v8 }
0x190b   :  { %17121 = vmatpush3.msra.mxu1 %v14836_v19 }
0x190c   :  { %17122 = vmatprep.subr.mxu1 %v19114_v8 }
0x190d   :  { %17123 = vmatpush3.msra.mxu1 %v14835_v21 }
0x190e   :  { %17124 = vmatprep.subr.mxu1 %v19114_v8 }
0x190f   :  { %17125 = vmatpush3.msra.mxu1 %v14834_v22 }
0x1910   :  { %17126 = vmatprep.subr.mxu1 %v19114_v8 }
0x1911   :  { %17127 = vmatpush3.msra.mxu1 %v14833_v24 }
0x1912   :  { %17128 = vmatprep.subr.mxu1 %v19114_v8 }
0x1913   :  { %17129 = vmatpush3.msra.mxu1 %v14832_v26 }
0x1914   :  { %17130 = vmatprep.subr.mxu1 %v19114_v8 }
0x1915   :  { %17131 = vmatpush3.msra.mxu1 %v14831_v27 }
0x1916   :  { %17132 = vmatprep.subr.mxu1 %v19114_v8 }
0x1917   :  { %17133 = vmatpush3.msra.mxu1 %v14830_v28 }
0x1918   :  { %17135 = vmatmul.mubr.msk.f32.vlgmr.msra.gmra.mxu1 %vm979_vm12, %v19982_v17  ;;  %17156 = vmatprep.subr.mxu1 %v19114_v8 }
0x1919   :  { %17158 = vmatprep.mubr.msk.f32.mxu1 %vm19115_vm7, %v19114_v8 }
0x19c8   :  { %v3673_v30 = vpop.f32.mrf.mxu1  ;;  %v3839_v31 = vpop.f32.mrf.mxu0 }
0x19c9   :  { %v3840_v32 = vadd.f32 %v14848_v29, %v3839_v31  ;;  %v3674_v37 = vadd.f32 %v14828_v23, %v3673_v30 }
0x19ca   :  { %v17117_v33 = vpop.f32.mrf.mxu1  ;;  %v17155_v34 = vpop.f32.mrf.mxu0 }
0x19cb   :  { %17162 = vmatpush3.msra.mxu0 %v3840_v32 }
0x19cc   :  { %17185 = vmatprep.subr.mxu0 %v19114_v8 }
0x19d8   :  { %v3752_v36 = vpop.f32.mrf.mxu1 }
0x19d9   :  { %17157 = vmatpush3.xpose.msk.msra.mxu1 %vm234_vm0, %v3752_v36 }
0x19da   :  { %v17136_v25 = vpop.f32.mrf.mxu1  ;;  %17166 = vmatprep.subr.mxu1 %v19114_v8 }
0x19dc   :  { %17159 = vmatmul.mubr.msk.f32.vlgmr.msra.gmra.mxu1 %vm234_vm0, %v3674_v37 }
0x19dd   :  { %17167 = vmatpush3.msra.mxu1 %v14862_v38  ;;  %17182 = vmatprep.mubr.msk.f32.mxu1 %vm19115_vm7, %v19114_v8 }
0x19de   :  { %17168 = vmatprep.subr.mxu1 %v19114_v8 }
0x19df   :  { %17169 = vmatpush3.msra.mxu1 %v14861_v39 }
0x19e0   :  { %17170 = vmatprep.subr.mxu1 %v19114_v8 }
0x19e1   :  { %17171 = vmatpush3.msra.mxu1 %v14860_v40 }
0x19e2   :  { %17172 = vmatprep.subr.mxu1 %v19114_v8 }
0x19e3   :  { %17173 = vmatpush3.msra.mxu1 %v14859_v41  ;;  %v14873_v41 = vld [vmem:[%s19337_s6 + $0x178] sm:$0xff] }
0x19e4   :  { %17174 = vmatprep.subr.mxu1 %v19114_v8 }
0x19e5   :  { %17175 = vmatpush3.msra.mxu1 %v14858_v44  ;;  %v14872_v44 = vld [vmem:[%s19337_s6 + $0x170] sm:$0xff] }
0x19e6   :  { %17176 = vmatprep.subr.mxu1 %v19114_v8 }
0x19e7   :  { %17177 = vmatpush3.msra.mxu1 %v14857_v42  ;;  %v14871_v42 = vld [vmem:[%s19337_s6 + $0x168] sm:$0xff] }
0x19e8   :  { %17178 = vmatprep.subr.mxu1 %v19114_v8 }
0x19e9   :  { %17179 = vmatpush3.msra.mxu1 %v14856_v43  ;;  %v14870_v43 = vld [vmem:[%s19337_s6 + $0x160] sm:$0xff] }
0x19ea   :  { %17180 = vmatprep.subr.mxu1 %v19114_v8 }
0x19eb   :  { %17181 = vmatpush3.msra.mxu1 %v14855_v45  ;;  %v14869_v45 = vld [vmem:[%s19337_s6 + $0x158] sm:$0xff] }
0x19ec   :  { %17183 = vmatmul.mubr.msk.f32.vlgmr.msra.gmra.mxu1 %vm979_vm12, %v19982_v17  ;;  %17204 = vmatprep.subr.mxu1 %v19114_v8 }
0x19ed   :  { %17205 = vmatpush3.msra.mxu1 %v14882_v46  ;;  %17220 = vmatprep.mubr.msk.f32.mxu1 %vm19115_vm7, %v19114_v8  ;;  %v14868_v46 = vld [vmem:[%s19337_s6 + $0x150] sm:$0xff] }
0x19ee   :  { %17206 = vmatprep.subr.mxu1 %v19114_v8 }
0x19ef   :  { %17207 = vmatpush3.msra.mxu1 %v14881_v47  ;;  %v14867_v47 = vld [vmem:[%s19337_s6 + $0x148] sm:$0xff] }
0x19f0   :  { %17208 = vmatprep.subr.mxu1 %v19114_v8 }
0x19f1   :  { %17209 = vmatpush3.msra.mxu1 %v14880_v49  ;;  %v14866_v49 = vld [vmem:[%s19337_s6 + $0x140] sm:$0xff] }
0x19f2   :  { %17210 = vmatprep.subr.mxu1 %v19114_v8 }
0x19f3   :  { %17211 = vmatpush3.msra.mxu1 %v14879_v50 }
0x19f4   :  { %17212 = vmatprep.subr.mxu1 %v19114_v8 }
0x19f5   :  { %17213 = vmatpush3.msra.mxu1 %v14878_v51 }
0x19f6   :  { %17214 = vmatprep.subr.mxu1 %v19114_v8 }
0x19f7   :  { %17215 = vmatpush3.msra.mxu1 %v14877_v52  ;;  %v14864_v52 = vld [vmem:[%s19327_s29 + $0x5] ss:$0 sm:$0xff] }
0x19f8   :  { %17216 = vmatprep.subr.mxu1 %v19114_v8 }
0x19f9   :  { %17217 = vmatpush3.msra.mxu1 %v14876_v53  ;;  %v14884_v53 = vld [vmem:[%s19332_s20 + $0x5] ss:$0 sm:$0xff] }
0x19fa   :  { %17218 = vmatprep.subr.mxu1 %v19114_v8 }
0x19fb   :  { %17219 = vmatpush3.msra.mxu1 %v14875_v54 }
0x19fc   :  { %17221 = vmatmul.mubr.msk.f32.vlgmr.msra.gmra.mxu1 %vm979_vm12, %v19982_v17  ;;  %17247 = vmatprep.subr.mxu1 %v19114_v8 }
0x19fd   :  { %17248 = vmatpush3.msra.mxu1 %v14900_v55  ;;  %17263 = vmatprep.mubr.msk.f32.mxu1 %vm19115_vm7, %v19114_v8 }
0x19fe   :  { %17249 = vmatprep.subr.mxu1 %v19114_v8 }
0x19ff   :  { %17250 = vmatpush3.msra.mxu1 %v14899_v35 }
0x1a00   :  { %17251 = vmatprep.subr.mxu1 %v19114_v8 }
0x1a01   :  { %17252 = vmatpush3.msra.mxu1 %v14898_v56 }
0x1a02   :  { %17253 = vmatprep.subr.mxu1 %v19114_v8 }
0x1a03   :  { %17254 = vmatpush3.msra.mxu1 %v14897_v57 }
0x1a04   :  { %17255 = vmatprep.subr.mxu1 %v19114_v8 }
0x1a05   :  { %17256 = vmatpush3.msra.mxu1 %v14896_v58 }
0x1a06   :  { %17257 = vmatprep.subr.mxu1 %v19114_v8 }
0x1a07   :  { %17258 = vmatpush3.msra.mxu1 %v14895_v59 }
0x1a08   :  { %17259 = vmatprep.subr.mxu1 %v19114_v8 }
0x1a09   :  { %17260 = vmatpush3.msra.mxu1 %v14894_v60 }
0x1a0a   :  { %17261 = vmatprep.subr.mxu1 %v19114_v8 }
0x1a0b   :  { %17262 = vmatpush3.msra.mxu1 %v14893_v61 }
0x1a0c   :  { %17264 = vmatmul.mubr.msk.f32.vlgmr.msra.gmra.mxu1 %vm979_vm12, %v19982_v17  ;;  %17285 = vmatprep.subr.mxu1 %v19114_v8 }
0x1a0d   :  { %17286 = vmatpush3.msra.mxu1 %v14920_v62  ;;  %17301 = vmatprep.mubr.msk.f32.mxu1 %vm19115_vm7, %v19114_v8 }
0x1a0e   :  { %17287 = vmatprep.subr.mxu1 %v19114_v8 }
0x1a0f   :  { %17288 = vmatpush3.msra.mxu1 %v14919_v63 }
0x1a10   :  { %17289 = vmatprep.subr.mxu1 %v19114_v8 }
0x1a11   :  { %17290 = vmatpush3.msra.mxu1 %v14918_v0 }
0x1a12   :  { %17291 = vmatprep.subr.mxu1 %v19114_v8 }
0x1a13   :  { %17292 = vmatpush3.msra.mxu1 %v14917_v1 }
0x1a14   :  { %17293 = vmatprep.subr.mxu1 %v19114_v8 }
0x1a15   :  { %17294 = vmatpush3.msra.mxu1 %v14916_v2 }
0x1a16   :  { %17295 = vmatprep.subr.mxu1 %v19114_v8 }
0x1a17   :  { %17296 = vmatpush3.msra.mxu1 %v14915_v5 }
0x1a18   :  { %17297 = vmatprep.subr.mxu1 %v19114_v8 }
0x1a19   :  { %17298 = vmatpush3.msra.mxu1 %v14914_v6  ;;  %v14890_v6 = vld [vmem:[%s19342_s25 + $0x58] sm:$0xff] }
0x1a1a   :  { %17299 = vmatprep.subr.mxu1 %v19114_v8 }
0x1a1b   :  { %17300 = vmatpush3.msra.mxu1 %v14913_v7  ;;  %v14889_v7 = vld [vmem:[%s19342_s25 + $0x50] sm:$0xff] }
0x1a1c   :  { %17302 = vmatmul.mubr.msk.f32.vlgmr.msra.gmra.mxu1 %vm979_vm12, %v19982_v17  ;;  %17340 = vmatprep.subr.mxu1 %v19114_v8 }
0x1a1d   :  { %17341 = vmatpush3.msra.mxu1 %v14948_v9  ;;  %17356 = vmatprep.mubr.msk.f32.mxu1 %vm19115_vm7, %v19114_v8  ;;  %v14854_v9 = vld [vmem:[%s19342_s25 + $0x48] sm:$0xff] }
0x1a1e   :  { %17342 = vmatprep.subr.mxu1 %v19114_v8 }
0x1a1f   :  { %17343 = vmatpush3.msra.mxu1 %v14947_v14 }
0x1a20   :  { %17344 = vmatprep.subr.mxu1 %v19114_v8 }
0x1a21   :  { %17345 = vmatpush3.msra.mxu1 %v14946_v10  ;;  %v14853_v10 = vld [vmem:[%s19342_s25 + $0x40] sm:$0xff] }
0x1a22   :  { %17346 = vmatprep.subr.mxu1 %v19114_v8 }
0x1a23   :  { %17347 = vmatpush3.msra.mxu1 %v14945_v11 }
0x1a24   :  { %17348 = vmatprep.subr.mxu1 %v19114_v8 }
0x1a25   :  { %17349 = vmatpush3.msra.mxu1 %v14944_v12  ;;  %v14911_v12 = vld [vmem:[%s19337_s6 + $0x1b8] sm:$0xff] }
0x1a26   :  { %17350 = vmatprep.subr.mxu1 %v19114_v8 }
0x1a27   :  { %17351 = vmatpush3.msra.mxu1 %v14943_v13  ;;  %v14910_v13 = vld [vmem:[%s19337_s6 + $0x1b0] sm:$0xff] }
0x1a28   :  { %17352 = vmatprep.subr.mxu1 %v19114_v8 }
0x1a29   :  { %17353 = vmatpush3.msra.mxu1 %v14942_v15  ;;  %v14909_v15 = vld [vmem:[%s19337_s6 + $0x1a8] sm:$0xff] }
0x1a2a   :  { %17354 = vmatprep.subr.mxu1 %v19114_v8 }
0x1a2b   :  { %17355 = vmatpush3.msra.mxu1 %v14941_v16  ;;  %v14908_v16 = vld [vmem:[%s19337_s6 + $0x1a0] sm:$0xff] }
0x1a2c   :  { %17357 = vmatmul.mubr.msk.f32.vlgmr.msra.gmra.mxu1 %vm979_vm12, %v19982_v17  ;;  %17378 = vmatprep.subr.mxu1 %v19114_v8 }
0x1a2d   :  { %17380 = vmatprep.mubr.msk.f32.mxu1 %vm19115_vm7, %v19114_v8 }
0x1a9c   :  { %v3915_v18 = vpop.f32.mrf.mxu1 }
0x1a9d   :  { %v3919_v19 = vsel %vm1680_vm15, %v3915_v18, -inf }
0x1a9e   :  { %3920 = vmax.xlane.f32.xlu0 %v3919_v19  ;;  %v17160_v21 = vpop.f32.mrf.mxu1  ;;  %v14906_v19 = vld [vmem:[%s19337_s6 + $0x190] sm:$0xff] }
0x1a9f   :  { %v14905_v21 = vld [vmem:[%s19337_s6 + $0x188] sm:$0xff] }
0x1aac   :  { %v4089_v22 = vpop.f32.mrf.mxu1 }
0x1aad   :  { %v4090_v55 = vadd.f32 %v14864_v52, %v4089_v22  ;;  %v14904_v22 = vld [vmem:[%s19337_s6 + $0x180] sm:$0xff] }
0x1aae   :  { %v17184_v24 = vpop.f32.mrf.mxu1 }
0x1abc   :  { %v4255_v26 = vpop.f32.mrf.mxu1 }
0x1abd   :  { %v4256_v56 = vadd.f32 %v14884_v53, %v4255_v26  ;;  %v14935_v53 = vld [vmem:[%s19347_s27 + $0x1e8] sm:$0xff] }
0x1abe   :  { %v17222_v27 = vpop.f32.mrf.mxu1 }
0x1acc   :  { %v20121_v28 = vpop.f32.mrf.mxu1 }
0x1ace   :  { %v17265_v29 = vpop.f32.mrf.mxu1 }
0x1adc   :  { %v20123_v30 = vpop.f32.mrf.mxu1 }
0x1ade   :  { %v17303_v31 = vpop.f32.mrf.mxu1 }
0x1aec   :  { %v5220_v32 = vpop.f32.mrf.mxu1 }
0x1aed   :  { %17379 = vmatpush3.xpose.msk.msra.mxu1 %vm234_vm0, %v5220_v32  ;;  %v14902_v32 = vld [vmem:[%s19327_s29 + $0x6] ss:$0 sm:$0xff] }
0x1aee   :  { %v17358_v33 = vpop.f32.mrf.mxu1  ;;  %17383 = vmatprep.subr.mxu1 %v19114_v8 }
0x1aef   :  { %v14922_v33 = vld [vmem:[%s19332_s20 + $0x6] ss:$0 sm:$0xff] }
0x1b27   :  { %v3921_v34 = vpop.xlane.xlu0 %3920 }
0x1b28   :  { %v3922_v23 = vsub.f32 %v3915_v18, %v3921_v34  ;;  %v14907_v18 = vld [vmem:[%s19337_s6 + $0x198] sm:$0xff]  ;;  %s22028_s6 = sld [smem:[#allocation23_spill]] }
0x1b2a   :  { %v3923_v36 = vmul.f32 1.442695, %v3922_v23  ;;  %v4652_v23 = vadd.f32 %v14902_v32, %v20121_v28  ;;  %v14965_v32 = vld [vmem:[%s19342_s25 + $0x78] sm:$0xff] }
0x1b2c   :  { %18907 = vpow2.f32 %v3923_v36 }
0x1b39   :  { %v18908_v37 = vpop.eup %18907 }
0x1b3a   :  { %v3925_v25 = vsel %vm1680_vm15, %v18908_v37, 0.0 }
0x1b3b   :  { %3926 = vadd.xlane.f32.xlu1 %v3925_v25 }
0x1bc4   :  { %v3927_v38 = vpop.xlane.xlu1 %3926 }
0x1bc5   :  { %18909 = vrcp.f32 %v3927_v38 }
0x1bd2   :  { %v18910_v39 = vpop.eup %18909 }
0x1bd3   :  { %v3929_v40 = vmul.f32 %v18910_v39, %v18908_v37  ;;  %v4818_v37 = vadd.f32 %v14922_v33, %v20123_v30  ;;  %v14964_v33 = vld [vmem:[%s19342_s25 + $0x70] sm:$0xff] }
0x1bd5   :  { %17164 = vmatmul.mubr.msk.f32.vlgmr.msra.gmra.mxu0 %vm1680_vm15, %v3929_v40 }
0x1bd6   :  { %17186 = vmatpush3.msra.mxu0 %v14873_v41  ;;  %17201 = vmatprep.mubr.msk.f32.mxu0 %vm19115_vm7, %v19114_v8 }
0x1bd7   :  { %17187 = vmatprep.subr.mxu0 %v19114_v8 }
0x1bd8   :  { %17188 = vmatpush3.msra.mxu0 %v14872_v44 }
0x1bd9   :  { %17189 = vmatprep.subr.mxu0 %v19114_v8 }
0x1bda   :  { %17190 = vmatpush3.msra.mxu0 %v14871_v42 }
0x1bdb   :  { %17191 = vmatprep.subr.mxu0 %v19114_v8 }
0x1bdc   :  { %17192 = vmatpush3.msra.mxu0 %v14870_v43 }
0x1bdd   :  { %17193 = vmatprep.subr.mxu0 %v19114_v8 }
0x1bde   :  { %17194 = vmatpush3.msra.mxu0 %v14869_v45 }
0x1bdf   :  { %17195 = vmatprep.subr.mxu0 %v19114_v8 }
0x1be0   :  { %17196 = vmatpush3.msra.mxu0 %v14868_v46  ;;  %v14928_v46 = vld [vmem:[%s19342_s25 + $0x68] sm:$0xff] }
0x1be1   :  { %17197 = vmatprep.subr.mxu0 %v19114_v8 }
0x1be2   :  { %17198 = vmatpush3.msra.mxu0 %v14867_v47  ;;  %v14927_v47 = vld [vmem:[%s19342_s25 + $0x60] sm:$0xff]  ;;  %s22022_s25 = sld [smem:[#allocation31_spill]] }
0x1be3   :  { %17199 = vmatprep.subr.mxu0 %v19114_v8 }
0x1be4   :  { %17200 = vmatpush3.msra.mxu0 %v14866_v49  ;;  %v14937_v49 = vld [vmem:[%s19347_s27 + $0x1f8] sm:$0xff] }
0x1be5   :  { %17202 = vmatmul.mubr.msk.f32.vlgmr.msra.gmra.mxu0 %vm979_vm12, %v19982_v17  ;;  %17223 = vmatprep.subr.mxu0 %v19114_v8 }
0x1be6   :  { %17225 = vmatprep.mubr.msk.f32.mxu0 %vm19115_vm7, %v19114_v8 }
0x1c95   :  { %v3999_v50 = vpop.f32.mrf.mxu0 }
0x1c97   :  { %v17165_v51 = vpop.f32.mrf.mxu0 }
0x1c98   :  { %v14936_v51 = vld [vmem:[%s19347_s27 + $0x1f0] sm:$0xff] }
0x1ca5   :  { %v4168_v54 = vpop.f32.mrf.mxu0 }
0x1ca6   :  { %17224 = vmatpush3.xpose.msk.msra.mxu0 %vm234_vm0, %v4168_v54  ;;  %v14934_v54 = vld [vmem:[%s19347_s27 + $0x1e0] sm:$0xff] }
0x1ca7   :  { %v17203_v35 = vpop.f32.mrf.mxu0  ;;  %17228 = vmatprep.subr.mxu0 %v19114_v8 }
0x1ca8   :  { %v14932_v35 = vld [vmem:[%s19347_s27 + $0x1d0] sm:$0xff] }
0x1ca9   :  { %17226 = vmatmul.mubr.msk.f32.vlgmr.msra.gmra.mxu0 %vm234_vm0, %v4090_v55  ;;  %v14933_v55 = vld [vmem:[%s19347_s27 + $0x1d8] sm:$0xff] }
0x1caa   :  { %17229 = vmatpush3.msra.mxu0 %v4256_v56  ;;  %17230 = vmatprep.mubr.msk.f32.mxu0 %vm19115_vm7, %v19114_v8  ;;  %v14931_v56 = vld [vmem:[%s19347_s27 + $0x1c8] sm:$0xff] }
0x1cab   :  { %17233 = vmatprep.subr.mxu0 %v19114_v8 }
0x1d69   :  { %v4331_v57 = vpop.f32.mrf.mxu0 }
0x1d6a   :  { %v4335_v58 = vsel %vm1680_vm15, %v4331_v57, -inf }
0x1d6b   :  { %4336 = vmax.xlane.f32.xlu0 %v4335_v58  ;;  %v17227_v59 = vpop.f32.mrf.mxu0  ;;  %v14957_v58 = vld [vmem:[%s19352_s21 + $0x1f8] sm:$0xff] }
0x1d6c   :  { %v14956_v59 = vld [vmem:[%s19352_s21 + $0x1f0] sm:$0xff] }
0x1df4   :  { %v4337_v60 = vpop.xlane.xlu0 %4336 }
0x1df5   :  { %v4338_v61 = vsub.f32 %v4331_v57, %v4337_v60  ;;  %v14930_v57 = vld [vmem:[%s19347_s27 + $0x1c0] sm:$0xff]  ;;  %v14955_v60 = vld [vmem:[%s19352_s21 + $0x1e8] sm:$0xff]  ;;  %s22030_s27 = sld [smem:[#allocation26_spill]] }
0x1df7   :  { %v4339_v62 = vmul.f32 1.442695, %v4338_v61  ;;  %v14954_v61 = vld [vmem:[%s19352_s21 + $0x1e0] sm:$0xff] }
0x1df9   :  { %18911 = vpow2.f32 %v4339_v62  ;;  %v14953_v62 = vld [vmem:[%s19352_s21 + $0x1d8] sm:$0xff] }
0x1e06   :  { %v18912_v63 = vpop.eup %18911 }
0x1e07   :  { %v4341_v0 = vsel %vm1680_vm15, %v18912_v63, 0.0 }
0x1e08   :  { %4342 = vadd.xlane.f32.xlu1 %v4341_v0  ;;  %v14951_v0 = vld [vmem:[%s19352_s21 + $0x1c8] sm:$0xff] }
0x1e91   :  { %v4343_v1 = vpop.xlane.xlu1 %4342 }
0x1e92   :  { %18913 = vrcp.f32 %v4343_v1  ;;  %v14950_v1 = vld [vmem:[%s19352_s21 + $0x1c0] sm:$0xff] }
0x1e9f   :  { %v18914_v2 = vpop.eup %18913 }
0x1ea0   :  { %v4345_v5 = vmul.f32 %v18914_v2, %v18912_v63  ;;  %v14952_v63 = vld [vmem:[%s19352_s21 + $0x1d0] sm:$0xff]  ;;  %s22021_s21 = sld [smem:[#allocation40_spill]] }
0x1ea2   :  { %17231 = vmatmul.mubr.msk.f32.vlgmr.msra.gmra.mxu0 %vm1680_vm15, %v4345_v5 }
0x1ea3   :  { %17234 = vmatpush3.msra.mxu0 %v14890_v6  ;;  %17237 = vmatprep.mubr.msk.f32.mxu0 %vm19115_vm7, %v19114_v8 }
0x1ea4   :  { %17235 = vmatprep.subr.mxu0 %v19114_v8 }
0x1ea5   :  { %17236 = vmatpush3.msra.mxu0 %v14889_v7  ;;  %v14939_v7 = vld [vmem:[%s19327_s29 + $0x7] ss:$0 sm:$0xff]  ;;  %s22023_s29 = sld [smem:[#allocation27_spill]] }
0x1ea6   :  { %17240 = vmatprep.subr.mxu0 %v19114_v8 }
0x1f62   :  { %v4415_v14 = vpop.f32.mrf.mxu0 }
0x1f63   :  { %17238 = vmatmul.mubr.msk.f32.vlgmr.msra.gmra.mxu0 %vm234_vm0, %v4415_v14 }
0x1f64   :  { %17241 = vmatpush3.msra.mxu0 %v14854_v9  ;;  %v17232_v11 = vpop.f32.mrf.mxu0  ;;  %17244 = vmatprep.mubr.msk.f32.mxu0 %vm19115_vm7, %v19114_v8 }
0x1f65   :  { %17242 = vmatprep.subr.mxu0 %v19114_v8  ;;  %v14959_v11 = vld [vmem:[%s19332_s20 + $0x7] ss:$0 sm:$0xff]  ;;  %s22029_s20 = sld [smem:[#allocation24_spill]] }
0x1f66   :  { %17243 = vmatpush3.msra.mxu0 %v14853_v10 }
0x1f67   :  { %17266 = vmatprep.subr.mxu0 %v19114_v8  ;;  %17245 = vmatmul.mubr.msk.f32.vlgmr.msra.gmra.mxu0 %vm234_vm0, %v3999_v50 }
0x1f68   :  { %17267 = vmatpush3.msra.mxu0 %v14911_v12  ;;  %17282 = vmatprep.mubr.msk.f32.mxu0 %vm19115_vm7, %v19114_v8 }
0x1f69   :  { %17268 = vmatprep.subr.mxu0 %v19114_v8 }
0x1f6a   :  { %17269 = vmatpush3.msra.mxu0 %v14910_v13 }
0x1f6b   :  { %17270 = vmatprep.subr.mxu0 %v19114_v8 }
0x1f6c   :  { %17271 = vmatpush3.msra.mxu0 %v14909_v15 }
0x1f6d   :  { %17272 = vmatprep.subr.mxu0 %v19114_v8 }
0x1f6e   :  { %17273 = vmatpush3.msra.mxu0 %v14908_v16 }
0x1f6f   :  { %17274 = vmatprep.subr.mxu0 %v19114_v8 }
0x1f70   :  { %17275 = vmatpush3.msra.mxu0 %v14907_v18 }
0x1f71   :  { %17276 = vmatprep.subr.mxu0 %v19114_v8 }
0x1f72   :  { %17277 = vmatpush3.msra.mxu0 %v14906_v19 }
0x1f73   :  { %17278 = vmatprep.subr.mxu0 %v19114_v8 }
0x1f74   :  { %17279 = vmatpush3.msra.mxu0 %v14905_v21 }
0x1f75   :  { %17280 = vmatprep.subr.mxu0 %v19114_v8 }
0x1f76   :  { %17281 = vmatpush3.msra.mxu0 %v14904_v22 }
0x1f77   :  { %17283 = vmatmul.mubr.msk.f32.vlgmr.msra.gmra.mxu0 %vm979_vm12, %v19982_v17  ;;  %17304 = vmatprep.subr.mxu0 %v19114_v8 }
0x1f78   :  { %17306 = vmatprep.mubr.msk.f32.mxu0 %vm19115_vm7, %v19114_v8 }
0x2023   :  { %v4491_v24 = vpop.f32.mrf.mxu0 }
0x2025   :  { %v17239_v26 = vpop.f32.mrf.mxu0 }
0x2027   :  { %v4564_v27 = vpop.f32.mrf.mxu0 }
0x2028   :  { %v20198_v29 = vadd.f32 %v4564_v27, %v4491_v24 }
0x2029   :  { %v17246_v31 = vpop.f32.mrf.mxu0 }
0x2037   :  { %v4730_v34 = vpop.f32.mrf.mxu0 }
0x2038   :  { %17305 = vmatpush3.xpose.msk.msra.mxu0 %vm234_vm0, %v4730_v34 }
0x2039   :  { %v17284_v36 = vpop.f32.mrf.mxu0  ;;  %17309 = vmatprep.subr.mxu0 %v19114_v8 }
0x203b   :  { %17307 = vmatmul.mubr.msk.f32.vlgmr.msra.gmra.mxu0 %vm234_vm0, %v4652_v23 }
0x203c   :  { %17310 = vmatpush3.msra.mxu0 %v4818_v37  ;;  %17311 = vmatprep.mubr.msk.f32.mxu0 %vm19115_vm7, %v19114_v8  ;;  %v14968_v37 = vld [vmem:[%s19322_s8 + $0x1] ss:$0 sm:$0xff]  ;;  %s22025_s8 = sld [smem:[#allocation30_spill]] }
0x203d   :  { %17314 = vmatprep.subr.mxu0 %v19114_v8 }
0x20fb   :  { %v4893_v25 = vpop.f32.mrf.mxu0 }
0x20fc   :  { %v4897_v38 = vsel %vm1680_vm15, %v4893_v25, -inf }
0x20fd   :  { %4898 = vmax.xlane.f32.xlu0 %v4897_v38  ;;  %v17308_v28 = vpop.f32.mrf.mxu0 }
0x2186   :  { %v4899_v39 = vpop.xlane.xlu0 %4898 }
0x2187   :  { %v4900_v40 = vsub.f32 %v4893_v25, %v4899_v39 }
0x2189   :  { %v4901_v41 = vmul.f32 1.442695, %v4900_v40 }
0x218b   :  { %18915 = vpow2.f32 %v4901_v41 }
0x2198   :  { %v18916_v30 = vpop.eup %18915 }
0x2199   :  { %v4903_v44 = vsel %vm1680_vm15, %v18916_v30, 0.0 }
0x219a   :  { %4904 = vadd.xlane.f32.xlu1 %v4903_v44 }
0x2223   :  { %v4905_v42 = vpop.xlane.xlu1 %4904 }
0x2224   :  { %18917 = vrcp.f32 %v4905_v42 }
0x2231   :  { %v18918_v43 = vpop.eup %18917 }
0x2232   :  { %v4907_v45 = vmul.f32 %v18918_v43, %v18916_v30 }
0x2234   :  { %17312 = vmatmul.mubr.msk.f32.vlgmr.msra.gmra.mxu0 %vm1680_vm15, %v4907_v45  ;;  %v14980_v45 = vld [vmem:[%s22015_s0 + $0x78] sm:$0xff] }
0x2235   :  { %17315 = vmatpush3.msra.mxu0 %v14928_v46  ;;  %17318 = vmatprep.mubr.msk.f32.mxu0 %vm19115_vm7, %v19114_v8  ;;  %v14978_v46 = vld [vmem:[%s22015_s0 + $0x68] sm:$0xff] }
0x2236   :  { %17316 = vmatprep.subr.mxu0 %v19114_v8 }
0x2237   :  { %17317 = vmatpush3.msra.mxu0 %v14927_v47  ;;  %v14977_v47 = vld [vmem:[%s22015_s0 + $0x60] sm:$0xff] }
0x2238   :  { %17321 = vmatprep.subr.mxu0 %v19114_v8 }
0x22f4   :  { %v4977_v50 = vpop.f32.mrf.mxu0 }
0x22f5   :  { %17319 = vmatmul.mubr.msk.f32.vlgmr.msra.gmra.mxu0 %vm234_vm0, %v4977_v50  ;;  %v14975_v50 = vld [vmem:[%s22015_s0 + $0x50] sm:$0xff] }
0x22f6   :  { %17322 = vmatpush3.msra.mxu0 %v14937_v49  ;;  %v17313_v52 = vpop.f32.mrf.mxu0  ;;  %17337 = vmatprep.mubr.msk.f32.mxu0 %vm19115_vm7, %v19114_v8  ;;  %v14976_v49 = vld [vmem:[%s22015_s0 + $0x58] sm:$0xff] }
0x22f7   :  { %17323 = vmatprep.subr.mxu0 %v19114_v8  ;;  %v14973_v52 = vld [vmem:[%s22015_s0 + $0x40] sm:$0xff] }
0x22f8   :  { %17324 = vmatpush3.msra.mxu0 %v14936_v51  ;;  %v14974_v51 = vld [vmem:[%s22015_s0 + $0x48] sm:$0xff] }
0x22f9   :  { %17325 = vmatprep.subr.mxu0 %v19114_v8 }
0x22fa   :  { %17326 = vmatpush3.msra.mxu0 %v14935_v53 }
0x22fb   :  { %17327 = vmatprep.subr.mxu0 %v19114_v8 }
0x22fc   :  { %17328 = vmatpush3.msra.mxu0 %v14934_v54 }
0x22fd   :  { %17329 = vmatprep.subr.mxu0 %v19114_v8 }
0x22fe   :  { %17330 = vmatpush3.msra.mxu0 %v14933_v55 }
0x22ff   :  { %17331 = vmatprep.subr.mxu0 %v19114_v8 }
0x2300   :  { %17332 = vmatpush3.msra.mxu0 %v14932_v35 }
0x2301   :  { %17333 = vmatprep.subr.mxu0 %v19114_v8 }
0x2302   :  { %17334 = vmatpush3.msra.mxu0 %v14931_v56  ;;  %v14971_v56 = vld [vmem:[%s22016_s5 + $0x1] ss:$0 sm:$0xff]  ;;  %s22045_s5 = sld [smem:[#allocation18_spill]] }
0x2303   :  { %17335 = vmatprep.subr.mxu0 %v19114_v8 }
0x2304   :  { %17336 = vmatpush3.msra.mxu0 %v14930_v57 }
0x2305   :  { %17338 = vmatmul.mubr.msk.f32.vlgmr.msra.gmra.mxu0 %vm979_vm12, %v19982_v17  ;;  %17359 = vmatprep.subr.mxu0 %v19114_v8 }
0x2306   :  { %17360 = vmatpush3.msra.mxu0 %v14957_v58  ;;  %17375 = vmatprep.mubr.msk.f32.mxu0 %vm19115_vm7, %v19114_v8  ;;  %v14972_v58 = vld [vmem:[%s22017_s9 + $0x1] ss:$0 sm:$0xff]  ;;  %s22046_s9 = sld [smem:[#allocation17_spill]] }
0x2307   :  { %17361 = vmatprep.subr.mxu0 %v19114_v8 }
0x2308   :  { %17362 = vmatpush3.msra.mxu0 %v14956_v59 }
0x2309   :  { %17363 = vmatprep.subr.mxu0 %v19114_v8 }
0x230a   :  { %17364 = vmatpush3.msra.mxu0 %v14955_v60 }
0x230b   :  { %17365 = vmatprep.subr.mxu0 %v19114_v8 }
0x230c   :  { %17366 = vmatpush3.msra.mxu0 %v14954_v61  ;;  %v5847_v61 = vld [vmem:[%s22021_s21 + $0x78] sm:$0xff] }
0x230d   :  { %17367 = vmatprep.subr.mxu0 %v19114_v8 }
0x230e   :  { %17368 = vmatpush3.msra.mxu0 %v14953_v62  ;;  %v5846_v62 = vld [vmem:[%s22021_s21 + $0x70] sm:$0xff] }
0x230f   :  { %17369 = vmatprep.subr.mxu0 %v19114_v8 }
0x2310   :  { %17370 = vmatpush3.msra.mxu0 %v14952_v63  ;;  %v5845_v63 = vld [vmem:[%s22021_s21 + $0x68] sm:$0xff] }
0x2311   :  { %17371 = vmatprep.subr.mxu0 %v19114_v8 }
0x2312   :  { %17372 = vmatpush3.msra.mxu0 %v14951_v0  ;;  %v5844_v0 = vld [vmem:[%s22021_s21 + $0x60] sm:$0xff] }
0x2313   :  { %17373 = vmatprep.subr.mxu0 %v19114_v8 }
0x2314   :  { %17374 = vmatpush3.msra.mxu0 %v14950_v1  ;;  %v5843_v1 = vld [vmem:[%s22021_s21 + $0x58] sm:$0xff] }
0x2315   :  { %17376 = vmatmul.mubr.msk.f32.vlgmr.msra.gmra.mxu0 %vm979_vm12, %v19982_v17  ;;  %17414 = vmatprep.subr.mxu0 %v19114_v8 }
0x2316   :  { %17446 = vmatprep.mubr.msk.f32.mxu0 %vm19115_vm7, %v19114_v8 }
0x23b5   :  { %v5053_v2 = vpop.f32.mrf.mxu0 }
0x23b6   :  { %v5057_v5 = vadd.f32 %v5053_v2, %v20198_v29  ;;  %v5842_v2 = vld [vmem:[%s22021_s21 + $0x50] sm:$0xff] }
0x23b7   :  { %v17320_v6 = vpop.f32.mrf.mxu0 }
0x23b8   :  { %v5840_v6 = vld [vmem:[%s22021_s21 + $0x40] sm:$0xff] }
0x23c5   :  { %v5141_v9 = vpop.f32.mrf.mxu0 }
0x23c6   :  { %v5142_v14 = vadd.f32 %v14939_v7, %v5141_v9  ;;  %v5839_v7 = vld [vmem:[%s22021_s21 + $0x38] sm:$0xff]  ;;  %v5838_v9 = vld [vmem:[%s22021_s21 + $0x30] sm:$0xff] }
0x23c7   :  { %v17339_v10 = vpop.f32.mrf.mxu0 }
0x23c8   :  { %17381 = vmatmul.mubr.msk.f32.vlgmr.msra.gmra.mxu1 %vm234_vm0, %v5142_v14  ;;  %v5837_v14 = vld [vmem:[%s22021_s21 + $0x28] sm:$0xff]  ;;  %v5836_v10 = vld [vmem:[%s22021_s21 + $0x20] sm:$0xff] }
0x23c9   :  { %17385 = vmatprep.mubr.msk.f32.mxu1 %vm19115_vm7, %v19114_v8 }
0x23d5   :  { %v5307_v17 = vpop.f32.mrf.mxu0 }
0x23d6   :  { %v5308_v12 = vadd.f32 %v14959_v11, %v5307_v17  ;;  %v5835_v11 = vld [vmem:[%s22021_s21 + $0x18] sm:$0xff]  ;;  %v5834_v17 = vld [vmem:[%s22021_s21 + $0x10] sm:$0xff] }
0x23d7   :  { %v17377_v13 = vpop.f32.mrf.mxu0 }
0x23d8   :  { %17384 = vmatpush3.msra.mxu1 %v5308_v12  ;;  %v5833_v12 = vld [vmem:[%s22021_s21 + $0x8] sm:$0xff]  ;;  %v5832_v13 = vld [vmem:[%s22021_s21] sm:$0xff] }
0x23d9   :  { %17388 = vmatprep.subr.mxu1 %v19114_v8 }
0x2488   :  { %v5383_v15 = vpop.f32.mrf.mxu1 }
0x2489   :  { %v5387_v16 = vsel %vm1680_vm15, %v5383_v15, -inf }
0x248a   :  { %5388 = vmax.xlane.f32.xlu0 %v5387_v16  ;;  %v17382_v18 = vpop.f32.mrf.mxu1  ;;  %v14999_v16 = vld [vmem:[%s22018_s13 + $0xf8] sm:$0xff] }
0x248b   :  { %17415 = vmatpush3.msra.mxu0 %v14999_v16  ;;  %v14998_v18 = vld [vmem:[%s22018_s13 + $0xf0] sm:$0xff]  ;;  %v5955_v16 = vld [vmem:[%s22023_s29 + $0x28] sm:$0xff] }
0x248c   :  { %17416 = vmatprep.subr.mxu0 %v19114_v8 }
0x248d   :  { %17417 = vmatpush3.msra.mxu0 %v14998_v18 }
0x248e   :  { %17418 = vmatprep.subr.mxu0 %v19114_v8 }
0x2513   :  { %v5389_v19 = vpop.xlane.xlu0 %5388 }
0x2514   :  { %v5390_v21 = vsub.f32 %v5383_v15, %v5389_v19  ;;  %v5831_v15 = vld [vmem:[%s19377_s3] sm:$0xff]  ;;  %v14997_v19 = vld [vmem:[%s22018_s13 + $0xe8] sm:$0xff]  ;;  %s22024_s3 = sld [smem:[#allocation25_spill]] }
0x2515   :  { %17419 = vmatpush3.msra.mxu0 %v14997_v19  ;;  %v5954_v19 = vld [vmem:[%s22023_s29 + $0x20] sm:$0xff] }
0x2516   :  { %v5391_v22 = vmul.f32 1.442695, %v5390_v21  ;;  %17420 = vmatprep.subr.mxu0 %v19114_v8  ;;  %v14996_v21 = vld [vmem:[%s22018_s13 + $0xe0] sm:$0xff] }
0x2517   :  { %17421 = vmatpush3.msra.mxu0 %v14996_v21 }
0x2518   :  { %18919 = vpow2.f32 %v5391_v22  ;;  %17422 = vmatprep.subr.mxu0 %v19114_v8  ;;  %v14995_v22 = vld [vmem:[%s22018_s13 + $0xd8] sm:$0xff] }
0x2519   :  { %17423 = vmatpush3.msra.mxu0 %v14995_v22  ;;  %v5953_v22 = vld [vmem:[%s22023_s29 + $0x18] sm:$0xff] }
0x251a   :  { %17424 = vmatprep.subr.mxu0 %v19114_v8  ;;  %v6043_v18 = vld [vmem:[%s22024_s3 + $0x28] sm:$0xff]  ;;  %v6042_v21 = vld [vmem:[%s22024_s3 + $0x20] sm:$0xff] }
0x2525   :  { %v18920_v24 = vpop.eup %18919 }
0x2526   :  { %v5393_v26 = vsel %vm1680_vm15, %v18920_v24, 0.0 }
0x2527   :  { %5394 = vadd.xlane.f32.xlu1 %v5393_v26  ;;  %v14993_v26 = vld [vmem:[%s22018_s13 + $0xc8] sm:$0xff] }
0x25b0   :  { %v5395_v27 = vpop.xlane.xlu1 %5394 }
0x25b1   :  { %18921 = vrcp.f32 %v5395_v27  ;;  %v14992_v27 = vld [vmem:[%s22018_s13 + $0xc0] sm:$0xff] }
0x25be   :  { %v18922_v29 = vpop.eup %18921 }
0x25bf   :  { %v5397_v31 = vmul.f32 %v18922_v29, %v18920_v24  ;;  %v14994_v24 = vld [vmem:[%s22018_s13 + $0xd0] sm:$0xff]  ;;  %v14991_v29 = vld [vmem:[%s22018_s13 + $0xb8] sm:$0xff] }
0x25c0   :  { %17425 = vmatpush3.msra.mxu0 %v14994_v24  ;;  %v6041_v24 = vld [vmem:[%s22024_s3 + $0x18] sm:$0xff] }
0x25c1   :  { %17386 = vmatmul.mubr.msk.f32.vlgmr.msra.gmra.mxu1 %vm1680_vm15, %v5397_v31  ;;  %17426 = vmatprep.subr.mxu0 %v19114_v8  ;;  %v14990_v31 = vld [vmem:[%s22018_s13 + $0xb0] sm:$0xff] }
0x25c2   :  { %17389 = vmatpush3.msra.mxu1 %v14965_v32  ;;  %17392 = vmatprep.mubr.msk.f32.mxu1 %vm19115_vm7, %v19114_v8  ;;  %v14989_v32 = vld [vmem:[%s22018_s13 + $0xa8] sm:$0xff] }
0x25c3   :  { %17390 = vmatprep.subr.mxu1 %v19114_v8  ;;  %17427 = vmatpush3.msra.mxu0 %v14993_v26  ;;  %v5952_v26 = vld [vmem:[%s22023_s29 + $0x10] sm:$0xff] }
0x25c4   :  { %17391 = vmatpush3.msra.mxu1 %v14964_v33  ;;  %17428 = vmatprep.subr.mxu0 %v19114_v8  ;;  %v14988_v33 = vld [vmem:[%s22018_s13 + $0xa0] sm:$0xff] }
0x25c5   :  { %17395 = vmatprep.subr.mxu1 %v19114_v8  ;;  %17429 = vmatpush3.msra.mxu0 %v14992_v27  ;;  %v6040_v27 = vld [vmem:[%s22024_s3 + $0x10] sm:$0xff] }
0x25c6   :  { %17430 = vmatprep.subr.mxu0 %v19114_v8 }
0x25c7   :  { %17431 = vmatpush3.msra.mxu0 %v14991_v29  ;;  %v5951_v29 = vld [vmem:[%s22023_s29 + $0x8] sm:$0xff] }
0x25c8   :  { %17432 = vmatprep.subr.mxu0 %v19114_v8 }
0x25c9   :  { %17433 = vmatpush3.msra.mxu0 %v14990_v31  ;;  %v6039_v31 = vld [vmem:[%s22024_s3 + $0x8] sm:$0xff] }
0x25ca   :  { %17434 = vmatprep.subr.mxu0 %v19114_v8 }
0x25cb   :  { %17435 = vmatpush3.msra.mxu0 %v14989_v32  ;;  %v5950_v32 = vld [vmem:[%s22023_s29] sm:$0xff] }
0x25cc   :  { %17436 = vmatprep.subr.mxu0 %v19114_v8 }
0x25cd   :  { %17437 = vmatpush3.msra.mxu0 %v14988_v33  ;;  %v6038_v33 = vld [vmem:[%s22024_s3] sm:$0xff] }
0x25ce   :  { %17438 = vmatprep.subr.mxu0 %v19114_v8 }
0x2681   :  { %v5467_v34 = vpop.f32.mrf.mxu1 }
0x2682   :  { %17393 = vmatmul.mubr.msk.f32.vlgmr.msra.gmra.mxu1 %vm234_vm0, %v5467_v34  ;;  %v14987_v34 = vld [vmem:[%s22018_s13 + $0x98] sm:$0xff] }
0x2683   :  { %v17387_v23 = vpop.f32.mrf.mxu1  ;;  %17411 = vmatprep.mubr.msk.f32.mxu1 %vm19115_vm7, %v19114_v8  ;;  %17396 = vmatpush3.msra.mxu1 %v14980_v45 }
0x2684   :  { %17397 = vmatprep.subr.mxu1 %v19114_v8  ;;  %17439 = vmatpush3.msra.mxu0 %v14987_v34  ;;  %v14986_v23 = vld [vmem:[%s22018_s13 + $0x90] sm:$0xff] }
0x2685   :  { %17440 = vmatprep.subr.mxu0 %v19114_v8 }
0x2686   :  { %17441 = vmatpush3.msra.mxu0 %v14986_v23 }
0x2687   :  { %17442 = vmatprep.subr.mxu0 %v19114_v8 }
0x2742   :  { %v5543_v36 = vpop.f32.mrf.mxu1 }
0x2743   :  { %v5547_v25 = vadd.f32 %v5543_v36, %v5057_v5  ;;  %v5841_v5 = vld [vmem:[%s22021_s21 + $0x48] sm:$0xff] }
0x2744   :  { %v17394_v38 = vpop.f32.mrf.mxu1  ;;  %v14985_v36 = vld [vmem:[%s22018_s13 + $0x88] sm:$0xff] }
0x2745   :  { %v5556_v28 = vadd.f32 %v14968_v37, %v5547_v25  ;;  %17443 = vmatpush3.msra.mxu0 %v14985_v36  ;;  %v14984_v37 = vld [vmem:[%s22018_s13 + $0x80] sm:$0xff]  ;;  %s22047_s13 = sld [smem:[#allocation14_spill]] }
0x2746   :  { %17444 = vmatprep.subr.mxu0 %v19114_v8  ;;  %v14982_v25 = vld [vmem:[%s22019_s17 + $0x1] ss:$0 sm:$0xff]  ;;  %s22048_s17 = sld [smem:[#allocation16_spill]] }
0x2747   :  { %v20283_v39 = vadd.f32 %v5556_v28, %v19942_v48  ;;  %v14979_v48 = vld [vmem:[%s22015_s0 + $0x70] sm:$0xff]  ;;  %17445 = vmatpush3.msra.mxu0 %v14984_v37  ;;  %s22044_s0 = sld [smem:[#allocation19_spill]] }
0x2748   :  { %17398 = vmatpush3.msra.mxu1 %v14979_v48  ;;  %17484 = vmatprep.subr.mxu0 %v19114_v8 }
0x2749   :  { %v5562_v40 = vsel %vm979_vm12, %v20283_v39, 0.0  ;;  %17399 = vmatprep.subr.mxu1 %v19114_v8 }
0x274a   :  { %5563 = vadd.xlane.f32.xlu0 %v5562_v40  ;;  %17400 = vmatpush3.msra.mxu1 %v14978_v46 }
0x274b   :  { %17401 = vmatprep.subr.mxu1 %v19114_v8 }
0x274c   :  { %17402 = vmatpush3.msra.mxu1 %v14977_v47 }
0x274d   :  { %17403 = vmatprep.subr.mxu1 %v19114_v8 }
0x274e   :  { %17404 = vmatpush3.msra.mxu1 %v14976_v49 }
0x274f   :  { %17405 = vmatprep.subr.mxu1 %v19114_v8 }
0x2750   :  { %17406 = vmatpush3.msra.mxu1 %v14975_v50 }
0x2751   :  { %17407 = vmatprep.subr.mxu1 %v19114_v8 }
0x2752   :  { %17408 = vmatpush3.msra.mxu1 %v14974_v51  ;;  %v5848_v51 = vld [vmem:[%s22022_s25] sm:$0xff]  ;;  %s19118_s25 = smov [#allocation2]  }
0x2753   :  { %17409 = vmatprep.subr.mxu1 %v19114_v8 }
0x2754   :  { %17410 = vmatpush3.msra.mxu1 %v14973_v52 }
0x2755   :  { %17449 = vmatprep.subr.mxu1 %v19114_v8 }
0x27d3   :  { %v5564_v41 = vpop.xlane.xlu0 %5563 }
0x27d4   :  { %v5565_v30 = vmul.f32 0.015625, %v5564_v41 }
0x27d6   :  { %v5566_v44 = vsub.f32 %v20283_v39, %v5565_v30 }
0x27d8   :  { %v5567_v42 = vmul.f32 %v5566_v44, %v5566_v44 }
0x27da   :  { %v5568_v43 = vsel %vm979_vm12, %v5567_v42, 0.0 }
0x27db   :  { %5569 = vadd.xlane.f32.xlu1 %v5568_v43 }
0x2864   :  { %v5570_v53 = vpop.xlane.xlu1 %5569 }
0x2865   :  { %v5571_v54 = vmul.f32 0.015625, %v5570_v53 }
0x2867   :  { %v5572_v55 = vadd.f32 1e-05, %v5571_v54 }
0x2869   :  { %18923 = vrsqrt.f32 %v5572_v55 }
0x2876   :  { %v18924_v35 = vpop.eup %18923 }
0x2877   :  { %v5574_v57 = vmul.f32 %v18924_v35, %v5566_v44 }
0x2879   :  { %v5581_v59 = vmul.f32 %v14971_v56, %v5574_v57 }
0x287b   :  { %v5588_v60 = vadd.f32 %v14972_v58, %v5581_v59 }
0x287d   :  { %17412 = vmatmul.mubr.msk.f32.vlgmr.msra.gmra.mxu1 %vm979_vm12, %v5588_v60 }
0x287e   :  { %17450 = vmatpush3.msra.mxu1 %v5847_v61  ;;  %17481 = vmatprep.mubr.msk.f32.mxu1 %vm19115_vm7, %v19114_v8 }
0x287f   :  { %17451 = vmatprep.subr.mxu1 %v19114_v8 }
0x2880   :  { %17452 = vmatpush3.msra.mxu1 %v5846_v62 }
0x2881   :  { %17453 = vmatprep.subr.mxu1 %v19114_v8 }
0x2882   :  { %17454 = vmatpush3.msra.mxu1 %v5845_v63 }
0x2883   :  { %17455 = vmatprep.subr.mxu1 %v19114_v8 }
0x2884   :  { %17456 = vmatpush3.msra.mxu1 %v5844_v0 }
0x2885   :  { %17457 = vmatprep.subr.mxu1 %v19114_v8 }
0x2886   :  { %17458 = vmatpush3.msra.mxu1 %v5843_v1 }
0x2887   :  { %17459 = vmatprep.subr.mxu1 %v19114_v8 }
0x2888   :  { %17460 = vmatpush3.msra.mxu1 %v5842_v2 }
0x2889   :  { %17461 = vmatprep.subr.mxu1 %v19114_v8 }
0x288a   :  { %17462 = vmatpush3.msra.mxu1 %v5841_v5 }
0x288b   :  { %17463 = vmatprep.subr.mxu1 %v19114_v8 }
0x288c   :  { %17464 = vmatpush3.msra.mxu1 %v5840_v6 }
0x288d   :  { %17465 = vmatprep.subr.mxu1 %v19114_v8 }
0x288e   :  { %17466 = vmatpush3.msra.mxu1 %v5839_v7 }
0x288f   :  { %17467 = vmatprep.subr.mxu1 %v19114_v8 }
0x2890   :  { %17468 = vmatpush3.msra.mxu1 %v5838_v9 }
0x2891   :  { %17469 = vmatprep.subr.mxu1 %v19114_v8 }
0x2892   :  { %17470 = vmatpush3.msra.mxu1 %v5837_v14 }
0x2893   :  { %17471 = vmatprep.subr.mxu1 %v19114_v8 }
0x2894   :  { %17472 = vmatpush3.msra.mxu1 %v5836_v10 }
0x2895   :  { %17473 = vmatprep.subr.mxu1 %v19114_v8 }
0x2896   :  { %17474 = vmatpush3.msra.mxu1 %v5835_v11 }
0x2897   :  { %17475 = vmatprep.subr.mxu1 %v19114_v8 }
0x2898   :  { %17476 = vmatpush3.msra.mxu1 %v5834_v17  ;;  %v5957_v17 = vld [vmem:[%s22023_s29 + $0x38] sm:$0xff] }
0x2899   :  { %17477 = vmatprep.subr.mxu1 %v19114_v8 }
0x289a   :  { %17478 = vmatpush3.msra.mxu1 %v5833_v12  ;;  %v6045_v12 = vld [vmem:[%s22024_s3 + $0x38] sm:$0xff] }
0x289b   :  { %17479 = vmatprep.subr.mxu1 %v19114_v8 }
0x289c   :  { %17480 = vmatpush3.msra.mxu1 %v5832_v13  ;;  %v5956_v13 = vld [vmem:[%s22023_s29 + $0x30] sm:$0xff] }
0x289d   :  { %17482 = vmatmul.mubr.f32.vlgmr.msra.gmra.mxu1 %v5831_v15  ;;  %17503 = vmatprep.subr.mxu1 %v19114_v8  ;;  %v6044_v15 = vld [vmem:[%s22024_s3 + $0x30] sm:$0xff] }
0x289e   :  { %17519 = vmatprep.mubr.msk.f32.mxu1 %vm19115_vm7, %v19114_v8  ;;  %17504 = vmatpush3.msra.mxu1 %v6045_v12  ;;  %v15035_v12 = vld [vmem:[%s22027_s19 + $0x48] sm:$0xff] }
0x289f   :  { %17505 = vmatprep.subr.mxu1 %v19114_v8 }
0x28a0   :  { %17506 = vmatpush3.msra.mxu1 %v6044_v15  ;;  %v15059_v15 = vld [vmem:[%s22023_s29 + $0xb8] sm:$0xff] }
0x28a1   :  { %17507 = vmatprep.subr.mxu1 %v19114_v8 }
0x28a2   :  { %17508 = vmatpush3.msra.mxu1 %v6043_v18  ;;  %v15057_v18 = vld [vmem:[%s22023_s29 + $0xa8] sm:$0xff] }
0x28a3   :  { %17509 = vmatprep.subr.mxu1 %v19114_v8 }
0x28a4   :  { %17510 = vmatpush3.msra.mxu1 %v6042_v21  ;;  %v15055_v21 = vld [vmem:[%s22023_s29 + $0x98] sm:$0xff] }
0x28a5   :  { %17511 = vmatprep.subr.mxu1 %v19114_v8 }
0x28a6   :  { %17512 = vmatpush3.msra.mxu1 %v6041_v24  ;;  %v15053_v24 = vld [vmem:[%s22023_s29 + $0x88] sm:$0xff] }
0x28a7   :  { %17513 = vmatprep.subr.mxu1 %v19114_v8 }
0x28a8   :  { %17514 = vmatpush3.msra.mxu1 %v6040_v27  ;;  %v15079_v27 = vld [vmem:[%s22027_s19 + $0xb8] sm:$0xff] }
0x28a9   :  { %17515 = vmatprep.subr.mxu1 %v19114_v8 }
0x28aa   :  { %17516 = vmatpush3.msra.mxu1 %v6039_v31  ;;  %v15077_v31 = vld [vmem:[%s22027_s19 + $0xa8] sm:$0xff] }
0x28ab   :  { %17517 = vmatprep.subr.mxu1 %v19114_v8 }
0x28ac   :  { %17518 = vmatpush3.msra.mxu1 %v6038_v33  ;;  %v15075_v33 = vld [vmem:[%s22027_s19 + $0x98] sm:$0xff] }
0x28ad   :  { %17541 = vmatprep.subr.mxu1 %v19114_v8 }
0x293d   :  { %v5675_v38 = vpop.f32.mrf.mxu1 }
0x293e   :  { %v5676_v28 = vadd.f32 %v14982_v25, %v5675_v38 }
0x293f   :  { %v17413_v40 = vpop.f32.mrf.mxu1 }
0x2940   :  { %v5680_v41 = vmul.f32 0.70710677, %v5676_v28  ;;  %v5679_v2 = vmul.f32 0.5, %v5676_v28  ;;  %v15004_v28 = vld [vmem:[%s22025_s8] ss:$0 sm:$0xff] }
0x2942   :  { %v5683_v30 = vand.u32 2147483647, %v5680_v41  ;;  %vm5681_vm2 = vcmp.ge.f32.partialorder %v5680_v41, 0.0  ;;  %v15005_v41 = vld [vmem:[%s22026_s14] ss:$0 sm:$0xff] }
0x2943   :  { %v5682_v0 = vsel %vm5681_vm2, 1.0, %v19116_v20 }
0x2944   :  { %v5684_v44 = vmul.f32 0.3275911, %v5683_v30  ;;  %v5697_v43 = vsub.f32 0.0, %v5683_v30 }
0x2946   :  { %v5685_v42 = vadd.f32 1.0, %v5684_v44  ;;  %v5698_v45 = vmul.f32 %v5697_v43, %v5683_v30  ;;  %v6122_v43 = vld [vmem:[%s22027_s19 + $0x30] sm:$0xff] }
0x2948   :  { %18925 = vrcp.f32 %v5685_v42  ;;  %v5699_v47 = vmul.f32 1.442695, %v5698_v45  ;;  %v6123_v42 = vld [vmem:[%s22027_s19 + $0x38] sm:$0xff]  ;;  %v6121_v45 = vld [vmem:[%s22027_s19 + $0x28] sm:$0xff] }
0x294a   :  { %18927 = vpow2.f32 %v5699_v47  ;;  %v6118_v47 = vld [vmem:[%s22027_s19 + $0x10] sm:$0xff] }
0x2955   :  { %v18926_v48 = vpop.eup %18925 }
0x2956   :  { %v5688_v46 = vmul.f32 1.0614054, %v18926_v48 }
0x2957   :  { %v18928_v61 = vpop.eup %18927 }
0x2958   :  { %v5689_v49 = vadd.f32 -1.4531521, %v5688_v46  ;;  %v6119_v46 = vld [vmem:[%s22027_s19 + $0x18] sm:$0xff] }
0x295a   :  { %v5690_v50 = vmul.f32 %v18926_v48, %v5689_v49  ;;  %v6117_v49 = vld [vmem:[%s22027_s19 + $0x8] sm:$0xff] }
0x295c   :  { %v5691_v52 = vadd.f32 1.4214138, %v5690_v50  ;;  %v6116_v50 = vld [vmem:[%s22027_s19] sm:$0xff] }
0x295d   :  { %v5915_v53 = vpop.f32.mrf.mxu1 }
0x295e   :  { %v5692_v54 = vmul.f32 %v18926_v48, %v5691_v52  ;;  %v20379_v55 = vadd.f32 %v5915_v53, %v5848_v51  ;;  %v15006_v51 = vld [vmem:[%s22028_s6] ss:$0 sm:$0xff] }
0x295f   :  { %v17483_v35 = vpop.f32.mrf.mxu1 }
0x2960   :  { %v5693_v56 = vadd.f32 -0.28449672, %v5692_v54  ;;  %v5923_v57 = vsel %vm979_vm12, %v20379_v55, 0.0 }
0x2961   :  { %5924 = vadd.xlane.f32.xlu0 %v5923_v57  ;;  %v15021_v57 = vld [vmem:[%s22023_s29 + $0x78] sm:$0xff] }
0x2962   :  { %v5694_v58 = vmul.f32 %v18926_v48, %v5693_v56 }
0x2964   :  { %v5695_v59 = vadd.f32 0.2548296, %v5694_v58  ;;  %v15020_v58 = vld [vmem:[%s22023_s29 + $0x70] sm:$0xff] }
0x2966   :  { %v5696_v60 = vmul.f32 %v18926_v48, %v5695_v59  ;;  %v6120_v48 = vld [vmem:[%s22027_s19 + $0x20] sm:$0xff]  ;;  %v15019_v59 = vld [vmem:[%s22023_s29 + $0x68] sm:$0xff] }
0x2968   :  { %v5701_v62 = vmul.f32 %v18928_v61, %v5696_v60  ;;  %v15018_v60 = vld [vmem:[%s22023_s29 + $0x60] sm:$0xff]  ;;  %v15017_v61 = vld [vmem:[%s22023_s29 + $0x58] sm:$0xff] }
0x296a   :  { %v5702_v63 = vsub.f32 1.0, %v5701_v62  ;;  %v15016_v62 = vld [vmem:[%s22023_s29 + $0x50] sm:$0xff] }
0x296c   :  { %v5703_v1 = vmul.f32 %v5702_v63, %v5682_v0  ;;  %v15009_v63 = vld [vmem:[%s22029_s20] ss:$0 sm:$0xff]  ;;  %v15015_v0 = vld [vmem:[%s22023_s29 + $0x48] sm:$0xff] }
0x296e   :  { %v5704_v5 = vadd.f32 1.0, %v5703_v1 }
0x2970   :  { %v5705_v6 = vmul.f32 %v5704_v5, %v5679_v2  ;;  %v15014_v2 = vld [vmem:[%s22023_s29 + $0x40] sm:$0xff] }
0x2972   :  { %17447 = vmatmul.mubr.f32.vlgmr.msra.gmra.mxu0 %v5705_v6 }
0x2973   :  { %17500 = vmatprep.mubr.msk.f32.mxu0 %vm19115_vm7, %v19114_v8  ;;  %17485 = vmatpush3.msra.mxu0 %v5957_v17  ;;  %v15036_v17 = vld [vmem:[%s22027_s19 + $0x50] sm:$0xff] }
0x2974   :  { %17486 = vmatprep.subr.mxu0 %v19114_v8 }
0x2975   :  { %17487 = vmatpush3.msra.mxu0 %v5956_v13  ;;  %v15034_v13 = vld [vmem:[%s22027_s19 + $0x40] sm:$0xff] }
0x2976   :  { %17488 = vmatprep.subr.mxu0 %v19114_v8 }
0x2977   :  { %17489 = vmatpush3.msra.mxu0 %v5955_v16  ;;  %v15058_v16 = vld [vmem:[%s22023_s29 + $0xb0] sm:$0xff] }
0x2978   :  { %17490 = vmatprep.subr.mxu0 %v19114_v8 }
0x2979   :  { %17491 = vmatpush3.msra.mxu0 %v5954_v19  ;;  %v15056_v19 = vld [vmem:[%s22023_s29 + $0xa0] sm:$0xff] }
0x297a   :  { %17492 = vmatprep.subr.mxu0 %v19114_v8 }
0x297b   :  { %17493 = vmatpush3.msra.mxu0 %v5953_v22  ;;  %v15054_v22 = vld [vmem:[%s22023_s29 + $0x90] sm:$0xff] }
0x297c   :  { %17494 = vmatprep.subr.mxu0 %v19114_v8 }
0x297d   :  { %17495 = vmatpush3.msra.mxu0 %v5952_v26  ;;  %v15052_v26 = vld [vmem:[%s22023_s29 + $0x80] sm:$0xff] }
0x297e   :  { %17496 = vmatprep.subr.mxu0 %v19114_v8 }
0x297f   :  { %17497 = vmatpush3.msra.mxu0 %v5951_v29  ;;  %v15078_v29 = vld [vmem:[%s22027_s19 + $0xb0] sm:$0xff] }
0x2980   :  { %17498 = vmatprep.subr.mxu0 %v19114_v8 }
0x2981   :  { %17499 = vmatpush3.msra.mxu0 %v5950_v32  ;;  %v15076_v32 = vld [vmem:[%s22027_s19 + $0xa0] sm:$0xff] }
0x2982   :  { %17522 = vmatprep.subr.mxu0 %v19114_v8 }
0x29ea   :  { %v5925_v7 = vpop.xlane.xlu0 %5924 }
0x29eb   :  { %v5926_v9 = vmul.f32 0.015625, %v5925_v7  ;;  %v15041_v7 = vld [vmem:[%s22027_s19 + $0x78] sm:$0xff] }
0x29ed   :  { %v5927_v14 = vsub.f32 %v20379_v55, %v5926_v9  ;;  %v15040_v9 = vld [vmem:[%s22027_s19 + $0x70] sm:$0xff] }
0x29ef   :  { %v5928_v10 = vmul.f32 %v5927_v14, %v5927_v14 }
0x29f1   :  { %v5929_v11 = vsel %vm979_vm12, %v5928_v10, 0.0  ;;  %v15038_v10 = vld [vmem:[%s22027_s19 + $0x60] sm:$0xff] }
0x29f2   :  { %5930 = vadd.xlane.f32.xlu1 %v5929_v11  ;;  %v15037_v11 = vld [vmem:[%s22027_s19 + $0x58] sm:$0xff] }
0x2a32   :  { %v20420_v34 = vpop.f32.mrf.mxu0 }
0x2a34   :  { %v17448_v23 = vpop.f32.mrf.mxu0 }
0x2a35   :  { %v15074_v23 = vld [vmem:[%s22027_s19 + $0x90] sm:$0xff] }
0x2a7b   :  { %v5931_v36 = vpop.xlane.xlu1 %5930 }
0x2a7c   :  { %v5932_v37 = vmul.f32 0.015625, %v5931_v36  ;;  %v15073_v36 = vld [vmem:[%s22027_s19 + $0x88] sm:$0xff] }
0x2a7e   :  { %v5933_v25 = vadd.f32 1e-05, %v5932_v37  ;;  %v15072_v37 = vld [vmem:[%s22027_s19 + $0x80] sm:$0xff] }
0x2a80   :  { %18929 = vrsqrt.f32 %v5933_v25  ;;  %v15107_v25 = vld [vmem:[%s22024_s3 + $0xf8] sm:$0xff] }
0x2a8d   :  { %v18930_v38 = vpop.eup %18929 }
0x2a8e   :  { %v5935_v40 = vmul.f32 %v18930_v38, %v5927_v14  ;;  %v15039_v14 = vld [vmem:[%s22027_s19 + $0x68] sm:$0xff]  ;;  %v15106_v38 = vld [vmem:[%s22024_s3 + $0xf0] sm:$0xff] }
0x2a90   :  { %v5942_v30 = vmul.f32 %v15004_v28, %v5935_v40  ;;  %v15105_v28 = vld [vmem:[%s22024_s3 + $0xe8] sm:$0xff]  ;;  %v15104_v40 = vld [vmem:[%s22024_s3 + $0xe0] sm:$0xff] }
0x2a92   :  { %v20424_v44 = vadd.f32 %v15005_v41, %v5942_v30  ;;  %v15103_v41 = vld [vmem:[%s22024_s3 + $0xd8] sm:$0xff]  ;;  %v15102_v30 = vld [vmem:[%s22024_s3 + $0xd0] sm:$0xff] }
0x2a94   :  { %17501 = vmatmul.mubr.msk.f32.vlgmr.msra.gmra.mxu0 %vm979_vm12, %v20424_v44  ;;  %17520 = vmatmul.mubr.msk.f32.vlgmr.msra.gmra.mxu1 %vm979_vm12, %v20424_v44 }
0x2a95   :  { %17523 = vmatpush3.msra.mxu0 %v6123_v42  ;;  %17538 = vmatprep.mubr.msk.f32.mxu0 %vm19115_vm7, %v19114_v8  ;;  %v15101_v42 = vld [vmem:[%s22024_s3 + $0xc8] sm:$0xff] }
0x2a96   :  { %17524 = vmatprep.subr.mxu0 %v19114_v8  ;;  %17543 = vmatprep.mubr.msk.f32.mxu1 %vm19115_vm7, %v19114_v8 }
0x2a97   :  { %17525 = vmatpush3.msra.mxu0 %v6122_v43  ;;  %v15100_v43 = vld [vmem:[%s22024_s3 + $0xc0] sm:$0xff] }
0x2a98   :  { %17526 = vmatprep.subr.mxu0 %v19114_v8 }
0x2a99   :  { %17527 = vmatpush3.msra.mxu0 %v6121_v45  ;;  %v19117_v45 = vmov -3.4028235e+38  }
0x2a9a   :  { %17528 = vmatprep.subr.mxu0 %v19114_v8 }
0x2a9b   :  { %17529 = vmatpush3.msra.mxu0 %v6120_v48  ;;  %v20564_v48 = vsel %vm5919_vm3, 0.0, %v19117_v45  ;;  %v15070_v45 = vld [vmem:[%s22024_s3 + $0xb8] sm:$0xff] }
0x2a9c   :  { %17530 = vmatprep.subr.mxu0 %v19114_v8 }
0x2a9d   :  { %17531 = vmatpush3.msra.mxu0 %v6119_v46 }
0x2a9e   :  { %17532 = vmatprep.subr.mxu0 %v19114_v8 }
0x2a9f   :  { %17533 = vmatpush3.msra.mxu0 %v6118_v47 }
0x2aa0   :  { %17534 = vmatprep.subr.mxu0 %v19114_v8 }
0x2aa1   :  { %17535 = vmatpush3.msra.mxu0 %v6117_v49 }
0x2aa2   :  { %17536 = vmatprep.subr.mxu0 %v19114_v8 }
0x2aa3   :  { %17537 = vmatpush3.msra.mxu0 %v6116_v50 }
0x2aa4   :  { %17539 = vmatmul.mubr.msk.f32.vlgmr.msra.gmra.mxu0 %vm979_vm12, %v20424_v44  ;;  %17546 = vmatprep.subr.mxu0 %v19114_v8 }
0x2aa5   :  { %17548 = vmatprep.mubr.msk.f32.mxu0 %vm19115_vm7, %v19114_v8 }
0x2b54   :  { %v6034_v52 = vpop.f32.mrf.mxu0  ;;  %v6112_v53 = vpop.f32.mrf.mxu1 }
0x2b55   :  { %v6035_v54 = vadd.f32 %v15006_v51, %v6034_v52  ;;  %17542 = vmatpush3.xpose.msk.msra.mxu1 %vm234_vm0, %v6112_v53 }
0x2b56   :  { %v17502_v35 = vpop.f32.mrf.mxu0  ;;  %v17521_v56 = vpop.f32.mrf.mxu1  ;;  %17551 = vmatprep.subr.mxu1 %v19114_v8 }
0x2b58   :  { %17544 = vmatmul.mubr.msk.f32.vlgmr.msra.gmra.mxu1 %vm234_vm0, %v6035_v54 }
0x2b59   :  { %17552 = vmatpush3.msra.mxu1 %v15021_v57  ;;  %17567 = vmatprep.mubr.msk.f32.mxu1 %vm19115_vm7, %v19114_v8 }
0x2b5a   :  { %17553 = vmatprep.subr.mxu1 %v19114_v8 }
0x2b5b   :  { %17554 = vmatpush3.msra.mxu1 %v15020_v58 }
0x2b5c   :  { %17555 = vmatprep.subr.mxu1 %v19114_v8 }
0x2b5d   :  { %17556 = vmatpush3.msra.mxu1 %v15019_v59 }
0x2b5e   :  { %17557 = vmatprep.subr.mxu1 %v19114_v8 }
0x2b5f   :  { %17558 = vmatpush3.msra.mxu1 %v15018_v60 }
0x2b60   :  { %17559 = vmatprep.subr.mxu1 %v19114_v8 }
0x2b61   :  { %17560 = vmatpush3.msra.mxu1 %v15017_v61 }
0x2b62   :  { %17561 = vmatprep.subr.mxu1 %v19114_v8 }
0x2b63   :  { %17562 = vmatpush3.msra.mxu1 %v15016_v62 }
0x2b64   :  { %v6197_v1 = vpop.f32.mrf.mxu0  ;;  %17563 = vmatprep.subr.mxu1 %v19114_v8 }
0x2b65   :  { %v6198_v5 = vadd.f32 %v15009_v63, %v6197_v1  ;;  %17564 = vmatpush3.msra.mxu1 %v15015_v0 }
0x2b66   :  { %v17540_v6 = vpop.f32.mrf.mxu0  ;;  %17565 = vmatprep.subr.mxu1 %v19114_v8 }
0x2b67   :  { %17547 = vmatpush3.msra.mxu0 %v6198_v5  ;;  %17566 = vmatpush3.msra.mxu1 %v15014_v2  ;;  %v15032_v5 = vld [vmem:[%s22024_s3 + $0x78] sm:$0xff]  ;;  %v15031_v6 = vld [vmem:[%s22024_s3 + $0x70] sm:$0xff] }
0x2b68   :  { %17568 = vmatmul.mubr.msk.f32.vlgmr.msra.gmra.mxu1 %vm979_vm12, %v20424_v44  ;;  %17589 = vmatprep.subr.mxu1 %v19114_v8 }
0x2b69   :  { %17590 = vmatpush3.msra.mxu1 %v15041_v7  ;;  %17605 = vmatprep.mubr.msk.f32.mxu1 %vm19115_vm7, %v19114_v8  ;;  %v15030_v7 = vld [vmem:[%s22024_s3 + $0x68] sm:$0xff] }
0x2b6a   :  { %17591 = vmatprep.subr.mxu1 %v19114_v8  ;;  %17570 = vmatprep.subr.mxu0 %v19114_v8 }
0x2b6b   :  { %17592 = vmatpush3.msra.mxu1 %v15040_v9  ;;  %v15029_v9 = vld [vmem:[%s22024_s3 + $0x60] sm:$0xff] }
0x2b6c   :  { %17593 = vmatprep.subr.mxu1 %v19114_v8 }
0x2b6d   :  { %17594 = vmatpush3.msra.mxu1 %v15039_v14  ;;  %v15028_v14 = vld [vmem:[%s22024_s3 + $0x58] sm:$0xff] }
0x2b6e   :  { %17595 = vmatprep.subr.mxu1 %v19114_v8 }
0x2b6f   :  { %17596 = vmatpush3.msra.mxu1 %v15038_v10  ;;  %v15027_v10 = vld [vmem:[%s22024_s3 + $0x50] sm:$0xff] }
0x2b70   :  { %17597 = vmatprep.subr.mxu1 %v19114_v8 }
0x2b71   :  { %17598 = vmatpush3.msra.mxu1 %v15037_v11  ;;  %v15026_v11 = vld [vmem:[%s22024_s3 + $0x48] sm:$0xff] }
0x2b72   :  { %17599 = vmatprep.subr.mxu1 %v19114_v8 }
0x2b73   :  { %17600 = vmatpush3.msra.mxu1 %v15036_v17  ;;  %v15025_v17 = vld [vmem:[%s22024_s3 + $0x40] sm:$0xff] }
0x2b74   :  { %17601 = vmatprep.subr.mxu1 %v19114_v8 }
0x2b75   :  { %17602 = vmatpush3.msra.mxu1 %v15035_v12 }
0x2b76   :  { %17603 = vmatprep.subr.mxu1 %v19114_v8 }
0x2b77   :  { %17604 = vmatpush3.msra.mxu1 %v15034_v13 }
0x2b78   :  { %17606 = vmatmul.mubr.msk.f32.vlgmr.msra.gmra.mxu1 %vm979_vm12, %v20424_v44  ;;  %17632 = vmatprep.subr.mxu1 %v19114_v8 }
0x2b79   :  { %17633 = vmatpush3.msra.mxu1 %v15059_v15  ;;  %17648 = vmatprep.mubr.msk.f32.mxu1 %vm19115_vm7, %v19114_v8  ;;  %v15023_v15 = vld [vmem:[%s22028_s6 + $0x1] ss:$0 sm:$0xff] }
0x2b7a   :  { %17634 = vmatprep.subr.mxu1 %v19114_v8 }
0x2b7b   :  { %17635 = vmatpush3.msra.mxu1 %v15058_v16  ;;  %v15043_v16 = vld [vmem:[%s22029_s20 + $0x1] ss:$0 sm:$0xff] }
0x2b7c   :  { %17636 = vmatprep.subr.mxu1 %v19114_v8 }
0x2b7d   :  { %17637 = vmatpush3.msra.mxu1 %v15057_v18 }
0x2b7e   :  { %17638 = vmatprep.subr.mxu1 %v19114_v8 }
0x2b7f   :  { %17639 = vmatpush3.msra.mxu1 %v15056_v19 }
0x2b80   :  { %17640 = vmatprep.subr.mxu1 %v19114_v8 }
0x2b81   :  { %17641 = vmatpush3.msra.mxu1 %v15055_v21 }
0x2b82   :  { %17642 = vmatprep.subr.mxu1 %v19114_v8 }
0x2b83   :  { %17643 = vmatpush3.msra.mxu1 %v15054_v22 }
0x2b84   :  { %17644 = vmatprep.subr.mxu1 %v19114_v8 }
0x2b85   :  { %17645 = vmatpush3.msra.mxu1 %v15053_v24 }
0x2b86   :  { %17646 = vmatprep.subr.mxu1 %v19114_v8 }
0x2b87   :  { %17647 = vmatpush3.msra.mxu1 %v15052_v26 }
0x2b88   :  { %17649 = vmatmul.mubr.msk.f32.vlgmr.msra.gmra.mxu1 %vm979_vm12, %v20424_v44  ;;  %17670 = vmatprep.subr.mxu1 %v19114_v8 }
0x2b89   :  { %17671 = vmatpush3.msra.mxu1 %v15079_v27  ;;  %17686 = vmatprep.mubr.msk.f32.mxu1 %vm19115_vm7, %v19114_v8 }
0x2b8a   :  { %17672 = vmatprep.subr.mxu1 %v19114_v8 }
0x2b8b   :  { %17673 = vmatpush3.msra.mxu1 %v15078_v29 }
0x2b8c   :  { %17674 = vmatprep.subr.mxu1 %v19114_v8 }
0x2b8d   :  { %17675 = vmatpush3.msra.mxu1 %v15077_v31 }
0x2b8e   :  { %17676 = vmatprep.subr.mxu1 %v19114_v8 }
0x2b8f   :  { %17677 = vmatpush3.msra.mxu1 %v15076_v32 }
0x2b90   :  { %17678 = vmatprep.subr.mxu1 %v19114_v8 }
0x2b91   :  { %17679 = vmatpush3.msra.mxu1 %v15075_v33 }
0x2b92   :  { %17680 = vmatprep.subr.mxu1 %v19114_v8 }
0x2b93   :  { %17681 = vmatpush3.msra.mxu1 %v15074_v23 }
0x2b94   :  { %17682 = vmatprep.subr.mxu1 %v19114_v8 }
0x2b95   :  { %17683 = vmatpush3.msra.mxu1 %v15073_v36 }
0x2b96   :  { %17684 = vmatprep.subr.mxu1 %v19114_v8 }
0x2b97   :  { %17685 = vmatpush3.msra.mxu1 %v15072_v37 }
0x2b98   :  { %17687 = vmatmul.mubr.msk.f32.vlgmr.msra.gmra.mxu1 %vm979_vm12, %v20424_v44  ;;  %17725 = vmatprep.subr.mxu1 %v19114_v8 }
0x2b99   :  { %17726 = vmatpush3.msra.mxu1 %v15107_v25  ;;  %17741 = vmatprep.mubr.msk.f32.mxu1 %vm19115_vm7, %v19114_v8 }
0x2b9a   :  { %17727 = vmatprep.subr.mxu1 %v19114_v8 }
0x2b9b   :  { %17728 = vmatpush3.msra.mxu1 %v15106_v38 }
0x2b9c   :  { %17729 = vmatprep.subr.mxu1 %v19114_v8 }
0x2b9d   :  { %17730 = vmatpush3.msra.mxu1 %v15105_v28  ;;  %v15049_v28 = vld [vmem:[%s22030_s27 + $0x18] sm:$0xff] }
0x2b9e   :  { %17731 = vmatprep.subr.mxu1 %v19114_v8 }
0x2b9f   :  { %17732 = vmatpush3.msra.mxu1 %v15104_v40  ;;  %v15048_v40 = vld [vmem:[%s22030_s27 + $0x10] sm:$0xff] }
0x2ba0   :  { %17733 = vmatprep.subr.mxu1 %v19114_v8 }
0x2ba1   :  { %17734 = vmatpush3.msra.mxu1 %v15103_v41  ;;  %v6362_v41 = vld [vmem:[%s22030_s27 + $0x8] sm:$0xff] }
0x2ba2   :  { %17735 = vmatprep.subr.mxu1 %v19114_v8 }
0x2ba3   :  { %17736 = vmatpush3.msra.mxu1 %v15102_v30 }
0x2ba4   :  { %17737 = vmatprep.subr.mxu1 %v19114_v8 }
0x2ba5   :  { %17738 = vmatpush3.msra.mxu1 %v15101_v42  ;;  %v6361_v42 = vld [vmem:[%s22030_s27] sm:$0xff] }
0x2ba6   :  { %17739 = vmatprep.subr.mxu1 %v19114_v8 }
0x2ba7   :  { %17740 = vmatpush3.msra.mxu1 %v15100_v43 }
0x2ba8   :  { %17742 = vmatmul.mubr.msk.f32.vlgmr.msra.gmra.mxu1 %vm979_vm12, %v20424_v44  ;;  %17763 = vmatprep.subr.mxu1 %v19114_v8 }
0x2ba9   :  { %17765 = vmatprep.mubr.msk.f32.mxu1 %vm19115_vm7, %v19114_v8 }
0x2c18   :  { %v6273_v46 = vpop.f32.mrf.mxu1 }
0x2c19   :  { %v6274_v47 = vadd.f32 %v6273_v46, %v20564_v48  ;;  %v15069_v46 = vld [vmem:[%s22024_s3 + $0xb0] sm:$0xff] }
0x2c1a   :  { %v17545_v49 = vpop.f32.mrf.mxu1 }
0x2c1b   :  { %v6277_v50 = vsel %vm1680_vm15, %v6274_v47, -inf  ;;  %v15067_v49 = vld [vmem:[%s22024_s3 + $0xa0] sm:$0xff] }
0x2c1c   :  { %6278 = vmax.xlane.f32.xlu0 %v6277_v50  ;;  %v15066_v50 = vld [vmem:[%s22024_s3 + $0x98] sm:$0xff] }
0x2c28   :  { %v6446_v51 = vpop.f32.mrf.mxu1 }
0x2c29   :  { %v6447_v19 = vadd.f32 %v15023_v15, %v6446_v51  ;;  %v15065_v51 = vld [vmem:[%s22024_s3 + $0x90] sm:$0xff]  ;;  %v15096_v15 = vld [vmem:[%s22023_s29 + $0xf8] sm:$0xff] }
0x2c2a   :  { %v17569_v52 = vpop.f32.mrf.mxu1 }
0x2c2b   :  { %v15064_v52 = vld [vmem:[%s22024_s3 + $0x88] sm:$0xff] }
0x2c38   :  { %v6612_v53 = vpop.f32.mrf.mxu1 }
0x2c39   :  { %v6613_v22 = vadd.f32 %v15043_v16, %v6612_v53  ;;  %v15063_v53 = vld [vmem:[%s22024_s3 + $0x80] sm:$0xff] }
0x2c3a   :  { %v17607_v54 = vpop.f32.mrf.mxu1 }
0x2c48   :  { %v20568_v35 = vpop.f32.mrf.mxu1 }
0x2c4a   :  { %v17650_v56 = vpop.f32.mrf.mxu1 }
0x2c58   :  { %v20570_v57 = vpop.f32.mrf.mxu1 }
0x2c5a   :  { %v17688_v3 = vpop.f32.mrf.mxu1 }
0x2c68   :  { %v7577_v4 = vpop.f32.mrf.mxu1 }
0x2c69   :  { %17764 = vmatpush3.xpose.msk.msra.mxu1 %vm234_vm0, %v7577_v4 }
0x2c6a   :  { %v17743_v58 = vpop.f32.mrf.mxu1  ;;  %17768 = vmatprep.subr.mxu1 %v19114_v8 }
0x2ca5   :  { %v6279_v59 = vpop.xlane.xlu0 %6278 }
0x2ca6   :  { %v6280_v60 = vsub.f32 %v6274_v47, %v6279_v59  ;;  %v15068_v47 = vld [vmem:[%s22024_s3 + $0xa8] sm:$0xff]  ;;  %v15061_v59 = vld [vmem:[%s22028_s6 + $0x2] ss:$0 sm:$0xff] }
0x2ca8   :  { %v6281_v61 = vmul.f32 1.442695, %v6280_v60  ;;  %v15081_v60 = vld [vmem:[%s22029_s20 + $0x2] ss:$0 sm:$0xff] }
0x2caa   :  { %18931 = vpow2.f32 %v6281_v61 }
0x2cb7   :  { %v18932_v62 = vpop.eup %18931 }
0x2cb8   :  { %v6283_v63 = vsel %vm1680_vm15, %v18932_v62, 0.0 }
0x2cb9   :  { %6284 = vadd.xlane.f32.xlu1 %v6283_v63 }
0x2d42   :  { %v6285_v0 = vpop.xlane.xlu1 %6284 }
0x2d43   :  { %18933 = vrcp.f32 %v6285_v0  ;;  %v7175_v0 = vadd.f32 %v15081_v60, %v20570_v57 }
0x2d50   :  { %v18934_v1 = vpop.eup %18933 }
0x2d51   :  { %v6287_v2 = vmul.f32 %v18934_v1, %v18932_v62  ;;  %v7009_v62 = vadd.f32 %v15061_v59, %v20568_v35 }
0x2d53   :  { %17549 = vmatmul.mubr.msk.f32.vlgmr.msra.gmra.mxu0 %vm1680_vm15, %v6287_v2 }
0x2d54   :  { %17571 = vmatpush3.msra.mxu0 %v15032_v5  ;;  %17586 = vmatprep.mubr.msk.f32.mxu0 %vm19115_vm7, %v19114_v8 }
0x2d55   :  { %17572 = vmatprep.subr.mxu0 %v19114_v8 }
0x2d56   :  { %17573 = vmatpush3.msra.mxu0 %v15031_v6 }
0x2d57   :  { %17574 = vmatprep.subr.mxu0 %v19114_v8 }
0x2d58   :  { %17575 = vmatpush3.msra.mxu0 %v15030_v7 }
0x2d59   :  { %17576 = vmatprep.subr.mxu0 %v19114_v8 }
0x2d5a   :  { %17577 = vmatpush3.msra.mxu0 %v15029_v9 }
0x2d5b   :  { %17578 = vmatprep.subr.mxu0 %v19114_v8 }
0x2d5c   :  { %17579 = vmatpush3.msra.mxu0 %v15028_v14 }
0x2d5d   :  { %17580 = vmatprep.subr.mxu0 %v19114_v8 }
0x2d5e   :  { %17581 = vmatpush3.msra.mxu0 %v15027_v10 }
0x2d5f   :  { %17582 = vmatprep.subr.mxu0 %v19114_v8 }
0x2d60   :  { %17583 = vmatpush3.msra.mxu0 %v15026_v11 }
0x2d61   :  { %17584 = vmatprep.subr.mxu0 %v19114_v8 }
0x2d62   :  { %17585 = vmatpush3.msra.mxu0 %v15025_v17 }
0x2d63   :  { %17587 = vmatmul.mubr.msk.f32.vlgmr.msra.gmra.mxu0 %vm979_vm12, %v20424_v44  ;;  %17608 = vmatprep.subr.mxu0 %v19114_v8 }
0x2d64   :  { %17610 = vmatprep.mubr.msk.f32.mxu0 %vm19115_vm7, %v19114_v8 }
0x2e13   :  { %v6357_v12 = vpop.f32.mrf.mxu0 }
0x2e15   :  { %v17550_v13 = vpop.f32.mrf.mxu0 }
0x2e16   :  { %v15086_v13 = vld [vmem:[%s22030_s27 + $0x20] sm:$0xff] }
0x2e23   :  { %v6525_v18 = vpop.f32.mrf.mxu0 }
0x2e24   :  { %17609 = vmatpush3.xpose.msk.msra.mxu0 %vm234_vm0, %v6525_v18  ;;  %v15095_v18 = vld [vmem:[%s22023_s29 + $0xf0] sm:$0xff] }
0x2e25   :  { %v17588_v21 = vpop.f32.mrf.mxu0  ;;  %17613 = vmatprep.subr.mxu0 %v19114_v8 }
0x2e26   :  { %v15094_v21 = vld [vmem:[%s22023_s29 + $0xe8] sm:$0xff] }
0x2e27   :  { %17611 = vmatmul.mubr.msk.f32.vlgmr.msra.gmra.mxu0 %vm234_vm0, %v6447_v19 }
0x2e28   :  { %17614 = vmatpush3.msra.mxu0 %v6613_v22  ;;  %17615 = vmatprep.mubr.msk.f32.mxu0 %vm19115_vm7, %v19114_v8  ;;  %v15093_v22 = vld [vmem:[%s22023_s29 + $0xe0] sm:$0xff] }
0x2e29   :  { %17618 = vmatprep.subr.mxu0 %v19114_v8 }
0x2ee7   :  { %v6688_v24 = vpop.f32.mrf.mxu0 }
0x2ee8   :  { %v6689_v26 = vadd.f32 %v6688_v24, %v20564_v48  ;;  %v15092_v24 = vld [vmem:[%s22023_s29 + $0xd8] sm:$0xff] }
0x2ee9   :  { %v17612_v27 = vpop.f32.mrf.mxu0 }
0x2eea   :  { %v6692_v29 = vsel %vm1680_vm15, %v6689_v26, -inf  ;;  %v15090_v27 = vld [vmem:[%s22023_s29 + $0xc8] sm:$0xff] }
0x2eeb   :  { %6693 = vmax.xlane.f32.xlu0 %v6692_v29  ;;  %v15089_v29 = vld [vmem:[%s22023_s29 + $0xc0] sm:$0xff] }
0x2f74   :  { %v6694_v31 = vpop.xlane.xlu0 %6693 }
0x2f75   :  { %v6695_v32 = vsub.f32 %v6689_v26, %v6694_v31  ;;  %v15091_v26 = vld [vmem:[%s22023_s29 + $0xd0] sm:$0xff]  ;;  %v15116_v31 = vld [vmem:[%s22027_s19 + $0xf8] sm:$0xff] }
0x2f77   :  { %v6696_v33 = vmul.f32 1.442695, %v6695_v32  ;;  %v15115_v32 = vld [vmem:[%s22027_s19 + $0xf0] sm:$0xff] }
0x2f79   :  { %18935 = vpow2.f32 %v6696_v33  ;;  %v15114_v33 = vld [vmem:[%s22027_s19 + $0xe8] sm:$0xff] }
0x2f86   :  { %v18936_v23 = vpop.eup %18935 }
0x2f87   :  { %v6698_v36 = vsel %vm1680_vm15, %v18936_v23, 0.0 }
0x2f88   :  { %6699 = vadd.xlane.f32.xlu1 %v6698_v36  ;;  %v15112_v36 = vld [vmem:[%s22027_s19 + $0xd8] sm:$0xff] }
0x3011   :  { %v6700_v37 = vpop.xlane.xlu1 %6699 }
0x3012   :  { %18937 = vrcp.f32 %v6700_v37  ;;  %v15111_v37 = vld [vmem:[%s22027_s19 + $0xd0] sm:$0xff] }
0x301f   :  { %v18938_v25 = vpop.eup %18937 }
0x3020   :  { %v6702_v38 = vmul.f32 %v18938_v25, %v18936_v23  ;;  %v15113_v23 = vld [vmem:[%s22027_s19 + $0xe0] sm:$0xff]  ;;  %v15110_v25 = vld [vmem:[%s22027_s19 + $0xc8] sm:$0xff] }
0x3022   :  { %17616 = vmatmul.mubr.msk.f32.vlgmr.msra.gmra.mxu0 %vm1680_vm15, %v6702_v38  ;;  %v15109_v38 = vld [vmem:[%s22027_s19 + $0xc0] sm:$0xff] }
0x3023   :  { %17619 = vmatpush3.msra.mxu0 %v15049_v28  ;;  %17622 = vmatprep.mubr.msk.f32.mxu0 %vm19115_vm7, %v19114_v8 }
0x3024   :  { %17620 = vmatprep.subr.mxu0 %v19114_v8 }
0x3025   :  { %17621 = vmatpush3.msra.mxu0 %v15048_v40 }
0x3026   :  { %17625 = vmatprep.subr.mxu0 %v19114_v8 }
0x30e2   :  { %v6772_v30 = vpop.f32.mrf.mxu0 }
0x30e3   :  { %17623 = vmatmul.mubr.msk.f32.vlgmr.msra.gmra.mxu0 %vm234_vm0, %v6772_v30  ;;  %v15098_v30 = vld [vmem:[%s22028_s6 + $0x3] ss:$0 sm:$0xff] }
0x30e4   :  { %17626 = vmatpush3.msra.mxu0 %v6362_v41  ;;  %v17617_v43 = vpop.f32.mrf.mxu0  ;;  %17629 = vmatprep.mubr.msk.f32.mxu0 %vm19115_vm7, %v19114_v8 }
0x30e5   :  { %17627 = vmatprep.subr.mxu0 %v19114_v8 }
0x30e6   :  { %17628 = vmatpush3.msra.mxu0 %v6361_v42 }
0x30e7   :  { %17651 = vmatprep.subr.mxu0 %v19114_v8  ;;  %17630 = vmatmul.mubr.msk.f32.vlgmr.msra.gmra.mxu0 %vm234_vm0, %v6357_v12  ;;  %v15087_v12 = vld [vmem:[%s22030_s27 + $0x28] sm:$0xff] }
0x30e8   :  { %17652 = vmatpush3.msra.mxu0 %v15070_v45  ;;  %17667 = vmatprep.mubr.msk.f32.mxu0 %vm19115_vm7, %v19114_v8 }
0x30e9   :  { %17653 = vmatprep.subr.mxu0 %v19114_v8 }
0x30ea   :  { %17654 = vmatpush3.msra.mxu0 %v15069_v46 }
0x30eb   :  { %17655 = vmatprep.subr.mxu0 %v19114_v8 }
0x30ec   :  { %17656 = vmatpush3.msra.mxu0 %v15068_v47 }
0x30ed   :  { %17657 = vmatprep.subr.mxu0 %v19114_v8 }
0x30ee   :  { %17658 = vmatpush3.msra.mxu0 %v15067_v49 }
0x30ef   :  { %17659 = vmatprep.subr.mxu0 %v19114_v8 }
0x30f0   :  { %17660 = vmatpush3.msra.mxu0 %v15066_v50  ;;  %v15001_v50 = vld [vmem:[%s22020_s12 + $0x1] ss:$0 sm:$0xff]  ;;  %s22049_s12 = sld [smem:[#allocation21_spill]] }
0x30f1   :  { %17661 = vmatprep.subr.mxu0 %v19114_v8 }
0x30f2   :  { %17662 = vmatpush3.msra.mxu0 %v15065_v51  ;;  %v5798_v51 = vadd.f32 %v15001_v50, %v20420_v34  ;;  %v7945_v50 = vld [vmem:[%s22035_s15 + $0x10] sm:$0xff] }
0x30f3   :  { %17663 = vmatprep.subr.mxu0 %v19114_v8 }
0x30f4   :  { %17664 = vmatpush3.msra.mxu0 %v15064_v52 }
0x30f5   :  { %17665 = vmatprep.subr.mxu0 %v19114_v8 }
0x30f6   :  { %17666 = vmatpush3.msra.mxu0 %v15063_v53 }
0x30f7   :  { %17668 = vmatmul.mubr.msk.f32.vlgmr.msra.gmra.mxu0 %vm979_vm12, %v20424_v44  ;;  %17689 = vmatprep.subr.mxu0 %v19114_v8 }
0x30f8   :  { %17691 = vmatprep.mubr.msk.f32.mxu0 %vm19115_vm7, %v19114_v8 }
0x31a3   :  { %v6848_v54 = vpop.f32.mrf.mxu0 }
0x31a5   :  { %v17624_v56 = vpop.f32.mrf.mxu0 }
0x31a7   :  { %v6921_v3 = vpop.f32.mrf.mxu0 }
0x31a8   :  { %v20646_v4 = vadd.f32 %v6921_v3, %v6848_v54  ;;  %v5801_v3 = vadd.f32 %v5798_v51, %v20283_v39  ;;  %v7944_v51 = vld [vmem:[%s22035_s15 + $0x8] sm:$0xff] }
0x31a9   :  { %v17631_v58 = vpop.f32.mrf.mxu0 }
0x31b7   :  { %v7087_v61 = vpop.f32.mrf.mxu0 }
0x31b8   :  { %17690 = vmatpush3.xpose.msk.msra.mxu0 %vm234_vm0, %v7087_v61 }
0x31b9   :  { %v17669_v63 = vpop.f32.mrf.mxu0  ;;  %17694 = vmatprep.subr.mxu0 %v19114_v8 }
0x31bb   :  { %17692 = vmatmul.mubr.msk.f32.vlgmr.msra.gmra.mxu0 %vm234_vm0, %v7009_v62 }
0x31bc   :  { %17695 = vmatpush3.msra.mxu0 %v7175_v0  ;;  %17696 = vmatprep.mubr.msk.f32.mxu0 %vm19115_vm7, %v19114_v8 }
0x31bd   :  { %17699 = vmatprep.subr.mxu0 %v19114_v8 }
0x327b   :  { %v7250_v1 = vpop.f32.mrf.mxu0 }
0x327c   :  { %v7251_v2 = vadd.f32 %v7250_v1, %v20564_v48 }
0x327d   :  { %v17693_v5 = vpop.f32.mrf.mxu0 }
0x327e   :  { %v7254_v35 = vsel %vm1680_vm15, %v7251_v2, -inf  ;;  %v8037_v5 = vld [vmem:[%s22031_s4 + $0x30] sm:$0xff] }
0x327f   :  { %7255 = vmax.xlane.f32.xlu0 %v7254_v35  ;;  %v8036_v35 = vld [vmem:[%s22031_s4 + $0x28] sm:$0xff] }
0x3308   :  { %v7256_v6 = vpop.xlane.xlu0 %7255 }
0x3309   :  { %v7257_v7 = vsub.f32 %v7251_v2, %v7256_v6  ;;  %v8038_v2 = vld [vmem:[%s22031_s4 + $0x38] sm:$0xff]  ;;  %v8035_v6 = vld [vmem:[%s22031_s4 + $0x20] sm:$0xff] }
0x330b   :  { %v7258_v57 = vmul.f32 1.442695, %v7257_v7  ;;  %v8034_v7 = vld [vmem:[%s22031_s4 + $0x18] sm:$0xff] }
0x330d   :  { %18939 = vpow2.f32 %v7258_v57  ;;  %v8033_v57 = vld [vmem:[%s22031_s4 + $0x10] sm:$0xff] }
0x331a   :  { %v18940_v9 = vpop.eup %18939 }
0x331b   :  { %v7260_v14 = vsel %vm1680_vm15, %v18940_v9, 0.0 }
0x331c   :  { %7261 = vadd.xlane.f32.xlu1 %v7260_v14  ;;  %v8031_v14 = vld [vmem:[%s22031_s4] sm:$0xff] }
0x33a5   :  { %v7262_v10 = vpop.xlane.xlu1 %7261 }
0x33a6   :  { %18941 = vrcp.f32 %v7262_v10 }
0x33b3   :  { %v18942_v11 = vpop.eup %18941 }
0x33b4   :  { %v7264_v17 = vmul.f32 %v18942_v11, %v18940_v9  ;;  %v8032_v9 = vld [vmem:[%s22031_s4 + $0x8] sm:$0xff] }
0x33b6   :  { %17697 = vmatmul.mubr.msk.f32.vlgmr.msra.gmra.mxu0 %vm1680_vm15, %v7264_v17 }
0x33b7   :  { %17700 = vmatpush3.msra.mxu0 %v15087_v12  ;;  %17703 = vmatprep.mubr.msk.f32.mxu0 %vm19115_vm7, %v19114_v8 }
0x33b8   :  { %17701 = vmatprep.subr.mxu0 %v19114_v8 }
0x33b9   :  { %17702 = vmatpush3.msra.mxu0 %v15086_v13 }
0x33ba   :  { %17706 = vmatprep.subr.mxu0 %v19114_v8 }
0x3476   :  { %v7334_v16 = vpop.f32.mrf.mxu0 }
0x3477   :  { %17704 = vmatmul.mubr.msk.f32.vlgmr.msra.gmra.mxu0 %vm234_vm0, %v7334_v16 }
0x3478   :  { %17707 = vmatpush3.msra.mxu0 %v15096_v15  ;;  %v17698_v19 = vpop.f32.mrf.mxu0  ;;  %17722 = vmatprep.mubr.msk.f32.mxu0 %vm19115_vm7, %v19114_v8  ;;  %v15002_v15 = vld [vmem:[%s22032_s7] ss:$0 sm:$0xff] }
0x3479   :  { %17708 = vmatprep.subr.mxu0 %v19114_v8 }
0x347a   :  { %17709 = vmatpush3.msra.mxu0 %v15095_v18  ;;  %v15003_v18 = vld [vmem:[%s22033_s10] ss:$0 sm:$0xff] }
0x347b   :  { %17710 = vmatprep.subr.mxu0 %v19114_v8 }
0x347c   :  { %17711 = vmatpush3.msra.mxu0 %v15094_v21 }
0x347d   :  { %17712 = vmatprep.subr.mxu0 %v19114_v8 }
0x347e   :  { %17713 = vmatpush3.msra.mxu0 %v15093_v22 }
0x347f   :  { %17714 = vmatprep.subr.mxu0 %v19114_v8 }
0x3480   :  { %17715 = vmatpush3.msra.mxu0 %v15092_v24 }
0x3481   :  { %17716 = vmatprep.subr.mxu0 %v19114_v8 }
0x3482   :  { %17717 = vmatpush3.msra.mxu0 %v15091_v26  ;;  %v15124_v26 = vld [vmem:[%s22030_s27 + $0x38] sm:$0xff] }
0x3483   :  { %17718 = vmatprep.subr.mxu0 %v19114_v8 }
0x3484   :  { %17719 = vmatpush3.msra.mxu0 %v15090_v27  ;;  %v15123_v27 = vld [vmem:[%s22030_s27 + $0x30] sm:$0xff] }
0x3485   :  { %17720 = vmatprep.subr.mxu0 %v19114_v8 }
0x3486   :  { %17721 = vmatpush3.msra.mxu0 %v15089_v29 }
0x3487   :  { %17723 = vmatmul.mubr.msk.f32.vlgmr.msra.gmra.mxu0 %vm979_vm12, %v20424_v44  ;;  %17744 = vmatprep.subr.mxu0 %v19114_v8 }
0x3488   :  { %17745 = vmatpush3.msra.mxu0 %v15116_v31  ;;  %17760 = vmatprep.mubr.msk.f32.mxu0 %vm19115_vm7, %v19114_v8 }
0x3489   :  { %17746 = vmatprep.subr.mxu0 %v19114_v8 }
0x348a   :  { %17747 = vmatpush3.msra.mxu0 %v15115_v32 }
0x348b   :  { %17748 = vmatprep.subr.mxu0 %v19114_v8 }
0x348c   :  { %17749 = vmatpush3.msra.mxu0 %v15114_v33 }
0x348d   :  { %17750 = vmatprep.subr.mxu0 %v19114_v8 }
0x348e   :  { %17751 = vmatpush3.msra.mxu0 %v15113_v23 }
0x348f   :  { %17752 = vmatprep.subr.mxu0 %v19114_v8 }
0x3490   :  { %17753 = vmatpush3.msra.mxu0 %v15112_v36  ;;  %v15126_v36 = vld [vmem:[%s22034_s11] ss:$0 sm:$0xff] }
0x3491   :  { %17754 = vmatprep.subr.mxu0 %v19114_v8 }
0x3492   :  { %17755 = vmatpush3.msra.mxu0 %v15111_v37 }
0x3493   :  { %17756 = vmatprep.subr.mxu0 %v19114_v8 }
0x3494   :  { %17757 = vmatpush3.msra.mxu0 %v15110_v25 }
0x3495   :  { %17758 = vmatprep.subr.mxu0 %v19114_v8 }
0x3496   :  { %17759 = vmatpush3.msra.mxu0 %v15109_v38 }
0x3497   :  { %17761 = vmatmul.mubr.msk.f32.vlgmr.msra.gmra.mxu0 %vm979_vm12, %v20424_v44  ;;  %17799 = vmatprep.subr.mxu0 %v19114_v8  ;;  %v15118_v44 = vld [vmem:[%s22029_s20 + $0x3] ss:$0 sm:$0xff] }
0x3498   :  { %17815 = vmatprep.mubr.msk.f32.mxu0 %vm19115_vm7, %v19114_v8  ;;  %17800 = vmatpush3.msra.mxu0 %v8038_v2  ;;  %v8113_v2 = vld [vmem:[%s22038_s23 + $0x8] sm:$0xff] }
0x3499   :  { %17801 = vmatprep.subr.mxu0 %v19114_v8 }
0x349a   :  { %17802 = vmatpush3.msra.mxu0 %v8037_v5  ;;  %v8112_v5 = vld [vmem:[%s22038_s23] sm:$0xff] }
0x349b   :  { %17803 = vmatprep.subr.mxu0 %v19114_v8 }
0x349c   :  { %17804 = vmatpush3.msra.mxu0 %v8036_v35  ;;  %v15155_v35 = vld [vmem:[%s22031_s4 + $0x78] sm:$0xff] }
0x349d   :  { %17805 = vmatprep.subr.mxu0 %v19114_v8 }
0x349e   :  { %17806 = vmatpush3.msra.mxu0 %v8035_v6  ;;  %v15154_v6 = vld [vmem:[%s22031_s4 + $0x70] sm:$0xff] }
0x349f   :  { %17807 = vmatprep.subr.mxu0 %v19114_v8 }
0x34a0   :  { %17808 = vmatpush3.msra.mxu0 %v8034_v7  ;;  %v15153_v7 = vld [vmem:[%s22031_s4 + $0x68] sm:$0xff] }
0x34a1   :  { %17809 = vmatprep.subr.mxu0 %v19114_v8 }
0x34a2   :  { %17810 = vmatpush3.msra.mxu0 %v8033_v57  ;;  %v15152_v57 = vld [vmem:[%s22031_s4 + $0x60] sm:$0xff] }
0x34a3   :  { %17811 = vmatprep.subr.mxu0 %v19114_v8 }
0x34a4   :  { %17812 = vmatpush3.msra.mxu0 %v8032_v9  ;;  %v15151_v9 = vld [vmem:[%s22031_s4 + $0x58] sm:$0xff] }
0x34a5   :  { %17813 = vmatprep.subr.mxu0 %v19114_v8 }
0x34a6   :  { %17814 = vmatpush3.msra.mxu0 %v8031_v14  ;;  %v15150_v14 = vld [vmem:[%s22031_s4 + $0x50] sm:$0xff] }
0x34a7   :  { %17837 = vmatprep.subr.mxu0 %v19114_v8 }
0x3537   :  { %v7410_v28 = vpop.f32.mrf.mxu0 }
0x3538   :  { %v20712_v40 = vadd.f32 %v7410_v28, %v20646_v4  ;;  %v5804_v4 = vsel %vm979_vm12, %v5801_v3, 0.0 }
0x3539   :  { %v17705_v41 = vpop.f32.mrf.mxu0 }
0x3547   :  { %v7498_v42 = vpop.f32.mrf.mxu0 }
0x3548   :  { %v7499_v43 = vadd.f32 %v15098_v30, %v7498_v42 }
0x3549   :  { %v17724_v45 = vpop.f32.mrf.mxu0 }
0x354a   :  { %17766 = vmatmul.mubr.msk.f32.vlgmr.msra.gmra.mxu1 %vm234_vm0, %v7499_v43 }
0x354b   :  { %17770 = vmatprep.mubr.msk.f32.mxu1 %vm19115_vm7, %v19114_v8 }
0x3557   :  { %v7664_v46 = vpop.f32.mrf.mxu0 }
0x3558   :  { %v7665_v47 = vadd.f32 %v15118_v44, %v7664_v46  ;;  %v7948_v46 = vld [vmem:[%s22035_s15 + $0x28] sm:$0xff] }
0x3559   :  { %v17762_v49 = vpop.f32.mrf.mxu0 }
0x355a   :  { %17769 = vmatpush3.msra.mxu1 %v7665_v47  ;;  %v7947_v47 = vld [vmem:[%s22035_s15 + $0x20] sm:$0xff]  ;;  %v7946_v49 = vld [vmem:[%s22035_s15 + $0x18] sm:$0xff] }
0x355b   :  { %17773 = vmatprep.subr.mxu1 %v19114_v8 }
0x360a   :  { %v7740_v52 = vpop.f32.mrf.mxu1 }
0x360b   :  { %v7741_v53 = vadd.f32 %v7740_v52, %v20564_v48  ;;  %v7943_v52 = vld [vmem:[%s22035_s15] sm:$0xff] }
0x360c   :  { %v17767_v54 = vpop.f32.mrf.mxu1 }
0x360d   :  { %v7744_v56 = vsel %vm1680_vm15, %v7741_v53, -inf }
0x360e   :  { %7745 = vmax.xlane.f32.xlu0 %v7744_v56 }
0x3612   :  { %5805 = vadd.xlane.f32.xlu0 %v5804_v4  ;;  %v15127_v4 = vld [vmem:[%s22036_s16] ss:$0 sm:$0xff] }
0x3697   :  { %v7746_v58 = vpop.xlane.xlu0 %7745 }
0x3698   :  { %v7747_v59 = vsub.f32 %v7741_v53, %v7746_v58 }
0x369a   :  { %v7748_v60 = vmul.f32 1.442695, %v7747_v59  ;;  %v15128_v59 = vld [vmem:[%s22037_s18] ss:$0 sm:$0xff] }
0x369b   :  { %v5806_v61 = vpop.xlane.xlu0 %5805 }
0x369c   :  { %18943 = vpow2.f32 %v7748_v60  ;;  %v5807_v34 = vmul.f32 0.015625, %v5806_v61 }
0x369e   :  { %v5808_v62 = vsub.f32 %v5801_v3, %v5807_v34  ;;  %v8119_v34 = vld [vmem:[%s22038_s23 + $0x38] sm:$0xff] }
0x36a0   :  { %v5809_v63 = vmul.f32 %v5808_v62, %v5808_v62 }
0x36a2   :  { %v5810_v0 = vsel %vm979_vm12, %v5809_v63, 0.0  ;;  %v8117_v63 = vld [vmem:[%s22038_s23 + $0x28] sm:$0xff] }
0x36a3   :  { %5811 = vadd.xlane.f32.xlu0 %v5810_v0  ;;  %v8116_v0 = vld [vmem:[%s22038_s23 + $0x20] sm:$0xff] }
0x36a9   :  { %v18944_v39 = vpop.eup %18943 }
0x36aa   :  { %v7750_v1 = vsel %vm1680_vm15, %v18944_v39, 0.0 }
0x36ab   :  { %7751 = vadd.xlane.f32.xlu1 %v7750_v1  ;;  %v8114_v1 = vld [vmem:[%s22038_s23 + $0x10] sm:$0xff] }
0x372c   :  { %v5812_v10 = vpop.xlane.xlu0 %5811 }
0x372d   :  { %v5813_v11 = vmul.f32 0.015625, %v5812_v10  ;;  %v15149_v10 = vld [vmem:[%s22031_s4 + $0x48] sm:$0xff] }
0x372f   :  { %v5814_v17 = vadd.f32 1e-05, %v5813_v11  ;;  %v15148_v11 = vld [vmem:[%s22031_s4 + $0x40] sm:$0xff] }
0x3731   :  { %18945 = vrsqrt.f32 %v5814_v17  ;;  %v15129_v17 = vld [vmem:[%s22039_s22] ss:$0 sm:$0xff] }
0x3734   :  { %v7752_v12 = vpop.xlane.xlu1 %7751 }
0x3735   :  { %18947 = vrcp.f32 %v7752_v12 }
0x373e   :  { %v18946_v13 = vpop.eup %18945 }
0x373f   :  { %v5816_v16 = vmul.f32 %v18946_v13, %v5808_v62  ;;  %v8118_v62 = vld [vmem:[%s22038_s23 + $0x30] sm:$0xff] }
0x3741   :  { %v5823_v19 = vmul.f32 %v15002_v15, %v5816_v16  ;;  %v15132_v16 = vld [vmem:[%s22040_s26] ss:$0 sm:$0xff] }
0x3742   :  { %v18948_v21 = vpop.eup %18947 }
0x3743   :  { %v20746_v22 = vadd.f32 %v15003_v18, %v5823_v19  ;;  %v7754_v24 = vmul.f32 %v18948_v21, %v18944_v39  ;;  %v8115_v39 = vld [vmem:[%s22038_s23 + $0x18] sm:$0xff] }
0x3745   :  { %17771 = vmatmul.mubr.msk.f32.vlgmr.msra.gmra.mxu1 %vm1680_vm15, %v7754_v24  ;;  %17816 = vmatmul.mubr.msk.f32.vlgmr.msra.gmra.mxu0 %vm979_vm12, %v20746_v22 }
0x3746   :  { %17774 = vmatpush3.msra.mxu1 %v15124_v26  ;;  %17777 = vmatprep.mubr.msk.f32.mxu1 %vm19115_vm7, %v19114_v8 }
0x3747   :  { %17775 = vmatprep.subr.mxu1 %v19114_v8  ;;  %17839 = vmatprep.mubr.msk.f32.mxu0 %vm19115_vm7, %v19114_v8 }
0x3748   :  { %17776 = vmatpush3.msra.mxu1 %v15123_v27 }
0x3749   :  { %17780 = vmatprep.subr.mxu1 %v19114_v8 }
0x3805   :  { %v7824_v29 = vpop.f32.mrf.mxu1  ;;  %v8108_v31 = vpop.f32.mrf.mxu0 }
0x3806   :  { %17778 = vmatmul.mubr.msk.f32.vlgmr.msra.gmra.mxu1 %vm234_vm0, %v7824_v29  ;;  %17838 = vmatpush3.xpose.msk.msra.mxu0 %vm234_vm0, %v8108_v31 }
0x3807   :  { %v17772_v32 = vpop.f32.mrf.mxu1  ;;  %v17817_v33 = vpop.f32.mrf.mxu0  ;;  %17796 = vmatprep.mubr.msk.f32.mxu1 %vm19115_vm7, %v19114_v8  ;;  %17842 = vmatprep.subr.mxu0 %v19114_v8 }
0x38c6   :  { %v7900_v23 = vpop.f32.mrf.mxu1 }
0x38c7   :  { %v7904_v37 = vadd.f32 %v7900_v23, %v20712_v40  ;;  %v7950_v40 = vld [vmem:[%s22035_s15 + $0x38] sm:$0xff] }
0x38c8   :  { %v17779_v25 = vpop.f32.mrf.mxu1  ;;  %17781 = vmatpush3.msra.mxu1 %v7950_v40  ;;  %v15139_v40 = vld [vmem:[%s22035_s15 + $0x50] sm:$0xff] }
0x38c9   :  { %v7912_v38 = vadd.f32 %v15126_v36, %v7904_v37  ;;  %17782 = vmatprep.subr.mxu1 %v19114_v8 }
0x38cb   :  { %v20767_v28 = vadd.f32 %v7912_v38, %v20379_v55  ;;  %v7949_v55 = vld [vmem:[%s22035_s15 + $0x30] sm:$0xff] }
0x38cc   :  { %17783 = vmatpush3.msra.mxu1 %v7949_v55  ;;  %v15138_v55 = vld [vmem:[%s22035_s15 + $0x48] sm:$0xff] }
0x38cd   :  { %v7916_v41 = vsel %vm979_vm12, %v20767_v28, 0.0  ;;  %17784 = vmatprep.subr.mxu1 %v19114_v8 }
0x38ce   :  { %7917 = vadd.xlane.f32.xlu1 %v7916_v41  ;;  %17785 = vmatpush3.msra.mxu1 %v7948_v46  ;;  %v15137_v46 = vld [vmem:[%s22035_s15 + $0x40] sm:$0xff] }
0x38cf   :  { %17786 = vmatprep.subr.mxu1 %v19114_v8 }
0x38d0   :  { %17787 = vmatpush3.msra.mxu1 %v7947_v47  ;;  %v15164_v47 = vld [vmem:[%s22038_s23 + $0x78] sm:$0xff] }
0x38d1   :  { %17788 = vmatprep.subr.mxu1 %v19114_v8 }
0x38d2   :  { %17789 = vmatpush3.msra.mxu1 %v7946_v49  ;;  %v15163_v49 = vld [vmem:[%s22038_s23 + $0x70] sm:$0xff] }
0x38d3   :  { %17790 = vmatprep.subr.mxu1 %v19114_v8 }
0x38d4   :  { %17791 = vmatpush3.msra.mxu1 %v7945_v50  ;;  %v15162_v50 = vld [vmem:[%s22038_s23 + $0x68] sm:$0xff] }
0x38d5   :  { %17792 = vmatprep.subr.mxu1 %v19114_v8 }
0x38d6   :  { %17793 = vmatpush3.msra.mxu1 %v7944_v51  ;;  %v15161_v51 = vld [vmem:[%s22038_s23 + $0x60] sm:$0xff] }
0x38d7   :  { %17794 = vmatprep.subr.mxu1 %v19114_v8 }
0x38d8   :  { %17795 = vmatpush3.msra.mxu1 %v7943_v52  ;;  %v15160_v52 = vld [vmem:[%s22038_s23 + $0x58] sm:$0xff] }
0x38d9   :  { %17818 = vmatprep.subr.mxu1 %v19114_v8 }
0x3957   :  { %v7918_v30 = vpop.xlane.xlu1 %7917 }
0x3958   :  { %v7919_v42 = vmul.f32 0.015625, %v7918_v30  ;;  %v15144_v30 = vld [vmem:[%s22035_s15 + $0x78] sm:$0xff] }
0x395a   :  { %v7920_v43 = vsub.f32 %v20767_v28, %v7919_v42  ;;  %v15143_v42 = vld [vmem:[%s22035_s15 + $0x70] sm:$0xff] }
0x395c   :  { %v7921_v45 = vmul.f32 %v7920_v43, %v7920_v43 }
0x395e   :  { %v7922_v44 = vsel %vm979_vm12, %v7921_v45, 0.0  ;;  %v15141_v45 = vld [vmem:[%s22035_s15 + $0x60] sm:$0xff] }
0x395f   :  { %7923 = vadd.xlane.f32.xlu1 %v7922_v44  ;;  %v15140_v44 = vld [vmem:[%s22035_s15 + $0x58] sm:$0xff] }
0x39e8   :  { %v7924_v53 = vpop.xlane.xlu1 %7923 }
0x39e9   :  { %v7925_v54 = vmul.f32 0.015625, %v7924_v53  ;;  %v15159_v53 = vld [vmem:[%s22038_s23 + $0x50] sm:$0xff] }
0x39eb   :  { %v7926_v56 = vadd.f32 1e-05, %v7925_v54  ;;  %v15158_v54 = vld [vmem:[%s22038_s23 + $0x48] sm:$0xff] }
0x39ed   :  { %18949 = vrsqrt.f32 %v7926_v56  ;;  %v15157_v56 = vld [vmem:[%s22038_s23 + $0x40] sm:$0xff] }
0x39fa   :  { %v18950_v3 = vpop.eup %18949 }
0x39fb   :  { %v7928_v58 = vmul.f32 %v18950_v3, %v7920_v43  ;;  %v15142_v43 = vld [vmem:[%s22035_s15 + $0x68] sm:$0xff] }
0x39fc   :  { %v8358_v3 = vld [vmem:[%s22041_s1 + $0x8] sm:$0xff] }
0x39fd   :  { %v7935_v60 = vmul.f32 %v15127_v4, %v7928_v58  ;;  %v8357_v4 = vld [vmem:[%s22041_s1] sm:$0xff]  ;;  %v15193_v58 = vld [vmem:[%s22031_s4 + $0xb8] sm:$0xff] }
0x39ff   :  { %v20791_v61 = vadd.f32 %v15128_v59, %v7935_v60  ;;  %v15192_v60 = vld [vmem:[%s22031_s4 + $0xb0] sm:$0xff] }
0x3a01   :  { %17797 = vmatmul.mubr.msk.f32.vlgmr.msra.gmra.mxu1 %vm979_vm12, %v20791_v61 }
0x3a02   :  { %17819 = vmatpush3.msra.mxu1 %v8119_v34  ;;  %17834 = vmatprep.mubr.msk.f32.mxu1 %vm19115_vm7, %v19114_v8 }
0x3a03   :  { %17820 = vmatprep.subr.mxu1 %v19114_v8 }
0x3a04   :  { %17821 = vmatpush3.msra.mxu1 %v8118_v62  ;;  %v15191_v62 = vld [vmem:[%s22031_s4 + $0xa8] sm:$0xff] }
0x3a05   :  { %17822 = vmatprep.subr.mxu1 %v19114_v8 }
0x3a06   :  { %17823 = vmatpush3.msra.mxu1 %v8117_v63  ;;  %v15190_v63 = vld [vmem:[%s22031_s4 + $0xa0] sm:$0xff] }
0x3a07   :  { %17824 = vmatprep.subr.mxu1 %v19114_v8 }
0x3a08   :  { %17825 = vmatpush3.msra.mxu1 %v8116_v0  ;;  %v15189_v0 = vld [vmem:[%s22031_s4 + $0x98] sm:$0xff] }
0x3a09   :  { %17826 = vmatprep.subr.mxu1 %v19114_v8 }
0x3a0a   :  { %17827 = vmatpush3.msra.mxu1 %v8115_v39  ;;  %v15188_v39 = vld [vmem:[%s22031_s4 + $0x90] sm:$0xff] }
0x3a0b   :  { %17828 = vmatprep.subr.mxu1 %v19114_v8 }
0x3a0c   :  { %17829 = vmatpush3.msra.mxu1 %v8114_v1  ;;  %v15187_v1 = vld [vmem:[%s22031_s4 + $0x88] sm:$0xff] }
0x3a0d   :  { %17830 = vmatprep.subr.mxu1 %v19114_v8 }
0x3a0e   :  { %17831 = vmatpush3.msra.mxu1 %v8113_v2  ;;  %v15186_v2 = vld [vmem:[%s22031_s4 + $0x80] sm:$0xff] }
0x3a0f   :  { %17832 = vmatprep.subr.mxu1 %v19114_v8 }
0x3a10   :  { %17833 = vmatpush3.msra.mxu1 %v8112_v5  ;;  %v15146_v5 = vld [vmem:[%s22039_s22 + $0x1] ss:$0 sm:$0xff] }
0x3a11   :  { %17835 = vmatmul.mubr.msk.f32.vlgmr.msra.gmra.mxu1 %vm979_vm12, %v20746_v22  ;;  %17866 = vmatprep.subr.mxu1 %v19114_v8 }
0x3a12   :  { %17867 = vmatpush3.msra.mxu1 %v15155_v35  ;;  %17882 = vmatprep.mubr.msk.f32.mxu1 %vm19115_vm7, %v19114_v8 }
0x3a13   :  { %17868 = vmatprep.subr.mxu1 %v19114_v8 }
0x3a14   :  { %17869 = vmatpush3.msra.mxu1 %v15154_v6 }
0x3a15   :  { %17870 = vmatprep.subr.mxu1 %v19114_v8 }
0x3a16   :  { %17871 = vmatpush3.msra.mxu1 %v15153_v7 }
0x3a17   :  { %17872 = vmatprep.subr.mxu1 %v19114_v8 }
0x3a18   :  { %17873 = vmatpush3.msra.mxu1 %v15152_v57  ;;  %v15166_v57 = vld [vmem:[%s22040_s26 + $0x1] ss:$0 sm:$0xff] }
0x3a19   :  { %17874 = vmatprep.subr.mxu1 %v19114_v8 }
0x3a1a   :  { %17875 = vmatpush3.msra.mxu1 %v15151_v9 }
0x3a1b   :  { %17876 = vmatprep.subr.mxu1 %v19114_v8 }
0x3a1c   :  { %17877 = vmatpush3.msra.mxu1 %v15150_v14 }
0x3a1d   :  { %17878 = vmatprep.subr.mxu1 %v19114_v8 }
0x3a1e   :  { %17879 = vmatpush3.msra.mxu1 %v15149_v10 }
0x3a1f   :  { %17880 = vmatprep.subr.mxu1 %v19114_v8 }
0x3a20   :  { %17881 = vmatpush3.msra.mxu1 %v15148_v11 }
0x3a21   :  { %17883 = vmatmul.mubr.msk.f32.vlgmr.msra.gmra.mxu1 %vm979_vm12, %v20746_v22  ;;  %17904 = vmatprep.subr.mxu1 %v19114_v8 }
0x3a22   :  { %17906 = vmatprep.mubr.msk.f32.mxu1 %vm19115_vm7, %v19114_v8 }
0x3ac1   :  { %v8027_v12 = vpop.f32.mrf.mxu1 }
0x3ac2   :  { %v8028_v13 = vadd.f32 %v15129_v17, %v8027_v12 }
0x3ac3   :  { %v17798_v15 = vpop.f32.mrf.mxu1 }
0x3ac4   :  { %17840 = vmatmul.mubr.msk.f32.vlgmr.msra.gmra.mxu0 %vm234_vm0, %v8028_v13 }
0x3ac5   :  { %17844 = vmatprep.mubr.msk.f32.mxu0 %vm19115_vm7, %v19114_v8 }
0x3ad1   :  { %v8193_v18 = vpop.f32.mrf.mxu1 }
0x3ad2   :  { %v8194_v19 = vadd.f32 %v15132_v16, %v8193_v18 }
0x3ad3   :  { %v17836_v21 = vpop.f32.mrf.mxu1 }
0x3ad4   :  { %17843 = vmatpush3.msra.mxu0 %v8194_v19 }
0x3ad5   :  { %17847 = vmatprep.subr.mxu0 %v19114_v8 }
0x3ae1   :  { %v8521_v24 = vpop.f32.mrf.mxu1 }
0x3ae2   :  { %17905 = vmatpush3.xpose.msk.msra.mxu1 %vm234_vm0, %v8521_v24 }
0x3ae3   :  { %v17884_v26 = vpop.f32.mrf.mxu1  ;;  %17909 = vmatprep.subr.mxu1 %v19114_v8 }
0x3b84   :  { %v8269_v27 = vpop.f32.mrf.mxu0 }
0x3b85   :  { %v8273_v29 = vsel %vm1680_vm15, %v8269_v27, -inf }
0x3b86   :  { %8274 = vmax.xlane.f32.xlu0 %v8273_v29  ;;  %v17841_v31 = vpop.f32.mrf.mxu0 }
0x3c0f   :  { %v8275_v32 = vpop.xlane.xlu0 %8274 }
0x3c10   :  { %v8276_v33 = vsub.f32 %v8269_v27, %v8275_v32 }
0x3c12   :  { %v8277_v23 = vmul.f32 1.442695, %v8276_v33  ;;  %v15172_v33 = vld [vmem:[%s22041_s1 + $0x18] sm:$0xff] }
0x3c14   :  { %18951 = vpow2.f32 %v8277_v23  ;;  %v15171_v23 = vld [vmem:[%s22041_s1 + $0x10] sm:$0xff] }
0x3c21   :  { %v18952_v36 = vpop.eup %18951 }
0x3c22   :  { %v8279_v37 = vsel %vm1680_vm15, %v18952_v36, 0.0 }
0x3c23   :  { %8280 = vadd.xlane.f32.xlu1 %v8279_v37 }
0x3cac   :  { %v8281_v25 = vpop.xlane.xlu1 %8280 }
0x3cad   :  { %18953 = vrcp.f32 %v8281_v25  ;;  %v15181_v25 = vld [vmem:[%s22035_s15 + $0xb0] sm:$0xff] }
0x3cba   :  { %v18954_v38 = vpop.eup %18953 }
0x3cbb   :  { %v8283_v41 = vmul.f32 %v18954_v38, %v18952_v36  ;;  %v15182_v36 = vld [vmem:[%s22035_s15 + $0xb8] sm:$0xff] }
0x3cbd   :  { %17845 = vmatmul.mubr.msk.f32.vlgmr.msra.gmra.mxu0 %vm1680_vm15, %v8283_v41  ;;  %v15180_v41 = vld [vmem:[%s22035_s15 + $0xa8] sm:$0xff] }
0x3cbe   :  { %17848 = vmatpush3.msra.mxu0 %v15144_v30  ;;  %17863 = vmatprep.mubr.msk.f32.mxu0 %vm19115_vm7, %v19114_v8  ;;  %v15179_v30 = vld [vmem:[%s22035_s15 + $0xa0] sm:$0xff] }
0x3cbf   :  { %17849 = vmatprep.subr.mxu0 %v19114_v8 }
0x3cc0   :  { %17850 = vmatpush3.msra.mxu0 %v15143_v42  ;;  %v15178_v42 = vld [vmem:[%s22035_s15 + $0x98] sm:$0xff] }
0x3cc1   :  { %17851 = vmatprep.subr.mxu0 %v19114_v8 }
0x3cc2   :  { %17852 = vmatpush3.msra.mxu0 %v15142_v43  ;;  %v15177_v43 = vld [vmem:[%s22035_s15 + $0x90] sm:$0xff] }
0x3cc3   :  { %17853 = vmatprep.subr.mxu0 %v19114_v8 }
0x3cc4   :  { %17854 = vmatpush3.msra.mxu0 %v15141_v45  ;;  %v15176_v45 = vld [vmem:[%s22035_s15 + $0x88] sm:$0xff] }
0x3cc5   :  { %17855 = vmatprep.subr.mxu0 %v19114_v8 }
0x3cc6   :  { %17856 = vmatpush3.msra.mxu0 %v15140_v44  ;;  %v15175_v44 = vld [vmem:[%s22035_s15 + $0x80] sm:$0xff] }
0x3cc7   :  { %17857 = vmatprep.subr.mxu0 %v19114_v8 }
0x3cc8   :  { %17858 = vmatpush3.msra.mxu0 %v15139_v40  ;;  %v15202_v40 = vld [vmem:[%s22038_s23 + $0xb8] sm:$0xff] }
0x3cc9   :  { %17859 = vmatprep.subr.mxu0 %v19114_v8 }
0x3cca   :  { %17860 = vmatpush3.msra.mxu0 %v15138_v55  ;;  %v15201_v55 = vld [vmem:[%s22038_s23 + $0xb0] sm:$0xff] }
0x3ccb   :  { %17861 = vmatprep.subr.mxu0 %v19114_v8 }
0x3ccc   :  { %17862 = vmatpush3.msra.mxu0 %v15137_v46  ;;  %v15200_v46 = vld [vmem:[%s22038_s23 + $0xa8] sm:$0xff] }
0x3ccd   :  { %17864 = vmatmul.mubr.msk.f32.vlgmr.msra.gmra.mxu0 %vm979_vm12, %v20791_v61  ;;  %17885 = vmatprep.subr.mxu0 %v19114_v8 }
0x3cce   :  { %17886 = vmatpush3.msra.mxu0 %v15164_v47  ;;  %17901 = vmatprep.mubr.msk.f32.mxu0 %vm19115_vm7, %v19114_v8  ;;  %v15199_v47 = vld [vmem:[%s22038_s23 + $0xa0] sm:$0xff] }
0x3ccf   :  { %17887 = vmatprep.subr.mxu0 %v19114_v8 }
0x3cd0   :  { %17888 = vmatpush3.msra.mxu0 %v15163_v49  ;;  %v15198_v49 = vld [vmem:[%s22038_s23 + $0x98] sm:$0xff] }
0x3cd1   :  { %17889 = vmatprep.subr.mxu0 %v19114_v8 }
0x3cd2   :  { %17890 = vmatpush3.msra.mxu0 %v15162_v50  ;;  %v15197_v50 = vld [vmem:[%s22038_s23 + $0x90] sm:$0xff] }
0x3cd3   :  { %17891 = vmatprep.subr.mxu0 %v19114_v8 }
0x3cd4   :  { %17892 = vmatpush3.msra.mxu0 %v15161_v51  ;;  %v15196_v51 = vld [vmem:[%s22038_s23 + $0x88] sm:$0xff] }
0x3cd5   :  { %17893 = vmatprep.subr.mxu0 %v19114_v8 }
0x3cd6   :  { %17894 = vmatpush3.msra.mxu0 %v15160_v52  ;;  %v15195_v52 = vld [vmem:[%s22038_s23 + $0x80] sm:$0xff] }
0x3cd7   :  { %17895 = vmatprep.subr.mxu0 %v19114_v8 }
0x3cd8   :  { %17896 = vmatpush3.msra.mxu0 %v15159_v53  ;;  %v15230_v53 = vld [vmem:[%s22031_s4 + $0xf8] sm:$0xff] }
0x3cd9   :  { %17897 = vmatprep.subr.mxu0 %v19114_v8 }
0x3cda   :  { %17898 = vmatpush3.msra.mxu0 %v15158_v54  ;;  %v15229_v54 = vld [vmem:[%s22031_s4 + $0xf0] sm:$0xff] }
0x3cdb   :  { %17899 = vmatprep.subr.mxu0 %v19114_v8 }
0x3cdc   :  { %17900 = vmatpush3.msra.mxu0 %v15157_v56  ;;  %v15228_v56 = vld [vmem:[%s22031_s4 + $0xe8] sm:$0xff] }
0x3cdd   :  { %17902 = vmatmul.mubr.msk.f32.vlgmr.msra.gmra.mxu0 %vm979_vm12, %v20746_v22  ;;  %17921 = vmatprep.subr.mxu0 %v19114_v8 }
0x3cde   :  { %17922 = vmatpush3.msra.mxu0 %v8358_v3  ;;  %17925 = vmatprep.mubr.msk.f32.mxu0 %vm19115_vm7, %v19114_v8  ;;  %v15227_v3 = vld [vmem:[%s22031_s4 + $0xe0] sm:$0xff] }
0x3cdf   :  { %17923 = vmatprep.subr.mxu0 %v19114_v8 }
0x3ce0   :  { %17924 = vmatpush3.msra.mxu0 %v8357_v4  ;;  %v15226_v4 = vld [vmem:[%s22031_s4 + $0xd8] sm:$0xff] }
0x3ce1   :  { %17947 = vmatprep.subr.mxu0 %v19114_v8 }
0x3d7d   :  { %v8353_v59 = vpop.f32.mrf.mxu0 }
0x3d7e   :  { %17926 = vmatmul.mubr.msk.f32.vlgmr.msra.gmra.mxu0 %vm234_vm0, %v8353_v59  ;;  %v15224_v59 = vld [vmem:[%s22031_s4 + $0xc8] sm:$0xff] }
0x3d7f   :  { %17948 = vmatpush3.msra.mxu0 %v15193_v58  ;;  %v17846_v34 = vpop.f32.mrf.mxu0  ;;  %17963 = vmatprep.mubr.msk.f32.mxu0 %vm19115_vm7, %v19114_v8  ;;  %v15225_v58 = vld [vmem:[%s22031_s4 + $0xd0] sm:$0xff] }
0x3d80   :  { %17949 = vmatprep.subr.mxu0 %v19114_v8 }
0x3d81   :  { %17950 = vmatpush3.msra.mxu0 %v15192_v60  ;;  %v15223_v60 = vld [vmem:[%s22031_s4 + $0xc0] sm:$0xff] }
0x3d82   :  { %17951 = vmatprep.subr.mxu0 %v19114_v8 }
0x3d83   :  { %17952 = vmatpush3.msra.mxu0 %v15191_v62 }
0x3d84   :  { %17953 = vmatprep.subr.mxu0 %v19114_v8 }
0x3d85   :  { %17954 = vmatpush3.msra.mxu0 %v15190_v63  ;;  %v15184_v63 = vld [vmem:[%s22039_s22 + $0x2] ss:$0 sm:$0xff] }
0x3d86   :  { %17955 = vmatprep.subr.mxu0 %v19114_v8 }
0x3d87   :  { %17956 = vmatpush3.msra.mxu0 %v15189_v0 }
0x3d88   :  { %17957 = vmatprep.subr.mxu0 %v19114_v8 }
0x3d89   :  { %17958 = vmatpush3.msra.mxu0 %v15188_v39 }
0x3d8a   :  { %17959 = vmatprep.subr.mxu0 %v19114_v8 }
0x3d8b   :  { %17960 = vmatpush3.msra.mxu0 %v15187_v1 }
0x3d8c   :  { %17961 = vmatprep.subr.mxu0 %v19114_v8 }
0x3d8d   :  { %v8442_v35 = vpop.f32.mrf.mxu0  ;;  %17962 = vmatpush3.msra.mxu0 %v15186_v2  ;;  %v15204_v2 = vld [vmem:[%s22040_s26 + $0x2] ss:$0 sm:$0xff] }
0x3d8e   :  { %v8443_v6 = vadd.f32 %v15146_v5, %v8442_v35  ;;  %17964 = vmatmul.mubr.msk.f32.vlgmr.msra.gmra.mxu0 %vm979_vm12, %v20746_v22  ;;  %17985 = vmatprep.subr.mxu0 %v19114_v8 }
0x3d8f   :  { %v17865_v7 = vpop.f32.mrf.mxu0  ;;  %17987 = vmatprep.mubr.msk.f32.mxu0 %vm19115_vm7, %v19114_v8 }
0x3d90   :  { %17907 = vmatmul.mubr.msk.f32.vlgmr.msra.gmra.mxu1 %vm234_vm0, %v8443_v6 }
0x3d91   :  { %17911 = vmatprep.mubr.msk.f32.mxu1 %vm19115_vm7, %v19114_v8 }
0x3d9d   :  { %v8608_v9 = vpop.f32.mrf.mxu0 }
0x3d9e   :  { %v8609_v14 = vadd.f32 %v15166_v57, %v8608_v9 }
0x3d9f   :  { %v17903_v10 = vpop.f32.mrf.mxu0 }
0x3da0   :  { %17910 = vmatpush3.msra.mxu1 %v8609_v14 }
0x3da1   :  { %17914 = vmatprep.subr.mxu1 %v19114_v8 }
0x3e3e   :  { %v20923_v11 = vpop.f32.mrf.mxu0 }
0x3e40   :  { %v17927_v17 = vpop.f32.mrf.mxu0 }
0x3e4e   :  { %v9083_v12 = vpop.f32.mrf.mxu0 }
0x3e4f   :  { %17986 = vmatpush3.xpose.msk.msra.mxu0 %vm234_vm0, %v9083_v12 }
0x3e50   :  { %v8684_v13 = vpop.f32.mrf.mxu1  ;;  %v17965_v15 = vpop.f32.mrf.mxu0  ;;  %17990 = vmatprep.subr.mxu0 %v19114_v8 }
0x3e51   :  { %v8688_v16 = vsel %vm1680_vm15, %v8684_v13, -inf }
0x3e52   :  { %8689 = vmax.xlane.f32.xlu0 %v8688_v16  ;;  %v17908_v18 = vpop.f32.mrf.mxu1 }
0x3edb   :  { %v8690_v19 = vpop.xlane.xlu0 %8689 }
0x3edc   :  { %v8691_v21 = vsub.f32 %v8684_v13, %v8690_v19 }
0x3ede   :  { %v8692_v24 = vmul.f32 1.442695, %v8691_v21 }
0x3ee0   :  { %18955 = vpow2.f32 %v8692_v24  ;;  %v15210_v24 = vld [vmem:[%s22041_s1 + $0x28] sm:$0xff] }
0x3eed   :  { %v18956_v26 = vpop.eup %18955 }
0x3eee   :  { %v8694_v27 = vsel %vm1680_vm15, %v18956_v26, 0.0 }
0x3eef   :  { %8695 = vadd.xlane.f32.xlu1 %v8694_v27  ;;  %v15219_v27 = vld [vmem:[%s22035_s15 + $0xf8] sm:$0xff] }
0x3f78   :  { %v8696_v29 = vpop.xlane.xlu1 %8695 }
0x3f79   :  { %18957 = vrcp.f32 %v8696_v29 }
0x3f86   :  { %v18958_v31 = vpop.eup %18957 }
0x3f87   :  { %v8698_v32 = vmul.f32 %v18958_v31, %v18956_v26  ;;  %v15209_v26 = vld [vmem:[%s22041_s1 + $0x20] sm:$0xff]  ;;  %v15218_v31 = vld [vmem:[%s22035_s15 + $0xf0] sm:$0xff] }
0x3f89   :  { %17912 = vmatmul.mubr.msk.f32.vlgmr.msra.gmra.mxu1 %vm1680_vm15, %v8698_v32 }
0x3f8a   :  { %17915 = vmatpush3.msra.mxu1 %v15172_v33  ;;  %17918 = vmatprep.mubr.msk.f32.mxu1 %vm19115_vm7, %v19114_v8  ;;  %v15217_v33 = vld [vmem:[%s22035_s15 + $0xe8] sm:$0xff] }
0x3f8b   :  { %17916 = vmatprep.subr.mxu1 %v19114_v8 }
0x3f8c   :  { %17917 = vmatpush3.msra.mxu1 %v15171_v23  ;;  %v15216_v23 = vld [vmem:[%s22035_s15 + $0xe0] sm:$0xff] }
0x3f8d   :  { %17928 = vmatprep.subr.mxu1 %v19114_v8 }
0x4049   :  { %v8768_v37 = vpop.f32.mrf.mxu1 }
0x404a   :  { %17919 = vmatmul.mubr.msk.f32.vlgmr.msra.gmra.mxu1 %vm234_vm0, %v8768_v37  ;;  %v15214_v37 = vld [vmem:[%s22035_s15 + $0xd0] sm:$0xff] }
0x404b   :  { %17929 = vmatpush3.msra.mxu1 %v15182_v36  ;;  %v17913_v38 = vpop.f32.mrf.mxu1  ;;  %17944 = vmatprep.mubr.msk.f32.mxu1 %vm19115_vm7, %v19114_v8  ;;  %v15215_v36 = vld [vmem:[%s22035_s15 + $0xd8] sm:$0xff] }
0x404c   :  { %17930 = vmatprep.subr.mxu1 %v19114_v8  ;;  %v15212_v38 = vld [vmem:[%s22035_s15 + $0xc0] sm:$0xff] }
0x404d   :  { %17931 = vmatpush3.msra.mxu1 %v15181_v25  ;;  %v15213_v25 = vld [vmem:[%s22035_s15 + $0xc8] sm:$0xff] }
0x404e   :  { %17932 = vmatprep.subr.mxu1 %v19114_v8 }
0x404f   :  { %17933 = vmatpush3.msra.mxu1 %v15180_v41  ;;  %v15239_v41 = vld [vmem:[%s22038_s23 + $0xf8] sm:$0xff] }
0x4050   :  { %17934 = vmatprep.subr.mxu1 %v19114_v8 }
0x4051   :  { %17935 = vmatpush3.msra.mxu1 %v15179_v30  ;;  %v15238_v30 = vld [vmem:[%s22038_s23 + $0xf0] sm:$0xff] }
0x4052   :  { %17936 = vmatprep.subr.mxu1 %v19114_v8 }
0x4053   :  { %17937 = vmatpush3.msra.mxu1 %v15178_v42  ;;  %v15237_v42 = vld [vmem:[%s22038_s23 + $0xe8] sm:$0xff] }
0x4054   :  { %17938 = vmatprep.subr.mxu1 %v19114_v8 }
0x4055   :  { %17939 = vmatpush3.msra.mxu1 %v15177_v43  ;;  %v15236_v43 = vld [vmem:[%s22038_s23 + $0xe0] sm:$0xff] }
0x4056   :  { %17940 = vmatprep.subr.mxu1 %v19114_v8 }
0x4057   :  { %17941 = vmatpush3.msra.mxu1 %v15176_v45  ;;  %v15234_v45 = vld [vmem:[%s22038_s23 + $0xd0] sm:$0xff] }
0x4058   :  { %17942 = vmatprep.subr.mxu1 %v19114_v8 }
0x4059   :  { %17943 = vmatpush3.msra.mxu1 %v15175_v44  ;;  %v15233_v44 = vld [vmem:[%s22038_s23 + $0xc8] sm:$0xff] }
0x405a   :  { %17945 = vmatmul.mubr.msk.f32.vlgmr.msra.gmra.mxu1 %vm979_vm12, %v20791_v61  ;;  %17966 = vmatprep.subr.mxu1 %v19114_v8 }
0x405b   :  { %17967 = vmatpush3.msra.mxu1 %v15202_v40  ;;  %17982 = vmatprep.mubr.msk.f32.mxu1 %vm19115_vm7, %v19114_v8  ;;  %v15232_v40 = vld [vmem:[%s22038_s23 + $0xc0] sm:$0xff] }
0x405c   :  { %17968 = vmatprep.subr.mxu1 %v19114_v8 }
0x405d   :  { %17969 = vmatpush3.msra.mxu1 %v15201_v55 }
0x405e   :  { %17970 = vmatprep.subr.mxu1 %v19114_v8 }
0x405f   :  { %17971 = vmatpush3.msra.mxu1 %v15200_v46 }
0x4060   :  { %17972 = vmatprep.subr.mxu1 %v19114_v8 }
0x4061   :  { %17973 = vmatpush3.msra.mxu1 %v15199_v47 }
0x4062   :  { %17974 = vmatprep.subr.mxu1 %v19114_v8 }
0x4063   :  { %17975 = vmatpush3.msra.mxu1 %v15198_v49 }
0x4064   :  { %17976 = vmatprep.subr.mxu1 %v19114_v8 }
0x4065   :  { %17977 = vmatpush3.msra.mxu1 %v15197_v50  ;;  %v15221_v50 = vld [vmem:[%s22039_s22 + $0x3] ss:$0 sm:$0xff] }
0x4066   :  { %17978 = vmatprep.subr.mxu1 %v19114_v8 }
0x4067   :  { %17979 = vmatpush3.msra.mxu1 %v15196_v51 }
0x4068   :  { %17980 = vmatprep.subr.mxu1 %v19114_v8 }
0x4069   :  { %17981 = vmatpush3.msra.mxu1 %v15195_v52 }
0x406a   :  { %17983 = vmatmul.mubr.msk.f32.vlgmr.msra.gmra.mxu1 %vm979_vm12, %v20746_v22  ;;  %18021 = vmatprep.subr.mxu1 %v19114_v8 }
0x406b   :  { %18022 = vmatpush3.msra.mxu1 %v15230_v53  ;;  %18037 = vmatprep.mubr.msk.f32.mxu1 %vm19115_vm7, %v19114_v8 }
0x406c   :  { %18023 = vmatprep.subr.mxu1 %v19114_v8 }
0x406d   :  { %18024 = vmatpush3.msra.mxu1 %v15229_v54  ;;  %v15241_v54 = vld [vmem:[%s22040_s26 + $0x3] ss:$0 sm:$0xff] }
0x406e   :  { %18025 = vmatprep.subr.mxu1 %v19114_v8 }
0x406f   :  { %18026 = vmatpush3.msra.mxu1 %v15228_v56 }
0x4070   :  { %18027 = vmatprep.subr.mxu1 %v19114_v8 }
0x4071   :  { %18028 = vmatpush3.msra.mxu1 %v15227_v3 }
0x4072   :  { %18029 = vmatprep.subr.mxu1 %v19114_v8 }
0x4073   :  { %18030 = vmatpush3.msra.mxu1 %v15226_v4 }
0x4074   :  { %18031 = vmatprep.subr.mxu1 %v19114_v8 }
0x4075   :  { %18032 = vmatpush3.msra.mxu1 %v15225_v58 }
0x4076   :  { %18033 = vmatprep.subr.mxu1 %v19114_v8 }
0x4077   :  { %18034 = vmatpush3.msra.mxu1 %v15224_v59 }
0x4078   :  { %18035 = vmatprep.subr.mxu1 %v19114_v8 }
0x4079   :  { %18036 = vmatpush3.msra.mxu1 %v15223_v60 }
0x407a   :  { %18038 = vmatmul.mubr.msk.f32.vlgmr.msra.gmra.mxu1 %vm979_vm12, %v20746_v22  ;;  %18059 = vmatprep.subr.mxu1 %v19114_v8 }
0x407b   :  { %18061 = vmatprep.mubr.msk.f32.mxu1 %vm19115_vm7, %v19114_v8 }
0x410a   :  { %v20999_v34 = vpop.f32.mrf.mxu1 }
0x410b   :  { %v8918_v55 = vadd.f32 %v20923_v11, %v20999_v34 }
0x410c   :  { %v17920_v62 = vpop.f32.mrf.mxu1 }
0x411a   :  { %v9004_v0 = vpop.f32.mrf.mxu1 }
0x411b   :  { %v9005_v39 = vadd.f32 %v15184_v63, %v9004_v0 }
0x411c   :  { %v17946_v1 = vpop.f32.mrf.mxu1 }
0x411d   :  { %17988 = vmatmul.mubr.msk.f32.vlgmr.msra.gmra.mxu0 %vm234_vm0, %v9005_v39 }
0x411e   :  { %17992 = vmatprep.mubr.msk.f32.mxu0 %vm19115_vm7, %v19114_v8 }
0x412a   :  { %v9170_v5 = vpop.f32.mrf.mxu1 }
0x412b   :  { %v9171_v35 = vadd.f32 %v15204_v2, %v9170_v5  ;;  %v15247_v5 = vld [vmem:[%s22041_s1 + $0x38] sm:$0xff] }
0x412c   :  { %v17984_v6 = vpop.f32.mrf.mxu1 }
0x412d   :  { %17991 = vmatpush3.msra.mxu0 %v9171_v35  ;;  %v15246_v35 = vld [vmem:[%s22041_s1 + $0x30] sm:$0xff] }
0x412e   :  { %17995 = vmatprep.subr.mxu0 %v19114_v8 }
0x413a   :  { %v9573_v7 = vpop.f32.mrf.mxu1 }
0x413b   :  { %18060 = vmatpush3.xpose.msk.msra.mxu1 %vm234_vm0, %v9573_v7 }
0x413c   :  { %v18039_v57 = vpop.f32.mrf.mxu1  ;;  %18064 = vmatprep.subr.mxu1 %v19114_v8 }
0x41dd   :  { %v9246_v9 = vpop.f32.mrf.mxu0 }
0x41de   :  { %v9250_v14 = vsel %vm1680_vm15, %v9246_v9, -inf }
0x41df   :  { %9251 = vmax.xlane.f32.xlu0 %v9250_v14  ;;  %v17989_v10 = vpop.f32.mrf.mxu0 }
0x4268   :  { %v9252_v17 = vpop.xlane.xlu0 %9251 }
0x4269   :  { %v9253_v12 = vsub.f32 %v9246_v9, %v9252_v17  ;;  %v15249_v9 = vld [vmem:[%s22042_s28] ss:$0 sm:$0xff] }
0x426b   :  { %v9254_v13 = vmul.f32 1.442695, %v9253_v12 }
0x426d   :  { %18959 = vpow2.f32 %v9254_v13 }
0x427a   :  { %v18960_v15 = vpop.eup %18959 }
0x427b   :  { %v9256_v16 = vsel %vm1680_vm15, %v18960_v15, 0.0 }
0x427c   :  { %9257 = vadd.xlane.f32.xlu1 %v9256_v16 }
0x4305   :  { %v9258_v18 = vpop.xlane.xlu1 %9257 }
0x4306   :  { %18961 = vrcp.f32 %v9258_v18 }
0x4313   :  { %v18962_v19 = vpop.eup %18961 }
0x4314   :  { %v9260_v21 = vmul.f32 %v18962_v19, %v18960_v15 }
0x4316   :  { %17993 = vmatmul.mubr.msk.f32.vlgmr.msra.gmra.mxu0 %vm1680_vm15, %v9260_v21 }
0x4317   :  { %17996 = vmatpush3.msra.mxu0 %v15210_v24  ;;  %17999 = vmatprep.mubr.msk.f32.mxu0 %vm19115_vm7, %v19114_v8  ;;  %v9946_v24 = vld [vmem:[%s22043_s2 + $0x38] sm:$0xff] }
0x4318   :  { %17997 = vmatprep.subr.mxu0 %v19114_v8 }
0x4319   :  { %17998 = vmatpush3.msra.mxu0 %v15209_v26  ;;  %v9944_v26 = vld [vmem:[%s22043_s2 + $0x28] sm:$0xff] }
0x431a   :  { %18002 = vmatprep.subr.mxu0 %v19114_v8 }
0x43d6   :  { %v9330_v29 = vpop.f32.mrf.mxu0 }
0x43d7   :  { %18000 = vmatmul.mubr.msk.f32.vlgmr.msra.gmra.mxu0 %vm234_vm0, %v9330_v29  ;;  %v9942_v29 = vld [vmem:[%s22043_s2 + $0x18] sm:$0xff] }
0x43d8   :  { %18003 = vmatpush3.msra.mxu0 %v15219_v27  ;;  %v17994_v32 = vpop.f32.mrf.mxu0  ;;  %18018 = vmatprep.mubr.msk.f32.mxu0 %vm19115_vm7, %v19114_v8  ;;  %v9943_v27 = vld [vmem:[%s22043_s2 + $0x20] sm:$0xff] }
0x43d9   :  { %18004 = vmatprep.subr.mxu0 %v19114_v8  ;;  %v9940_v32 = vld [vmem:[%s22043_s2 + $0x8] sm:$0xff] }
0x43da   :  { %18005 = vmatpush3.msra.mxu0 %v15218_v31  ;;  %v9941_v31 = vld [vmem:[%s22043_s2 + $0x10] sm:$0xff] }
0x43db   :  { %18006 = vmatprep.subr.mxu0 %v19114_v8 }
0x43dc   :  { %18007 = vmatpush3.msra.mxu0 %v15217_v33  ;;  %v9939_v33 = vld [vmem:[%s22043_s2] sm:$0xff] }
0x43dd   :  { %18008 = vmatprep.subr.mxu0 %v19114_v8 }
0x43de   :  { %18009 = vmatpush3.msra.mxu0 %v15216_v23 }
0x43df   :  { %18010 = vmatprep.subr.mxu0 %v19114_v8 }
0x43e0   :  { %18011 = vmatpush3.msra.mxu0 %v15215_v36 }
0x43e1   :  { %18012 = vmatprep.subr.mxu0 %v19114_v8 }
0x43e2   :  { %18013 = vmatpush3.msra.mxu0 %v15214_v37 }
0x43e3   :  { %18014 = vmatprep.subr.mxu0 %v19114_v8 }
0x43e4   :  { %18015 = vmatpush3.msra.mxu0 %v15213_v25 }
0x43e5   :  { %18016 = vmatprep.subr.mxu0 %v19114_v8 }
0x43e6   :  { %18017 = vmatpush3.msra.mxu0 %v15212_v38  ;;  %v15250_v38 = vld [vmem:[%s22044_s0] ss:$0 sm:$0xff] }
0x43e7   :  { %18019 = vmatmul.mubr.msk.f32.vlgmr.msra.gmra.mxu0 %vm979_vm12, %v20791_v61  ;;  %18040 = vmatprep.subr.mxu0 %v19114_v8  ;;  %v15235_v61 = vld [vmem:[%s22038_s23 + $0xd8] sm:$0xff] }
0x43e8   :  { %18041 = vmatpush3.msra.mxu0 %v15239_v41  ;;  %18056 = vmatprep.mubr.msk.f32.mxu0 %vm19115_vm7, %v19114_v8 }
0x43e9   :  { %18042 = vmatprep.subr.mxu0 %v19114_v8 }
0x43ea   :  { %18043 = vmatpush3.msra.mxu0 %v15238_v30  ;;  %v15251_v30 = vld [vmem:[%s22045_s5] ss:$0 sm:$0xff] }
0x43eb   :  { %18044 = vmatprep.subr.mxu0 %v19114_v8 }
0x43ec   :  { %18045 = vmatpush3.msra.mxu0 %v15237_v42 }
0x43ed   :  { %18046 = vmatprep.subr.mxu0 %v19114_v8 }
0x43ee   :  { %18047 = vmatpush3.msra.mxu0 %v15236_v43 }
0x43ef   :  { %18048 = vmatprep.subr.mxu0 %v19114_v8 }
0x43f0   :  { %18049 = vmatpush3.msra.mxu0 %v15235_v61  ;;  %v10069_v61 = vld [vmem:[%s22046_s9 + $0x78] sm:$0xff] }
0x43f1   :  { %18050 = vmatprep.subr.mxu0 %v19114_v8 }
0x43f2   :  { %18051 = vmatpush3.msra.mxu0 %v15234_v45  ;;  %v10068_v45 = vld [vmem:[%s22046_s9 + $0x70] sm:$0xff] }
0x43f3   :  { %18052 = vmatprep.subr.mxu0 %v19114_v8 }
0x43f4   :  { %18053 = vmatpush3.msra.mxu0 %v15233_v44  ;;  %v10067_v44 = vld [vmem:[%s22046_s9 + $0x68] sm:$0xff] }
0x43f5   :  { %18054 = vmatprep.subr.mxu0 %v19114_v8 }
0x43f6   :  { %18055 = vmatpush3.msra.mxu0 %v15232_v40  ;;  %v10066_v40 = vld [vmem:[%s22046_s9 + $0x60] sm:$0xff] }
0x43f7   :  { %18057 = vmatmul.mubr.msk.f32.vlgmr.msra.gmra.mxu0 %vm979_vm12, %v20746_v22  ;;  %18095 = vmatprep.subr.mxu0 %v19114_v8 }
0x43f8   :  { %18127 = vmatprep.mubr.msk.f32.mxu0 %vm19115_vm7, %v19114_v8  ;;  %18096 = vmatpush3.msra.mxu0 %v10069_v61  ;;  %v15264_v61 = vld [vmem:[%s22023_s29 + $0x128] sm:$0xff] }
0x43f9   :  { %18097 = vmatprep.subr.mxu0 %v19114_v8 }
0x43fa   :  { %18098 = vmatpush3.msra.mxu0 %v10068_v45  ;;  %v15284_v45 = vld [vmem:[%s22027_s19 + $0x128] sm:$0xff] }
0x43fb   :  { %18099 = vmatprep.subr.mxu0 %v19114_v8 }
0x43fc   :  { %18100 = vmatpush3.msra.mxu0 %v10067_v44  ;;  %v15263_v44 = vld [vmem:[%s22023_s29 + $0x120] sm:$0xff] }
0x43fd   :  { %18101 = vmatprep.subr.mxu0 %v19114_v8 }
0x43fe   :  { %18102 = vmatpush3.msra.mxu0 %v10066_v40  ;;  %v15283_v40 = vld [vmem:[%s22027_s19 + $0x120] sm:$0xff] }
0x43ff   :  { %18103 = vmatprep.subr.mxu0 %v19114_v8 }
0x4497   :  { %v9406_v46 = vpop.f32.mrf.mxu0 }
0x4498   :  { %v9410_v47 = vadd.f32 %v9406_v46, %v8918_v55  ;;  %v10065_v55 = vld [vmem:[%s22046_s9 + $0x58] sm:$0xff]  ;;  %v10064_v46 = vld [vmem:[%s22046_s9 + $0x50] sm:$0xff] }
0x4499   :  { %v18001_v49 = vpop.f32.mrf.mxu0  ;;  %18104 = vmatpush3.msra.mxu0 %v10065_v55  ;;  %v15262_v55 = vld [vmem:[%s22023_s29 + $0x118] sm:$0xff] }
0x449a   :  { %18105 = vmatprep.subr.mxu0 %v19114_v8  ;;  %v10062_v49 = vld [vmem:[%s22046_s9 + $0x40] sm:$0xff] }
0x449b   :  { %18106 = vmatpush3.msra.mxu0 %v10064_v46  ;;  %v15282_v46 = vld [vmem:[%s22027_s19 + $0x118] sm:$0xff] }
0x449c   :  { %18107 = vmatprep.subr.mxu0 %v19114_v8 }
0x44a7   :  { %v9494_v51 = vpop.f32.mrf.mxu0 }
0x44a8   :  { %v9495_v52 = vadd.f32 %v15221_v50, %v9494_v51  ;;  %v10061_v50 = vld [vmem:[%s22046_s9 + $0x38] sm:$0xff]  ;;  %v10060_v51 = vld [vmem:[%s22046_s9 + $0x30] sm:$0xff] }
0x44a9   :  { %v18020_v53 = vpop.f32.mrf.mxu0 }
0x44aa   :  { %18062 = vmatmul.mubr.msk.f32.vlgmr.msra.gmra.mxu1 %vm234_vm0, %v9495_v52  ;;  %v10059_v52 = vld [vmem:[%s22046_s9 + $0x28] sm:$0xff]  ;;  %v10058_v53 = vld [vmem:[%s22046_s9 + $0x20] sm:$0xff] }
0x44ab   :  { %18066 = vmatprep.mubr.msk.f32.mxu1 %vm19115_vm7, %v19114_v8 }
0x44b7   :  { %v9660_v56 = vpop.f32.mrf.mxu0 }
0x44b8   :  { %v9661_v3 = vadd.f32 %v15241_v54, %v9660_v56  ;;  %v10057_v54 = vld [vmem:[%s22046_s9 + $0x18] sm:$0xff]  ;;  %v10056_v56 = vld [vmem:[%s22046_s9 + $0x10] sm:$0xff] }
0x44b9   :  { %v18058_v4 = vpop.f32.mrf.mxu0 }
0x44ba   :  { %18065 = vmatpush3.msra.mxu1 %v9661_v3  ;;  %v10055_v3 = vld [vmem:[%s22046_s9 + $0x8] sm:$0xff]  ;;  %v10054_v4 = vld [vmem:[%s22046_s9] sm:$0xff] }
0x44bb   :  { %18069 = vmatprep.subr.mxu1 %v19114_v8 }
0x456a   :  { %v9736_v11 = vpop.f32.mrf.mxu1 }
0x456b   :  { %v9740_v58 = vsel %vm1680_vm15, %v9736_v11, -inf }
0x456c   :  { %9741 = vmax.xlane.f32.xlu0 %v9740_v58  ;;  %v18063_v59 = vpop.f32.mrf.mxu1 }
0x45f5   :  { %v9742_v60 = vpop.xlane.xlu0 %9741 }
0x45f6   :  { %v9743_v34 = vsub.f32 %v9736_v11, %v9742_v60  ;;  %v15252_v11 = vld [vmem:[%s22047_s13] ss:$0 sm:$0xff] }
0x45f8   :  { %v9744_v62 = vmul.f32 1.442695, %v9743_v34 }
0x45fa   :  { %18963 = vpow2.f32 %v9744_v62 }
0x4607   :  { %v18964_v63 = vpop.eup %18963 }
0x4608   :  { %v9746_v0 = vsel %vm1680_vm15, %v18964_v63, 0.0 }
0x4609   :  { %9747 = vadd.xlane.f32.xlu1 %v9746_v0 }
0x4692   :  { %v9748_v39 = vpop.xlane.xlu1 %9747 }
0x4693   :  { %18965 = vrcp.f32 %v9748_v39 }
0x46a0   :  { %v18966_v1 = vpop.eup %18965 }
0x46a1   :  { %v9750_v2 = vmul.f32 %v18966_v1, %v18964_v63 }
0x46a3   :  { %18067 = vmatmul.mubr.msk.f32.vlgmr.msra.gmra.mxu1 %vm1680_vm15, %v9750_v2 }
0x46a4   :  { %18070 = vmatpush3.msra.mxu1 %v15247_v5  ;;  %18073 = vmatprep.mubr.msk.f32.mxu1 %vm19115_vm7, %v19114_v8 }
0x46a5   :  { %18071 = vmatprep.subr.mxu1 %v19114_v8 }
0x46a6   :  { %18072 = vmatpush3.msra.mxu1 %v15246_v35 }
0x46a7   :  { %18076 = vmatprep.subr.mxu1 %v19114_v8 }
0x4763   :  { %v9820_v6 = vpop.f32.mrf.mxu1 }
0x4764   :  { %18074 = vmatmul.mubr.msk.f32.vlgmr.msra.gmra.mxu1 %vm234_vm0, %v9820_v6 }
0x4765   :  { %v18068_v7 = vpop.f32.mrf.mxu1  ;;  %18092 = vmatprep.mubr.msk.f32.mxu1 %vm19115_vm7, %v19114_v8  ;;  %18077 = vmatpush3.msra.mxu1 %v9946_v24 }
0x4766   :  { %18078 = vmatprep.subr.mxu1 %v19114_v8 }
0x4824   :  { %v9896_v57 = vpop.f32.mrf.mxu1 }
0x4825   :  { %v9900_v14 = vadd.f32 %v9896_v57, %v9410_v47  ;;  %v10063_v47 = vld [vmem:[%s22046_s9 + $0x48] sm:$0xff] }
0x4826   :  { %v18075_v10 = vpop.f32.mrf.mxu1  ;;  %18108 = vmatpush3.msra.mxu0 %v10063_v47  ;;  %v15261_v47 = vld [vmem:[%s22023_s29 + $0x110] sm:$0xff] }
0x4827   :  { %v9908_v17 = vadd.f32 %v15249_v9, %v9900_v14  ;;  %18109 = vmatprep.subr.mxu0 %v19114_v8 }
0x4828   :  { %18110 = vmatpush3.msra.mxu0 %v10062_v49  ;;  %v15281_v49 = vld [vmem:[%s22027_s19 + $0x110] sm:$0xff] }
0x4829   :  { %v21083_v12 = vadd.f32 %v9908_v17, %v20767_v28  ;;  %v9945_v28 = vld [vmem:[%s22043_s2 + $0x30] sm:$0xff]  ;;  %18111 = vmatprep.subr.mxu0 %v19114_v8 }
0x482a   :  { %18079 = vmatpush3.msra.mxu1 %v9945_v28  ;;  %18112 = vmatpush3.msra.mxu0 %v10061_v50  ;;  %v15260_v50 = vld [vmem:[%s22023_s29 + $0x108] sm:$0xff] }
0x482b   :  { %v9912_v13 = vsel %vm979_vm12, %v21083_v12, 0.0  ;;  %18080 = vmatprep.subr.mxu1 %v19114_v8  ;;  %18113 = vmatprep.subr.mxu0 %v19114_v8 }
0x482c   :  { %9913 = vadd.xlane.f32.xlu0 %v9912_v13  ;;  %18081 = vmatpush3.msra.mxu1 %v9944_v26 }
0x482d   :  { %18082 = vmatprep.subr.mxu1 %v19114_v8  ;;  %18114 = vmatpush3.msra.mxu0 %v10060_v51  ;;  %v15280_v51 = vld [vmem:[%s22027_s19 + $0x108] sm:$0xff] }
0x482e   :  { %18083 = vmatpush3.msra.mxu1 %v9943_v27  ;;  %18115 = vmatprep.subr.mxu0 %v19114_v8  ;;  %v15254_v27 = vld [vmem:[%s22048_s17] ss:$0 sm:$0xff] }
0x482f   :  { %18084 = vmatprep.subr.mxu1 %v19114_v8  ;;  %18116 = vmatpush3.msra.mxu0 %v10059_v52  ;;  %v15259_v52 = vld [vmem:[%s22023_s29 + $0x100] sm:$0xff] }
0x4830   :  { %18085 = vmatpush3.msra.mxu1 %v9942_v29  ;;  %18117 = vmatprep.subr.mxu0 %v19114_v8 }
0x4831   :  { %18086 = vmatprep.subr.mxu1 %v19114_v8  ;;  %18118 = vmatpush3.msra.mxu0 %v10058_v53  ;;  %v15279_v53 = vld [vmem:[%s22027_s19 + $0x100] sm:$0xff] }
0x4832   :  { %18087 = vmatpush3.msra.mxu1 %v9941_v31  ;;  %18119 = vmatprep.subr.mxu0 %v19114_v8 }
0x4833   :  { %18088 = vmatprep.subr.mxu1 %v19114_v8  ;;  %18120 = vmatpush3.msra.mxu0 %v10057_v54 }
0x4834   :  { %18089 = vmatpush3.msra.mxu1 %v9940_v32  ;;  %18121 = vmatprep.subr.mxu0 %v19114_v8 }
0x4835   :  { %18090 = vmatprep.subr.mxu1 %v19114_v8  ;;  %18122 = vmatpush3.msra.mxu0 %v10056_v56 }
0x4836   :  { %18091 = vmatpush3.msra.mxu1 %v9939_v33  ;;  %18123 = vmatprep.subr.mxu0 %v19114_v8 }
0x4837   :  { %18130 = vmatprep.subr.mxu1 %v19114_v8  ;;  %18124 = vmatpush3.msra.mxu0 %v10055_v3 }
0x4838   :  { %18125 = vmatprep.subr.mxu0 %v19114_v8 }
0x4839   :  { %18126 = vmatpush3.msra.mxu0 %v10054_v4 }
0x483a   :  { %18168 = vmatprep.subr.mxu0 %v19114_v8 }
0x48b5   :  { %v9914_v15 = vpop.xlane.xlu0 %9913 }
0x48b6   :  { %v9915_v16 = vmul.f32 0.015625, %v9914_v15 }
0x48b8   :  { %v9916_v18 = vsub.f32 %v21083_v12, %v9915_v16 }
0x48ba   :  { %v9917_v19 = vmul.f32 %v9916_v18, %v9916_v18 }
0x48bc   :  { %v9918_v21 = vsel %vm979_vm12, %v9917_v19, 0.0 }
0x48bd   :  { %9919 = vadd.xlane.f32.xlu1 %v9918_v21 }
0x4946   :  { %v9920_v23 = vpop.xlane.xlu1 %9919 }
0x4947   :  { %v9921_v36 = vmul.f32 0.015625, %v9920_v23 }
0x4949   :  { %v9922_v37 = vadd.f32 1e-05, %v9921_v36 }
0x494b   :  { %18967 = vrsqrt.f32 %v9922_v37 }
0x4958   :  { %v18968_v25 = vpop.eup %18967 }
0x4959   :  { %v9924_v41 = vmul.f32 %v18968_v25, %v9916_v18 }
0x495b   :  { %v9931_v42 = vmul.f32 %v15250_v38, %v9924_v41 }
0x495d   :  { %v9938_v43 = vadd.f32 %v15251_v30, %v9931_v42  ;;  %v15266_v30 = vld [vmem:[%s22023_s29 + $0x138] sm:$0xff]  ;;  %v15265_v42 = vld [vmem:[%s22023_s29 + $0x130] sm:$0xff] }
0x495f   :  { %18093 = vmatmul.mubr.msk.f32.vlgmr.msra.gmra.mxu1 %vm979_vm12, %v9938_v43  ;;  %v15285_v43 = vld [vmem:[%s22027_s19 + $0x130] sm:$0xff] }
0x4960   :  { %18146 = vmatprep.mubr.msk.f32.mxu1 %vm19115_vm7, %v19114_v8  ;;  %18131 = vmatpush3.msra.mxu1 %v15266_v30  ;;  %v15340_v30 = vld [vmem:[%s22023_s29 + $0x1b8] sm:$0xff] }
0x4961   :  { %18132 = vmatprep.subr.mxu1 %v19114_v8 }
0x4962   :  { %18133 = vmatpush3.msra.mxu1 %v15265_v42  ;;  %v15338_v42 = vld [vmem:[%s22023_s29 + $0x1a8] sm:$0xff] }
0x4963   :  { %18134 = vmatprep.subr.mxu1 %v19114_v8 }
0x4964   :  { %18135 = vmatpush3.msra.mxu1 %v15264_v61  ;;  %v15336_v61 = vld [vmem:[%s22023_s29 + $0x198] sm:$0xff] }
0x4965   :  { %18136 = vmatprep.subr.mxu1 %v19114_v8 }
0x4966   :  { %18137 = vmatpush3.msra.mxu1 %v15263_v44  ;;  %v15334_v44 = vld [vmem:[%s22023_s29 + $0x188] sm:$0xff] }
0x4967   :  { %18138 = vmatprep.subr.mxu1 %v19114_v8 }
0x4968   :  { %18139 = vmatpush3.msra.mxu1 %v15262_v55  ;;  %v15360_v55 = vld [vmem:[%s22027_s19 + $0x1b8] sm:$0xff] }
0x4969   :  { %18140 = vmatprep.subr.mxu1 %v19114_v8 }
0x496a   :  { %18141 = vmatpush3.msra.mxu1 %v15261_v47  ;;  %v15358_v47 = vld [vmem:[%s22027_s19 + $0x1a8] sm:$0xff] }
0x496b   :  { %18142 = vmatprep.subr.mxu1 %v19114_v8 }
0x496c   :  { %18143 = vmatpush3.msra.mxu1 %v15260_v50  ;;  %v15356_v50 = vld [vmem:[%s22027_s19 + $0x198] sm:$0xff] }
0x496d   :  { %18144 = vmatprep.subr.mxu1 %v19114_v8 }
0x496e   :  { %18145 = vmatpush3.msra.mxu1 %v15259_v52  ;;  %v15354_v52 = vld [vmem:[%s22027_s19 + $0x188] sm:$0xff] }
0x496f   :  { %18149 = vmatprep.subr.mxu1 %v19114_v8 }
0x4a1f   :  { %v10023_v58 = vpop.f32.mrf.mxu1 }
0x4a20   :  { %v10024_v59 = vadd.f32 %v15252_v11, %v10023_v58  ;;  %v15257_v11 = vld [vmem:[%s22025_s8 + $0x1] ss:$0 sm:$0xff] }
0x4a21   :  { %v18094_v60 = vpop.f32.mrf.mxu1 }
0x4a22   :  { %v10028_v34 = vmul.f32 0.70710677, %v10024_v59  ;;  %v10027_v24 = vmul.f32 0.5, %v10024_v59  ;;  %v15258_v59 = vld [vmem:[%s22026_s14 + $0x1] ss:$0 sm:$0xff] }
0x4a24   :  { %v10031_v62 = vand.u32 2147483647, %v10028_v34  ;;  %vm10029_vm4 = vcmp.ge.f32.partialorder %v10028_v34, 0.0 }
0x4a25   :  { %v10030_v19 = vsel %vm10029_vm4, 1.0, %v19116_v20 }
0x4a26   :  { %v10032_v63 = vmul.f32 0.3275911, %v10031_v62  ;;  %v10045_v39 = vsub.f32 0.0, %v10031_v62 }
0x4a28   :  { %v10033_v0 = vadd.f32 1.0, %v10032_v63  ;;  %v10046_v1 = vmul.f32 %v10045_v39, %v10031_v62  ;;  %v15277_v62 = vld [vmem:[%s22024_s3 + $0x138] sm:$0xff]  ;;  %v15276_v63 = vld [vmem:[%s22024_s3 + $0x130] sm:$0xff]  ;;  %v15274_v39 = vld [vmem:[%s22024_s3 + $0x120] sm:$0xff] }
0x4a2a   :  { %18969 = vrcp.f32 %v10033_v0  ;;  %v10047_v35 = vmul.f32 1.442695, %v10046_v1  ;;  %v15275_v0 = vld [vmem:[%s22024_s3 + $0x128] sm:$0xff]  ;;  %v15273_v1 = vld [vmem:[%s22024_s3 + $0x118] sm:$0xff] }
0x4a2c   :  { %18971 = vpow2.f32 %v10047_v35  ;;  %v15270_v35 = vld [vmem:[%s22024_s3 + $0x100] sm:$0xff] }
0x4a37   :  { %v18970_v2 = vpop.eup %18969 }
0x4a38   :  { %v10036_v5 = vmul.f32 1.0614054, %v18970_v2 }
0x4a39   :  { %v18972_v15 = vpop.eup %18971 }
0x4a3a   :  { %v10037_v6 = vadd.f32 -1.4531521, %v10036_v5  ;;  %v15271_v5 = vld [vmem:[%s22024_s3 + $0x108] sm:$0xff] }
0x4a3c   :  { %v10038_v7 = vmul.f32 %v18970_v2, %v10037_v6  ;;  %v15288_v6 = vld [vmem:[%s22029_s20 + $0x4] ss:$0 sm:$0xff] }
0x4a3e   :  { %v10039_v57 = vadd.f32 1.4214138, %v10038_v7 }
0x4a40   :  { %v10040_v9 = vmul.f32 %v18970_v2, %v10039_v57 }
0x4a42   :  { %v10041_v14 = vadd.f32 -0.28449672, %v10040_v9 }
0x4a44   :  { %v10042_v10 = vmul.f32 %v18970_v2, %v10041_v14 }
0x4a46   :  { %v10043_v17 = vadd.f32 0.2548296, %v10042_v10 }
0x4a48   :  { %v10044_v13 = vmul.f32 %v18970_v2, %v10043_v17  ;;  %v15272_v2 = vld [vmem:[%s22024_s3 + $0x110] sm:$0xff]  ;;  %v15268_v17 = vld [vmem:[%s22028_s6 + $0x4] ss:$0 sm:$0xff] }
0x4a4a   :  { %v10049_v16 = vmul.f32 %v18972_v15, %v10044_v13 }
0x4a4c   :  { %v10050_v18 = vsub.f32 1.0, %v10049_v16 }
0x4a4e   :  { %v10051_v21 = vmul.f32 %v10050_v18, %v10030_v19  ;;  %v15302_v18 = vld [vmem:[%s22023_s29 + $0x178] sm:$0xff]  ;;  %v15301_v19 = vld [vmem:[%s22023_s29 + $0x170] sm:$0xff] }
0x4a50   :  { %v10052_v28 = vadd.f32 1.0, %v10051_v21  ;;  %v15300_v21 = vld [vmem:[%s22023_s29 + $0x168] sm:$0xff] }
0x4a52   :  { %v10053_v26 = vmul.f32 %v10052_v28, %v10027_v24  ;;  %v15299_v24 = vld [vmem:[%s22023_s29 + $0x160] sm:$0xff]  ;;  %v15298_v28 = vld [vmem:[%s22023_s29 + $0x158] sm:$0xff] }
0x4a54   :  { %18128 = vmatmul.mubr.f32.vlgmr.msra.gmra.mxu0 %v10053_v26  ;;  %v15297_v26 = vld [vmem:[%s22023_s29 + $0x150] sm:$0xff] }
0x4a55   :  { %18184 = vmatprep.mubr.msk.f32.mxu0 %vm19115_vm7, %v19114_v8 }
0x4b14   :  { %v10143_v29 = vpop.f32.mrf.mxu0 }
0x4b15   :  { %v10144_v31 = vadd.f32 %v15254_v27, %v10143_v29  ;;  %v15296_v27 = vld [vmem:[%s22023_s29 + $0x148] sm:$0xff]  ;;  %v15295_v29 = vld [vmem:[%s22023_s29 + $0x140] sm:$0xff] }
0x4b16   :  { %v18129_v32 = vpop.f32.mrf.mxu0 }
0x4b17   :  { %v21148_v33 = vadd.f32 %v10144_v31, %v21083_v12  ;;  %v15286_v12 = vld [vmem:[%s22027_s19 + $0x138] sm:$0xff]  ;;  %v15321_v32 = vld [vmem:[%s22027_s19 + $0x170] sm:$0xff] }
0x4b18   :  { %18169 = vmatpush3.msra.mxu0 %v15286_v12  ;;  %v15322_v31 = vld [vmem:[%s22027_s19 + $0x178] sm:$0xff]  ;;  %v15339_v12 = vld [vmem:[%s22023_s29 + $0x1b0] sm:$0xff] }
0x4b19   :  { %v10152_v23 = vsel %vm979_vm12, %v21148_v33, 0.0  ;;  %18170 = vmatprep.subr.mxu0 %v19114_v8 }
0x4b1a   :  { %10153 = vadd.xlane.f32.xlu0 %v10152_v23  ;;  %18171 = vmatpush3.msra.mxu0 %v15285_v43  ;;  %v15320_v23 = vld [vmem:[%s22027_s19 + $0x168] sm:$0xff]  ;;  %v15337_v43 = vld [vmem:[%s22023_s29 + $0x1a0] sm:$0xff] }
0x4b1b   :  { %18172 = vmatprep.subr.mxu0 %v19114_v8 }
0x4b1c   :  { %18173 = vmatpush3.msra.mxu0 %v15284_v45  ;;  %v15335_v45 = vld [vmem:[%s22023_s29 + $0x190] sm:$0xff] }
0x4b1d   :  { %18174 = vmatprep.subr.mxu0 %v19114_v8 }
0x4b1e   :  { %18175 = vmatpush3.msra.mxu0 %v15283_v40  ;;  %v15333_v40 = vld [vmem:[%s22023_s29 + $0x180] sm:$0xff] }
0x4b1f   :  { %18176 = vmatprep.subr.mxu0 %v19114_v8 }
0x4b20   :  { %18177 = vmatpush3.msra.mxu0 %v15282_v46  ;;  %v15359_v46 = vld [vmem:[%s22027_s19 + $0x1b0] sm:$0xff] }
0x4b21   :  { %18178 = vmatprep.subr.mxu0 %v19114_v8 }
0x4b22   :  { %18179 = vmatpush3.msra.mxu0 %v15281_v49  ;;  %v15357_v49 = vld [vmem:[%s22027_s19 + $0x1a0] sm:$0xff] }
0x4b23   :  { %18180 = vmatprep.subr.mxu0 %v19114_v8 }
0x4b24   :  { %18181 = vmatpush3.msra.mxu0 %v15280_v51  ;;  %v15355_v51 = vld [vmem:[%s22027_s19 + $0x190] sm:$0xff] }
0x4b25   :  { %18182 = vmatprep.subr.mxu0 %v19114_v8 }
0x4b26   :  { %18183 = vmatpush3.msra.mxu0 %v15279_v53  ;;  %v15353_v53 = vld [vmem:[%s22027_s19 + $0x180] sm:$0xff] }
0x4b27   :  { %18192 = vmatprep.subr.mxu0 %v19114_v8 }
0x4ba3   :  { %v10154_v36 = vpop.xlane.xlu0 %10153 }
0x4ba4   :  { %v10155_v37 = vmul.f32 0.015625, %v10154_v36  ;;  %v15319_v36 = vld [vmem:[%s22027_s19 + $0x160] sm:$0xff] }
0x4ba6   :  { %v10156_v25 = vsub.f32 %v21148_v33, %v10155_v37  ;;  %v15318_v37 = vld [vmem:[%s22027_s19 + $0x158] sm:$0xff] }
0x4ba8   :  { %v10157_v38 = vmul.f32 %v10156_v25, %v10156_v25 }
0x4baa   :  { %v10158_v41 = vsel %vm979_vm12, %v10157_v38, 0.0  ;;  %v15316_v38 = vld [vmem:[%s22027_s19 + $0x148] sm:$0xff] }
0x4bab   :  { %10159 = vadd.xlane.f32.xlu1 %v10158_v41  ;;  %v15315_v41 = vld [vmem:[%s22027_s19 + $0x140] sm:$0xff] }
0x4c34   :  { %v10160_v54 = vpop.xlane.xlu1 %10159 }
0x4c35   :  { %v10161_v56 = vmul.f32 0.015625, %v10160_v54  ;;  %v15388_v54 = vld [vmem:[%s22024_s3 + $0x1f8] sm:$0xff] }
0x4c37   :  { %v10162_v3 = vadd.f32 1e-05, %v10161_v56  ;;  %v15387_v56 = vld [vmem:[%s22024_s3 + $0x1f0] sm:$0xff] }
0x4c39   :  { %18973 = vrsqrt.f32 %v10162_v3  ;;  %v15386_v3 = vld [vmem:[%s22024_s3 + $0x1e8] sm:$0xff] }
0x4c46   :  { %v18974_v4 = vpop.eup %18973 }
0x4c47   :  { %v10164_v58 = vmul.f32 %v18974_v4, %v10156_v25  ;;  %v15317_v25 = vld [vmem:[%s22027_s19 + $0x150] sm:$0xff]  ;;  %v15385_v4 = vld [vmem:[%s22024_s3 + $0x1e0] sm:$0xff] }
0x4c49   :  { %v10171_v60 = vmul.f32 %v15257_v11, %v10164_v58  ;;  %v15384_v11 = vld [vmem:[%s22024_s3 + $0x1d8] sm:$0xff]  ;;  %v15383_v58 = vld [vmem:[%s22024_s3 + $0x1d0] sm:$0xff] }
0x4c4b   :  { %v21188_v34 = vadd.f32 %v15258_v59, %v10171_v60  ;;  %v15382_v59 = vld [vmem:[%s22024_s3 + $0x1c8] sm:$0xff]  ;;  %v15381_v60 = vld [vmem:[%s22024_s3 + $0x1c0] sm:$0xff] }
0x4c4d   :  { %18147 = vmatmul.mubr.msk.f32.vlgmr.msra.gmra.mxu1 %vm979_vm12, %v21188_v34  ;;  %18185 = vmatmul.mubr.msk.f32.vlgmr.msra.gmra.mxu0 %vm979_vm12, %v21188_v34 }
0x4c4e   :  { %18150 = vmatpush3.msra.mxu1 %v15277_v62  ;;  %18165 = vmatprep.mubr.msk.f32.mxu1 %vm19115_vm7, %v19114_v8 }
0x4c4f   :  { %18151 = vmatprep.subr.mxu1 %v19114_v8  ;;  %18194 = vmatprep.mubr.msk.f32.mxu0 %vm19115_vm7, %v19114_v8 }
0x4c50   :  { %18152 = vmatpush3.msra.mxu1 %v15276_v63 }
0x4c51   :  { %18153 = vmatprep.subr.mxu1 %v19114_v8 }
0x4c52   :  { %18154 = vmatpush3.msra.mxu1 %v15275_v0 }
0x4c53   :  { %18155 = vmatprep.subr.mxu1 %v19114_v8 }
0x4c54   :  { %18156 = vmatpush3.msra.mxu1 %v15274_v39 }
0x4c55   :  { %18157 = vmatprep.subr.mxu1 %v19114_v8 }
0x4c56   :  { %18158 = vmatpush3.msra.mxu1 %v15273_v1 }
0x4c57   :  { %18159 = vmatprep.subr.mxu1 %v19114_v8 }
0x4c58   :  { %18160 = vmatpush3.msra.mxu1 %v15272_v2 }
0x4c59   :  { %18161 = vmatprep.subr.mxu1 %v19114_v8 }
0x4c5a   :  { %18162 = vmatpush3.msra.mxu1 %v15271_v5 }
0x4c5b   :  { %18163 = vmatprep.subr.mxu1 %v19114_v8 }
0x4c5c   :  { %18164 = vmatpush3.msra.mxu1 %v15270_v35 }
0x4c5d   :  { %18166 = vmatmul.mubr.msk.f32.vlgmr.msra.gmra.mxu1 %vm979_vm12, %v21188_v34  ;;  %18187 = vmatprep.subr.mxu1 %v19114_v8 }
0x4c5e   :  { %18189 = vmatprep.mubr.msk.f32.mxu1 %vm19115_vm7, %v19114_v8 }
0x4d0d   :  { %v10265_v7 = vpop.f32.mrf.mxu1  ;;  %v10431_v57 = vpop.f32.mrf.mxu0 }
0x4d0e   :  { %v10432_v9 = vadd.f32 %v15288_v6, %v10431_v57  ;;  %v10266_v15 = vadd.f32 %v15268_v17, %v10265_v7 }
0x4d0f   :  { %v18148_v14 = vpop.f32.mrf.mxu1  ;;  %v18186_v10 = vpop.f32.mrf.mxu0 }
0x4d10   :  { %18193 = vmatpush3.msra.mxu0 %v10432_v9 }
0x4d11   :  { %18216 = vmatprep.subr.mxu0 %v19114_v8 }
0x4d1d   :  { %v10344_v13 = vpop.f32.mrf.mxu1 }
0x4d1e   :  { %18188 = vmatpush3.xpose.msk.msra.mxu1 %vm234_vm0, %v10344_v13 }
0x4d1f   :  { %v18167_v16 = vpop.f32.mrf.mxu1  ;;  %18197 = vmatprep.subr.mxu1 %v19114_v8 }
0x4d21   :  { %18190 = vmatmul.mubr.msk.f32.vlgmr.msra.gmra.mxu1 %vm234_vm0, %v10266_v15 }
0x4d22   :  { %18198 = vmatpush3.msra.mxu1 %v15302_v18  ;;  %18213 = vmatprep.mubr.msk.f32.mxu1 %vm19115_vm7, %v19114_v8 }
0x4d23   :  { %18199 = vmatprep.subr.mxu1 %v19114_v8 }
0x4d24   :  { %18200 = vmatpush3.msra.mxu1 %v15301_v19 }
0x4d25   :  { %18201 = vmatprep.subr.mxu1 %v19114_v8 }
0x4d26   :  { %18202 = vmatpush3.msra.mxu1 %v15300_v21 }
0x4d27   :  { %18203 = vmatprep.subr.mxu1 %v19114_v8 }
0x4d28   :  { %18204 = vmatpush3.msra.mxu1 %v15299_v24 }
0x4d29   :  { %18205 = vmatprep.subr.mxu1 %v19114_v8 }
0x4d2a   :  { %18206 = vmatpush3.msra.mxu1 %v15298_v28  ;;  %v15313_v28 = vld [vmem:[%s22024_s3 + $0x178] sm:$0xff] }
0x4d2b   :  { %18207 = vmatprep.subr.mxu1 %v19114_v8 }
0x4d2c   :  { %18208 = vmatpush3.msra.mxu1 %v15297_v26  ;;  %v15312_v26 = vld [vmem:[%s22024_s3 + $0x170] sm:$0xff] }
0x4d2d   :  { %18209 = vmatprep.subr.mxu1 %v19114_v8 }
0x4d2e   :  { %18210 = vmatpush3.msra.mxu1 %v15296_v27  ;;  %v15311_v27 = vld [vmem:[%s22024_s3 + $0x168] sm:$0xff] }
0x4d2f   :  { %18211 = vmatprep.subr.mxu1 %v19114_v8 }
0x4d30   :  { %18212 = vmatpush3.msra.mxu1 %v15295_v29  ;;  %v15310_v29 = vld [vmem:[%s22024_s3 + $0x160] sm:$0xff] }
0x4d31   :  { %18214 = vmatmul.mubr.msk.f32.vlgmr.msra.gmra.mxu1 %vm979_vm12, %v21188_v34  ;;  %18235 = vmatprep.subr.mxu1 %v19114_v8 }
0x4d32   :  { %18236 = vmatpush3.msra.mxu1 %v15322_v31  ;;  %18251 = vmatprep.mubr.msk.f32.mxu1 %vm19115_vm7, %v19114_v8  ;;  %v15309_v31 = vld [vmem:[%s22024_s3 + $0x158] sm:$0xff] }
0x4d33   :  { %18237 = vmatprep.subr.mxu1 %v19114_v8 }
0x4d34   :  { %18238 = vmatpush3.msra.mxu1 %v15321_v32  ;;  %v15308_v32 = vld [vmem:[%s22024_s3 + $0x150] sm:$0xff] }
0x4d35   :  { %18239 = vmatprep.subr.mxu1 %v19114_v8 }
0x4d36   :  { %18240 = vmatpush3.msra.mxu1 %v15320_v23  ;;  %v15307_v23 = vld [vmem:[%s22024_s3 + $0x148] sm:$0xff] }
0x4d37   :  { %18241 = vmatprep.subr.mxu1 %v19114_v8 }
0x4d38   :  { %18242 = vmatpush3.msra.mxu1 %v15319_v36  ;;  %v15306_v36 = vld [vmem:[%s22024_s3 + $0x140] sm:$0xff] }
0x4d39   :  { %18243 = vmatprep.subr.mxu1 %v19114_v8 }
0x4d3a   :  { %18244 = vmatpush3.msra.mxu1 %v15318_v37 }
0x4d3b   :  { %18245 = vmatprep.subr.mxu1 %v19114_v8 }
0x4d3c   :  { %18246 = vmatpush3.msra.mxu1 %v15317_v25 }
0x4d3d   :  { %18247 = vmatprep.subr.mxu1 %v19114_v8 }
0x4d3e   :  { %18248 = vmatpush3.msra.mxu1 %v15316_v38  ;;  %v15304_v38 = vld [vmem:[%s22028_s6 + $0x5] ss:$0 sm:$0xff] }
0x4d3f   :  { %18249 = vmatprep.subr.mxu1 %v19114_v8 }
0x4d40   :  { %18250 = vmatpush3.msra.mxu1 %v15315_v41  ;;  %v15324_v41 = vld [vmem:[%s22029_s20 + $0x5] ss:$0 sm:$0xff] }
0x4d41   :  { %18252 = vmatmul.mubr.msk.f32.vlgmr.msra.gmra.mxu1 %vm979_vm12, %v21188_v34  ;;  %18278 = vmatprep.subr.mxu1 %v19114_v8 }
0x4d42   :  { %18279 = vmatpush3.msra.mxu1 %v15340_v30  ;;  %18294 = vmatprep.mubr.msk.f32.mxu1 %vm19115_vm7, %v19114_v8 }
0x4d43   :  { %18280 = vmatprep.subr.mxu1 %v19114_v8 }
0x4d44   :  { %18281 = vmatpush3.msra.mxu1 %v15339_v12 }
0x4d45   :  { %18282 = vmatprep.subr.mxu1 %v19114_v8 }
0x4d46   :  { %18283 = vmatpush3.msra.mxu1 %v15338_v42 }
0x4d47   :  { %18284 = vmatprep.subr.mxu1 %v19114_v8 }
0x4d48   :  { %18285 = vmatpush3.msra.mxu1 %v15337_v43 }
0x4d49   :  { %18286 = vmatprep.subr.mxu1 %v19114_v8 }
0x4d4a   :  { %18287 = vmatpush3.msra.mxu1 %v15336_v61 }
0x4d4b   :  { %18288 = vmatprep.subr.mxu1 %v19114_v8 }
0x4d4c   :  { %18289 = vmatpush3.msra.mxu1 %v15335_v45 }
0x4d4d   :  { %18290 = vmatprep.subr.mxu1 %v19114_v8 }
0x4d4e   :  { %18291 = vmatpush3.msra.mxu1 %v15334_v44 }
0x4d4f   :  { %18292 = vmatprep.subr.mxu1 %v19114_v8 }
0x4d50   :  { %18293 = vmatpush3.msra.mxu1 %v15333_v40 }
0x4d51   :  { %18295 = vmatmul.mubr.msk.f32.vlgmr.msra.gmra.mxu1 %vm979_vm12, %v21188_v34  ;;  %18316 = vmatprep.subr.mxu1 %v19114_v8 }
0x4d52   :  { %18317 = vmatpush3.msra.mxu1 %v15360_v55  ;;  %18332 = vmatprep.mubr.msk.f32.mxu1 %vm19115_vm7, %v19114_v8 }
0x4d53   :  { %18318 = vmatprep.subr.mxu1 %v19114_v8 }
0x4d54   :  { %18319 = vmatpush3.msra.mxu1 %v15359_v46 }
0x4d55   :  { %18320 = vmatprep.subr.mxu1 %v19114_v8 }
0x4d56   :  { %18321 = vmatpush3.msra.mxu1 %v15358_v47 }
0x4d57   :  { %18322 = vmatprep.subr.mxu1 %v19114_v8 }
0x4d58   :  { %18323 = vmatpush3.msra.mxu1 %v15357_v49 }
0x4d59   :  { %18324 = vmatprep.subr.mxu1 %v19114_v8 }
0x4d5a   :  { %18325 = vmatpush3.msra.mxu1 %v15356_v50 }
0x4d5b   :  { %18326 = vmatprep.subr.mxu1 %v19114_v8 }
0x4d5c   :  { %18327 = vmatpush3.msra.mxu1 %v15355_v51 }
0x4d5d   :  { %18328 = vmatprep.subr.mxu1 %v19114_v8 }
0x4d5e   :  { %18329 = vmatpush3.msra.mxu1 %v15354_v52 }
0x4d5f   :  { %18330 = vmatprep.subr.mxu1 %v19114_v8 }
0x4d60   :  { %18331 = vmatpush3.msra.mxu1 %v15353_v53 }
0x4d61   :  { %18333 = vmatmul.mubr.msk.f32.vlgmr.msra.gmra.mxu1 %vm979_vm12, %v21188_v34  ;;  %18371 = vmatprep.subr.mxu1 %v19114_v8 }
0x4d62   :  { %18372 = vmatpush3.msra.mxu1 %v15388_v54  ;;  %18387 = vmatprep.mubr.msk.f32.mxu1 %vm19115_vm7, %v19114_v8  ;;  %v15330_v54 = vld [vmem:[%s22030_s27 + $0x58] sm:$0xff] }
0x4d63   :  { %18373 = vmatprep.subr.mxu1 %v19114_v8 }
0x4d64   :  { %18374 = vmatpush3.msra.mxu1 %v15387_v56  ;;  %v15329_v56 = vld [vmem:[%s22030_s27 + $0x50] sm:$0xff] }
0x4d65   :  { %18375 = vmatprep.subr.mxu1 %v19114_v8 }
0x4d66   :  { %18376 = vmatpush3.msra.mxu1 %v15386_v3  ;;  %v15294_v3 = vld [vmem:[%s22030_s27 + $0x48] sm:$0xff] }
0x4d67   :  { %18377 = vmatprep.subr.mxu1 %v19114_v8 }
0x4d68   :  { %18378 = vmatpush3.msra.mxu1 %v15385_v4 }
0x4d69   :  { %18379 = vmatprep.subr.mxu1 %v19114_v8 }
0x4d6a   :  { %18380 = vmatpush3.msra.mxu1 %v15384_v11  ;;  %v15293_v11 = vld [vmem:[%s22030_s27 + $0x40] sm:$0xff] }
0x4d6b   :  { %18381 = vmatprep.subr.mxu1 %v19114_v8 }
0x4d6c   :  { %18382 = vmatpush3.msra.mxu1 %v15383_v58 }
0x4d6d   :  { %18383 = vmatprep.subr.mxu1 %v19114_v8 }
0x4d6e   :  { %18384 = vmatpush3.msra.mxu1 %v15382_v59  ;;  %v15351_v59 = vld [vmem:[%s22024_s3 + $0x1b8] sm:$0xff] }
0x4d6f   :  { %18385 = vmatprep.subr.mxu1 %v19114_v8 }
0x4d70   :  { %18386 = vmatpush3.msra.mxu1 %v15381_v60  ;;  %v15350_v60 = vld [vmem:[%s22024_s3 + $0x1b0] sm:$0xff] }
0x4d71   :  { %18388 = vmatmul.mubr.msk.f32.vlgmr.msra.gmra.mxu1 %vm979_vm12, %v21188_v34  ;;  %18409 = vmatprep.subr.mxu1 %v19114_v8 }
0x4d72   :  { %18411 = vmatprep.mubr.msk.f32.mxu1 %vm19115_vm7, %v19114_v8 }
0x4de1   :  { %v10507_v62 = vpop.f32.mrf.mxu1 }
0x4de2   :  { %v10508_v63 = vadd.f32 %v10507_v62, %v20564_v48  ;;  %v15349_v62 = vld [vmem:[%s22024_s3 + $0x1a8] sm:$0xff] }
0x4de3   :  { %v18191_v0 = vpop.f32.mrf.mxu1 }
0x4de4   :  { %v10511_v39 = vsel %vm1680_vm15, %v10508_v63, -inf  ;;  %v15347_v0 = vld [vmem:[%s22024_s3 + $0x198] sm:$0xff] }
0x4de5   :  { %10512 = vmax.xlane.f32.xlu0 %v10511_v39  ;;  %v15346_v39 = vld [vmem:[%s22024_s3 + $0x190] sm:$0xff] }
0x4df1   :  { %v10681_v1 = vpop.f32.mrf.mxu1 }
0x4df2   :  { %v10682_v12 = vadd.f32 %v15304_v38, %v10681_v1  ;;  %v15345_v1 = vld [vmem:[%s22024_s3 + $0x188] sm:$0xff] }
0x4df3   :  { %v18215_v2 = vpop.f32.mrf.mxu1 }
0x4df4   :  { %v15344_v2 = vld [vmem:[%s22024_s3 + $0x180] sm:$0xff] }
0x4e01   :  { %v10847_v5 = vpop.f32.mrf.mxu1 }
0x4e02   :  { %v10848_v43 = vadd.f32 %v15324_v41, %v10847_v5  ;;  %v15376_v41 = vld [vmem:[%s22023_s29 + $0x1f0] sm:$0xff] }
0x4e03   :  { %v18253_v35 = vpop.f32.mrf.mxu1 }
0x4e11   :  { %v21328_v6 = vpop.f32.mrf.mxu1 }
0x4e13   :  { %v18296_v7 = vpop.f32.mrf.mxu1 }
0x4e21   :  { %v21330_v57 = vpop.f32.mrf.mxu1 }
0x4e23   :  { %v18334_v9 = vpop.f32.mrf.mxu1 }
0x4e31   :  { %v11812_v14 = vpop.f32.mrf.mxu1 }
0x4e32   :  { %18410 = vmatpush3.xpose.msk.msra.mxu1 %vm234_vm0, %v11812_v14 }
0x4e33   :  { %v18389_v10 = vpop.f32.mrf.mxu1  ;;  %18414 = vmatprep.subr.mxu1 %v19114_v8 }
0x4e34   :  { %v15342_v10 = vld [vmem:[%s22028_s6 + $0x6] ss:$0 sm:$0xff] }
0x4e6e   :  { %v10513_v17 = vpop.xlane.xlu0 %10512 }
0x4e6f   :  { %v10514_v13 = vsub.f32 %v10508_v63, %v10513_v17  ;;  %v15348_v63 = vld [vmem:[%s22024_s3 + $0x1a0] sm:$0xff] }
0x4e70   :  { %v15362_v17 = vld [vmem:[%s22029_s20 + $0x6] ss:$0 sm:$0xff] }
0x4e71   :  { %v10515_v15 = vmul.f32 1.442695, %v10514_v13 }
0x4e73   :  { %18975 = vpow2.f32 %v10515_v15  ;;  %v11244_v15 = vadd.f32 %v15342_v10, %v21328_v6 }
0x4e80   :  { %v18976_v16 = vpop.eup %18975 }
0x4e81   :  { %v10517_v18 = vsel %vm1680_vm15, %v18976_v16, 0.0 }
0x4e82   :  { %10518 = vadd.xlane.f32.xlu1 %v10517_v18  ;;  %v11410_v18 = vadd.f32 %v15362_v17, %v21330_v57 }
0x4f0b   :  { %v10519_v19 = vpop.xlane.xlu1 %10518 }
0x4f0c   :  { %18977 = vrcp.f32 %v10519_v19 }
0x4f19   :  { %v18978_v21 = vpop.eup %18977 }
0x4f1a   :  { %v10521_v24 = vmul.f32 %v18978_v21, %v18976_v16 }
0x4f1c   :  { %18195 = vmatmul.mubr.msk.f32.vlgmr.msra.gmra.mxu0 %vm1680_vm15, %v10521_v24 }
0x4f1d   :  { %18217 = vmatpush3.msra.mxu0 %v15313_v28  ;;  %18232 = vmatprep.mubr.msk.f32.mxu0 %vm19115_vm7, %v19114_v8 }
0x4f1e   :  { %18218 = vmatprep.subr.mxu0 %v19114_v8 }
0x4f1f   :  { %18219 = vmatpush3.msra.mxu0 %v15312_v26 }
0x4f20   :  { %18220 = vmatprep.subr.mxu0 %v19114_v8 }
0x4f21   :  { %18221 = vmatpush3.msra.mxu0 %v15311_v27 }
0x4f22   :  { %18222 = vmatprep.subr.mxu0 %v19114_v8 }
0x4f23   :  { %18223 = vmatpush3.msra.mxu0 %v15310_v29 }
0x4f24   :  { %18224 = vmatprep.subr.mxu0 %v19114_v8 }
0x4f25   :  { %18225 = vmatpush3.msra.mxu0 %v15309_v31 }
0x4f26   :  { %18226 = vmatprep.subr.mxu0 %v19114_v8 }
0x4f27   :  { %18227 = vmatpush3.msra.mxu0 %v15308_v32 }
0x4f28   :  { %18228 = vmatprep.subr.mxu0 %v19114_v8 }
0x4f29   :  { %18229 = vmatpush3.msra.mxu0 %v15307_v23 }
0x4f2a   :  { %18230 = vmatprep.subr.mxu0 %v19114_v8 }
0x4f2b   :  { %18231 = vmatpush3.msra.mxu0 %v15306_v36  ;;  %v15368_v36 = vld [vmem:[%s22030_s27 + $0x68] sm:$0xff] }
0x4f2c   :  { %18233 = vmatmul.mubr.msk.f32.vlgmr.msra.gmra.mxu0 %vm979_vm12, %v21188_v34  ;;  %18254 = vmatprep.subr.mxu0 %v19114_v8 }
0x4f2d   :  { %18256 = vmatprep.mubr.msk.f32.mxu0 %vm19115_vm7, %v19114_v8 }
0x4fdc   :  { %v10591_v37 = vpop.f32.mrf.mxu0 }
0x4fde   :  { %v18196_v25 = vpop.f32.mrf.mxu0 }
0x4fdf   :  { %v15377_v25 = vld [vmem:[%s22023_s29 + $0x1f8] sm:$0xff] }
0x4fec   :  { %v10760_v30 = vpop.f32.mrf.mxu0 }
0x4fed   :  { %18255 = vmatpush3.xpose.msk.msra.mxu0 %vm234_vm0, %v10760_v30 }
0x4fee   :  { %v18234_v42 = vpop.f32.mrf.mxu0  ;;  %18259 = vmatprep.subr.mxu0 %v19114_v8 }
0x4fef   :  { %v15374_v42 = vld [vmem:[%s22023_s29 + $0x1e0] sm:$0xff] }
0x4ff0   :  { %18257 = vmatmul.mubr.msk.f32.vlgmr.msra.gmra.mxu0 %vm234_vm0, %v10682_v12  ;;  %v15375_v12 = vld [vmem:[%s22023_s29 + $0x1e8] sm:$0xff] }
0x4ff1   :  { %18260 = vmatpush3.msra.mxu0 %v10848_v43  ;;  %18261 = vmatprep.mubr.msk.f32.mxu0 %vm19115_vm7, %v19114_v8  ;;  %v15373_v43 = vld [vmem:[%s22023_s29 + $0x1d8] sm:$0xff] }
0x4ff2   :  { %18264 = vmatprep.subr.mxu0 %v19114_v8 }
0x50b0   :  { %v10923_v61 = vpop.f32.mrf.mxu0 }
0x50b1   :  { %v10924_v45 = vadd.f32 %v10923_v61, %v20564_v48  ;;  %v15372_v61 = vld [vmem:[%s22023_s29 + $0x1d0] sm:$0xff] }
0x50b2   :  { %v18258_v44 = vpop.f32.mrf.mxu0 }
0x50b3   :  { %v10927_v40 = vsel %vm1680_vm15, %v10924_v45, -inf  ;;  %v15370_v44 = vld [vmem:[%s22023_s29 + $0x1c0] sm:$0xff] }
0x50b4   :  { %10928 = vmax.xlane.f32.xlu0 %v10927_v40  ;;  %v15397_v40 = vld [vmem:[%s22027_s19 + $0x1f8] sm:$0xff] }
0x513d   :  { %v10929_v55 = vpop.xlane.xlu0 %10928 }
0x513e   :  { %v10930_v46 = vsub.f32 %v10924_v45, %v10929_v55  ;;  %v15371_v45 = vld [vmem:[%s22023_s29 + $0x1c8] sm:$0xff]  ;;  %v15396_v55 = vld [vmem:[%s22027_s19 + $0x1f0] sm:$0xff]  ;;  %s14577_s29 = sshll.u32 %s19118_s25, 4  ;;  %s14578_s29 = int_to_ptr.vmem [resolvable:$true] %s14577_s29 }
0x513f   :  { %s19039_s3 = scalar_lea.vmem %s14578_s29, 16  ;;  %p19044_p1 = scmp.lt.s32.totalorder %s14578_s29, %s14578_s29 }
0x5140   :  { %v10931_v47 = vmul.f32 1.442695, %v10930_v46  ;;  %v15395_v46 = vld [vmem:[%s22027_s19 + $0x1e8] sm:$0xff]  ;;  %p19040_p0 = scmp.ne.s32.totalorder %s14578_s29, %s19039_s3 }
0x5142   :  { %18979 = vpow2.f32 %v10931_v47  ;;  %v15394_v47 = vld [vmem:[%s22027_s19 + $0x1e0] sm:$0xff] }
0x514f   :  { %v18980_v49 = vpop.eup %18979 }
0x5150   :  { %v10933_v50 = vsel %vm1680_vm15, %v18980_v49, 0.0 }
0x5151   :  { %10934 = vadd.xlane.f32.xlu1 %v10933_v50  ;;  %v15392_v50 = vld [vmem:[%s22027_s19 + $0x1d0] sm:$0xff] }
0x51da   :  { %v10935_v51 = vpop.xlane.xlu1 %10934 }
0x51db   :  { %18981 = vrcp.f32 %v10935_v51  ;;  %v15391_v51 = vld [vmem:[%s22027_s19 + $0x1c8] sm:$0xff] }
0x51e8   :  { %v18982_v52 = vpop.eup %18981 }
0x51e9   :  { %v10937_v53 = vmul.f32 %v18982_v52, %v18980_v49  ;;  %v15393_v49 = vld [vmem:[%s22027_s19 + $0x1d8] sm:$0xff]  ;;  %v15390_v52 = vld [vmem:[%s22027_s19 + $0x1c0] sm:$0xff] }
0x51eb   :  { %18262 = vmatmul.mubr.msk.f32.vlgmr.msra.gmra.mxu0 %vm1680_vm15, %v10937_v53  ;;  %v15431_v53 = vld [vmem:[%s22031_s4 + $0x138] sm:$0xff] }
0x51ec   :  { %18265 = vmatpush3.msra.mxu0 %v15330_v54  ;;  %18268 = vmatprep.mubr.msk.f32.mxu0 %vm19115_vm7, %v19114_v8  ;;  %v15430_v54 = vld [vmem:[%s22031_s4 + $0x130] sm:$0xff] }
0x51ed   :  { %18266 = vmatprep.subr.mxu0 %v19114_v8 }
0x51ee   :  { %18267 = vmatpush3.msra.mxu0 %v15329_v56  ;;  %v15429_v56 = vld [vmem:[%s22031_s4 + $0x128] sm:$0xff] }
0x51ef   :  { %18271 = vmatprep.subr.mxu0 %v19114_v8 }
0x52ab   :  { %v11007_v4 = vpop.f32.mrf.mxu0 }
0x52ac   :  { %18269 = vmatmul.mubr.msk.f32.vlgmr.msra.gmra.mxu0 %vm234_vm0, %v11007_v4  ;;  %v15426_v4 = vld [vmem:[%s22031_s4 + $0x110] sm:$0xff] }
0x52ad   :  { %18272 = vmatpush3.msra.mxu0 %v15294_v3  ;;  %v18263_v58 = vpop.f32.mrf.mxu0  ;;  %18275 = vmatprep.mubr.msk.f32.mxu0 %vm19115_vm7, %v19114_v8  ;;  %v15428_v3 = vld [vmem:[%s22031_s4 + $0x120] sm:$0xff] }
0x52ae   :  { %18273 = vmatprep.subr.mxu0 %v19114_v8  ;;  %v15424_v58 = vld [vmem:[%s22031_s4 + $0x100] sm:$0xff] }
0x52af   :  { %18274 = vmatpush3.msra.mxu0 %v15293_v11  ;;  %v15425_v11 = vld [vmem:[%s22031_s4 + $0x108] sm:$0xff] }
0x52b0   :  { %18297 = vmatprep.subr.mxu0 %v19114_v8  ;;  %18276 = vmatmul.mubr.msk.f32.vlgmr.msra.gmra.mxu0 %vm234_vm0, %v10591_v37  ;;  %v15367_v37 = vld [vmem:[%s22030_s27 + $0x60] sm:$0xff] }
0x52b1   :  { %18298 = vmatpush3.msra.mxu0 %v15351_v59  ;;  %18313 = vmatprep.mubr.msk.f32.mxu0 %vm19115_vm7, %v19114_v8 }
0x52b2   :  { %18299 = vmatprep.subr.mxu0 %v19114_v8 }
0x52b3   :  { %18300 = vmatpush3.msra.mxu0 %v15350_v60 }
0x52b4   :  { %18301 = vmatprep.subr.mxu0 %v19114_v8 }
0x52b5   :  { %18302 = vmatpush3.msra.mxu0 %v15349_v62 }
0x52b6   :  { %18303 = vmatprep.subr.mxu0 %v19114_v8 }
0x52b7   :  { %18304 = vmatpush3.msra.mxu0 %v15348_v63  ;;  %v15379_v63 = vld [vmem:[%s22028_s6 + $0x7] ss:$0 sm:$0xff] }
0x52b8   :  { %18305 = vmatprep.subr.mxu0 %v19114_v8 }
0x52b9   :  { %18306 = vmatpush3.msra.mxu0 %v15347_v0 }
0x52ba   :  { %18307 = vmatprep.subr.mxu0 %v19114_v8 }
0x52bb   :  { %18308 = vmatpush3.msra.mxu0 %v15346_v39 }
0x52bc   :  { %18309 = vmatprep.subr.mxu0 %v19114_v8 }
0x52bd   :  { %18310 = vmatpush3.msra.mxu0 %v15345_v1 }
0x52be   :  { %18311 = vmatprep.subr.mxu0 %v19114_v8 }
0x52bf   :  { %18312 = vmatpush3.msra.mxu0 %v15344_v2  ;;  %v15399_v2 = vld [vmem:[%s22029_s20 + $0x7] ss:$0 sm:$0xff] }
0x52c0   :  { %18314 = vmatmul.mubr.msk.f32.vlgmr.msra.gmra.mxu0 %vm979_vm12, %v21188_v34  ;;  %18335 = vmatprep.subr.mxu0 %v19114_v8 }
0x52c1   :  { %18337 = vmatprep.mubr.msk.f32.mxu0 %vm19115_vm7, %v19114_v8 }
0x536c   :  { %v11083_v5 = vpop.f32.mrf.mxu0 }
0x536e   :  { %v18270_v35 = vpop.f32.mrf.mxu0 }
0x5370   :  { %v11156_v7 = vpop.f32.mrf.mxu0 }
0x5371   :  { %v21406_v9 = vadd.f32 %v11156_v7, %v11083_v5 }
0x5372   :  { %v18277_v14 = vpop.f32.mrf.mxu0 }
0x5380   :  { %v11322_v13 = vpop.f32.mrf.mxu0 }
0x5381   :  { %18336 = vmatpush3.xpose.msk.msra.mxu0 %vm234_vm0, %v11322_v13 }
0x5382   :  { %v18315_v16 = vpop.f32.mrf.mxu0  ;;  %18340 = vmatprep.subr.mxu0 %v19114_v8 }
0x5384   :  { %18338 = vmatmul.mubr.msk.f32.vlgmr.msra.gmra.mxu0 %vm234_vm0, %v11244_v15 }
0x5385   :  { %18341 = vmatpush3.msra.mxu0 %v11410_v18  ;;  %18342 = vmatprep.mubr.msk.f32.mxu0 %vm19115_vm7, %v19114_v8 }
0x5386   :  { %18345 = vmatprep.subr.mxu0 %v19114_v8 }
0x5444   :  { %v11485_v19 = vpop.f32.mrf.mxu0 }
0x5445   :  { %v11486_v21 = vadd.f32 %v11485_v19, %v20564_v48 }
0x5446   :  { %v18339_v24 = vpop.f32.mrf.mxu0 }
0x5447   :  { %v11489_v6 = vsel %vm1680_vm15, %v11486_v21, -inf }
0x5448   :  { %11490 = vmax.xlane.f32.xlu0 %v11489_v6 }
0x54d1   :  { %v11491_v28 = vpop.xlane.xlu0 %11490 }
0x54d2   :  { %v11492_v26 = vsub.f32 %v11486_v21, %v11491_v28 }
0x54d4   :  { %v11493_v57 = vmul.f32 1.442695, %v11492_v26 }
0x54d6   :  { %18983 = vpow2.f32 %v11493_v57  ;;  %v15405_v57 = vld [vmem:[%s22030_s27 + $0x78] sm:$0xff] }
0x54e3   :  { %v18984_v27 = vpop.eup %18983 }
0x54e4   :  { %v11495_v29 = vsel %vm1680_vm15, %v18984_v27, 0.0 }
0x54e5   :  { %11496 = vadd.xlane.f32.xlu1 %v11495_v29 }
0x556e   :  { %v11497_v31 = vpop.xlane.xlu1 %11496 }
0x556f   :  { %18985 = vrcp.f32 %v11497_v31 }
0x557c   :  { %v18986_v32 = vpop.eup %18985 }
0x557d   :  { %v11499_v23 = vmul.f32 %v18986_v32, %v18984_v27  ;;  %v15408_v32 = vld [vmem:[%s22034_s11 + $0x1] ss:$0 sm:$0xff] }
0x557f   :  { %18343 = vmatmul.mubr.msk.f32.vlgmr.msra.gmra.mxu0 %vm1680_vm15, %v11499_v23 }
0x5580   :  { %18346 = vmatpush3.msra.mxu0 %v15368_v36  ;;  %18349 = vmatprep.mubr.msk.f32.mxu0 %vm19115_vm7, %v19114_v8 }
0x5581   :  { %18347 = vmatprep.subr.mxu0 %v19114_v8 }
0x5582   :  { %18348 = vmatpush3.msra.mxu0 %v15367_v37 }
0x5583   :  { %18352 = vmatprep.subr.mxu0 %v19114_v8 }
0x563f   :  { %v11569_v38 = vpop.f32.mrf.mxu0 }
0x5640   :  { %18350 = vmatmul.mubr.msk.f32.vlgmr.msra.gmra.mxu0 %vm234_vm0, %v11569_v38 }
0x5641   :  { %18353 = vmatpush3.msra.mxu0 %v15377_v25  ;;  %v18344_v30 = vpop.f32.mrf.mxu0  ;;  %18368 = vmatprep.mubr.msk.f32.mxu0 %vm19115_vm7, %v19114_v8 }
0x5642   :  { %18354 = vmatprep.subr.mxu0 %v19114_v8 }
0x5643   :  { %18355 = vmatpush3.msra.mxu0 %v15376_v41 }
0x5644   :  { %18356 = vmatprep.subr.mxu0 %v19114_v8 }
0x5645   :  { %18357 = vmatpush3.msra.mxu0 %v15375_v12 }
0x5646   :  { %18358 = vmatprep.subr.mxu0 %v19114_v8 }
0x5647   :  { %18359 = vmatpush3.msra.mxu0 %v15374_v42 }
0x5648   :  { %18360 = vmatprep.subr.mxu0 %v19114_v8 }
0x5649   :  { %18361 = vmatpush3.msra.mxu0 %v15373_v43 }
0x564a   :  { %18362 = vmatprep.subr.mxu0 %v19114_v8 }
0x564b   :  { %18363 = vmatpush3.msra.mxu0 %v15372_v61  ;;  %v15420_v61 = vld [vmem:[%s22035_s15 + $0x138] sm:$0xff] }
0x564c   :  { %18364 = vmatprep.subr.mxu0 %v19114_v8 }
0x564d   :  { %18365 = vmatpush3.msra.mxu0 %v15371_v45  ;;  %v15418_v45 = vld [vmem:[%s22035_s15 + $0x128] sm:$0xff] }
0x564e   :  { %18366 = vmatprep.subr.mxu0 %v19114_v8 }
0x564f   :  { %18367 = vmatpush3.msra.mxu0 %v15370_v44  ;;  %v15417_v44 = vld [vmem:[%s22035_s15 + $0x120] sm:$0xff] }
0x5650   :  { %18369 = vmatmul.mubr.msk.f32.vlgmr.msra.gmra.mxu0 %vm979_vm12, %v21188_v34  ;;  %18390 = vmatprep.subr.mxu0 %v19114_v8 }
0x5651   :  { %18391 = vmatpush3.msra.mxu0 %v15397_v40  ;;  %18406 = vmatprep.mubr.msk.f32.mxu0 %vm19115_vm7, %v19114_v8  ;;  %v15416_v40 = vld [vmem:[%s22035_s15 + $0x118] sm:$0xff] }
0x5652   :  { %18392 = vmatprep.subr.mxu0 %v19114_v8 }
0x5653   :  { %18393 = vmatpush3.msra.mxu0 %v15396_v55  ;;  %v15415_v55 = vld [vmem:[%s22035_s15 + $0x110] sm:$0xff] }
0x5654   :  { %18394 = vmatprep.subr.mxu0 %v19114_v8 }
0x5655   :  { %18395 = vmatpush3.msra.mxu0 %v15395_v46  ;;  %v15414_v46 = vld [vmem:[%s22035_s15 + $0x108] sm:$0xff] }
0x5656   :  { %18396 = vmatprep.subr.mxu0 %v19114_v8 }
0x5657   :  { %18397 = vmatpush3.msra.mxu0 %v15394_v47  ;;  %v15413_v47 = vld [vmem:[%s22035_s15 + $0x100] sm:$0xff] }
0x5658   :  { %18398 = vmatprep.subr.mxu0 %v19114_v8 }
0x5659   :  { %18399 = vmatpush3.msra.mxu0 %v15393_v49 }
0x565a   :  { %18400 = vmatprep.subr.mxu0 %v19114_v8 }
0x565b   :  { %18401 = vmatpush3.msra.mxu0 %v15392_v50 }
0x565c   :  { %18402 = vmatprep.subr.mxu0 %v19114_v8 }
0x565d   :  { %18403 = vmatpush3.msra.mxu0 %v15391_v51 }
0x565e   :  { %18404 = vmatprep.subr.mxu0 %v19114_v8 }
0x565f   :  { %18405 = vmatpush3.msra.mxu0 %v15390_v52 }
0x5660   :  { %18407 = vmatmul.mubr.msk.f32.vlgmr.msra.gmra.mxu0 %vm979_vm12, %v21188_v34  ;;  %18445 = vmatprep.subr.mxu0 %v19114_v8  ;;  %v15427_v34 = vld [vmem:[%s22031_s4 + $0x118] sm:$0xff] }
0x5661   :  { %18446 = vmatpush3.msra.mxu0 %v15431_v53  ;;  %18461 = vmatprep.mubr.msk.f32.mxu0 %vm19115_vm7, %v19114_v8  ;;  %v15411_v53 = vld [vmem:[%s22036_s16 + $0x1] ss:$0 sm:$0xff] }
0x5662   :  { %18447 = vmatprep.subr.mxu0 %v19114_v8 }
0x5663   :  { %18448 = vmatpush3.msra.mxu0 %v15430_v54 }
0x5664   :  { %18449 = vmatprep.subr.mxu0 %v19114_v8 }
0x5665   :  { %18450 = vmatpush3.msra.mxu0 %v15429_v56  ;;  %v15412_v56 = vld [vmem:[%s22037_s18 + $0x1] ss:$0 sm:$0xff] }
0x5666   :  { %18451 = vmatprep.subr.mxu0 %v19114_v8 }
0x5667   :  { %18452 = vmatpush3.msra.mxu0 %v15428_v3 }
0x5668   :  { %18453 = vmatprep.subr.mxu0 %v19114_v8 }
0x5669   :  { %18454 = vmatpush3.msra.mxu0 %v15427_v34 }
0x566a   :  { %18455 = vmatprep.subr.mxu0 %v19114_v8 }
0x566b   :  { %18456 = vmatpush3.msra.mxu0 %v15426_v4  ;;  %v15440_v4 = vld [vmem:[%s22038_s23 + $0x138] sm:$0xff] }
0x566c   :  { %18457 = vmatprep.subr.mxu0 %v19114_v8 }
0x566d   :  { %18458 = vmatpush3.msra.mxu0 %v15425_v11  ;;  %v15439_v11 = vld [vmem:[%s22038_s23 + $0x130] sm:$0xff] }
0x566e   :  { %18459 = vmatprep.subr.mxu0 %v19114_v8 }
0x566f   :  { %18460 = vmatpush3.msra.mxu0 %v15424_v58  ;;  %v15438_v58 = vld [vmem:[%s22038_s23 + $0x128] sm:$0xff] }
0x5670   :  { %18462 = vmatmul.mubr.msk.f32.vlgmr.msra.gmra.mxu0 %vm979_vm12, %v20746_v22  ;;  %18483 = vmatprep.subr.mxu0 %v19114_v8 }
0x5671   :  { %18485 = vmatprep.mubr.msk.f32.mxu0 %vm19115_vm7, %v19114_v8 }
0x5700   :  { %v11645_v59 = vpop.f32.mrf.mxu0 }
0x5701   :  { %v11649_v60 = vadd.f32 %v11645_v59, %v21406_v9  ;;  %v15437_v59 = vld [vmem:[%s22038_s23 + $0x120] sm:$0xff] }
0x5702   :  { %v18351_v62 = vpop.f32.mrf.mxu0 }
0x5703   :  { %v15435_v62 = vld [vmem:[%s22038_s23 + $0x110] sm:$0xff] }
0x5710   :  { %v11733_v0 = vpop.f32.mrf.mxu0 }
0x5711   :  { %v11734_v39 = vadd.f32 %v15379_v63, %v11733_v0  ;;  %v15434_v63 = vld [vmem:[%s22038_s23 + $0x108] sm:$0xff]  ;;  %v15433_v0 = vld [vmem:[%s22038_s23 + $0x100] sm:$0xff] }
0x5712   :  { %v18370_v1 = vpop.f32.mrf.mxu0 }
0x5713   :  { %18412 = vmatmul.mubr.msk.f32.vlgmr.msra.gmra.mxu1 %vm234_vm0, %v11734_v39  ;;  %v15467_v39 = vld [vmem:[%s22031_s4 + $0x178] sm:$0xff]  ;;  %v15466_v1 = vld [vmem:[%s22031_s4 + $0x170] sm:$0xff] }
0x5714   :  { %18416 = vmatprep.mubr.msk.f32.mxu1 %vm19115_vm7, %v19114_v8 }
0x5720   :  { %v11899_v5 = vpop.f32.mrf.mxu0 }
0x5721   :  { %v11900_v35 = vadd.f32 %v15399_v2, %v11899_v5  ;;  %v15465_v2 = vld [vmem:[%s22031_s4 + $0x168] sm:$0xff]  ;;  %v15464_v5 = vld [vmem:[%s22031_s4 + $0x160] sm:$0xff] }
0x5722   :  { %v18408_v7 = vpop.f32.mrf.mxu0 }
0x5723   :  { %18415 = vmatpush3.msra.mxu1 %v11900_v35  ;;  %v15463_v35 = vld [vmem:[%s22031_s4 + $0x158] sm:$0xff]  ;;  %v15462_v7 = vld [vmem:[%s22031_s4 + $0x150] sm:$0xff] }
0x5724   :  { %18419 = vmatprep.subr.mxu1 %v19114_v8 }
0x5730   :  { %v12346_v14 = vpop.f32.mrf.mxu0 }
0x5731   :  { %18484 = vmatpush3.xpose.msk.msra.mxu0 %vm234_vm0, %v12346_v14  ;;  %v15461_v14 = vld [vmem:[%s22031_s4 + $0x148] sm:$0xff] }
0x5732   :  { %v18463_v9 = vpop.f32.mrf.mxu0  ;;  %18488 = vmatprep.subr.mxu0 %v19114_v8 }
0x5733   :  { %v15460_v9 = vld [vmem:[%s22031_s4 + $0x140] sm:$0xff] }
0x57d3   :  { %v11975_v10 = vpop.f32.mrf.mxu1 }
0x57d4   :  { %v11976_v17 = vadd.f32 %v11975_v10, %v20564_v48  ;;  %v15404_v48 = vld [vmem:[%s22030_s27 + $0x70] sm:$0xff]  ;;  %v15422_v10 = vld [vmem:[%s22039_s22 + $0x4] ss:$0 sm:$0xff] }
0x57d5   :  { %v18413_v13 = vpop.f32.mrf.mxu1 }
0x57d6   :  { %v11979_v15 = vsel %vm1680_vm15, %v11976_v17, -inf }
0x57d7   :  { %11980 = vmax.xlane.f32.xlu0 %v11979_v15 }
0x5860   :  { %v11981_v16 = vpop.xlane.xlu0 %11980 }
0x5861   :  { %v11982_v18 = vsub.f32 %v11976_v17, %v11981_v16  ;;  %v15442_v16 = vld [vmem:[%s22040_s26 + $0x4] ss:$0 sm:$0xff] }
0x5863   :  { %v11983_v19 = vmul.f32 1.442695, %v11982_v18 }
0x5865   :  { %18987 = vpow2.f32 %v11983_v19 }
0x5872   :  { %v18988_v21 = vpop.eup %18987 }
0x5873   :  { %v11985_v24 = vsel %vm1680_vm15, %v18988_v21, 0.0 }
0x5874   :  { %11986 = vadd.xlane.f32.xlu1 %v11985_v24 }
0x58fd   :  { %v11987_v6 = vpop.xlane.xlu1 %11986 }
0x58fe   :  { %18989 = vrcp.f32 %v11987_v6 }
0x590b   :  { %v18990_v28 = vpop.eup %18989 }
0x590c   :  { %v11989_v26 = vmul.f32 %v18990_v28, %v18988_v21 }
0x590e   :  { %18417 = vmatmul.mubr.msk.f32.vlgmr.msra.gmra.mxu1 %vm1680_vm15, %v11989_v26 }
0x590f   :  { %18420 = vmatpush3.msra.mxu1 %v15405_v57  ;;  %18423 = vmatprep.mubr.msk.f32.mxu1 %vm19115_vm7, %v19114_v8 }
0x5910   :  { %18421 = vmatprep.subr.mxu1 %v19114_v8 }
0x5911   :  { %18422 = vmatpush3.msra.mxu1 %v15404_v48 }
0x5912   :  { %18426 = vmatprep.subr.mxu1 %v19114_v8 }
0x59ce   :  { %v12059_v27 = vpop.f32.mrf.mxu1 }
0x59cf   :  { %18424 = vmatmul.mubr.msk.f32.vlgmr.msra.gmra.mxu1 %vm234_vm0, %v12059_v27 }
0x59d0   :  { %v18418_v29 = vpop.f32.mrf.mxu1  ;;  %18442 = vmatprep.mubr.msk.f32.mxu1 %vm19115_vm7, %v19114_v8  ;;  %18427 = vmatpush3.msra.mxu1 %v15420_v61  ;;  %v15450_v61 = vld [vmem:[%s22035_s15 + $0x148] sm:$0xff] }
0x59d1   :  { %18428 = vmatprep.subr.mxu1 %v19114_v8 }
0x5a8f   :  { %v12135_v31 = vpop.f32.mrf.mxu1 }
0x5a90   :  { %v12139_v23 = vadd.f32 %v12135_v31, %v11649_v60  ;;  %v15436_v60 = vld [vmem:[%s22038_s23 + $0x118] sm:$0xff] }
0x5a91   :  { %v18425_v36 = vpop.f32.mrf.mxu1 }
0x5a92   :  { %v12148_v37 = vadd.f32 %v15408_v32, %v12139_v23 }
0x5a94   :  { %v21515_v25 = vadd.f32 %v12148_v37, %v21148_v33  ;;  %v15419_v33 = vld [vmem:[%s22035_s15 + $0x130] sm:$0xff] }
0x5a95   :  { %18429 = vmatpush3.msra.mxu1 %v15419_v33  ;;  %v15449_v33 = vld [vmem:[%s22035_s15 + $0x140] sm:$0xff] }
0x5a96   :  { %v12154_v38 = vsel %vm979_vm12, %v21515_v25, 0.0  ;;  %18430 = vmatprep.subr.mxu1 %v19114_v8 }
0x5a97   :  { %12155 = vadd.xlane.f32.xlu0 %v12154_v38  ;;  %18431 = vmatpush3.msra.mxu1 %v15418_v45  ;;  %v15456_v38 = vld [vmem:[%s22035_s15 + $0x178] sm:$0xff] }
0x5a98   :  { %18432 = vmatprep.subr.mxu1 %v19114_v8  ;;  %v15476_v45 = vld [vmem:[%s22038_s23 + $0x178] sm:$0xff] }
0x5a99   :  { %18433 = vmatpush3.msra.mxu1 %v15417_v44  ;;  %v15475_v44 = vld [vmem:[%s22038_s23 + $0x170] sm:$0xff] }
0x5a9a   :  { %18434 = vmatprep.subr.mxu1 %v19114_v8 }
0x5a9b   :  { %18435 = vmatpush3.msra.mxu1 %v15416_v40  ;;  %v15474_v40 = vld [vmem:[%s22038_s23 + $0x168] sm:$0xff] }
0x5a9c   :  { %18436 = vmatprep.subr.mxu1 %v19114_v8 }
0x5a9d   :  { %18437 = vmatpush3.msra.mxu1 %v15415_v55  ;;  %v15473_v55 = vld [vmem:[%s22038_s23 + $0x160] sm:$0xff] }
0x5a9e   :  { %18438 = vmatprep.subr.mxu1 %v19114_v8 }
0x5a9f   :  { %18439 = vmatpush3.msra.mxu1 %v15414_v46  ;;  %v15472_v46 = vld [vmem:[%s22038_s23 + $0x158] sm:$0xff] }
0x5aa0   :  { %18440 = vmatprep.subr.mxu1 %v19114_v8 }
0x5aa1   :  { %18441 = vmatpush3.msra.mxu1 %v15413_v47  ;;  %v15471_v47 = vld [vmem:[%s22038_s23 + $0x150] sm:$0xff] }
0x5aa2   :  { %18464 = vmatprep.subr.mxu1 %v19114_v8 }
0x5b20   :  { %v12156_v41 = vpop.xlane.xlu0 %12155 }
0x5b21   :  { %v12157_v30 = vmul.f32 0.015625, %v12156_v41  ;;  %v15455_v41 = vld [vmem:[%s22035_s15 + $0x170] sm:$0xff] }
0x5b23   :  { %v12158_v12 = vsub.f32 %v21515_v25, %v12157_v30  ;;  %v15454_v30 = vld [vmem:[%s22035_s15 + $0x168] sm:$0xff] }
0x5b25   :  { %v12159_v42 = vmul.f32 %v12158_v12, %v12158_v12 }
0x5b27   :  { %v12160_v43 = vsel %vm979_vm12, %v12159_v42, 0.0  ;;  %v15452_v42 = vld [vmem:[%s22035_s15 + $0x158] sm:$0xff] }
0x5b28   :  { %12161 = vadd.xlane.f32.xlu1 %v12160_v43  ;;  %v15451_v43 = vld [vmem:[%s22035_s15 + $0x150] sm:$0xff] }
0x5bb1   :  { %v12162_v49 = vpop.xlane.xlu1 %12161 }
0x5bb2   :  { %v12163_v50 = vmul.f32 0.015625, %v12162_v49  ;;  %v15470_v49 = vld [vmem:[%s22038_s23 + $0x148] sm:$0xff] }
0x5bb4   :  { %v12164_v51 = vadd.f32 1e-05, %v12163_v50  ;;  %v15469_v50 = vld [vmem:[%s22038_s23 + $0x140] sm:$0xff] }
0x5bb6   :  { %18991 = vrsqrt.f32 %v12164_v51  ;;  %v15448_v51 = vld [vmem:[%s22041_s1 + $0x48] sm:$0xff] }
0x5bc3   :  { %v18992_v52 = vpop.eup %18991 }
0x5bc4   :  { %v12166_v54 = vmul.f32 %v18992_v52, %v12158_v12  ;;  %v15453_v12 = vld [vmem:[%s22035_s15 + $0x160] sm:$0xff] }
0x5bc5   :  { %v15447_v52 = vld [vmem:[%s22041_s1 + $0x40] sm:$0xff] }
0x5bc6   :  { %v12173_v3 = vmul.f32 %v15411_v53, %v12166_v54  ;;  %v15505_v53 = vld [vmem:[%s22031_s4 + $0x1b8] sm:$0xff] }
0x5bc8   :  { %v21539_v34 = vadd.f32 %v15412_v56, %v12173_v3  ;;  %v15504_v56 = vld [vmem:[%s22031_s4 + $0x1b0] sm:$0xff] }
0x5bca   :  { %18443 = vmatmul.mubr.msk.f32.vlgmr.msra.gmra.mxu1 %vm979_vm12, %v21539_v34 }
0x5bcb   :  { %18465 = vmatpush3.msra.mxu1 %v15440_v4  ;;  %18480 = vmatprep.mubr.msk.f32.mxu1 %vm19115_vm7, %v19114_v8  ;;  %v15503_v4 = vld [vmem:[%s22031_s4 + $0x1a8] sm:$0xff] }
0x5bcc   :  { %18466 = vmatprep.subr.mxu1 %v19114_v8 }
0x5bcd   :  { %18467 = vmatpush3.msra.mxu1 %v15439_v11  ;;  %v15502_v11 = vld [vmem:[%s22031_s4 + $0x1a0] sm:$0xff] }
0x5bce   :  { %18468 = vmatprep.subr.mxu1 %v19114_v8 }
0x5bcf   :  { %18469 = vmatpush3.msra.mxu1 %v15438_v58  ;;  %v15501_v58 = vld [vmem:[%s22031_s4 + $0x198] sm:$0xff] }
0x5bd0   :  { %18470 = vmatprep.subr.mxu1 %v19114_v8 }
0x5bd1   :  { %18471 = vmatpush3.msra.mxu1 %v15437_v59  ;;  %v15500_v59 = vld [vmem:[%s22031_s4 + $0x190] sm:$0xff] }
0x5bd2   :  { %18472 = vmatprep.subr.mxu1 %v19114_v8 }
0x5bd3   :  { %18473 = vmatpush3.msra.mxu1 %v15436_v60  ;;  %v15499_v60 = vld [vmem:[%s22031_s4 + $0x188] sm:$0xff] }
0x5bd4   :  { %18474 = vmatprep.subr.mxu1 %v19114_v8 }
0x5bd5   :  { %18475 = vmatpush3.msra.mxu1 %v15435_v62  ;;  %v15498_v62 = vld [vmem:[%s22031_s4 + $0x180] sm:$0xff] }
0x5bd6   :  { %18476 = vmatprep.subr.mxu1 %v19114_v8 }
0x5bd7   :  { %18477 = vmatpush3.msra.mxu1 %v15434_v63  ;;  %v15458_v63 = vld [vmem:[%s22039_s22 + $0x5] ss:$0 sm:$0xff] }
0x5bd8   :  { %18478 = vmatprep.subr.mxu1 %v19114_v8 }
0x5bd9   :  { %18479 = vmatpush3.msra.mxu1 %v15433_v0 }
0x5bda   :  { %18481 = vmatmul.mubr.msk.f32.vlgmr.msra.gmra.mxu1 %vm979_vm12, %v20746_v22  ;;  %18512 = vmatprep.subr.mxu1 %v19114_v8 }
0x5bdb   :  { %18513 = vmatpush3.msra.mxu1 %v15467_v39  ;;  %18528 = vmatprep.mubr.msk.f32.mxu1 %vm19115_vm7, %v19114_v8 }
0x5bdc   :  { %18514 = vmatprep.subr.mxu1 %v19114_v8 }
0x5bdd   :  { %18515 = vmatpush3.msra.mxu1 %v15466_v1 }
0x5bde   :  { %18516 = vmatprep.subr.mxu1 %v19114_v8 }
0x5bdf   :  { %18517 = vmatpush3.msra.mxu1 %v15465_v2  ;;  %v15478_v2 = vld [vmem:[%s22040_s26 + $0x5] ss:$0 sm:$0xff] }
0x5be0   :  { %18518 = vmatprep.subr.mxu1 %v19114_v8 }
0x5be1   :  { %18519 = vmatpush3.msra.mxu1 %v15464_v5 }
0x5be2   :  { %18520 = vmatprep.subr.mxu1 %v19114_v8 }
0x5be3   :  { %18521 = vmatpush3.msra.mxu1 %v15463_v35 }
0x5be4   :  { %18522 = vmatprep.subr.mxu1 %v19114_v8 }
0x5be5   :  { %18523 = vmatpush3.msra.mxu1 %v15462_v7 }
0x5be6   :  { %18524 = vmatprep.subr.mxu1 %v19114_v8 }
0x5be7   :  { %18525 = vmatpush3.msra.mxu1 %v15461_v14 }
0x5be8   :  { %18526 = vmatprep.subr.mxu1 %v19114_v8 }
0x5be9   :  { %18527 = vmatpush3.msra.mxu1 %v15460_v9 }
0x5bea   :  { %18529 = vmatmul.mubr.msk.f32.vlgmr.msra.gmra.mxu1 %vm979_vm12, %v20746_v22  ;;  %18550 = vmatprep.subr.mxu1 %v19114_v8 }
0x5beb   :  { %18552 = vmatprep.mubr.msk.f32.mxu1 %vm19115_vm7, %v19114_v8 }
0x5c8a   :  { %v12267_v17 = vpop.f32.mrf.mxu1 }
0x5c8b   :  { %v12268_v13 = vadd.f32 %v15422_v10, %v12267_v17 }
0x5c8c   :  { %v18444_v15 = vpop.f32.mrf.mxu1 }
0x5c8d   :  { %18486 = vmatmul.mubr.msk.f32.vlgmr.msra.gmra.mxu0 %vm234_vm0, %v12268_v13 }
0x5c8e   :  { %18490 = vmatprep.mubr.msk.f32.mxu0 %vm19115_vm7, %v19114_v8 }
0x5c9a   :  { %v12433_v18 = vpop.f32.mrf.mxu1 }
0x5c9b   :  { %v12434_v19 = vadd.f32 %v15442_v16, %v12433_v18 }
0x5c9c   :  { %v18482_v21 = vpop.f32.mrf.mxu1 }
0x5c9d   :  { %18489 = vmatpush3.msra.mxu0 %v12434_v19 }
0x5c9e   :  { %18493 = vmatprep.subr.mxu0 %v19114_v8 }
0x5caa   :  { %v12762_v24 = vpop.f32.mrf.mxu1 }
0x5cab   :  { %18551 = vmatpush3.xpose.msk.msra.mxu1 %vm234_vm0, %v12762_v24 }
0x5cac   :  { %v18530_v6 = vpop.f32.mrf.mxu1  ;;  %18555 = vmatprep.subr.mxu1 %v19114_v8 }
0x5d4d   :  { %v12509_v28 = vpop.f32.mrf.mxu0 }
0x5d4e   :  { %v12513_v26 = vsel %vm1680_vm15, %v12509_v28, -inf }
0x5d4f   :  { %12514 = vmax.xlane.f32.xlu0 %v12513_v26  ;;  %v18487_v57 = vpop.f32.mrf.mxu0 }
0x5dd8   :  { %v12515_v48 = vpop.xlane.xlu0 %12514 }
0x5dd9   :  { %v12516_v27 = vsub.f32 %v12509_v28, %v12515_v48  ;;  %v15484_v48 = vld [vmem:[%s22041_s1 + $0x58] sm:$0xff] }
0x5ddb   :  { %v12517_v29 = vmul.f32 1.442695, %v12516_v27  ;;  %v15483_v27 = vld [vmem:[%s22041_s1 + $0x50] sm:$0xff] }
0x5ddd   :  { %18993 = vpow2.f32 %v12517_v29  ;;  %v15494_v29 = vld [vmem:[%s22035_s15 + $0x1b8] sm:$0xff] }
0x5dea   :  { %v18994_v31 = vpop.eup %18993 }
0x5deb   :  { %v12519_v32 = vsel %vm1680_vm15, %v18994_v31, 0.0 }
0x5dec   :  { %12520 = vadd.xlane.f32.xlu1 %v12519_v32  ;;  %v15493_v32 = vld [vmem:[%s22035_s15 + $0x1b0] sm:$0xff] }
0x5e75   :  { %v12521_v23 = vpop.xlane.xlu1 %12520 }
0x5e76   :  { %18995 = vrcp.f32 %v12521_v23 }
0x5e83   :  { %v18996_v36 = vpop.eup %18995 }
0x5e84   :  { %v12523_v37 = vmul.f32 %v18996_v36, %v18994_v31  ;;  %v15492_v36 = vld [vmem:[%s22035_s15 + $0x1a8] sm:$0xff] }
0x5e86   :  { %18491 = vmatmul.mubr.msk.f32.vlgmr.msra.gmra.mxu0 %vm1680_vm15, %v12523_v37  ;;  %v15491_v37 = vld [vmem:[%s22035_s15 + $0x1a0] sm:$0xff] }
0x5e87   :  { %18494 = vmatpush3.msra.mxu0 %v15456_v38  ;;  %18509 = vmatprep.mubr.msk.f32.mxu0 %vm19115_vm7, %v19114_v8  ;;  %v15490_v38 = vld [vmem:[%s22035_s15 + $0x198] sm:$0xff] }
0x5e88   :  { %18495 = vmatprep.subr.mxu0 %v19114_v8 }
0x5e89   :  { %18496 = vmatpush3.msra.mxu0 %v15455_v41  ;;  %v15489_v41 = vld [vmem:[%s22035_s15 + $0x190] sm:$0xff] }
0x5e8a   :  { %18497 = vmatprep.subr.mxu0 %v19114_v8 }
0x5e8b   :  { %18498 = vmatpush3.msra.mxu0 %v15454_v30  ;;  %v15488_v30 = vld [vmem:[%s22035_s15 + $0x188] sm:$0xff] }
0x5e8c   :  { %18499 = vmatprep.subr.mxu0 %v19114_v8 }
0x5e8d   :  { %18500 = vmatpush3.msra.mxu0 %v15453_v12  ;;  %v15487_v12 = vld [vmem:[%s22035_s15 + $0x180] sm:$0xff] }
0x5e8e   :  { %18501 = vmatprep.subr.mxu0 %v19114_v8 }
0x5e8f   :  { %18502 = vmatpush3.msra.mxu0 %v15452_v42  ;;  %v15514_v42 = vld [vmem:[%s22038_s23 + $0x1b8] sm:$0xff] }
0x5e90   :  { %18503 = vmatprep.subr.mxu0 %v19114_v8 }
0x5e91   :  { %18504 = vmatpush3.msra.mxu0 %v15451_v43  ;;  %v15513_v43 = vld [vmem:[%s22038_s23 + $0x1b0] sm:$0xff] }
0x5e92   :  { %18505 = vmatprep.subr.mxu0 %v19114_v8 }
0x5e93   :  { %18506 = vmatpush3.msra.mxu0 %v15450_v61  ;;  %v15512_v61 = vld [vmem:[%s22038_s23 + $0x1a8] sm:$0xff] }
0x5e94   :  { %18507 = vmatprep.subr.mxu0 %v19114_v8 }
0x5e95   :  { %18508 = vmatpush3.msra.mxu0 %v15449_v33  ;;  %v15511_v33 = vld [vmem:[%s22038_s23 + $0x1a0] sm:$0xff] }
0x5e96   :  { %18510 = vmatmul.mubr.msk.f32.vlgmr.msra.gmra.mxu0 %vm979_vm12, %v21539_v34  ;;  %18531 = vmatprep.subr.mxu0 %v19114_v8 }
0x5e97   :  { %18532 = vmatpush3.msra.mxu0 %v15476_v45  ;;  %18547 = vmatprep.mubr.msk.f32.mxu0 %vm19115_vm7, %v19114_v8  ;;  %v15510_v45 = vld [vmem:[%s22038_s23 + $0x198] sm:$0xff] }
0x5e98   :  { %18533 = vmatprep.subr.mxu0 %v19114_v8 }
0x5e99   :  { %18534 = vmatpush3.msra.mxu0 %v15475_v44  ;;  %v15509_v44 = vld [vmem:[%s22038_s23 + $0x190] sm:$0xff] }
0x5e9a   :  { %18535 = vmatprep.subr.mxu0 %v19114_v8 }
0x5e9b   :  { %18536 = vmatpush3.msra.mxu0 %v15474_v40  ;;  %v15508_v40 = vld [vmem:[%s22038_s23 + $0x188] sm:$0xff] }
0x5e9c   :  { %18537 = vmatprep.subr.mxu0 %v19114_v8 }
0x5e9d   :  { %18538 = vmatpush3.msra.mxu0 %v15473_v55  ;;  %v15507_v55 = vld [vmem:[%s22038_s23 + $0x180] sm:$0xff] }
0x5e9e   :  { %18539 = vmatprep.subr.mxu0 %v19114_v8 }
0x5e9f   :  { %18540 = vmatpush3.msra.mxu0 %v15472_v46  ;;  %v15542_v46 = vld [vmem:[%s22031_s4 + $0x1f8] sm:$0xff] }
0x5ea0   :  { %18541 = vmatprep.subr.mxu0 %v19114_v8 }
0x5ea1   :  { %18542 = vmatpush3.msra.mxu0 %v15471_v47  ;;  %v15541_v47 = vld [vmem:[%s22031_s4 + $0x1f0] sm:$0xff] }
0x5ea2   :  { %18543 = vmatprep.subr.mxu0 %v19114_v8 }
0x5ea3   :  { %18544 = vmatpush3.msra.mxu0 %v15470_v49  ;;  %v15540_v49 = vld [vmem:[%s22031_s4 + $0x1e8] sm:$0xff] }
0x5ea4   :  { %18545 = vmatprep.subr.mxu0 %v19114_v8 }
0x5ea5   :  { %18546 = vmatpush3.msra.mxu0 %v15469_v50  ;;  %v15539_v50 = vld [vmem:[%s22031_s4 + $0x1e0] sm:$0xff] }
0x5ea6   :  { %18548 = vmatmul.mubr.msk.f32.vlgmr.msra.gmra.mxu0 %vm979_vm12, %v20746_v22  ;;  %18567 = vmatprep.subr.mxu0 %v19114_v8 }
0x5ea7   :  { %18568 = vmatpush3.msra.mxu0 %v15448_v51  ;;  %18571 = vmatprep.mubr.msk.f32.mxu0 %vm19115_vm7, %v19114_v8  ;;  %v15538_v51 = vld [vmem:[%s22031_s4 + $0x1d8] sm:$0xff] }
0x5ea8   :  { %18569 = vmatprep.subr.mxu0 %v19114_v8 }
0x5ea9   :  { %18570 = vmatpush3.msra.mxu0 %v15447_v52  ;;  %v15537_v52 = vld [vmem:[%s22031_s4 + $0x1d0] sm:$0xff] }
0x5eaa   :  { %18593 = vmatprep.subr.mxu0 %v19114_v8 }
0x5f46   :  { %v12593_v54 = vpop.f32.mrf.mxu0 }
0x5f47   :  { %18572 = vmatmul.mubr.msk.f32.vlgmr.msra.gmra.mxu0 %vm234_vm0, %v12593_v54  ;;  %v15535_v54 = vld [vmem:[%s22031_s4 + $0x1c0] sm:$0xff] }
0x5f48   :  { %18594 = vmatpush3.msra.mxu0 %v15505_v53  ;;  %v18492_v3 = vpop.f32.mrf.mxu0  ;;  %18609 = vmatprep.mubr.msk.f32.mxu0 %vm19115_vm7, %v19114_v8  ;;  %v15536_v53 = vld [vmem:[%s22031_s4 + $0x1c8] sm:$0xff] }
0x5f49   :  { %18595 = vmatprep.subr.mxu0 %v19114_v8 }
0x5f4a   :  { %18596 = vmatpush3.msra.mxu0 %v15504_v56 }
0x5f4b   :  { %18597 = vmatprep.subr.mxu0 %v19114_v8 }
0x5f4c   :  { %18598 = vmatpush3.msra.mxu0 %v15503_v4  ;;  %v15496_v4 = vld [vmem:[%s22039_s22 + $0x6] ss:$0 sm:$0xff] }
0x5f4d   :  { %18599 = vmatprep.subr.mxu0 %v19114_v8 }
0x5f4e   :  { %18600 = vmatpush3.msra.mxu0 %v15502_v11 }
0x5f4f   :  { %18601 = vmatprep.subr.mxu0 %v19114_v8 }
0x5f50   :  { %18602 = vmatpush3.msra.mxu0 %v15501_v58 }
0x5f51   :  { %18603 = vmatprep.subr.mxu0 %v19114_v8 }
0x5f52   :  { %18604 = vmatpush3.msra.mxu0 %v15500_v59 }
0x5f53   :  { %18605 = vmatprep.subr.mxu0 %v19114_v8 }
0x5f54   :  { %18606 = vmatpush3.msra.mxu0 %v15499_v60  ;;  %v15516_v60 = vld [vmem:[%s22040_s26 + $0x6] ss:$0 sm:$0xff] }
0x5f55   :  { %18607 = vmatprep.subr.mxu0 %v19114_v8 }
0x5f56   :  { %v12683_v0 = vpop.f32.mrf.mxu0  ;;  %18608 = vmatpush3.msra.mxu0 %v15498_v62 }
0x5f57   :  { %v12684_v39 = vadd.f32 %v15458_v63, %v12683_v0  ;;  %18610 = vmatmul.mubr.msk.f32.vlgmr.msra.gmra.mxu0 %vm979_vm12, %v20746_v22  ;;  %18631 = vmatprep.subr.mxu0 %v19114_v8 }
0x5f58   :  { %v18511_v1 = vpop.f32.mrf.mxu0  ;;  %18633 = vmatprep.mubr.msk.f32.mxu0 %vm19115_vm7, %v19114_v8 }
0x5f59   :  { %18553 = vmatmul.mubr.msk.f32.vlgmr.msra.gmra.mxu1 %vm234_vm0, %v12684_v39 }
0x5f5a   :  { %18557 = vmatprep.mubr.msk.f32.mxu1 %vm19115_vm7, %v19114_v8 }
0x5f66   :  { %v12849_v5 = vpop.f32.mrf.mxu0 }
0x5f67   :  { %v12850_v35 = vadd.f32 %v15478_v2, %v12849_v5 }
0x5f68   :  { %v18549_v7 = vpop.f32.mrf.mxu0 }
0x5f69   :  { %18556 = vmatpush3.msra.mxu1 %v12850_v35 }
0x5f6a   :  { %18560 = vmatprep.subr.mxu1 %v19114_v8 }
0x6007   :  { %v21671_v14 = vpop.f32.mrf.mxu0 }
0x6009   :  { %v18573_v9 = vpop.f32.mrf.mxu0 }
0x6017   :  { %v13324_v10 = vpop.f32.mrf.mxu0 }
0x6018   :  { %18632 = vmatpush3.xpose.msk.msra.mxu0 %vm234_vm0, %v13324_v10 }
0x6019   :  { %v12925_v17 = vpop.f32.mrf.mxu1  ;;  %v18611_v13 = vpop.f32.mrf.mxu0  ;;  %18636 = vmatprep.subr.mxu0 %v19114_v8 }
0x601a   :  { %v12929_v15 = vsel %vm1680_vm15, %v12925_v17, -inf }
0x601b   :  { %12930 = vmax.xlane.f32.xlu0 %v12929_v15  ;;  %v18554_v16 = vpop.f32.mrf.mxu1 }
0x60a4   :  { %v12931_v18 = vpop.xlane.xlu0 %12930 }
0x60a5   :  { %v12932_v19 = vsub.f32 %v12925_v17, %v12931_v18 }
0x60a7   :  { %v12933_v21 = vmul.f32 1.442695, %v12932_v19  ;;  %v15522_v19 = vld [vmem:[%s22041_s1 + $0x68] sm:$0xff] }
0x60a9   :  { %18997 = vpow2.f32 %v12933_v21  ;;  %v15521_v21 = vld [vmem:[%s22041_s1 + $0x60] sm:$0xff] }
0x60b6   :  { %v18998_v24 = vpop.eup %18997 }
0x60b7   :  { %v12935_v6 = vsel %vm1680_vm15, %v18998_v24, 0.0 }
0x60b8   :  { %12936 = vadd.xlane.f32.xlu1 %v12935_v6 }
0x6141   :  { %v12937_v28 = vpop.xlane.xlu1 %12936 }
0x6142   :  { %18999 = vrcp.f32 %v12937_v28  ;;  %v15530_v28 = vld [vmem:[%s22035_s15 + $0x1f0] sm:$0xff] }
0x614f   :  { %v19000_v26 = vpop.eup %18999 }
0x6150   :  { %v12939_v57 = vmul.f32 %v19000_v26, %v18998_v24  ;;  %v15531_v24 = vld [vmem:[%s22035_s15 + $0x1f8] sm:$0xff] }
0x6152   :  { %18558 = vmatmul.mubr.msk.f32.vlgmr.msra.gmra.mxu1 %vm1680_vm15, %v12939_v57  ;;  %v15529_v57 = vld [vmem:[%s22035_s15 + $0x1e8] sm:$0xff] }
0x6153   :  { %18561 = vmatpush3.msra.mxu1 %v15484_v48  ;;  %18564 = vmatprep.mubr.msk.f32.mxu1 %vm19115_vm7, %v19114_v8  ;;  %v15528_v48 = vld [vmem:[%s22035_s15 + $0x1e0] sm:$0xff] }
0x6154   :  { %18562 = vmatprep.subr.mxu1 %v19114_v8 }
0x6155   :  { %18563 = vmatpush3.msra.mxu1 %v15483_v27  ;;  %v15527_v27 = vld [vmem:[%s22035_s15 + $0x1d8] sm:$0xff] }
0x6156   :  { %18574 = vmatprep.subr.mxu1 %v19114_v8 }
0x6212   :  { %v13009_v31 = vpop.f32.mrf.mxu1 }
0x6213   :  { %18565 = vmatmul.mubr.msk.f32.vlgmr.msra.gmra.mxu1 %vm234_vm0, %v13009_v31  ;;  %v15525_v31 = vld [vmem:[%s22035_s15 + $0x1c8] sm:$0xff] }
0x6214   :  { %18575 = vmatpush3.msra.mxu1 %v15494_v29  ;;  %v18559_v23 = vpop.f32.mrf.mxu1  ;;  %18590 = vmatprep.mubr.msk.f32.mxu1 %vm19115_vm7, %v19114_v8  ;;  %v15526_v29 = vld [vmem:[%s22035_s15 + $0x1d0] sm:$0xff] }
0x6215   :  { %18576 = vmatprep.subr.mxu1 %v19114_v8  ;;  %v15551_v23 = vld [vmem:[%s22038_s23 + $0x1f8] sm:$0xff] }
0x6216   :  { %18577 = vmatpush3.msra.mxu1 %v15493_v32  ;;  %v15524_v32 = vld [vmem:[%s22035_s15 + $0x1c0] sm:$0xff] }
0x6217   :  { %18578 = vmatprep.subr.mxu1 %v19114_v8 }
0x6218   :  { %18579 = vmatpush3.msra.mxu1 %v15492_v36  ;;  %v15550_v36 = vld [vmem:[%s22038_s23 + $0x1f0] sm:$0xff] }
0x6219   :  { %18580 = vmatprep.subr.mxu1 %v19114_v8 }
0x621a   :  { %18581 = vmatpush3.msra.mxu1 %v15491_v37  ;;  %v15549_v37 = vld [vmem:[%s22038_s23 + $0x1e8] sm:$0xff] }
0x621b   :  { %18582 = vmatprep.subr.mxu1 %v19114_v8 }
0x621c   :  { %18583 = vmatpush3.msra.mxu1 %v15490_v38  ;;  %v15548_v38 = vld [vmem:[%s22038_s23 + $0x1e0] sm:$0xff] }
0x621d   :  { %18584 = vmatprep.subr.mxu1 %v19114_v8 }
0x621e   :  { %18585 = vmatpush3.msra.mxu1 %v15489_v41  ;;  %v15546_v41 = vld [vmem:[%s22038_s23 + $0x1d0] sm:$0xff] }
0x621f   :  { %18586 = vmatprep.subr.mxu1 %v19114_v8 }
0x6220   :  { %18587 = vmatpush3.msra.mxu1 %v15488_v30  ;;  %v15545_v30 = vld [vmem:[%s22038_s23 + $0x1c8] sm:$0xff] }
0x6221   :  { %18588 = vmatprep.subr.mxu1 %v19114_v8 }
0x6222   :  { %18589 = vmatpush3.msra.mxu1 %v15487_v12  ;;  %v15544_v12 = vld [vmem:[%s22038_s23 + $0x1c0] sm:$0xff] }
0x6223   :  { %18591 = vmatmul.mubr.msk.f32.vlgmr.msra.gmra.mxu1 %vm979_vm12, %v21539_v34  ;;  %18612 = vmatprep.subr.mxu1 %v19114_v8 }
0x6224   :  { %18613 = vmatpush3.msra.mxu1 %v15514_v42  ;;  %18628 = vmatprep.mubr.msk.f32.mxu1 %vm19115_vm7, %v19114_v8 }
0x6225   :  { %18614 = vmatprep.subr.mxu1 %v19114_v8 }
0x6226   :  { %18615 = vmatpush3.msra.mxu1 %v15513_v43 }
0x6227   :  { %18616 = vmatprep.subr.mxu1 %v19114_v8 }
0x6228   :  { %18617 = vmatpush3.msra.mxu1 %v15512_v61 }
0x6229   :  { %18618 = vmatprep.subr.mxu1 %v19114_v8 }
0x622a   :  { %18619 = vmatpush3.msra.mxu1 %v15511_v33 }
0x622b   :  { %18620 = vmatprep.subr.mxu1 %v19114_v8 }
0x622c   :  { %18621 = vmatpush3.msra.mxu1 %v15510_v45  ;;  %v15533_v45 = vld [vmem:[%s22039_s22 + $0x7] ss:$0 sm:$0xff] }
0x622d   :  { %18622 = vmatprep.subr.mxu1 %v19114_v8 }
0x622e   :  { %18623 = vmatpush3.msra.mxu1 %v15509_v44 }
0x622f   :  { %18624 = vmatprep.subr.mxu1 %v19114_v8 }
0x6230   :  { %18625 = vmatpush3.msra.mxu1 %v15508_v40 }
0x6231   :  { %18626 = vmatprep.subr.mxu1 %v19114_v8 }
0x6232   :  { %18627 = vmatpush3.msra.mxu1 %v15507_v55 }
0x6233   :  { %18629 = vmatmul.mubr.msk.f32.vlgmr.msra.gmra.mxu1 %vm979_vm12, %v20746_v22  ;;  %18667 = vmatprep.subr.mxu1 %v19114_v8 }
0x6234   :  { %18668 = vmatpush3.msra.mxu1 %v15542_v46  ;;  %18683 = vmatprep.mubr.msk.f32.mxu1 %vm19115_vm7, %v19114_v8 }
0x6235   :  { %18669 = vmatprep.subr.mxu1 %v19114_v8 }
0x6236   :  { %18670 = vmatpush3.msra.mxu1 %v15541_v47 }
0x6237   :  { %18671 = vmatprep.subr.mxu1 %v19114_v8 }
0x6238   :  { %18672 = vmatpush3.msra.mxu1 %v15540_v49 }
0x6239   :  { %18673 = vmatprep.subr.mxu1 %v19114_v8 }
0x623a   :  { %18674 = vmatpush3.msra.mxu1 %v15539_v50 }
0x623b   :  { %18675 = vmatprep.subr.mxu1 %v19114_v8 }
0x623c   :  { %18676 = vmatpush3.msra.mxu1 %v15538_v51 }
0x623d   :  { %18677 = vmatprep.subr.mxu1 %v19114_v8 }
0x623e   :  { %18678 = vmatpush3.msra.mxu1 %v15537_v52 }
0x623f   :  { %18679 = vmatprep.subr.mxu1 %v19114_v8 }
0x6240   :  { %18680 = vmatpush3.msra.mxu1 %v15536_v53 }
0x6241   :  { %18681 = vmatprep.subr.mxu1 %v19114_v8 }
0x6242   :  { %18682 = vmatpush3.msra.mxu1 %v15535_v54 }
0x6243   :  { %18684 = vmatmul.mubr.msk.f32.vlgmr.msra.gmra.mxu1 %vm979_vm12, %v20746_v22  ;;  %18705 = vmatprep.subr.mxu1 %v19114_v8 }
0x6244   :  { %18707 = vmatprep.mubr.msk.f32.mxu1 %vm19115_vm7, %v19114_v8 }
0x62d3   :  { %v21747_v56 = vpop.f32.mrf.mxu1 }
0x62d4   :  { %v13159_v42 = vadd.f32 %v21671_v14, %v21747_v56 }
0x62d5   :  { %v18566_v3 = vpop.f32.mrf.mxu1 }
0x62e3   :  { %v13245_v11 = vpop.f32.mrf.mxu1 }
0x62e4   :  { %v13246_v58 = vadd.f32 %v15496_v4, %v13245_v11 }
0x62e5   :  { %v18592_v59 = vpop.f32.mrf.mxu1 }
0x62e6   :  { %18634 = vmatmul.mubr.msk.f32.vlgmr.msra.gmra.mxu0 %vm234_vm0, %v13246_v58  ;;  %v15559_v59 = vld [vmem:[%s22041_s1 + $0x78] sm:$0xff] }
0x62e7   :  { %18638 = vmatprep.mubr.msk.f32.mxu0 %vm19115_vm7, %v19114_v8 }
0x62f3   :  { %v13411_v62 = vpop.f32.mrf.mxu1 }
0x62f4   :  { %v13412_v63 = vadd.f32 %v15516_v60, %v13411_v62  ;;  %v15558_v60 = vld [vmem:[%s22041_s1 + $0x70] sm:$0xff] }
0x62f5   :  { %v18630_v0 = vpop.f32.mrf.mxu1 }
0x62f6   :  { %18637 = vmatpush3.msra.mxu0 %v13412_v63 }
0x62f7   :  { %18641 = vmatprep.subr.mxu0 %v19114_v8 }
0x6303   :  { %v13814_v39 = vpop.f32.mrf.mxu1 }
0x6304   :  { %18706 = vmatpush3.xpose.msk.msra.mxu1 %vm234_vm0, %v13814_v39  ;;  %v15562_v39 = vld [vmem:[%s22042_s28 + $0x1] ss:$0 sm:$0xff] }
0x6305   :  { %v18685_v1 = vpop.f32.mrf.mxu1  ;;  %18710 = vmatprep.subr.mxu1 %v19114_v8 }
0x63a6   :  { %v13487_v2 = vpop.f32.mrf.mxu0 }
0x63a7   :  { %v13491_v5 = vsel %vm1680_vm15, %v13487_v2, -inf }
0x63a8   :  { %13492 = vmax.xlane.f32.xlu0 %v13491_v5  ;;  %v18635_v35 = vpop.f32.mrf.mxu0 }
0x6431   :  { %v13493_v7 = vpop.xlane.xlu0 %13492 }
0x6432   :  { %v13494_v9 = vsub.f32 %v13487_v2, %v13493_v7 }
0x6434   :  { %v13495_v10 = vmul.f32 1.442695, %v13494_v9 }
0x6436   :  { %19001 = vpow2.f32 %v13495_v10 }
0x6443   :  { %v19002_v17 = vpop.eup %19001 }
0x6444   :  { %v13497_v13 = vsel %vm1680_vm15, %v19002_v17, 0.0 }
0x6445   :  { %13498 = vadd.xlane.f32.xlu1 %v13497_v13 }
0x64ce   :  { %v13499_v15 = vpop.xlane.xlu1 %13498 }
0x64cf   :  { %19003 = vrcp.f32 %v13499_v15 }
0x64dc   :  { %v19004_v16 = vpop.eup %19003 }
0x64dd   :  { %v13501_v18 = vmul.f32 %v19004_v16, %v19002_v17  ;;  %v15574_v16 = vld [vmem:[%s22043_s2 + $0x78] sm:$0xff] }
0x64df   :  { %18639 = vmatmul.mubr.msk.f32.vlgmr.msra.gmra.mxu0 %vm1680_vm15, %v13501_v18  ;;  %v15572_v18 = vld [vmem:[%s22043_s2 + $0x68] sm:$0xff] }
0x64e0   :  { %18642 = vmatpush3.msra.mxu0 %v15522_v19  ;;  %18645 = vmatprep.mubr.msk.f32.mxu0 %vm19115_vm7, %v19114_v8  ;;  %v15571_v19 = vld [vmem:[%s22043_s2 + $0x60] sm:$0xff] }
0x64e1   :  { %18643 = vmatprep.subr.mxu0 %v19114_v8 }
0x64e2   :  { %18644 = vmatpush3.msra.mxu0 %v15521_v21  ;;  %v15570_v21 = vld [vmem:[%s22043_s2 + $0x58] sm:$0xff] }
0x64e3   :  { %18648 = vmatprep.subr.mxu0 %v19114_v8 }
0x659f   :  { %v13571_v6 = vpop.f32.mrf.mxu0 }
0x65a0   :  { %18646 = vmatmul.mubr.msk.f32.vlgmr.msra.gmra.mxu0 %vm234_vm0, %v13571_v6  ;;  %v15568_v6 = vld [vmem:[%s22043_s2 + $0x48] sm:$0xff] }
0x65a1   :  { %18649 = vmatpush3.msra.mxu0 %v15531_v24  ;;  %v18640_v26 = vpop.f32.mrf.mxu0  ;;  %18664 = vmatprep.mubr.msk.f32.mxu0 %vm19115_vm7, %v19114_v8  ;;  %v15569_v24 = vld [vmem:[%s22043_s2 + $0x50] sm:$0xff] }
0x65a2   :  { %18650 = vmatprep.subr.mxu0 %v19114_v8 }
0x65a3   :  { %18651 = vmatpush3.msra.mxu0 %v15530_v28  ;;  %v15567_v28 = vld [vmem:[%s22043_s2 + $0x40] sm:$0xff] }
0x65a4   :  { %18652 = vmatprep.subr.mxu0 %v19114_v8 }
0x65a5   :  { %18653 = vmatpush3.msra.mxu0 %v15529_v57 }
0x65a6   :  { %18654 = vmatprep.subr.mxu0 %v19114_v8 }
0x65a7   :  { %18655 = vmatpush3.msra.mxu0 %v15528_v48 }
0x65a8   :  { %18656 = vmatprep.subr.mxu0 %v19114_v8 }
0x65a9   :  { %18657 = vmatpush3.msra.mxu0 %v15527_v27 }
0x65aa   :  { %18658 = vmatprep.subr.mxu0 %v19114_v8 }
0x65ab   :  { %18659 = vmatpush3.msra.mxu0 %v15526_v29  ;;  %v15565_v29 = vld [vmem:[%s22044_s0 + $0x1] ss:$0 sm:$0xff] }
0x65ac   :  { %18660 = vmatprep.subr.mxu0 %v19114_v8 }
0x65ad   :  { %18661 = vmatpush3.msra.mxu0 %v15525_v31 }
0x65ae   :  { %18662 = vmatprep.subr.mxu0 %v19114_v8 }
0x65af   :  { %18663 = vmatpush3.msra.mxu0 %v15524_v32  ;;  %v15566_v32 = vld [vmem:[%s22045_s5 + $0x1] ss:$0 sm:$0xff] }
0x65b0   :  { %18665 = vmatmul.mubr.msk.f32.vlgmr.msra.gmra.mxu0 %vm979_vm12, %v21539_v34  ;;  %18686 = vmatprep.subr.mxu0 %v19114_v8  ;;  %v15547_v34 = vld [vmem:[%s22038_s23 + $0x1d8] sm:$0xff] }
0x65b1   :  { %18687 = vmatpush3.msra.mxu0 %v15551_v23  ;;  %18702 = vmatprep.mubr.msk.f32.mxu0 %vm19115_vm7, %v19114_v8 }
0x65b2   :  { %18688 = vmatprep.subr.mxu0 %v19114_v8 }
0x65b3   :  { %18689 = vmatpush3.msra.mxu0 %v15550_v36 }
0x65b4   :  { %18690 = vmatprep.subr.mxu0 %v19114_v8 }
0x65b5   :  { %18691 = vmatpush3.msra.mxu0 %v15549_v37  ;;  %v19023_v37 = vld [vmem:[%s22021_s21 + $0x78] sm:$0xff] }
0x65b6   :  { %18692 = vmatprep.subr.mxu0 %v19114_v8 }
0x65b7   :  { %18693 = vmatpush3.msra.mxu0 %v15548_v38  ;;  %v19024_v38 = vld [vmem:[%s22021_s21 + $0x70] sm:$0xff] }
0x65b8   :  { %18694 = vmatprep.subr.mxu0 %v19114_v8 }
0x65b9   :  { %18695 = vmatpush3.msra.mxu0 %v15547_v34  ;;  %v19025_v34 = vld [vmem:[%s22021_s21 + $0x68] sm:$0xff] }
0x65ba   :  { %18696 = vmatprep.subr.mxu0 %v19114_v8 }
0x65bb   :  { %18697 = vmatpush3.msra.mxu0 %v15546_v41  ;;  %v19026_v41 = vld [vmem:[%s22021_s21 + $0x60] sm:$0xff] }
0x65bc   :  { %18698 = vmatprep.subr.mxu0 %v19114_v8 }
0x65bd   :  { %18699 = vmatpush3.msra.mxu0 %v15545_v30  ;;  %v19027_v30 = vld [vmem:[%s22021_s21 + $0x58] sm:$0xff] }
0x65be   :  { %18700 = vmatprep.subr.mxu0 %v19114_v8 }
0x65bf   :  { %18701 = vmatpush3.msra.mxu0 %v15544_v12  ;;  %v19028_v12 = vld [vmem:[%s22021_s21 + $0x50] sm:$0xff] }
0x65c0   :  { %18703 = vmatmul.mubr.msk.f32.vlgmr.msra.gmra.mxu0 %vm979_vm12, %v20746_v22  ;;  %18741 = vmatprep.subr.mxu0 %v19114_v8  ;;  %v15553_v22 = vld [vmem:[%s22040_s26 + $0x7] ss:$0 sm:$0xff] }
0x65c1   :  { %18773 = vmatprep.mubr.msk.f32.mxu0 %vm19115_vm7, %v19114_v8 }
0x6660   :  { %v13647_v43 = vpop.f32.mrf.mxu0 }
0x6661   :  { %v13651_v61 = vadd.f32 %v13647_v43, %v13159_v42  ;;  %v19029_v42 = vld [vmem:[%s22021_s21 + $0x48] sm:$0xff]  ;;  %v19030_v43 = vld [vmem:[%s22021_s21 + $0x40] sm:$0xff] }
0x6662   :  { %v18647_v33 = vpop.f32.mrf.mxu0 }
0x6663   :  { %v19032_v33 = vld [vmem:[%s22021_s21 + $0x30] sm:$0xff] }
0x6670   :  { %v13735_v44 = vpop.f32.mrf.mxu0 }
0x6671   :  { %v13736_v40 = vadd.f32 %v15533_v45, %v13735_v44  ;;  %v19033_v45 = vld [vmem:[%s22021_s21 + $0x28] sm:$0xff]  ;;  %v19034_v44 = vld [vmem:[%s22021_s21 + $0x20] sm:$0xff] }
0x6672   :  { %v18666_v55 = vpop.f32.mrf.mxu0 }
0x6673   :  { %18708 = vmatmul.mubr.msk.f32.vlgmr.msra.gmra.mxu1 %vm234_vm0, %v13736_v40  ;;  %v19035_v40 = vld [vmem:[%s22021_s21 + $0x18] sm:$0xff]  ;;  %v19036_v55 = vld [vmem:[%s22021_s21 + $0x10] sm:$0xff] }
0x6674   :  { %18712 = vmatprep.mubr.msk.f32.mxu1 %vm19115_vm7, %v19114_v8 }
0x6680   :  { %v13901_v46 = vpop.f32.mrf.mxu0 }
0x6681   :  { %v13902_v47 = vadd.f32 %v15553_v22, %v13901_v46  ;;  %v19037_v22 = vld [vmem:[%s22021_s21 + $0x8] sm:$0xff]  ;;  %v19038_v46 = vld [vmem:[%s22021_s21] sm:$0xff] }
0x6682   :  { %v18704_v49 = vpop.f32.mrf.mxu0 }
0x6683   :  { %18711 = vmatpush3.msra.mxu1 %v13902_v47  ;;  %v15593_v47 = vld [vmem:[%s22046_s9 + $0xf8] sm:$0xff]  ;;  %v15592_v49 = vld [vmem:[%s22046_s9 + $0xf0] sm:$0xff] }
0x6684   :  { %18715 = vmatprep.subr.mxu1 %v19114_v8  ;;  %18742 = vmatpush3.msra.mxu0 %v15593_v47 }
0x6685   :  { %18743 = vmatprep.subr.mxu0 %v19114_v8 }
0x6686   :  { %18744 = vmatpush3.msra.mxu0 %v15592_v49 }
0x6687   :  { %18745 = vmatprep.subr.mxu0 %v19114_v8 }
0x6733   :  { %v13977_v14 = vpop.f32.mrf.mxu1 }
0x6734   :  { %v13981_v50 = vsel %vm1680_vm15, %v13977_v14, -inf }
0x6735   :  { %13982 = vmax.xlane.f32.xlu0 %v13981_v50  ;;  %v18709_v51 = vpop.f32.mrf.mxu1  ;;  %v15590_v50 = vld [vmem:[%s22046_s9 + $0xe0] sm:$0xff] }
0x6736   :  { %v15589_v51 = vld [vmem:[%s22046_s9 + $0xd8] sm:$0xff] }
0x67be   :  { %v13983_v52 = vpop.xlane.xlu0 %13982 }
0x67bf   :  { %v13984_v53 = vsub.f32 %v13977_v14, %v13983_v52  ;;  %v15591_v14 = vld [vmem:[%s22046_s9 + $0xe8] sm:$0xff]  ;;  %v15588_v52 = vld [vmem:[%s22046_s9 + $0xd0] sm:$0xff] }
0x67c0   :  { %18746 = vmatpush3.msra.mxu0 %v15591_v14 }
0x67c1   :  { %v13985_v54 = vmul.f32 1.442695, %v13984_v53  ;;  %18747 = vmatprep.subr.mxu0 %v19114_v8  ;;  %v15587_v53 = vld [vmem:[%s22046_s9 + $0xc8] sm:$0xff] }
0x67c2   :  { %18748 = vmatpush3.msra.mxu0 %v15590_v50 }
0x67c3   :  { %19005 = vpow2.f32 %v13985_v54  ;;  %18749 = vmatprep.subr.mxu0 %v19114_v8  ;;  %v15586_v54 = vld [vmem:[%s22046_s9 + $0xc0] sm:$0xff] }
0x67c4   :  { %18750 = vmatpush3.msra.mxu0 %v15589_v51 }
0x67c5   :  { %18751 = vmatprep.subr.mxu0 %v19114_v8 }
0x67c6   :  { %18752 = vmatpush3.msra.mxu0 %v15588_v52 }
0x67c7   :  { %18753 = vmatprep.subr.mxu0 %v19114_v8 }
0x67c8   :  { %18754 = vmatpush3.msra.mxu0 %v15587_v53 }
0x67c9   :  { %18755 = vmatprep.subr.mxu0 %v19114_v8 }
0x67ca   :  { %18756 = vmatpush3.msra.mxu0 %v15586_v54 }
0x67cb   :  { %18757 = vmatprep.subr.mxu0 %v19114_v8 }
0x67d0   :  { %v19006_v56 = vpop.eup %19005 }
0x67d1   :  { %v13987_v3 = vsel %vm1680_vm15, %v19006_v56, 0.0 }
0x67d2   :  { %13988 = vadd.xlane.f32.xlu1 %v13987_v3  ;;  %v15584_v3 = vld [vmem:[%s22046_s9 + $0xb0] sm:$0xff] }
0x685b   :  { %v13989_v4 = vpop.xlane.xlu1 %13988 }
0x685c   :  { %19007 = vrcp.f32 %v13989_v4  ;;  %v15583_v4 = vld [vmem:[%s22046_s9 + $0xa8] sm:$0xff] }
0x6869   :  { %v19008_v11 = vpop.eup %19007 }
0x686a   :  { %v13991_v58 = vmul.f32 %v19008_v11, %v19006_v56  ;;  %v15585_v56 = vld [vmem:[%s22046_s9 + $0xb8] sm:$0xff]  ;;  %v15582_v11 = vld [vmem:[%s22046_s9 + $0xa0] sm:$0xff] }
0x686b   :  { %18758 = vmatpush3.msra.mxu0 %v15585_v56 }
0x686c   :  { %18713 = vmatmul.mubr.msk.f32.vlgmr.msra.gmra.mxu1 %vm1680_vm15, %v13991_v58  ;;  %18759 = vmatprep.subr.mxu0 %v19114_v8  ;;  %v15581_v58 = vld [vmem:[%s22046_s9 + $0x98] sm:$0xff] }
0x686d   :  { %18716 = vmatpush3.msra.mxu1 %v15559_v59  ;;  %18719 = vmatprep.mubr.msk.f32.mxu1 %vm19115_vm7, %v19114_v8  ;;  %v15580_v59 = vld [vmem:[%s22046_s9 + $0x90] sm:$0xff] }
0x686e   :  { %18717 = vmatprep.subr.mxu1 %v19114_v8  ;;  %18760 = vmatpush3.msra.mxu0 %v15584_v3 }
0x686f   :  { %18718 = vmatpush3.msra.mxu1 %v15558_v60  ;;  %18761 = vmatprep.subr.mxu0 %v19114_v8  ;;  %v15579_v60 = vld [vmem:[%s22046_s9 + $0x88] sm:$0xff] }
0x6870   :  { %18722 = vmatprep.subr.mxu1 %v19114_v8  ;;  %18762 = vmatpush3.msra.mxu0 %v15583_v4 }
0x6871   :  { %18763 = vmatprep.subr.mxu0 %v19114_v8 }
0x6872   :  { %18764 = vmatpush3.msra.mxu0 %v15582_v11  ;;  %v14557_v11 = vld [vmem:[%s19385_s24] sm:$0xff]  ;;  %s19043_s24 = scalar_lea.vmem %s14578_s29, 32 }
0x6873   :  { %18765 = vmatprep.subr.mxu0 %v19114_v8  ;;  %p19045_p2 = scmp.lt.s32.totalorder %s19043_s24, %s19039_s3 }
0x6874   :  { %18766 = vmatpush3.msra.mxu0 %v15581_v58 }
0x6875   :  { %18767 = vmatprep.subr.mxu0 %v19114_v8  ;;  %p19046_p3 = por %p19045_p2, %p19044_p1 }
0x6876   :  { %18768 = vmatpush3.msra.mxu0 %v15580_v59 }
0x6877   :  { %18769 = vmatprep.subr.mxu0 %v19114_v8  ;;  %p19047_p4 = pnand %p19046_p3, %p19040_p0 }
0x6878   :  { %18770 = vmatpush3.msra.mxu0 %v15579_v60 }
0x6879   :  { %18771 = vmatprep.subr.mxu0 %v19114_v8 }
0x692c   :  { %v14061_v62 = vpop.f32.mrf.mxu1 }
0x692d   :  { %18720 = vmatmul.mubr.msk.f32.vlgmr.msra.gmra.mxu1 %vm234_vm0, %v14061_v62  ;;  %v15578_v62 = vld [vmem:[%s22046_s9 + $0x80] sm:$0xff] }
0x692e   :  { %v18714_v63 = vpop.f32.mrf.mxu1  ;;  %18738 = vmatprep.mubr.msk.f32.mxu1 %vm19115_vm7, %v19114_v8  ;;  %18723 = vmatpush3.msra.mxu1 %v15574_v16 }
0x692f   :  { %18724 = vmatprep.subr.mxu1 %v19114_v8  ;;  %18772 = vmatpush3.msra.mxu0 %v15578_v62  ;;  %v15576_v63 = vld [vmem:[%s22047_s13 + $0x1] ss:$0 sm:$0xff] }
0x69ed   :  { %v14137_v0 = vpop.f32.mrf.mxu1 }
0x69ee   :  { %v14141_v1 = vadd.f32 %v14137_v0, %v13651_v61  ;;  %v19031_v61 = vld [vmem:[%s22021_s21 + $0x38] sm:$0xff]  ;;  %s22050_s21 = sld [smem:[#allocation20_spill]] }
0x69ef   :  { %v18721_v2 = vpop.f32.mrf.mxu1 }
0x69f0   :  { %v14150_v5 = vadd.f32 %v15562_v39, %v14141_v1 }
0x69f2   :  { %v21831_v35 = vadd.f32 %v14150_v5, %v21515_v25  ;;  %v15573_v25 = vld [vmem:[%s22043_s2 + $0x70] sm:$0xff] }
0x69f3   :  { %18725 = vmatpush3.msra.mxu1 %v15573_v25 }
0x69f4   :  { %v14156_v7 = vsel %vm979_vm12, %v21831_v35, 0.0  ;;  %18726 = vmatprep.subr.mxu1 %v19114_v8 }
0x69f5   :  { %14157 = vadd.xlane.f32.xlu0 %v14156_v7  ;;  %18727 = vmatpush3.msra.mxu1 %v15572_v18 }
0x69f6   :  { %18728 = vmatprep.subr.mxu1 %v19114_v8 }
0x69f7   :  { %18729 = vmatpush3.msra.mxu1 %v15571_v19 }
0x69f8   :  { %18730 = vmatprep.subr.mxu1 %v19114_v8 }
0x69f9   :  { %18731 = vmatpush3.msra.mxu1 %v15570_v21 }
0x69fa   :  { %18732 = vmatprep.subr.mxu1 %v19114_v8 }
0x69fb   :  { %18733 = vmatpush3.msra.mxu1 %v15569_v24 }
0x69fc   :  { %18734 = vmatprep.subr.mxu1 %v19114_v8 }
0x69fd   :  { %18735 = vmatpush3.msra.mxu1 %v15568_v6 }
0x69fe   :  { %18736 = vmatprep.subr.mxu1 %v19114_v8 }
0x69ff   :  { %18737 = vmatpush3.msra.mxu1 %v15567_v28 }
0x6a00   :  { %18776 = vmatprep.subr.mxu1 %v19114_v8 }
0x6a7e   :  { %v14158_v9 = vpop.xlane.xlu0 %14157 }
0x6a7f   :  { %v14159_v10 = vmul.f32 0.015625, %v14158_v9 }
0x6a81   :  { %v14160_v17 = vsub.f32 %v21831_v35, %v14159_v10 }
0x6a83   :  { %v14161_v13 = vmul.f32 %v14160_v17, %v14160_v17 }
0x6a85   :  { %v14162_v15 = vsel %vm979_vm12, %v14161_v13, 0.0 }
0x6a86   :  { %14163 = vadd.xlane.f32.xlu1 %v14162_v15 }
0x6b0f   :  { %v14164_v26 = vpop.xlane.xlu1 %14163 }
0x6b10   :  { %v14165_v57 = vmul.f32 0.015625, %v14164_v26 }
0x6b12   :  { %v14166_v48 = vadd.f32 1e-05, %v14165_v57 }
0x6b14   :  { %19009 = vrsqrt.f32 %v14166_v48 }
0x6b21   :  { %v19010_v27 = vpop.eup %19009 }
0x6b22   :  { %v14168_v31 = vmul.f32 %v19010_v27, %v14160_v17 }
0x6b24   :  { %v14175_v23 = vmul.f32 %v15565_v29, %v14168_v31 }
0x6b26   :  { %v14182_v36 = vadd.f32 %v15566_v32, %v14175_v23 }
0x6b28   :  { %18739 = vmatmul.mubr.msk.f32.vlgmr.msra.gmra.mxu1 %vm979_vm12, %v14182_v36  ;;  %v15595_v36 = vld [vmem:[%s22048_s17 + $0x1] ss:$0 sm:$0xff] }
0x6b29   :  { %18777 = vmatpush3.xpose.msk.msra.mxu1 %vm979_vm12, %v19023_v37  ;;  %18808 = vmatprep.mubr.msk.f32.mxu1 %vm19115_vm7, %v19114_v8 }
0x6b2a   :  { %18778 = vmatprep.subr.mxu1 %v19114_v8 }
0x6b2d   :  { %18779 = vmatpush3.xpose.msk.msra.mxu1 %vm979_vm12, %v19024_v38 }
0x6b2e   :  { %18780 = vmatprep.subr.mxu1 %v19114_v8 }
0x6b31   :  { %18781 = vmatpush3.xpose.msk.msra.mxu1 %vm979_vm12, %v19025_v34 }
0x6b32   :  { %18782 = vmatprep.subr.mxu1 %v19114_v8 }
0x6b35   :  { %18783 = vmatpush3.xpose.msk.msra.mxu1 %vm979_vm12, %v19026_v41 }
0x6b36   :  { %18784 = vmatprep.subr.mxu1 %v19114_v8 }
0x6b39   :  { %18785 = vmatpush3.xpose.msk.msra.mxu1 %vm979_vm12, %v19027_v30 }
0x6b3a   :  { %18786 = vmatprep.subr.mxu1 %v19114_v8 }
0x6b3d   :  { %18787 = vmatpush3.xpose.msk.msra.mxu1 %vm979_vm12, %v19028_v12 }
0x6b3e   :  { %18788 = vmatprep.subr.mxu1 %v19114_v8 }
0x6b41   :  { %18789 = vmatpush3.xpose.msk.msra.mxu1 %vm979_vm12, %v19029_v42 }
0x6b42   :  { %18790 = vmatprep.subr.mxu1 %v19114_v8 }
0x6b45   :  { %18791 = vmatpush3.xpose.msk.msra.mxu1 %vm979_vm12, %v19030_v43 }
0x6b46   :  { %18792 = vmatprep.subr.mxu1 %v19114_v8 }
0x6b49   :  { %18793 = vmatpush3.xpose.msk.msra.mxu1 %vm979_vm12, %v19031_v61 }
0x6b4a   :  { %18794 = vmatprep.subr.mxu1 %v19114_v8 }
0x6b4d   :  { %18795 = vmatpush3.xpose.msk.msra.mxu1 %vm979_vm12, %v19032_v33 }
0x6b4e   :  { %18796 = vmatprep.subr.mxu1 %v19114_v8 }
0x6b51   :  { %18797 = vmatpush3.xpose.msk.msra.mxu1 %vm979_vm12, %v19033_v45 }
0x6b52   :  { %18798 = vmatprep.subr.mxu1 %v19114_v8 }
0x6b55   :  { %18799 = vmatpush3.xpose.msk.msra.mxu1 %vm979_vm12, %v19034_v44 }
0x6b56   :  { %18800 = vmatprep.subr.mxu1 %v19114_v8 }
0x6b59   :  { %18801 = vmatpush3.xpose.msk.msra.mxu1 %vm979_vm12, %v19035_v40 }
0x6b5a   :  { %18802 = vmatprep.subr.mxu1 %v19114_v8 }
0x6b5d   :  { %18803 = vmatpush3.xpose.msk.msra.mxu1 %vm979_vm12, %v19036_v55  ;;  %v15596_v55 = vld [vmem:[%s22049_s12] ss:$0 sm:$0xff] }
0x6b5e   :  { %18804 = vmatprep.subr.mxu1 %v19114_v8 }
0x6b61   :  { %18805 = vmatpush3.xpose.msk.msra.mxu1 %vm979_vm12, %v19037_v22 }
0x6b62   :  { %18806 = vmatprep.subr.mxu1 %v19114_v8 }
0x6b65   :  { %18807 = vmatpush3.xpose.msk.msra.mxu1 %vm979_vm12, %v19038_v46  ;;  %v15597_v46 = vld [vmem:[%s22050_s21] ss:$0 sm:$0xff] }
0x6be8   :  { %v14269_v0 = vpop.f32.mrf.mxu1 }
0x6be9   :  { %v14270_v39 = vadd.f32 %v15576_v63, %v14269_v0 }
0x6bea   :  { %v18740_v1 = vpop.f32.mrf.mxu1 }
0x6beb   :  { %v14274_v2 = vmul.f32 0.70710677, %v14270_v39  ;;  %v14273_v31 = vmul.f32 0.5, %v14270_v39 }
0x6bed   :  { %v14277_v5 = vand.u32 2147483647, %v14274_v2  ;;  %vm14275_vm0 = vcmp.ge.f32.partialorder %v14274_v2, 0.0 }
0x6bee   :  { %v14276_v27 = vsel %vm14275_vm0, 1.0, %v19116_v20 }
0x6bef   :  { %v14278_v7 = vmul.f32 0.3275911, %v14277_v5  ;;  %v14291_v10 = vsub.f32 0.0, %v14277_v5 }
0x6bf1   :  { %v14279_v9 = vadd.f32 1.0, %v14278_v7  ;;  %v14292_v17 = vmul.f32 %v14291_v10, %v14277_v5 }
0x6bf3   :  { %19011 = vrcp.f32 %v14279_v9  ;;  %v14293_v16 = vmul.f32 1.442695, %v14292_v17 }
0x6bf5   :  { %19013 = vpow2.f32 %v14293_v16 }
0x6c00   :  { %v19012_v13 = vpop.eup %19011 }
0x6c01   :  { %v14282_v15 = vmul.f32 1.0614054, %v19012_v13 }
0x6c02   :  { %v19014_v26 = vpop.eup %19013 }
0x6c03   :  { %v14283_v25 = vadd.f32 -1.4531521, %v14282_v15 }
0x6c05   :  { %v14284_v18 = vmul.f32 %v19012_v13, %v14283_v25 }
0x6c07   :  { %v14285_v8 = vadd.f32 1.4214138, %v14284_v18 }
0x6c09   :  { %v14286_v19 = vmul.f32 %v19012_v13, %v14285_v8 }
0x6c0b   :  { %v14287_v21 = vadd.f32 -0.28449672, %v14286_v19 }
0x6c0d   :  { %v14288_v24 = vmul.f32 %v19012_v13, %v14287_v21 }
0x6c0f   :  { %v14289_v6 = vadd.f32 0.2548296, %v14288_v24 }
0x6c11   :  { %v14290_v28 = vmul.f32 %v19012_v13, %v14289_v6 }
0x6c13   :  { %v14295_v57 = vmul.f32 %v19014_v26, %v14290_v28 }
0x6c15   :  { %v14296_v48 = vsub.f32 1.0, %v14295_v57 }
0x6c17   :  { %v14297_v29 = vmul.f32 %v14296_v48, %v14276_v27 }
0x6c19   :  { %v14298_v32 = vadd.f32 1.0, %v14297_v29 }
0x6c1b   :  { %v14299_v23 = vmul.f32 %v14298_v32, %v14273_v31 }
0x6c1d   :  { %18774 = vmatmul.mubr.f32.vlgmr.msra.gmra.mxu0 %v14299_v23 }
0x6cdd   :  { %v14391_v37 = vpop.f32.mrf.mxu0 }
0x6cde   :  { %v14392_v38 = vadd.f32 %v15595_v36, %v14391_v37 }
0x6cdf   :  { %v18775_v34 = vpop.f32.mrf.mxu0 }
0x6ce0   :  { %v14395_v41 = vadd.f32 %v14392_v38, %v21831_v35 }
0x6ce2   :  { %v14398_v30 = vsel %vm979_vm12, %v14395_v41, 0.0 }
0x6ce3   :  { %14399 = vadd.xlane.f32.xlu0 %v14398_v30 }
0x6d6c   :  { %v14400_v12 = vpop.xlane.xlu0 %14399 }
0x6d6d   :  { %v14401_v42 = vmul.f32 0.015625, %v14400_v12 }
0x6d6f   :  { %v14402_v43 = vsub.f32 %v14395_v41, %v14401_v42 }
0x6d71   :  { %v14403_v20 = vmul.f32 %v14402_v43, %v14402_v43 }
0x6d73   :  { %v14404_v61 = vsel %vm979_vm12, %v14403_v20, 0.0 }
0x6d74   :  { %14405 = vadd.xlane.f32.xlu1 %v14404_v61 }
0x6dfd   :  { %v14406_v33 = vpop.xlane.xlu1 %14405 }
0x6dfe   :  { %v14407_v45 = vmul.f32 0.015625, %v14406_v33 }
0x6e00   :  { %v14408_v44 = vadd.f32 1e-05, %v14407_v45 }
0x6e02   :  { %19015 = vrsqrt.f32 %v14408_v44 }
0x6e0f   :  { %v19016_v40 = vpop.eup %19015 }
0x6e10   :  { %v14410_v22 = vmul.f32 %v19016_v40, %v14402_v43 }
0x6e12   :  { %v14417_v35 = vmul.f32 %v15596_v55, %v14410_v22 }
0x6e14   :  { %v14424_v47 = vadd.f32 %v15597_v46, %v14417_v35 }
0x6e16   :  { %18809 = vmatmul.mubr.msk.f32.vlgmr.msra.gmra.mxu1 %vm979_vm12, %v14424_v47 }
0x6ed6   :  { %v14542_v49 = vpop.f32.mrf.mxu1 }
0x6ed7   :  { %14546 = vmax.xlane.f32.xlu0 %v14542_v49 }
0x6ed8   :  { %v18810_v14 = vpop.f32.mrf.mxu1 }
0x6f60   :  { %v14547_v50 = vpop.xlane.xlu0 %14546 }
0x6f61   :  { %v14548_v51 = vsub.f32 %v14542_v49, %v14547_v50 }
0x6f63   :  { %v14549_v52 = vmul.f32 1.442695, %v14548_v51 }
0x6f65   :  { %19017 = vpow2.f32 %v14549_v52 }
0x6f72   :  { %v19018_v53 = vpop.eup %19017 }
0x6f73   :  { %14551 = vadd.xlane.f32.xlu1 %v19018_v53 }
0x6ffc   :  { %v14552_v54 = vpop.xlane.xlu1 %14551 }
0x6ffd   :  { %19019 = vlog2.f32 %v14552_v54 }
0x700a   :  { %v19020_v56 = vpop.eup %19019 }
0x700b   :  { %v14554_v3 = vmul.f32 0.6931472, %v19020_v56 }
0x700d   :  { %v14555_v4 = vadd.f32 %v14554_v3, %v14547_v50 }
0x700f   :  { %v14556_v58 = vsub.f32 %v14542_v49, %v14555_v4 }
0x7011   :  { %v14558_v59 = vmul.f32 %v14557_v11, %v14556_v58 }
0x7013   :  { %14559 = vadd.xlane.f32.xlu0 %v14558_v59 }
0x709c   :  { %v14560_v60 = vpop.xlane.xlu0 %14559 }
0x709d   :  { %v14561_v62 = vrot.slane %v14560_v60, 4 }
0x709f   :  { %v14562_v63 = vadd.f32 %v14561_v62, %v14560_v60 }
0x70a1   :  { %v14563_v0 = vrot.slane %v14562_v63, 2 }
0x70a3   :  { %v14564_v39 = vadd.f32 %v14563_v0, %v14562_v63 }
0x70a5   :  { %v14565_v1 = vrot.slane %v14564_v39, 1 }
0x70a7   :  { %v14566_v2 = vadd.f32 %v14565_v1, %v14564_v39 }
0x70a9   :  { %v14567_v5 = vmul.f32 1.442695, %v14566_v2 }
0x70ab   :  { %19021 = vpow2.f32 %v14567_v5 }
0x70b8   :  { %v19022_v7 = vpop.eup %19021 }
0x70b9   :  { %14570 = vst.msk [vmem:[#allocation2] sm:$0x1] %vm14569_vm5, %v19022_v7 }
0x70ba   :  { %19050 = shalt.err (!%p19047_p4)
}
0x70bb   :  { %14580 = dma.vmem_to_hbm [thread:$0]  %s14578_s29, 16, %s19390_s30, [#allocation3]  }
0x70bc   :  { %19059 = dma.done.wait [#allocation3], 16  }
0x70bd   :  { %19060 = vsyncadd [#allocation3], 4294967280 }
0x70be   :  { %14584 = vsyncpa [#allocation3], 1 }

</bundles_post_ra>
